<compile_context>
chip_gen: v5e
topology: v5e:2x2
jax: 0.10.0
libtpu: 0.0.40
codegen_flags: <defaults>
</compile_context>

<pallas_src>
import functools
import numpy as np

import jax
import jax.numpy as jnp
from jax import lax
from jax.experimental import pallas as pl
from jax.experimental.pallas import tpu as pltpu

LANE = 128          # C_out padded up to a multiple of this (lane-dense stores)
SUB = 8             # sublane count used for the per-step BN stats blocks
SUBLANE = 8         # C_in padded up to a multiple of this (matmul K alignment)
MAX_BN_ROWS = 2048  # target row tile for the elementwise BN/ReLU kernel


def _vmem_limit_bytes():
    """Per-generation scoped-VMEM limit (v5e/v6e: 128 MiB physical, v7x: 64 MiB
    per TensorCore).  Leave ~25% headroom for compiler-internal scratch."""
    cap = 64 * 1024 * 1024
    try:
        info = pltpu.get_tpu_info()
        cap = int(getattr(info, "vmem_capacity_bytes", cap) or cap)
    except Exception:
        pass
    return max(32 * 1024 * 1024, min((cap * 3) // 4, 110 * 1024 * 1024))


# ---------------------------------------------------------------------------
# Pallas kernels
# ---------------------------------------------------------------------------
def _fused_conv_kernel(*refs, kt, kh, kw, sh, sw, h_out, w_out, emit_stats):
    """Fused im2col + conv-as-matmul for one (n, t_out) grid step.

    refs = (x_tap_0, ..., x_tap_{kt-1}, w, y[, sum, sumsq])
      x_tap_a : (H_pad, W_pad, C_in_pad) bf16  -- T slice t*st + a
      w       : (kt*kh*kw, C_in_pad, C_pad) bf16
      y       : (H_out*W_out, C_pad) output block
      sum/sumsq : (SUB, C_pad) f32 per-step BN partials (broadcast on sublanes)
    """
    x_refs = refs[:kt]
    w_ref = refs[kt]
    y_ref = refs[kt + 1]

    cp_in = w_ref.shape[1]
    c_pad = w_ref.shape[2]
    hw = h_out * w_out

    acc = jnp.zeros((hw, c_pad), jnp.float32)
    tap = 0
    for a in range(kt):
        for b in range(kh):
            for c in range(kw):
                if sh == 1 and sw == 1:
                    win = x_refs[a][b:b + h_out, c:c + w_out, :]
                else:
                    # TODO(synk): strided-window path is not exercised by the demo.
                    win = x_refs[a][pl.ds(b, h_out, sh), pl.ds(c, w_out, sw), :]
                lhs = win.reshape(hw, cp_in)          # leading-dim collapse (free)
                acc = acc + jnp.dot(lhs, w_ref[tap],
                                    preferred_element_type=jnp.float32)
                tap += 1

    y_ref[...] = acc.astype(y_ref.dtype)

    if emit_stats:
        # Plain sum / sum-of-squares on the f32 accumulator (merged in the
        # wrapper as E[y^2] - mean^2).  NOTE: BN is later applied to the
        # bf16-rounded y while the stats come from the f32 accumulator -- a
        # tiny, documented mismatch vs a pure-f32 reference.
        s_ref = refs[kt + 2]
        q_ref = refs[kt + 3]
        s = jnp.sum(acc, axis=0, keepdims=True)
        q = jnp.sum(acc * acc, axis=0, keepdims=True)
        s_ref[...] = jnp.broadcast_to(s, s_ref.shape)
        q_ref[...] = jnp.broadcast_to(q, q_ref.shape)


def _bn_act_kernel(y_ref, scale_ref, shift_ref, o_ref, *, use_relu):
    """y * scale + shift (folded BatchNorm / bias) followed by optional ReLU."""
    y = y_ref[...].astype(jnp.float32)     # upcast: v5e VPU has no bf16 ALU
    out = y * scale_ref[...] + shift_ref[...]
    if use_relu:
        out = jnp.maximum(out, 0.0)
    o_ref[...] = out.astype(o_ref.dtype)


# ---------------------------------------------------------------------------
# pallas_call wrappers
# ---------------------------------------------------------------------------
def fused_conv(x_pad, w_taps, *, n, t_out, h_out, w_out,
               kt, kh, kw, st, sh, sw, emit_stats, y_dtype):
    _, _, h_pad, w_pad, cp_in = x_pad.shape
    n_taps, _, c_pad = w_taps.shape
    hw = h_out * w_out
    m = n * t_out * hw
    steps = n * t_out

    # kt views of the same padded input, each shifted along T by its tap index.
    x_specs = [
        pl.BlockSpec((None, None, h_pad, w_pad, cp_in),
                     lambda nn, tt, a=a: (nn, tt * st + a, 0, 0, 0))
        for a in range(kt)
    ]
    w_spec = pl.BlockSpec((n_taps, cp_in, c_pad), lambda nn, tt: (0, 0, 0))
    y_spec = pl.BlockSpec((hw, c_pad), lambda nn, tt: (nn * t_out + tt, 0))

    if emit_stats:
        out_shape = (
            jax.ShapeDtypeStruct((m, c_pad), y_dtype),
            jax.ShapeDtypeStruct((steps * SUB, c_pad), jnp.float32),
            jax.ShapeDtypeStruct((steps * SUB, c_pad), jnp.float32),
        )
        out_specs = (
            y_spec,
            pl.BlockSpec((SUB, c_pad), lambda nn, tt: (nn * t_out + tt, 0)),
            pl.BlockSpec((SUB, c_pad), lambda nn, tt: (nn * t_out + tt, 0)),
        )
    else:
        out_shape = jax.ShapeDtypeStruct((m, c_pad), y_dtype)
        out_specs = y_spec

    kernel = functools.partial(
        _fused_conv_kernel, kt=kt, kh=kh, kw=kw, sh=sh, sw=sw,
        h_out=h_out, w_out=w_out, emit_stats=emit_stats)

    return pl.pallas_call(
        kernel,
        out_shape=out_shape,
        grid=(n, t_out),
        in_specs=x_specs + [w_spec],
        out_specs=out_specs,
        compiler_params=pltpu.CompilerParams(
            dimension_semantics=("parallel", "parallel"),
            vmem_limit_bytes=_vmem_limit_bytes()),
    )(*([x_pad] * kt), w_taps)


def bn_act(y, scale, shift, *, use_relu, out_dtype, rows):
    m, c_pad = y.shape
    return pl.pallas_call(
        functools.partial(_bn_act_kernel, use_relu=use_relu),
        out_shape=jax.ShapeDtypeStruct((m, c_pad), out_dtype),
        grid=(m // rows,),
        in_specs=[
            pl.BlockSpec((rows, c_pad), lambda i: (i, 0)),
            pl.BlockSpec((1, c_pad), lambda i: (0, 0)),
            pl.BlockSpec((1, c_pad), lambda i: (0, 0)),
        ],
        out_specs=pl.BlockSpec((rows, c_pad), lambda i: (i, 0)),
        compiler_params=pltpu.CompilerParams(
            dimension_semantics=("parallel",),
            vmem_limit_bytes=_vmem_limit_bytes()),
    )(y, scale, shift)


# ---------------------------------------------------------------------------
# Unit3D forward (glue: padding, param folding, reshapes)
# ---------------------------------------------------------------------------
def _compute_pad(kernel, stride, size):
    if size % stride == 0:
        return max(kernel - stride, 0)
    return max(kernel - size % stride, 0)


def _round_up(x, mult):
    return ((x + mult - 1) // mult) * mult


def unit3d_forward(x, params, kernel_shape=(1, 1, 1), stride=(1, 1, 1),
                   use_batch_norm=True, use_bias=False, use_relu=True,
                   eps=1e-3, out_dtype=jnp.float32):
    """x: (N, C_in, T, H, W) float32 -- same convention as the PyTorch module.
    out_dtype: keep f32 for drop-in parity; use bf16 inside a fused network."""
    n, c_in, t, h, w = x.shape
    kt, kh, kw = kernel_shape
    st, sh, sw = stride
    out_t = int(np.ceil(t / st))
    out_h = int(np.ceil(h / sh))
    out_w = int(np.ceil(w / sw))

    pad_t = _compute_pad(kt, st, t)
    pad_h = _compute_pad(kh, sh, h)
    pad_w = _compute_pad(kw, sw, w)
    pt_f, pt_b = pad_t // 2, pad_t - pad_t // 2
    ph_f, ph_b = pad_h // 2, pad_h - pad_h // 2
    pw_f, pw_b = pad_w // 2, pad_w - pad_w // 2

    hw = out_h * out_w
    m = n * out_t * hw
    if hw % 8 != 0:
        raise NotImplementedError(
            "TODO(synk): pad H_out*W_out up to a multiple of 8 for the y block")

    # channels-last + SAME pad + C_in aligned to a sublane multiple, in bf16
    # (halves HBM traffic of the activation reads; zero channels are exact).
    cp_in = _round_up(c_in, SUBLANE)
    x_cl = jnp.transpose(x, (0, 2, 3, 4, 1)).astype(jnp.bfloat16)  # (N,T,H,W,C)
    x_pad = jnp.pad(x_cl, ((0, 0), (pt_f, pt_b), (ph_f, ph_b),
                           (pw_f, pw_b), (0, cp_in - c_in)))

    # weight -> (kt*kh*kw, C_in_pad, C_out_pad) bf16, tap-major (matches kernel).
    conv_w = params["conv_w"]                       # (C_out, C_in, kt, kh, kw)
    c_out = conv_w.shape[0]
    c_pad = _round_up(c_out, LANE)   # 128 lanes; prefer 256 once C_out is tiled (v6e/v7x MXU)
    w_taps = jnp.transpose(conv_w, (2, 3, 4, 1, 0))  # (kt,kh,kw,Cin,Cout)
    w_taps = jnp.pad(w_taps, ((0, 0), (0, 0), (0, 0),
                              (0, cp_in - c_in), (0, c_pad - c_out)))
    w_taps = w_taps.reshape(kt * kh * kw, cp_in, c_pad).astype(jnp.bfloat16)

    needs_epilogue = use_batch_norm or use_relu or use_bias
    y_dtype = jnp.bfloat16 if needs_epilogue else out_dtype

    res = fused_conv(x_pad, w_taps, n=n, t_out=out_t, h_out=out_h, w_out=out_w,
                     kt=kt, kh=kh, kw=kw, st=st, sh=sh, sw=sw,
                     emit_stats=use_batch_norm, y_dtype=y_dtype)

    if use_batch_norm:
        y, sum_out, sq_out = res
        steps = n * out_t
        sums = sum_out.reshape(steps, SUB, c_pad)[:, 0, :]   # (steps, C_pad)
        sqs = sq_out.reshape(steps, SUB, c_pad)[:, 0, :]
        total_sum = jnp.sum(sums, axis=0)
        total_sq = jnp.sum(sqs, axis=0)
        mean = total_sum / m
        var = jnp.maximum(total_sq / m - mean * mean, 0.0)   # biased batch var
        inv_std = lax.rsqrt(var + eps)
        gamma = jnp.pad(params["bn_gamma"].astype(jnp.float32), (0, c_pad - c_out))
        beta = jnp.pad(params["bn_beta"].astype(jnp.float32), (0, c_pad - c_out))
        scale = gamma * inv_std
        shift = beta - mean * scale
        # A conv bias cancels exactly under training-mode BatchNorm (it shifts y
        # and the batch mean identically), so it is intentionally not applied.
        # TODO(synk): running_mean/running_var buffer updates (momentum=0.01)
        # are a training side effect and are not materialized here.
    else:
        y = res
        scale = jnp.ones((c_pad,), jnp.float32)
        if use_bias:
            shift = jnp.pad(params["conv_b"].astype(jnp.float32),
                            (0, c_pad - c_out))
        else:
            shift = jnp.zeros((c_pad,), jnp.float32)

    if needs_epilogue:
        rows = hw
        while rows * 2 <= MAX_BN_ROWS and m % (rows * 2) == 0:
            rows *= 2
        out2d = bn_act(y, scale.reshape(1, c_pad), shift.reshape(1, c_pad),
                       use_relu=use_relu, out_dtype=out_dtype, rows=rows)
    else:
        out2d = y      # identity epilogue: skip the elementwise pass entirely

    out = out2d[:, :c_out].reshape(n, out_t, out_h, out_w, c_out)
    # TODO(synk): in a full network return channels-last here and skip this
    # NCDHW transpose (an extra XLA HBM pass kept only for drop-in parity).
    return jnp.transpose(out, (0, 4, 1, 2, 3))


# ---------------------------------------------------------------------------
# Pure-JAX reference (for a sanity check)
# ---------------------------------------------------------------------------
def unit3d_reference(x, params, kernel_shape, stride, use_relu=True, eps=1e-3):
    n, c_in, t, h, w = x.shape
    kt, kh, kw = kernel_shape
    st, sh, sw = stride
    pads = [(_compute_pad(kt, st, t),), (_compute_pad(kh, sh, h),),
            (_compute_pad(kw, sw, w),)]
    pad_cfg = [(p[0] // 2, p[0] - p[0] // 2) for p in pads]
    y = lax.conv_general_dilated(
        x, params["conv_w"], window_strides=(st, sh, sw), padding=pad_cfg,
        dimension_numbers=("NCTHW", "OITHW", "NCTHW"))
    mean = jnp.mean(y, axis=(0, 2, 3, 4), keepdims=True)
    var = jnp.var(y, axis=(0, 2, 3, 4), keepdims=True)
    g = params["bn_gamma"].reshape(1, -1, 1, 1, 1)
    b = params["bn_beta"].reshape(1, -1, 1, 1, 1)
    y = (y - mean) / jnp.sqrt(var + eps) * g + b
    if use_relu:
        y = jnp.maximum(y, 0.0)
    return y


# ---------------------------------------------------------------------------
if __name__ == "__main__":
    # Module config: Unit3D(in_channels=4, output_channels=8,
    #                       kernel_shape=(3,3,3), stride=(1,1,1))
    c_in, c_out = 4, 8
    kernel_shape = (3, 3, 3)
    stride = (1, 1, 1)

    key = jax.random.PRNGKey(0)
    k_x, k_w = jax.random.split(key)
    # (N, C, T, H, W) = (2, 4, 8, 16, 16): conv grid = (2, 8) = 16 steps,
    # BN/ReLU grid = 2 steps -- both even so v7x's two TensorCores stay busy.
    x = jax.random.normal(k_x, (2, c_in, 8, 16, 16), jnp.float32)

    params = {
        "conv_w": 0.1 * jax.random.normal(
            k_w, (c_out, c_in) + kernel_shape, jnp.float32),
        # PyTorch BatchNorm3d default affine init
        "bn_gamma": jnp.ones((c_out,), jnp.float32),
        "bn_beta": jnp.zeros((c_out,), jnp.float32),
    }

    out = unit3d_forward(x, params, kernel_shape=kernel_shape, stride=stride,
                         use_batch_norm=True, use_bias=False, use_relu=True)
    out = jax.block_until_ready(out)

    ref = unit3d_reference(x, params, kernel_shape, stride)
    # bf16 matmul path (f32 accumulation): looser tolerance than pure f32.
    np.testing.assert_allclose(np.asarray(out), np.asarray(ref),
                               rtol=3e-2, atol=3e-2)

    print("KERNEL_OK")
</pallas_src>

<mosaic_0001>
module attributes {stable_mosaic.version = 11 : i64} {
  func.func @_fused_conv_kernel(%arg0: i32, %arg1: i32, %arg2: memref<1x1x18x18x8xbf16, #tpu.memory_space<vmem>>, %arg3: memref<1x1x18x18x8xbf16, #tpu.memory_space<vmem>>, %arg4: memref<1x1x18x18x8xbf16, #tpu.memory_space<vmem>>, %arg5: memref<27x8x128xbf16, #tpu.memory_space<vmem>>, %arg6: memref<256x128xbf16, #tpu.memory_space<vmem>>, %arg7: memref<8x128xf32, #tpu.memory_space<vmem>>, %arg8: memref<8x128xf32, #tpu.memory_space<vmem>>) attributes {dimension_semantics = [#tpu.dimension_semantics<parallel>, #tpu.dimension_semantics<parallel>], iteration_bounds = array<i64: 2, 8>, scalar_prefetch = 0 : i64, scratch_operands = 0 : i64, tpu.core_type = #tpu.core_type<tc>, window_params = [{transform_indices = @transform_0, window_bounds = array<i64: 1, 1, 18, 18, 8>}, {transform_indices = @transform_1, window_bounds = array<i64: 1, 1, 18, 18, 8>}, {transform_indices = @transform_2, window_bounds = array<i64: 1, 1, 18, 18, 8>}, {pipeline_mode = #tpu.pipeline_mode<synchronous>, transform_indices = @transform_3, window_bounds = array<i64: 27, 8, 128>}, {transform_indices = @transform_4, window_bounds = array<i64: 256, 128>}, {transform_indices = @transform_5, window_bounds = array<i64: 8, 128>}, {transform_indices = @transform_6, window_bounds = array<i64: 8, 128>}]} {
    %cst = arith.constant 0.000000e+00 : f32
    %0 = vector.broadcast %cst : f32 to vector<256x128xf32>
    %c0 = arith.constant 0 : index
    %c0_0 = arith.constant 0 : index
    %c0_1 = arith.constant 0 : index
    %c0_2 = arith.constant 0 : index
    %c0_3 = arith.constant 0 : index
    %1 = vector.load %arg2[%c0, %c0_0, %c0_1, %c0_2, %c0_3] : memref<1x1x18x18x8xbf16, #tpu.memory_space<vmem>>, vector<1x1x16x16x8xbf16>
    %2 = vector.shape_cast %1 : vector<1x1x16x16x8xbf16> to vector<16x16x8xbf16>
    %3 = vector.shape_cast %2 : vector<16x16x8xbf16> to vector<256x8xbf16>
    %c0_4 = arith.constant 0 : index
    %c0_5 = arith.constant 0 : index
    %c0_6 = arith.constant 0 : index
    %4 = vector.load %arg5[%c0_4, %c0_5, %c0_6] : memref<27x8x128xbf16, #tpu.memory_space<vmem>>, vector<1x8x128xbf16>
    %5 = vector.shape_cast %4 : vector<1x8x128xbf16> to vector<8x128xbf16>
    %cst_7 = arith.constant dense<0.000000e+00> : vector<256x128xf32>
    %6 = tpu.matmul %3, %5, %cst_7 {dimension_numbers = #tpu.dot_dimension_numbers<[1], [0], [0], [1], [0, 0, 1, 1], [], []>} : vector<256x8xbf16>, vector<8x128xbf16>, vector<256x128xf32> -> vector<256x128xf32>
    %7 = arith.addf %0, %6 : vector<256x128xf32>
    %c0_8 = arith.constant 0 : index
    %c0_9 = arith.constant 0 : index
    %c0_10 = arith.constant 0 : index
    %c1 = arith.constant 1 : index
    %c0_11 = arith.constant 0 : index
    %8 = vector.load %arg2[%c0_8, %c0_9, %c0_10, %c1, %c0_11] : memref<1x1x18x18x8xbf16, #tpu.memory_space<vmem>>, vector<1x1x16x16x8xbf16>
    %9 = vector.shape_cast %8 : vector<1x1x16x16x8xbf16> to vector<16x16x8xbf16>
    %10 = vector.shape_cast %9 : vector<16x16x8xbf16> to vector<256x8xbf16>
    %c1_12 = arith.constant 1 : index
    %c0_13 = arith.constant 0 : index
    %c0_14 = arith.constant 0 : index
    %11 = vector.load %arg5[%c1_12, %c0_13, %c0_14] : memref<27x8x128xbf16, #tpu.memory_space<vmem>>, vector<1x8x128xbf16>
    %12 = vector.shape_cast %11 : vector<1x8x128xbf16> to vector<8x128xbf16>
    %cst_15 = arith.constant dense<0.000000e+00> : vector<256x128xf32>
    %13 = tpu.matmul %10, %12, %cst_15 {dimension_numbers = #tpu.dot_dimension_numbers<[1], [0], [0], [1], [0, 0, 1, 1], [], []>} : vector<256x8xbf16>, vector<8x128xbf16>, vector<256x128xf32> -> vector<256x128xf32>
    %14 = arith.addf %7, %13 : vector<256x128xf32>
    %c0_16 = arith.constant 0 : index
    %c0_17 = arith.constant 0 : index
    %c0_18 = arith.constant 0 : index
    %c2 = arith.constant 2 : index
    %c0_19 = arith.constant 0 : index
    %15 = vector.load %arg2[%c0_16, %c0_17, %c0_18, %c2, %c0_19] : memref<1x1x18x18x8xbf16, #tpu.memory_space<vmem>>, vector<1x1x16x16x8xbf16>
    %16 = vector.shape_cast %15 : vector<1x1x16x16x8xbf16> to vector<16x16x8xbf16>
    %17 = vector.shape_cast %16 : vector<16x16x8xbf16> to vector<256x8xbf16>
    %c2_20 = arith.constant 2 : index
    %c0_21 = arith.constant 0 : index
    %c0_22 = arith.constant 0 : index
    %18 = vector.load %arg5[%c2_20, %c0_21, %c0_22] : memref<27x8x128xbf16, #tpu.memory_space<vmem>>, vector<1x8x128xbf16>
    %19 = vector.shape_cast %18 : vector<1x8x128xbf16> to vector<8x128xbf16>
    %cst_23 = arith.constant dense<0.000000e+00> : vector<256x128xf32>
    %20 = tpu.matmul %17, %19, %cst_23 {dimension_numbers = #tpu.dot_dimension_numbers<[1], [0], [0], [1], [0, 0, 1, 1], [], []>} : vector<256x8xbf16>, vector<8x128xbf16>, vector<256x128xf32> -> vector<256x128xf32>
    %21 = arith.addf %14, %20 : vector<256x128xf32>
    %c0_24 = arith.constant 0 : index
    %c0_25 = arith.constant 0 : index
    %c1_26 = arith.constant 1 : index
    %c0_27 = arith.constant 0 : index
    %c0_28 = arith.constant 0 : index
    %22 = vector.load %arg2[%c0_24, %c0_25, %c1_26, %c0_27, %c0_28] : memref<1x1x18x18x8xbf16, #tpu.memory_space<vmem>>, vector<1x1x16x16x8xbf16>
    %23 = vector.shape_cast %22 : vector<1x1x16x16x8xbf16> to vector<16x16x8xbf16>
    %24 = vector.shape_cast %23 : vector<16x16x8xbf16> to vector<256x8xbf16>
    %c3 = arith.constant 3 : index
    %c0_29 = arith.constant 0 : index
    %c0_30 = arith.constant 0 : index
    %25 = vector.load %arg5[%c3, %c0_29, %c0_30] : memref<27x8x128xbf16, #tpu.memory_space<vmem>>, vector<1x8x128xbf16>
    %26 = vector.shape_cast %25 : vector<1x8x128xbf16> to vector<8x128xbf16>
    %cst_31 = arith.constant dense<0.000000e+00> : vector<256x128xf32>
    %27 = tpu.matmul %24, %26, %cst_31 {dimension_numbers = #tpu.dot_dimension_numbers<[1], [0], [0], [1], [0, 0, 1, 1], [], []>} : vector<256x8xbf16>, vector<8x128xbf16>, vector<256x128xf32> -> vector<256x128xf32>
    %28 = arith.addf %21, %27 : vector<256x128xf32>
    %c0_32 = arith.constant 0 : index
    %c0_33 = arith.constant 0 : index
    %c1_34 = arith.constant 1 : index
    %c1_35 = arith.constant 1 : index
    %c0_36 = arith.constant 0 : index
    %29 = vector.load %arg2[%c0_32, %c0_33, %c1_34, %c1_35, %c0_36] : memref<1x1x18x18x8xbf16, #tpu.memory_space<vmem>>, vector<1x1x16x16x8xbf16>
    %30 = vector.shape_cast %29 : vector<1x1x16x16x8xbf16> to vector<16x16x8xbf16>
    %31 = vector.shape_cast %30 : vector<16x16x8xbf16> to vector<256x8xbf16>
    %c4 = arith.constant 4 : index
    %c0_37 = arith.constant 0 : index
    %c0_38 = arith.constant 0 : index
    %32 = vector.load %arg5[%c4, %c0_37, %c0_38] : memref<27x8x128xbf16, #tpu.memory_space<vmem>>, vector<1x8x128xbf16>
    %33 = vector.shape_cast %32 : vector<1x8x128xbf16> to vector<8x128xbf16>
    %cst_39 = arith.constant dense<0.000000e+00> : vector<256x128xf32>
    %34 = tpu.matmul %31, %33, %cst_39 {dimension_numbers = #tpu.dot_dimension_numbers<[1], [0], [0], [1], [0, 0, 1, 1], [], []>} : vector<256x8xbf16>, vector<8x128xbf16>, vector<256x128xf32> -> vector<256x128xf32>
    %35 = arith.addf %28, %34 : vector<256x128xf32>
    %c0_40 = arith.constant 0 : index
    %c0_41 = arith.constant 0 : index
    %c1_42 = arith.constant 1 : index
    %c2_43 = arith.constant 2 : index
    %c0_44 = arith.constant 0 : index
    %36 = vector.load %arg2[%c0_40, %c0_41, %c1_42, %c2_43, %c0_44] : memref<1x1x18x18x8xbf16, #tpu.memory_space<vmem>>, vector<1x1x16x16x8xbf16>
    %37 = vector.shape_cast %36 : vector<1x1x16x16x8xbf16> to vector<16x16x8xbf16>
    %38 = vector.shape_cast %37 : vector<16x16x8xbf16> to vector<256x8xbf16>
    %c5 = arith.constant 5 : index
    %c0_45 = arith.constant 0 : index
    %c0_46 = arith.constant 0 : index
    %39 = vector.load %arg5[%c5, %c0_45, %c0_46] : memref<27x8x128xbf16, #tpu.memory_space<vmem>>, vector<1x8x128xbf16>
    %40 = vector.shape_cast %39 : vector<1x8x128xbf16> to vector<8x128xbf16>
    %cst_47 = arith.constant dense<0.000000e+00> : vector<256x128xf32>
    %41 = tpu.matmul %38, %40, %cst_47 {dimension_numbers = #tpu.dot_dimension_numbers<[1], [0], [0], [1], [0, 0, 1, 1], [], []>} : vector<256x8xbf16>, vector<8x128xbf16>, vector<256x128xf32> -> vector<256x128xf32>
    %42 = arith.addf %35, %41 : vector<256x128xf32>
    %c0_48 = arith.constant 0 : index
    %c0_49 = arith.constant 0 : index
    %c2_50 = arith.constant 2 : index
    %c0_51 = arith.constant 0 : index
    %c0_52 = arith.constant 0 : index
    %43 = vector.load %arg2[%c0_48, %c0_49, %c2_50, %c0_51, %c0_52] : memref<1x1x18x18x8xbf16, #tpu.memory_space<vmem>>, vector<1x1x16x16x8xbf16>
    %44 = vector.shape_cast %43 : vector<1x1x16x16x8xbf16> to vector<16x16x8xbf16>
    %45 = vector.shape_cast %44 : vector<16x16x8xbf16> to vector<256x8xbf16>
    %c6 = arith.constant 6 : index
    %c0_53 = arith.constant 0 : index
    %c0_54 = arith.constant 0 : index
    %46 = vector.load %arg5[%c6, %c0_53, %c0_54] : memref<27x8x128xbf16, #tpu.memory_space<vmem>>, vector<1x8x128xbf16>
    %47 = vector.shape_cast %46 : vector<1x8x128xbf16> to vector<8x128xbf16>
    %cst_55 = arith.constant dense<0.000000e+00> : vector<256x128xf32>
    %48 = tpu.matmul %45, %47, %cst_55 {dimension_numbers = #tpu.dot_dimension_numbers<[1], [0], [0], [1], [0, 0, 1, 1], [], []>} : vector<256x8xbf16>, vector<8x128xbf16>, vector<256x128xf32> -> vector<256x128xf32>
    %49 = arith.addf %42, %48 : vector<256x128xf32>
    %c0_56 = arith.constant 0 : index
    %c0_57 = arith.constant 0 : index
    %c2_58 = arith.constant 2 : index
    %c1_59 = arith.constant 1 : index
    %c0_60 = arith.constant 0 : index
    %50 = vector.load %arg2[%c0_56, %c0_57, %c2_58, %c1_59, %c0_60] : memref<1x1x18x18x8xbf16, #tpu.memory_space<vmem>>, vector<1x1x16x16x8xbf16>
    %51 = vector.shape_cast %50 : vector<1x1x16x16x8xbf16> to vector<16x16x8xbf16>
    %52 = vector.shape_cast %51 : vector<16x16x8xbf16> to vector<256x8xbf16>
    %c7 = arith.constant 7 : index
    %c0_61 = arith.constant 0 : index
    %c0_62 = arith.constant 0 : index
    %53 = vector.load %arg5[%c7, %c0_61, %c0_62] : memref<27x8x128xbf16, #tpu.memory_space<vmem>>, vector<1x8x128xbf16>
    %54 = vector.shape_cast %53 : vector<1x8x128xbf16> to vector<8x128xbf16>
    %cst_63 = arith.constant dense<0.000000e+00> : vector<256x128xf32>
    %55 = tpu.matmul %52, %54, %cst_63 {dimension_numbers = #tpu.dot_dimension_numbers<[1], [0], [0], [1], [0, 0, 1, 1], [], []>} : vector<256x8xbf16>, vector<8x128xbf16>, vector<256x128xf32> -> vector<256x128xf32>
    %56 = arith.addf %49, %55 : vector<256x128xf32>
    %c0_64 = arith.constant 0 : index
    %c0_65 = arith.constant 0 : index
    %c2_66 = arith.constant 2 : index
    %c2_67 = arith.constant 2 : index
    %c0_68 = arith.constant 0 : index
    %57 = vector.load %arg2[%c0_64, %c0_65, %c2_66, %c2_67, %c0_68] : memref<1x1x18x18x8xbf16, #tpu.memory_space<vmem>>, vector<1x1x16x16x8xbf16>
    %58 = vector.shape_cast %57 : vector<1x1x16x16x8xbf16> to vector<16x16x8xbf16>
    %59 = vector.shape_cast %58 : vector<16x16x8xbf16> to vector<256x8xbf16>
    %c8 = arith.constant 8 : index
    %c0_69 = arith.constant 0 : index
    %c0_70 = arith.constant 0 : index
    %60 = vector.load %arg5[%c8, %c0_69, %c0_70] : memref<27x8x128xbf16, #tpu.memory_space<vmem>>, vector<1x8x128xbf16>
    %61 = vector.shape_cast %60 : vector<1x8x128xbf16> to vector<8x128xbf16>
    %cst_71 = arith.constant dense<0.000000e+00> : vector<256x128xf32>
    %62 = tpu.matmul %59, %61, %cst_71 {dimension_numbers = #tpu.dot_dimension_numbers<[1], [0], [0], [1], [0, 0, 1, 1], [], []>} : vector<256x8xbf16>, vector<8x128xbf16>, vector<256x128xf32> -> vector<256x128xf32>
    %63 = arith.addf %56, %62 : vector<256x128xf32>
    %c0_72 = arith.constant 0 : index
    %c0_73 = arith.constant 0 : index
    %c0_74 = arith.constant 0 : index
    %c0_75 = arith.constant 0 : index
    %c0_76 = arith.constant 0 : index
    %64 = vector.load %arg3[%c0_72, %c0_73, %c0_74, %c0_75, %c0_76] : memref<1x1x18x18x8xbf16, #tpu.memory_space<vmem>>, vector<1x1x16x16x8xbf16>
    %65 = vector.shape_cast %64 : vector<1x1x16x16x8xbf16> to vector<16x16x8xbf16>
    %66 = vector.shape_cast %65 : vector<16x16x8xbf16> to vector<256x8xbf16>
    %c9 = arith.constant 9 : index
    %c0_77 = arith.constant 0 : index
    %c0_78 = arith.constant 0 : index
    %67 = vector.load %arg5[%c9, %c0_77, %c0_78] : memref<27x8x128xbf16, #tpu.memory_space<vmem>>, vector<1x8x128xbf16>
    %68 = vector.shape_cast %67 : vector<1x8x128xbf16> to vector<8x128xbf16>
    %cst_79 = arith.constant dense<0.000000e+00> : vector<256x128xf32>
    %69 = tpu.matmul %66, %68, %cst_79 {dimension_numbers = #tpu.dot_dimension_numbers<[1], [0], [0], [1], [0, 0, 1, 1], [], []>} : vector<256x8xbf16>, vector<8x128xbf16>, vector<256x128xf32> -> vector<256x128xf32>
    %70 = arith.addf %63, %69 : vector<256x128xf32>
    %c0_80 = arith.constant 0 : index
    %c0_81 = arith.constant 0 : index
    %c0_82 = arith.constant 0 : index
    %c1_83 = arith.constant 1 : index
    %c0_84 = arith.constant 0 : index
    %71 = vector.load %arg3[%c0_80, %c0_81, %c0_82, %c1_83, %c0_84] : memref<1x1x18x18x8xbf16, #tpu.memory_space<vmem>>, vector<1x1x16x16x8xbf16>
    %72 = vector.shape_cast %71 : vector<1x1x16x16x8xbf16> to vector<16x16x8xbf16>
    %73 = vector.shape_cast %72 : vector<16x16x8xbf16> to vector<256x8xbf16>
    %c10 = arith.constant 10 : index
    %c0_85 = arith.constant 0 : index
    %c0_86 = arith.constant 0 : index
    %74 = vector.load %arg5[%c10, %c0_85, %c0_86] : memref<27x8x128xbf16, #tpu.memory_space<vmem>>, vector<1x8x128xbf16>
    %75 = vector.shape_cast %74 : vector<1x8x128xbf16> to vector<8x128xbf16>
    %cst_87 = arith.constant dense<0.000000e+00> : vector<256x128xf32>
    %76 = tpu.matmul %73, %75, %cst_87 {dimension_numbers = #tpu.dot_dimension_numbers<[1], [0], [0], [1], [0, 0, 1, 1], [], []>} : vector<256x8xbf16>, vector<8x128xbf16>, vector<256x128xf32> -> vector<256x128xf32>
    %77 = arith.addf %70, %76 : vector<256x128xf32>
    %c0_88 = arith.constant 0 : index
    %c0_89 = arith.constant 0 : index
    %c0_90 = arith.constant 0 : index
    %c2_91 = arith.constant 2 : index
    %c0_92 = arith.constant 0 : index
    %78 = vector.load %arg3[%c0_88, %c0_89, %c0_90, %c2_91, %c0_92] : memref<1x1x18x18x8xbf16, #tpu.memory_space<vmem>>, vector<1x1x16x16x8xbf16>
    %79 = vector.shape_cast %78 : vector<1x1x16x16x8xbf16> to vector<16x16x8xbf16>
    %80 = vector.shape_cast %79 : vector<16x16x8xbf16> to vector<256x8xbf16>
    %c11 = arith.constant 11 : index
    %c0_93 = arith.constant 0 : index
    %c0_94 = arith.constant 0 : index
    %81 = vector.load %arg5[%c11, %c0_93, %c0_94] : memref<27x8x128xbf16, #tpu.memory_space<vmem>>, vector<1x8x128xbf16>
    %82 = vector.shape_cast %81 : vector<1x8x128xbf16> to vector<8x128xbf16>
    %cst_95 = arith.constant dense<0.000000e+00> : vector<256x128xf32>
    %83 = tpu.matmul %80, %82, %cst_95 {dimension_numbers = #tpu.dot_dimension_numbers<[1], [0], [0], [1], [0, 0, 1, 1], [], []>} : vector<256x8xbf16>, vector<8x128xbf16>, vector<256x128xf32> -> vector<256x128xf32>
    %84 = arith.addf %77, %83 : vector<256x128xf32>
    %c0_96 = arith.constant 0 : index
    %c0_97 = arith.constant 0 : index
    %c1_98 = arith.constant 1 : index
    %c0_99 = arith.constant 0 : index
    %c0_100 = arith.constant 0 : index
    %85 = vector.load %arg3[%c0_96, %c0_97, %c1_98, %c0_99, %c0_100] : memref<1x1x18x18x8xbf16, #tpu.memory_space<vmem>>, vector<1x1x16x16x8xbf16>
    %86 = vector.shape_cast %85 : vector<1x1x16x16x8xbf16> to vector<16x16x8xbf16>
    %87 = vector.shape_cast %86 : vector<16x16x8xbf16> to vector<256x8xbf16>
    %c12 = arith.constant 12 : index
    %c0_101 = arith.constant 0 : index
    %c0_102 = arith.constant 0 : index
    %88 = vector.load %arg5[%c12, %c0_101, %c0_102] : memref<27x8x128xbf16, #tpu.memory_space<vmem>>, vector<1x8x128xbf16>
    %89 = vector.shape_cast %88 : vector<1x8x128xbf16> to vector<8x128xbf16>
    %cst_103 = arith.constant dense<0.000000e+00> : vector<256x128xf32>
    %90 = tpu.matmul %87, %89, %cst_103 {dimension_numbers = #tpu.dot_dimension_numbers<[1], [0], [0], [1], [0, 0, 1, 1], [], []>} : vector<256x8xbf16>, vector<8x128xbf16>, vector<256x128xf32> -> vector<256x128xf32>
    %91 = arith.addf %84, %90 : vector<256x128xf32>
    %c0_104 = arith.constant 0 : index
    %c0_105 = arith.constant 0 : index
    %c1_106 = arith.constant 1 : index
    %c1_107 = arith.constant 1 : index
    %c0_108 = arith.constant 0 : index
    %92 = vector.load %arg3[%c0_104, %c0_105, %c1_106, %c1_107, %c0_108] : memref<1x1x18x18x8xbf16, #tpu.memory_space<vmem>>, vector<1x1x16x16x8xbf16>
    %93 = vector.shape_cast %92 : vector<1x1x16x16x8xbf16> to vector<16x16x8xbf16>
    %94 = vector.shape_cast %93 : vector<16x16x8xbf16> to vector<256x8xbf16>
    %c13 = arith.constant 13 : index
    %c0_109 = arith.constant 0 : index
    %c0_110 = arith.constant 0 : index
    %95 = vector.load %arg5[%c13, %c0_109, %c0_110] : memref<27x8x128xbf16, #tpu.memory_space<vmem>>, vector<1x8x128xbf16>
    %96 = vector.shape_cast %95 : vector<1x8x128xbf16> to vector<8x128xbf16>
    %cst_111 = arith.constant dense<0.000000e+00> : vector<256x128xf32>
    %97 = tpu.matmul %94, %96, %cst_111 {dimension_numbers = #tpu.dot_dimension_numbers<[1], [0], [0], [1], [0, 0, 1, 1], [], []>} : vector<256x8xbf16>, vector<8x128xbf16>, vector<256x128xf32> -> vector<256x128xf32>
    %98 = arith.addf %91, %97 : vector<256x128xf32>
    %c0_112 = arith.constant 0 : index
    %c0_113 = arith.constant 0 : index
    %c1_114 = arith.constant 1 : index
    %c2_115 = arith.constant 2 : index
    %c0_116 = arith.constant 0 : index
    %99 = vector.load %arg3[%c0_112, %c0_113, %c1_114, %c2_115, %c0_116] : memref<1x1x18x18x8xbf16, #tpu.memory_space<vmem>>, vector<1x1x16x16x8xbf16>
    %100 = vector.shape_cast %99 : vector<1x1x16x16x8xbf16> to vector<16x16x8xbf16>
    %101 = vector.shape_cast %100 : vector<16x16x8xbf16> to vector<256x8xbf16>
    %c14 = arith.constant 14 : index
    %c0_117 = arith.constant 0 : index
    %c0_118 = arith.constant 0 : index
    %102 = vector.load %arg5[%c14, %c0_117, %c0_118] : memref<27x8x128xbf16, #tpu.memory_space<vmem>>, vector<1x8x128xbf16>
    %103 = vector.shape_cast %102 : vector<1x8x128xbf16> to vector<8x128xbf16>
    %cst_119 = arith.constant dense<0.000000e+00> : vector<256x128xf32>
    %104 = tpu.matmul %101, %103, %cst_119 {dimension_numbers = #tpu.dot_dimension_numbers<[1], [0], [0], [1], [0, 0, 1, 1], [], []>} : vector<256x8xbf16>, vector<8x128xbf16>, vector<256x128xf32> -> vector<256x128xf32>
    %105 = arith.addf %98, %104 : vector<256x128xf32>
    %c0_120 = arith.constant 0 : index
    %c0_121 = arith.constant 0 : index
    %c2_122 = arith.constant 2 : index
    %c0_123 = arith.constant 0 : index
    %c0_124 = arith.constant 0 : index
    %106 = vector.load %arg3[%c0_120, %c0_121, %c2_122, %c0_123, %c0_124] : memref<1x1x18x18x8xbf16, #tpu.memory_space<vmem>>, vector<1x1x16x16x8xbf16>
    %107 = vector.shape_cast %106 : vector<1x1x16x16x8xbf16> to vector<16x16x8xbf16>
    %108 = vector.shape_cast %107 : vector<16x16x8xbf16> to vector<256x8xbf16>
    %c15 = arith.constant 15 : index
    %c0_125 = arith.constant 0 : index
    %c0_126 = arith.constant 0 : index
    %109 = vector.load %arg5[%c15, %c0_125, %c0_126] : memref<27x8x128xbf16, #tpu.memory_space<vmem>>, vector<1x8x128xbf16>
    %110 = vector.shape_cast %109 : vector<1x8x128xbf16> to vector<8x128xbf16>
    %cst_127 = arith.constant dense<0.000000e+00> : vector<256x128xf32>
    %111 = tpu.matmul %108, %110, %cst_127 {dimension_numbers = #tpu.dot_dimension_numbers<[1], [0], [0], [1], [0, 0, 1, 1], [], []>} : vector<256x8xbf16>, vector<8x128xbf16>, vector<256x128xf32> -> vector<256x128xf32>
    %112 = arith.addf %105, %111 : vector<256x128xf32>
    %c0_128 = arith.constant 0 : index
    %c0_129 = arith.constant 0 : index
    %c2_130 = arith.constant 2 : index
    %c1_131 = arith.constant 1 : index
    %c0_132 = arith.constant 0 : index
    %113 = vector.load %arg3[%c0_128, %c0_129, %c2_130, %c1_131, %c0_132] : memref<1x1x18x18x8xbf16, #tpu.memory_space<vmem>>, vector<1x1x16x16x8xbf16>
    %114 = vector.shape_cast %113 : vector<1x1x16x16x8xbf16> to vector<16x16x8xbf16>
    %115 = vector.shape_cast %114 : vector<16x16x8xbf16> to vector<256x8xbf16>
    %c16 = arith.constant 16 : index
    %c0_133 = arith.constant 0 : index
    %c0_134 = arith.constant 0 : index
    %116 = vector.load %arg5[%c16, %c0_133, %c0_134] : memref<27x8x128xbf16, #tpu.memory_space<vmem>>, vector<1x8x128xbf16>
    %117 = vector.shape_cast %116 : vector<1x8x128xbf16> to vector<8x128xbf16>
    %cst_135 = arith.constant dense<0.000000e+00> : vector<256x128xf32>
    %118 = tpu.matmul %115, %117, %cst_135 {dimension_numbers = #tpu.dot_dimension_numbers<[1], [0], [0], [1], [0, 0, 1, 1], [], []>} : vector<256x8xbf16>, vector<8x128xbf16>, vector<256x128xf32> -> vector<256x128xf32>
    %119 = arith.addf %112, %118 : vector<256x128xf32>
    %c0_136 = arith.constant 0 : index
    %c0_137 = arith.constant 0 : index
    %c2_138 = arith.constant 2 : index
    %c2_139 = arith.constant 2 : index
    %c0_140 = arith.constant 0 : index
    %120 = vector.load %arg3[%c0_136, %c0_137, %c2_138, %c2_139, %c0_140] : memref<1x1x18x18x8xbf16, #tpu.memory_space<vmem>>, vector<1x1x16x16x8xbf16>
    %121 = vector.shape_cast %120 : vector<1x1x16x16x8xbf16> to vector<16x16x8xbf16>
    %122 = vector.shape_cast %121 : vector<16x16x8xbf16> to vector<256x8xbf16>
    %c17 = arith.constant 17 : index
    %c0_141 = arith.constant 0 : index
    %c0_142 = arith.constant 0 : index
    %123 = vector.load %arg5[%c17, %c0_141, %c0_142] : memref<27x8x128xbf16, #tpu.memory_space<vmem>>, vector<1x8x128xbf16>
    %124 = vector.shape_cast %123 : vector<1x8x128xbf16> to vector<8x128xbf16>
    %cst_143 = arith.constant dense<0.000000e+00> : vector<256x128xf32>
    %125 = tpu.matmul %122, %124, %cst_143 {dimension_numbers = #tpu.dot_dimension_numbers<[1], [0], [0], [1], [0, 0, 1, 1], [], []>} : vector<256x8xbf16>, vector<8x128xbf16>, vector<256x128xf32> -> vector<256x128xf32>
    %126 = arith.addf %119, %125 : vector<256x128xf32>
    %c0_144 = arith.constant 0 : index
    %c0_145 = arith.constant 0 : index
    %c0_146 = arith.constant 0 : index
    %c0_147 = arith.constant 0 : index
    %c0_148 = arith.constant 0 : index
    %127 = vector.load %arg4[%c0_144, %c0_145, %c0_146, %c0_147, %c0_148] : memref<1x1x18x18x8xbf16, #tpu.memory_space<vmem>>, vector<1x1x16x16x8xbf16>
    %128 = vector.shape_cast %127 : vector<1x1x16x16x8xbf16> to vector<16x16x8xbf16>
    %129 = vector.shape_cast %128 : vector<16x16x8xbf16> to vector<256x8xbf16>
    %c18 = arith.constant 18 : index
    %c0_149 = arith.constant 0 : index
    %c0_150 = arith.constant 0 : index
    %130 = vector.load %arg5[%c18, %c0_149, %c0_150] : memref<27x8x128xbf16, #tpu.memory_space<vmem>>, vector<1x8x128xbf16>
    %131 = vector.shape_cast %130 : vector<1x8x128xbf16> to vector<8x128xbf16>
    %cst_151 = arith.constant dense<0.000000e+00> : vector<256x128xf32>
    %132 = tpu.matmul %129, %131, %cst_151 {dimension_numbers = #tpu.dot_dimension_numbers<[1], [0], [0], [1], [0, 0, 1, 1], [], []>} : vector<256x8xbf16>, vector<8x128xbf16>, vector<256x128xf32> -> vector<256x128xf32>
    %133 = arith.addf %126, %132 : vector<256x128xf32>
    %c0_152 = arith.constant 0 : index
    %c0_153 = arith.constant 0 : index
    %c0_154 = arith.constant 0 : index
    %c1_155 = arith.constant 1 : index
    %c0_156 = arith.constant 0 : index
    %134 = vector.load %arg4[%c0_152, %c0_153, %c0_154, %c1_155, %c0_156] : memref<1x1x18x18x8xbf16, #tpu.memory_space<vmem>>, vector<1x1x16x16x8xbf16>
    %135 = vector.shape_cast %134 : vector<1x1x16x16x8xbf16> to vector<16x16x8xbf16>
    %136 = vector.shape_cast %135 : vector<16x16x8xbf16> to vector<256x8xbf16>
    %c19 = arith.constant 19 : index
    %c0_157 = arith.constant 0 : index
    %c0_158 = arith.constant 0 : index
    %137 = vector.load %arg5[%c19, %c0_157, %c0_158] : memref<27x8x128xbf16, #tpu.memory_space<vmem>>, vector<1x8x128xbf16>
    %138 = vector.shape_cast %137 : vector<1x8x128xbf16> to vector<8x128xbf16>
    %cst_159 = arith.constant dense<0.000000e+00> : vector<256x128xf32>
    %139 = tpu.matmul %136, %138, %cst_159 {dimension_numbers = #tpu.dot_dimension_numbers<[1], [0], [0], [1], [0, 0, 1, 1], [], []>} : vector<256x8xbf16>, vector<8x128xbf16>, vector<256x128xf32> -> vector<256x128xf32>
    %140 = arith.addf %133, %139 : vector<256x128xf32>
    %c0_160 = arith.constant 0 : index
    %c0_161 = arith.constant 0 : index
    %c0_162 = arith.constant 0 : index
    %c2_163 = arith.constant 2 : index
    %c0_164 = arith.constant 0 : index
    %141 = vector.load %arg4[%c0_160, %c0_161, %c0_162, %c2_163, %c0_164] : memref<1x1x18x18x8xbf16, #tpu.memory_space<vmem>>, vector<1x1x16x16x8xbf16>
    %142 = vector.shape_cast %141 : vector<1x1x16x16x8xbf16> to vector<16x16x8xbf16>
    %143 = vector.shape_cast %142 : vector<16x16x8xbf16> to vector<256x8xbf16>
    %c20 = arith.constant 20 : index
    %c0_165 = arith.constant 0 : index
    %c0_166 = arith.constant 0 : index
    %144 = vector.load %arg5[%c20, %c0_165, %c0_166] : memref<27x8x128xbf16, #tpu.memory_space<vmem>>, vector<1x8x128xbf16>
    %145 = vector.shape_cast %144 : vector<1x8x128xbf16> to vector<8x128xbf16>
    %cst_167 = arith.constant dense<0.000000e+00> : vector<256x128xf32>
    %146 = tpu.matmul %143, %145, %cst_167 {dimension_numbers = #tpu.dot_dimension_numbers<[1], [0], [0], [1], [0, 0, 1, 1], [], []>} : vector<256x8xbf16>, vector<8x128xbf16>, vector<256x128xf32> -> vector<256x128xf32>
    %147 = arith.addf %140, %146 : vector<256x128xf32>
    %c0_168 = arith.constant 0 : index
    %c0_169 = arith.constant 0 : index
    %c1_170 = arith.constant 1 : index
    %c0_171 = arith.constant 0 : index
    %c0_172 = arith.constant 0 : index
    %148 = vector.load %arg4[%c0_168, %c0_169, %c1_170, %c0_171, %c0_172] : memref<1x1x18x18x8xbf16, #tpu.memory_space<vmem>>, vector<1x1x16x16x8xbf16>
    %149 = vector.shape_cast %148 : vector<1x1x16x16x8xbf16> to vector<16x16x8xbf16>
    %150 = vector.shape_cast %149 : vector<16x16x8xbf16> to vector<256x8xbf16>
    %c21 = arith.constant 21 : index
    %c0_173 = arith.constant 0 : index
    %c0_174 = arith.constant 0 : index
    %151 = vector.load %arg5[%c21, %c0_173, %c0_174] : memref<27x8x128xbf16, #tpu.memory_space<vmem>>, vector<1x8x128xbf16>
    %152 = vector.shape_cast %151 : vector<1x8x128xbf16> to vector<8x128xbf16>
    %cst_175 = arith.constant dense<0.000000e+00> : vector<256x128xf32>
    %153 = tpu.matmul %150, %152, %cst_175 {dimension_numbers = #tpu.dot_dimension_numbers<[1], [0], [0], [1], [0, 0, 1, 1], [], []>} : vector<256x8xbf16>, vector<8x128xbf16>, vector<256x128xf32> -> vector<256x128xf32>
    %154 = arith.addf %147, %153 : vector<256x128xf32>
    %c0_176 = arith.constant 0 : index
    %c0_177 = arith.constant 0 : index
    %c1_178 = arith.constant 1 : index
    %c1_179 = arith.constant 1 : index
    %c0_180 = arith.constant 0 : index
    %155 = vector.load %arg4[%c0_176, %c0_177, %c1_178, %c1_179, %c0_180] : memref<1x1x18x18x8xbf16, #tpu.memory_space<vmem>>, vector<1x1x16x16x8xbf16>
    %156 = vector.shape_cast %155 : vector<1x1x16x16x8xbf16> to vector<16x16x8xbf16>
    %157 = vector.shape_cast %156 : vector<16x16x8xbf16> to vector<256x8xbf16>
    %c22 = arith.constant 22 : index
    %c0_181 = arith.constant 0 : index
    %c0_182 = arith.constant 0 : index
    %158 = vector.load %arg5[%c22, %c0_181, %c0_182] : memref<27x8x128xbf16, #tpu.memory_space<vmem>>, vector<1x8x128xbf16>
    %159 = vector.shape_cast %158 : vector<1x8x128xbf16> to vector<8x128xbf16>
    %cst_183 = arith.constant dense<0.000000e+00> : vector<256x128xf32>
    %160 = tpu.matmul %157, %159, %cst_183 {dimension_numbers = #tpu.dot_dimension_numbers<[1], [0], [0], [1], [0, 0, 1, 1], [], []>} : vector<256x8xbf16>, vector<8x128xbf16>, vector<256x128xf32> -> vector<256x128xf32>
    %161 = arith.addf %154, %160 : vector<256x128xf32>
    %c0_184 = arith.constant 0 : index
    %c0_185 = arith.constant 0 : index
    %c1_186 = arith.constant 1 : index
    %c2_187 = arith.constant 2 : index
    %c0_188 = arith.constant 0 : index
    %162 = vector.load %arg4[%c0_184, %c0_185, %c1_186, %c2_187, %c0_188] : memref<1x1x18x18x8xbf16, #tpu.memory_space<vmem>>, vector<1x1x16x16x8xbf16>
    %163 = vector.shape_cast %162 : vector<1x1x16x16x8xbf16> to vector<16x16x8xbf16>
    %164 = vector.shape_cast %163 : vector<16x16x8xbf16> to vector<256x8xbf16>
    %c23 = arith.constant 23 : index
    %c0_189 = arith.constant 0 : index
    %c0_190 = arith.constant 0 : index
    %165 = vector.load %arg5[%c23, %c0_189, %c0_190] : memref<27x8x128xbf16, #tpu.memory_space<vmem>>, vector<1x8x128xbf16>
    %166 = vector.shape_cast %165 : vector<1x8x128xbf16> to vector<8x128xbf16>
    %cst_191 = arith.constant dense<0.000000e+00> : vector<256x128xf32>
    %167 = tpu.matmul %164, %166, %cst_191 {dimension_numbers = #tpu.dot_dimension_numbers<[1], [0], [0], [1], [0, 0, 1, 1], [], []>} : vector<256x8xbf16>, vector<8x128xbf16>, vector<256x128xf32> -> vector<256x128xf32>
    %168 = arith.addf %161, %167 : vector<256x128xf32>
    %c0_192 = arith.constant 0 : index
    %c0_193 = arith.constant 0 : index
    %c2_194 = arith.constant 2 : index
    %c0_195 = arith.constant 0 : index
    %c0_196 = arith.constant 0 : index
    %169 = vector.load %arg4[%c0_192, %c0_193, %c2_194, %c0_195, %c0_196] : memref<1x1x18x18x8xbf16, #tpu.memory_space<vmem>>, vector<1x1x16x16x8xbf16>
    %170 = vector.shape_cast %169 : vector<1x1x16x16x8xbf16> to vector<16x16x8xbf16>
    %171 = vector.shape_cast %170 : vector<16x16x8xbf16> to vector<256x8xbf16>
    %c24 = arith.constant 24 : index
    %c0_197 = arith.constant 0 : index
    %c0_198 = arith.constant 0 : index
    %172 = vector.load %arg5[%c24, %c0_197, %c0_198] : memref<27x8x128xbf16, #tpu.memory_space<vmem>>, vector<1x8x128xbf16>
    %173 = vector.shape_cast %172 : vector<1x8x128xbf16> to vector<8x128xbf16>
    %cst_199 = arith.constant dense<0.000000e+00> : vector<256x128xf32>
    %174 = tpu.matmul %171, %173, %cst_199 {dimension_numbers = #tpu.dot_dimension_numbers<[1], [0], [0], [1], [0, 0, 1, 1], [], []>} : vector<256x8xbf16>, vector<8x128xbf16>, vector<256x128xf32> -> vector<256x128xf32>
    %175 = arith.addf %168, %174 : vector<256x128xf32>
    %c0_200 = arith.constant 0 : index
    %c0_201 = arith.constant 0 : index
    %c2_202 = arith.constant 2 : index
    %c1_203 = arith.constant 1 : index
    %c0_204 = arith.constant 0 : index
    %176 = vector.load %arg4[%c0_200, %c0_201, %c2_202, %c1_203, %c0_204] : memref<1x1x18x18x8xbf16, #tpu.memory_space<vmem>>, vector<1x1x16x16x8xbf16>
    %177 = vector.shape_cast %176 : vector<1x1x16x16x8xbf16> to vector<16x16x8xbf16>
    %178 = vector.shape_cast %177 : vector<16x16x8xbf16> to vector<256x8xbf16>
    %c25 = arith.constant 25 : index
    %c0_205 = arith.constant 0 : index
    %c0_206 = arith.constant 0 : index
    %179 = vector.load %arg5[%c25, %c0_205, %c0_206] : memref<27x8x128xbf16, #tpu.memory_space<vmem>>, vector<1x8x128xbf16>
    %180 = vector.shape_cast %179 : vector<1x8x128xbf16> to vector<8x128xbf16>
    %cst_207 = arith.constant dense<0.000000e+00> : vector<256x128xf32>
    %181 = tpu.matmul %178, %180, %cst_207 {dimension_numbers = #tpu.dot_dimension_numbers<[1], [0], [0], [1], [0, 0, 1, 1], [], []>} : vector<256x8xbf16>, vector<8x128xbf16>, vector<256x128xf32> -> vector<256x128xf32>
    %182 = arith.addf %175, %181 : vector<256x128xf32>
    %c0_208 = arith.constant 0 : index
    %c0_209 = arith.constant 0 : index
    %c2_210 = arith.constant 2 : index
    %c2_211 = arith.constant 2 : index
    %c0_212 = arith.constant 0 : index
    %183 = vector.load %arg4[%c0_208, %c0_209, %c2_210, %c2_211, %c0_212] : memref<1x1x18x18x8xbf16, #tpu.memory_space<vmem>>, vector<1x1x16x16x8xbf16>
    %184 = vector.shape_cast %183 : vector<1x1x16x16x8xbf16> to vector<16x16x8xbf16>
    %185 = vector.shape_cast %184 : vector<16x16x8xbf16> to vector<256x8xbf16>
    %c26 = arith.constant 26 : index
    %c0_213 = arith.constant 0 : index
    %c0_214 = arith.constant 0 : index
    %186 = vector.load %arg5[%c26, %c0_213, %c0_214] : memref<27x8x128xbf16, #tpu.memory_space<vmem>>, vector<1x8x128xbf16>
    %187 = vector.shape_cast %186 : vector<1x8x128xbf16> to vector<8x128xbf16>
    %cst_215 = arith.constant dense<0.000000e+00> : vector<256x128xf32>
    %188 = tpu.matmul %185, %187, %cst_215 {dimension_numbers = #tpu.dot_dimension_numbers<[1], [0], [0], [1], [0, 0, 1, 1], [], []>} : vector<256x8xbf16>, vector<8x128xbf16>, vector<256x128xf32> -> vector<256x128xf32>
    %189 = arith.addf %182, %188 : vector<256x128xf32>
    %190 = arith.truncf %189 : vector<256x128xf32> to vector<256x128xbf16>
    %c0_216 = arith.constant 0 : index
    %c0_217 = arith.constant 0 : index
    %191 = vector.load %arg6[%c0_216, %c0_217] : memref<256x128xbf16, #tpu.memory_space<vmem>>, vector<256x128xbf16>
    tpu.vector_store %arg6[%c0_216, %c0_217], %190 {strides = array<i32>} : memref<256x128xbf16, #tpu.memory_space<vmem>>, vector<256x128xbf16>,
    %cst_218 = arith.constant dense<0.000000e+00> : vector<128xf32>
    %192 = vector.multi_reduction <add>, %189, %cst_218 [0] : vector<256x128xf32> to vector<128xf32>
    %193 = vector.shape_cast %192 : vector<128xf32> to vector<1x128xf32>
    %194 = arith.mulf %189, %189 : vector<256x128xf32>
    %cst_219 = arith.constant dense<0.000000e+00> : vector<128xf32>
    %195 = vector.multi_reduction <add>, %194, %cst_219 [0] : vector<256x128xf32> to vector<128xf32>
    %196 = vector.shape_cast %195 : vector<128xf32> to vector<1x128xf32>
    %197 = vector.shape_cast %193 : vector<1x128xf32> to vector<1x128xf32>
    %198 = vector.broadcast %197 : vector<1x128xf32> to vector<8x128xf32>
    %c0_220 = arith.constant 0 : index
    %c0_221 = arith.constant 0 : index
    %199 = vector.load %arg7[%c0_220, %c0_221] : memref<8x128xf32, #tpu.memory_space<vmem>>, vector<8x128xf32>
    tpu.vector_store %arg7[%c0_220, %c0_221], %198 {strides = array<i32>} : memref<8x128xf32, #tpu.memory_space<vmem>>, vector<8x128xf32>,
    %200 = vector.shape_cast %196 : vector<1x128xf32> to vector<1x128xf32>
    %201 = vector.broadcast %200 : vector<1x128xf32> to vector<8x128xf32>
    %c0_222 = arith.constant 0 : index
    %c0_223 = arith.constant 0 : index
    %202 = vector.load %arg8[%c0_222, %c0_223] : memref<8x128xf32, #tpu.memory_space<vmem>>, vector<8x128xf32>
    tpu.vector_store %arg8[%c0_222, %c0_223], %201 {strides = array<i32>} : memref<8x128xf32, #tpu.memory_space<vmem>>, vector<8x128xf32>,
    return
  }
  func.func @transform_0(%arg0: i32, %arg1: i32) -> (i32, i32, i32, i32, i32) {
    %c1_i32 = arith.constant 1 : i32
    %0 = arith.muli %arg1, %c1_i32 : i32
    %c0_i32 = arith.constant 0 : i32
    %1 = arith.addi %0, %c0_i32 : i32
    %c0_i32_0 = arith.constant 0 : i32
    %c0_i32_1 = arith.constant 0 : i32
    %c0_i32_2 = arith.constant 0 : i32
    %c0_i32_3 = arith.constant 0 : i32
    return %arg0, %1, %c0_i32_0, %c0_i32_1, %c0_i32_2 : i32, i32, i32, i32, i32
  }
  func.func @transform_1(%arg0: i32, %arg1: i32) -> (i32, i32, i32, i32, i32) {
    %c1_i32 = arith.constant 1 : i32
    %0 = arith.muli %arg1, %c1_i32 : i32
    %c1_i32_0 = arith.constant 1 : i32
    %1 = arith.addi %0, %c1_i32_0 : i32
    %c0_i32 = arith.constant 0 : i32
    %c0_i32_1 = arith.constant 0 : i32
    %c0_i32_2 = arith.constant 0 : i32
    %c0_i32_3 = arith.constant 0 : i32
    return %arg0, %1, %c0_i32, %c0_i32_1, %c0_i32_2 : i32, i32, i32, i32, i32
  }
  func.func @transform_2(%arg0: i32, %arg1: i32) -> (i32, i32, i32, i32, i32) {
    %c1_i32 = arith.constant 1 : i32
    %0 = arith.muli %arg1, %c1_i32 : i32
    %c2_i32 = arith.constant 2 : i32
    %1 = arith.addi %0, %c2_i32 : i32
    %c0_i32 = arith.constant 0 : i32
    %c0_i32_0 = arith.constant 0 : i32
    %c0_i32_1 = arith.constant 0 : i32
    %c0_i32_2 = arith.constant 0 : i32
    return %arg0, %1, %c0_i32, %c0_i32_0, %c0_i32_1 : i32, i32, i32, i32, i32
  }
  func.func @transform_3(%arg0: i32, %arg1: i32) -> (i32, i32, i32) {
    %c0_i32 = arith.constant 0 : i32
    %c0_i32_0 = arith.constant 0 : i32
    %c0_i32_1 = arith.constant 0 : i32
    %c0_i32_2 = arith.constant 0 : i32
    return %c0_i32, %c0_i32_0, %c0_i32_1 : i32, i32, i32
  }
  func.func @transform_4(%arg0: i32, %arg1: i32) -> (i32, i32) {
    %c8_i32 = arith.constant 8 : i32
    %0 = arith.muli %arg0, %c8_i32 : i32
    %1 = arith.addi %0, %arg1 : i32
    %c0_i32 = arith.constant 0 : i32
    %c0_i32_0 = arith.constant 0 : i32
    return %1, %c0_i32 : i32, i32
  }
  func.func @transform_5(%arg0: i32, %arg1: i32) -> (i32, i32) {
    %c8_i32 = arith.constant 8 : i32
    %0 = arith.muli %arg0, %c8_i32 : i32
    %1 = arith.addi %0, %arg1 : i32
    %c0_i32 = arith.constant 0 : i32
    %c0_i32_0 = arith.constant 0 : i32
    return %1, %c0_i32 : i32, i32
  }
  func.func @transform_6(%arg0: i32, %arg1: i32) -> (i32, i32) {
    %c8_i32 = arith.constant 8 : i32
    %0 = arith.muli %arg0, %c8_i32 : i32
    %1 = arith.addi %0, %arg1 : i32
    %c0_i32 = arith.constant 0 : i32
    %c0_i32_0 = arith.constant 0 : i32
    return %1, %c0_i32 : i32, i32
  }
}

</mosaic_0001>

<bundles_post_ra>
// kernel: tpu_custom_call.1
= control target key start
LH: loop header
LB: loop body
LE: loop exit
PB: predicated region body
PF: predicated region fallthrough
CT: control target
= control target key end

     0   :  { %s19998_s0 = inlined_call_operand.vmem [shape: bf16[2,10,18,18,8], index: 0, kind: input, shape index: {}]   ;;  %s19999_s1 = inlined_call_operand.vmem [shape: bf16[2,10,18,18,8], index: 1, kind: input, shape index: {}]   ;;  %s20000_s2 = inlined_call_operand.vmem [shape: bf16[2,10,18,18,8], index: 2, kind: input, shape index: {}]   ;;  %s20001_s3 = inlined_call_operand.vmem [shape: bf16[27,8,128], index: 3, kind: input, shape index: {}]   ;;  %s20002_s4 = inlined_call_operand.hbm [shape: bf16[4096,128], index: 4, kind: output, shape index: {0}]   ;;  %s20003_s5 = inlined_call_operand.hbm [shape: f32[128,128], index: 5, kind: output, shape index: {1}]   ;;  %s20004_s6 = inlined_call_operand.hbm [shape: f32[128,128], index: 6, kind: output, shape index: {2}]  }
   0x1   :  { %20007 = sst [smem:[#allocation20_spill]] %s19998_s0 }
   0x2   :  { %20008 = sst [smem:[#allocation21_spill]] %s19999_s1 }
   0x3   :  { %20009 = sst [smem:[#allocation22_spill]] %s20000_s2 }
   0x4   :  { %20010 = sst [smem:[#allocation23_spill]] %s20001_s3 }
   0x5   :  { %12 = vsyncpa [#allocation3], 0 }
   0x6   :  { %14 = vsyncpa [#allocation3 + $0x1], 0 }
   0x7   :  { %15 = vsyncpa [#allocation5], 0 }
   0x8   :  { %17 = vsyncpa [#allocation5 + $0x1], 0  ;;  %s15134_s21 = smov 0   ;;  %s15136_s22 = smov 0  }
   0x9   :  { %s15138_s23 = smov 0   ;;  %s15140_s24 = smov 0  }
   0xa   :  { %s15142_s25 = smov 0   ;;  %s15144_s26 = smov 0  }
   0xb   :  { %s15146_s27 = smov 0   ;;  %s15148_s28 = smov 0  }
   0xc LB: > { %s20006_s29 = sadd.s32 4294967295, %s15095_s28   ;;  %s32_s30 = sadd.s32 1, %s15087_s26  ;;  %s15095_s28 = sphi %s15148_s28, %s23_s28   ;;  %s15091_s27 = sphi %s15146_s27, %s20109_s27   ;;  %s15087_s26 = sphi %s15144_s26, %s20108_s26   ;;  %s15083_s25 = sphi %s15142_s25, %s20107_s25   ;;  %s15079_s24 = sphi %s15140_s24, %s20106_s24   ;;  %s15075_s23 = sphi %s15138_s23, %s20105_s23   ;;  %s15071_s22 = sphi %s15136_s22, %s20104_s22   ;;  %s15067_s21 = sphi %s15134_s21, %s20103_s21  }
   0xd   : > { %s35_s7 = sadd.s32 1, %s15091_s27  ;;  %p33_p0 = scmp.ge.s32.totalorder %s32_s30, 8 }
   0xe   : > { %s12766_s8 = sshll.u32 %s15091_s27, 3  ;;  %s20005_s9 = sadd.s32 4294967294, %s15095_s28  }
   0xf   : > { %s149_s10 = sadd.s32 %s15087_s26, %s12766_s8  ;;  %s20111_s30 = smov (%p33_p0, %s32_s30), 0 }
  0x10   : > { %s20113_s7 = smov (!%p33_p0, %s35_s7), %s15091_s27  ;;  %p165_p1 = scmp.ne.s32.totalorder %s15075_s23, %s15071_s22 }
  0x11   : > { %p166_p2 = scmp.eq.s32.totalorder %s20006_s29, 15  ;;  %p37_p3 = scmp.ge.s32.totalorder %s20113_s7, 2 }
  0x12   : > { %p171_p4 = scmp.ne.s32.totalorder %s15071_s22, %s15067_s21  ;;  %p172_p6 = scmp.eq.s32.totalorder %s20005_s9, 15 }
  0x13   : > { %p15189_p5 = por %p166_p2, %p165_p1  ;;  %s20115_s7 = smov (%p37_p3, %s20113_s7), 0 }
  0x14   : > { %p15197_p7 = por %p172_p6, %p171_p4  ;;  %p12774_p8 = scmp.ge.s32.totalorder %s15095_s28, 1 }
  0x15   : > { %s12767_s13 = sshll.u32 %s20115_s7, 3  ;;  %p293_p9 = scmp.lt.s32.totalorder %s15095_s28, 17 }
  0x16   : > { %s151_s14 = sadd.s32 %s12767_s13, %s20111_s30  ;;  %s155_s15 = sadd.s32 1, %s15075_s23 }
  0x17   : > { %s152_s16 = ssub.s32 %s149_s10, %s151_s14  ;;  %p294_p10 = pnand %p12774_p8, %p293_p9 }
  0x18   : > { %p153_p11 = scmp.eq.s32.totalorder %s152_s16, 0 }
  0x19   : > { %297 = sbr.rel (%p294_p10) target bundleno = 1956 (0x7a4), region = 36 }
  0x1a   : > { %s15207_s17 = scalar_select %p153_p11, %s15075_s23, %s155_s15  }
  0x1e   : > { %vm931_vm0 = vcmask 1043456   ;;  %s20013_s3 = sld [smem:[#allocation23_spill]]  ;;  %p357_p12 = scmp.lt.s32.totalorder %s15083_s25, 1  ;;  %vm1292_vm1 = vcmask 1042432   ;;  %vm1293_vm2 = vcmask 1046532   ;;  %vm882_vm5 = vcmask 64512  }
  0x1f   : > { %p359_p13 = scmp.lt.s32.totalorder %s15079_s24, 9  ;;  %s20014_s0 = sld [smem:[#allocation20_spill]]  ;;  %vm15248_vm3 = vmor %vm1292_vm1, %vm1293_vm2  ;;  %vm445_vm4 = vsmask.f32 3328  ;;  %vm446_vm6 = vsmask.f32 7440 }
  0x20   : > { %s358_s10 = scalar_select %p357_p12, %s15083_s25, 1  ;;  %vm15272_vm7 = vmor %vm445_vm4, %vm446_vm6 }
  0x21   : > { %s360_s15 = scalar_select %p359_p13, %s15079_s24, 9 }
  0x22   : > { %s15231_s19 = smul.u32 540, %s358_s10  ;;  %s366_s9 = sadd.s32 1, %s15079_s24 }
  0x23   : > { %s14790_s13 = smul.u32 54, %s360_s15  ;;  %p15992_p0 = scmp.lt.s32.totalorder %s366_s9, 9 }
  0x24   : > { %v12894_v0 = vld [vmem:[%s20013_s3 + $0x8] sm:$0xf]  ;;  %v12781_v2 = vld [vmem:[%s20013_s3 + $0x4] sm:$0xf]  ;;  %v428_v4 = vld [vmem:[%s20013_s3] sm:$0xf] }
  0x25   : > { %v15215_v1 = vsel %vm931_vm0, %v12894_v0, 0  ;;  %v933_v3 = vsel %vm931_vm0, %v12781_v2, 0  ;;  %v1153_v5 = vsel %vm931_vm0, %v428_v4, 0  ;;  %v13170_v6 = vld [vmem:[%s20013_s3 + $0x18] sm:$0xf]  ;;  %s363_s10 = sadd.s32 %s15231_s19, %s14790_s13  ;;  %s20117_s9 = smov (!%p15992_p0, %s366_s9), 9 }
  0x26   : > { %1515 = vmatpush.bf16.msra.mxu2 %v15215_v1  ;;  %942 = vmatpush.bf16.msra.mxu0 %v933_v3  ;;  %v3132_v7 = vsel %vm931_vm0, %v13170_v6, 0  ;;  %v13072_v8 = vld [vmem:[%s20013_s3 + $0x10] sm:$0xf]  ;;  %v13121_v10 = vld [vmem:[%s20013_s3 + $0x14] sm:$0xf]  ;;  %s12778_s16 = sshll.u32 %s363_s10, 2 }
  0x27   : > { %14787 = vmatpush.bf16.msra.mxu3 %v933_v3  ;;  %1162 = vmatpush.bf16.msra.mxu1 %v1153_v5  ;;  %v2447_v9 = vsel %vm931_vm0, %v13072_v8, 0  ;;  %v2845_v11 = vsel %vm931_vm0, %v13121_v10, 0  ;;  %s15246_s20 = scalar_lea.vmem %s20014_s0, %s12778_s16  ;;  %s14792_s8 = smul.u32 54, %s20117_s9 }
  0x28   : > { %v397_v13 = vld [vmem:[%s15246_s20 + $0x4] sm:$0xf]  ;;  %v429_v14 = vld [vmem:[%s15246_s20 + $0x8] sm:$0x1]  ;;  %v1244_v15 = vld [vmem:[%s15246_s20] sm:$0xe] }
  0x29   : > { %v12878_v16 = vrot.slane %v1244_v15, 9  ;;  %v1297_v17 = vrot.slane %v397_v13, 5  ;;  %v1300_v18 = vrot.slane %v429_v14, 5  ;;  %v396_v19 = vld [vmem:[%s15246_s20] sm:$0xf]  ;;  %v458_v22 = vshll.u32 %v397_v13, 16  ;;  %s373_s13 = sadd.s32 %s14792_s8, %s15231_s19 }
  0x2a   : > { %3141 = vmatpush.bf16.msrb.mxu2 %v3132_v7  ;;  %2456 = vmatpush.bf16.msrb.mxu0 %v2447_v9  ;;  %v449_v20 = vshrl.u32 %v396_v19, 16  ;;  %v452_v21 = vshll.u32 %v396_v19, 16  ;;  %v462_v23 = vshrl.u32 %v397_v13, 16  ;;  %v420_v24 = vld [vmem:[%s15246_s20 + $0x90] sm:$0xf]  ;;  %v468_v27 = vshll.u32 %v429_v14, 16 }
  0x2b   : > { %14788 = vmatpush.bf16.msrb.mxu3 %v1153_v5  ;;  %2854 = vmatpush.bf16.msrb.mxu1 %v2845_v11  ;;  %v1298_v25 = vsel %vm15248_vm3, %v12878_v16, %v1297_v17  ;;  %v1299_v26 = vrot.slane %v1297_v17, 4  ;;  %v15260_v28 = vld [vmem:[%s15246_s20 + $0x94] sm:$0xf]  ;;  %v460_v32 = vrot.slane %v458_v22, 5  ;;  %v15263_v33 = vld [vmem:[%s15246_s20 + $0x98] sm:$0x1] }
  0x2c   : > { %v1409_v29 = vunpack.c.l.b16 %v1298_v25  ;;  %v451_v30 = vrot.slane %v449_v20, 4  ;;  %v454_v31 = vrot.slane %v452_v21, 5  ;;  %v14547_v34 = vld [vmem:[%s15246_s20] sm:$0xff]  ;;  %v464_v36 = vrot.slane %v462_v23, 4  ;;  %v1245_v48 = vld [vmem:[%s15246_s20 + $0xc] sm:$0xe] }
  0x2d   : > { %v1301_v35 = vsel %vm15248_vm3, %v1299_v26, %v1300_v18  ;;  %v470_v37 = vrot.slane %v468_v27, 5  ;;  %v737_v38 = vshrl.u32 %v420_v24, 16  ;;  %v740_v41 = vshll.u32 %v420_v24, 16  ;;  %12862 = vmatmul.msk.bf16.vlgmr.msra.gmra.mxu1 %vm882_vm5, %v14547_v34  ;;  %v399_v55 = vld [vmem:[%s15246_s20 + $0x10] sm:$0xf]  ;;  %s12779_s14 = sshll.u32 %s373_s13, 2 }
  0x2e   : > { %v1410_v39 = vunpack.c.l.b16 %v1301_v35  ;;  %v455_v40 = vor.u32 %v454_v31, %v451_v30  ;;  %v746_v42 = vshll.u32 %v15260_v28, 16  ;;  %v465_v44 = vor.u32 %v464_v36, %v460_v32  ;;  %v430_v56 = vld [vmem:[%s15246_s20 + $0x14] sm:$0x1]  ;;  %v398_v60 = vld [vmem:[%s15246_s20 + $0xc] sm:$0xf]  ;;  %s20027_s1 = sld [smem:[#allocation21_spill]] }
  0x2f   : > { %v739_v45 = vrot.slane %v737_v38, 4  ;;  %v750_v46 = vshrl.u32 %v15260_v28, 16  ;;  %v756_v47 = vshll.u32 %v15263_v33, 16  ;;  %v742_v51 = vrot.slane %v740_v41, 5  ;;  %v422_v15 = vld [vmem:[%s15246_s20 + $0x9c] sm:$0xf] }
  0x30   : > { %v1441_v49 = vpack.c.b16 %v1410_v39, %v1409_v29  ;;  %v456_v50 = vrot.slane %v455_v40, 4  ;;  %v748_v52 = vrot.slane %v746_v42, 5  ;;  %v466_v53 = vrot.slane %v465_v44, 4  ;;  %v15295_v20 = vld [vmem:[%s15246_s20 + $0xa0] sm:$0xf]  ;;  %v14548_v30 = vld [vmem:[%s15246_s20 + $0xc] sm:$0xff] }
  0x31   : > { %v752_v54 = vrot.slane %v750_v46, 4  ;;  %v743_v58 = vor.u32 %v742_v51, %v739_v45  ;;  %v12879_v59 = vrot.slane %v1245_v48, 9  ;;  %v758_v0 = vrot.slane %v756_v47, 5  ;;  %v15302_v34 = vld [vmem:[%s15246_s20 + $0xa4] sm:$0x1]  ;;  %s377_s16 = sadd.s32 2, %s15079_s24 }
  0x32   : > { %12895 = vmatmul.msk.bf16.vlgmr.msra.gmra.mxu2 %vm882_vm5, %v1441_v49  ;;  %v461_v57 = vsel %vm15272_vm7, %v456_v50, %v460_v32  ;;  %v471_v61 = vsel %vm15272_vm7, %v466_v53, %v470_v37  ;;  %v1304_v4 = vrot.slane %v399_v55, 5  ;;  %v1307_v5 = vrot.slane %v430_v56, 5  ;;  %v401_v37 = vld [vmem:[%s15246_s20 + $0x1c] sm:$0xf]  ;;  %v431_v40 = vld [vmem:[%s15246_s20 + $0x20] sm:$0x1] }
  0x33   : > { %v834_v62 = vunpack.c.l.b16 %v461_v57  ;;  %v753_v63 = vor.u32 %v752_v54, %v748_v52  ;;  %v835_v2 = vunpack.c.l.b16 %v471_v61  ;;  %v744_v3 = vrot.slane %v743_v58, 4  ;;  %v1246_v46 = vld [vmem:[%s15246_s20 + $0x18] sm:$0xe]  ;;  %p17759_p1 = scmp.lt.s32.totalorder %s377_s16, 9  ;;  %s20060_s2 = sld [smem:[#allocation22_spill]] }
  0x34   : > { %v473_v7 = vshrl.u32 %v398_v60, 16  ;;  %v476_v8 = vshll.u32 %v398_v60, 16  ;;  %v482_v9 = vshll.u32 %v399_v55, 16  ;;  %v1305_v13 = vsel %vm15248_vm3, %v12879_v59, %v1304_v4  ;;  %s16048_s18 = scalar_lea.vmem %s20027_s1, %s12779_s14 }
  0x35   : > { %v754_v6 = vrot.slane %v753_v63, 4  ;;  %v866_v10 = vpack.c.b16 %v835_v2, %v834_v62  ;;  %v749_v11 = vsel %vm15272_vm7, %v744_v3, %v748_v52  ;;  %v1306_v14 = vrot.slane %v1304_v4, 4  ;;  %s20119_s16 = smov (!%p17759_p1, %s377_s16), 9 }
  0x36   : > { %v858_v17 = vunpack.c.l.b16 %v749_v11  ;;  %v1411_v18 = vunpack.c.l.b16 %v1305_v13  ;;  %v475_v19 = vrot.slane %v473_v7, 4  ;;  %v478_v23 = vrot.slane %v476_v8, 5  ;;  %v424_v11 = vld [vmem:[%s15246_s20 + $0xa8] sm:$0xf]  ;;  %v15325_v13 = vld [vmem:[%s15246_s20 + $0xac] sm:$0xf] }
  0x37   : > { %v759_v16 = vsel %vm15272_vm7, %v754_v6, %v758_v0  ;;  %12782 = vmatmul.msk.bf16.vlgmr.msra.gmra.mxu0 %vm882_vm5, %v866_v10  ;;  %v1308_v22 = vsel %vm15248_vm3, %v1306_v14, %v1307_v5  ;;  %v484_v24 = vrot.slane %v482_v9, 5  ;;  %v486_v26 = vshrl.u32 %v399_v55, 16  ;;  %v400_v55 = vld [vmem:[%s15246_s20 + $0x18] sm:$0xf]  ;;  %s14793_s15 = smul.u32 54, %s20119_s16 }
  0x38   : > { %v859_v21 = vunpack.c.l.b16 %v759_v16  ;;  %v1412_v25 = vunpack.c.l.b16 %v1308_v22  ;;  %v492_v27 = vshll.u32 %v430_v56, 16  ;;  %v761_v29 = vshrl.u32 %v422_v15, 16 }
  0x39   : > { %v479_v32 = vor.u32 %v478_v23, %v475_v19  ;;  %v764_v35 = vshll.u32 %v422_v15, 16  ;;  %v770_v36 = vshll.u32 %v15295_v20, 16  ;;  %v488_v38 = vrot.slane %v486_v26, 4  ;;  %s384_s16 = sadd.s32 %s14793_s15, %s15231_s19 }
  0x3a   : > { %v878_v31 = vpack.c.b16 %v859_v21, %v858_v17  ;;  %v763_v39 = vrot.slane %v761_v29, 4  ;;  %v774_v45 = vshrl.u32 %v15295_v20, 16  ;;  %v494_v48 = vrot.slane %v492_v27, 5  ;;  %s12780_s9 = sshll.u32 %s384_s16, 2 }
  0x3b   : > { %v480_v41 = vrot.slane %v479_v32, 4  ;;  %v766_v42 = vrot.slane %v764_v35, 5  ;;  %v772_v44 = vrot.slane %v770_v36, 5  ;;  %v489_v47 = vor.u32 %v488_v38, %v484_v24  ;;  %s17828_s8 = scalar_lea.vmem %s20060_s2, %s12780_s9 }
  0x3c   : > { %12794 = vmatmul.msk.bf16.vlgmr.msra.gmra.mxu3 %vm882_vm5, %v878_v31  ;;  %v780_v49 = vshll.u32 %v15302_v34, 16  ;;  %v1311_v50 = vrot.slane %v401_v37, 5  ;;  %v1442_v51 = vpack.c.b16 %v1412_v25, %v1411_v18  ;;  %v776_v54 = vrot.slane %v774_v45, 4 }
  0x3d   : > { %14789 = vmatpush.bf16.msra.mxu3 %v15215_v1  ;;  %v485_v52 = vsel %vm15272_vm7, %v480_v41, %v484_v24  ;;  %v767_v53 = vor.u32 %v766_v42, %v763_v39  ;;  %12863 = vmatmul.msk.bf16.gmra.mxu1 %vm882_vm5, %v14548_v30  ;;  %v490_v56 = vrot.slane %v489_v47, 4  ;;  %v12880_v58 = vrot.slane %v1246_v46, 9  ;;  %v15332_v24 = vld [vmem:[%s15246_s20 + $0xb0] sm:$0x1]  ;;  %v402_v39 = vld [vmem:[%s15246_s20 + $0x24] sm:$0xf] }
  0x3e   : > { %v836_v57 = vunpack.c.l.b16 %v485_v52  ;;  %v1314_v59 = vrot.slane %v431_v40, 5  ;;  %v777_v61 = vor.u32 %v776_v54, %v772_v44  ;;  %v782_v62 = vrot.slane %v780_v49, 5 }
  0x3f   : > { %v768_v60 = vrot.slane %v767_v53, 4  ;;  %v1313_v63 = vrot.slane %v1311_v50, 4  ;;  %v495_v1 = vsel %vm15272_vm7, %v490_v56, %v494_v48  ;;  %v497_v0 = vshrl.u32 %v400_v55, 16  ;;  %v14549_v48 = vld [vmem:[%s15246_s20 + $0x18] sm:$0xff] }
  0x40   : > { %v500_v2 = vshll.u32 %v400_v55, 16  ;;  %v506_v3 = vshll.u32 %v401_v37, 16  ;;  %v837_v4 = vunpack.c.l.b16 %v495_v1  ;;  %v778_v6 = vrot.slane %v777_v61, 4  ;;  %v426_v1 = vld [vmem:[%s15246_s20 + $0xb4] sm:$0xf] }
  0x41   : > { %v773_v5 = vsel %vm15272_vm7, %v768_v60, %v772_v44  ;;  %v1312_v8 = vsel %vm15248_vm3, %v12880_v58, %v1311_v50  ;;  %v499_v9 = vrot.slane %v497_v0, 4  ;;  %v510_v17 = vshrl.u32 %v401_v37, 16  ;;  %v403_v50 = vld [vmem:[%s15246_s20 + $0x28] sm:$0xf]  ;;  %v432_v58 = vld [vmem:[%s15246_s20 + $0x2c] sm:$0x1] }
  0x42   : > { %12896 = vmatmul.msk.bf16.gmra.mxu2 %vm882_vm5, %v1442_v51  ;;  %v860_v7 = vunpack.c.l.b16 %v773_v5  ;;  %v502_v10 = vrot.slane %v500_v2, 5  ;;  %v867_v14 = vpack.c.b16 %v837_v4, %v836_v57  ;;  %v783_v15 = vsel %vm15272_vm7, %v778_v6, %v782_v62 }
  0x43   : > { %v508_v16 = vrot.slane %v506_v3, 5  ;;  %v861_v18 = vunpack.c.l.b16 %v783_v15  ;;  %v1315_v19 = vsel %vm15248_vm3, %v1313_v63, %v1314_v59  ;;  %v516_v22 = vshll.u32 %v431_v40, 16  ;;  %v1247_v59 = vld [vmem:[%s15246_s20 + $0x24] sm:$0xe]  ;;  %v15353_v3 = vld [vmem:[%s15246_s20 + $0xb8] sm:$0xf] }
  0x44   : > { %v503_v21 = vor.u32 %v502_v10, %v499_v9  ;;  %v512_v23 = vrot.slane %v510_v17, 4  ;;  %v785_v25 = vshrl.u32 %v424_v11, 16  ;;  %v788_v26 = vshll.u32 %v424_v11, 16 }
  0x45   : > { %v794_v27 = vshll.u32 %v15325_v13, 16  ;;  %v879_v29 = vpack.c.b16 %v861_v18, %v860_v7  ;;  %v518_v31 = vrot.slane %v516_v22, 5  ;;  %v798_v32 = vshrl.u32 %v15325_v13, 16 }
  0x46   : > { %v504_v30 = vrot.slane %v503_v21, 4  ;;  %v513_v35 = vor.u32 %v512_v23, %v508_v16  ;;  %v787_v36 = vrot.slane %v785_v25, 4  ;;  %v790_v37 = vrot.slane %v788_v26, 5 }
  0x47   : > { %12783 = vmatmul.msk.bf16.gmra.mxu0 %vm882_vm5, %v867_v14  ;;  %v796_v38 = vrot.slane %v794_v27, 5  ;;  %v1413_v40 = vunpack.c.l.b16 %v1312_v8  ;;  %v1414_v41 = vunpack.c.l.b16 %v1315_v19  ;;  %v800_v42 = vrot.slane %v798_v32, 4 }
  0x48   : > { %v804_v44 = vshll.u32 %v15332_v24, 16  ;;  %v509_v45 = vsel %vm15272_vm7, %v504_v30, %v508_v16  ;;  %v514_v46 = vrot.slane %v513_v35, 4  ;;  %v791_v47 = vor.u32 %v790_v37, %v787_v36 }
  0x49   : > { %v801_v49 = vor.u32 %v800_v42, %v796_v38  ;;  %v521_v51 = vshrl.u32 %v402_v39, 16  ;;  %v1443_v55 = vpack.c.b16 %v1414_v41, %v1413_v40  ;;  %v838_v56 = vunpack.c.l.b16 %v509_v45 }
  0x4a   : > { %v519_v52 = vsel %vm15272_vm7, %v514_v46, %v518_v31  ;;  %v792_v53 = vrot.slane %v791_v47, 4  ;;  %v806_v54 = vrot.slane %v804_v44, 5  ;;  %v1318_v61 = vrot.slane %v403_v50, 5  ;;  %v404_v44 = vld [vmem:[%s15246_s20 + $0x30] sm:$0xf]  ;;  %v14550_v47 = vld [vmem:[%s15246_s20 + $0x24] sm:$0xff] }
  0x4b   : > { %v802_v57 = vrot.slane %v801_v49, 4  ;;  %v839_v60 = vunpack.c.l.b16 %v519_v52  ;;  %v524_v62 = vshll.u32 %v402_v39, 16  ;;  %v530_v63 = vshll.u32 %v403_v50, 16 }
  0x4c   : > { %12795 = vmatmul.msk.bf16.gmra.mxu3 %vm882_vm5, %v879_v29  ;;  %v797_v0 = vsel %vm15272_vm7, %v792_v53, %v796_v38  ;;  %v523_v2 = vrot.slane %v521_v51, 4  ;;  %v534_v7 = vshrl.u32 %v403_v50, 16  ;;  %v12881_v8 = vrot.slane %v1247_v59, 9  ;;  %v15361_v29 = vld [vmem:[%s15246_s20 + $0xbc] sm:$0x1] }
  0x4d   : > { %12864 = vmatmul.msk.bf16.gmra.mxu1 %vm882_vm5, %v14549_v48  ;;  %v807_v4 = vsel %vm15272_vm7, %v802_v57, %v806_v54  ;;  %v526_v5 = vrot.slane %v524_v62, 5  ;;  %v532_v6 = vrot.slane %v530_v63, 5  ;;  %v1321_v9 = vrot.slane %v432_v58, 5  ;;  %v405_v48 = vld [vmem:[%s15246_s20 + $0x34] sm:$0xf] }
  0x4e   : > { %v809_v10 = vshrl.u32 %v426_v1, 16  ;;  %v812_v11 = vshll.u32 %v426_v1, 16  ;;  %v868_v14 = vpack.c.b16 %v839_v60, %v838_v56  ;;  %v1320_v15 = vrot.slane %v1318_v61, 4  ;;  %v433_v63 = vld [vmem:[%s15246_s20 + $0x38] sm:$0x1] }
  0x4f   : > { %v536_v16 = vrot.slane %v534_v7, 4  ;;  %v818_v17 = vshll.u32 %v15353_v3, 16  ;;  %v862_v18 = vunpack.c.l.b16 %v797_v0  ;;  %v863_v19 = vunpack.c.l.b16 %v807_v4  ;;  %v1248_v1 = vld [vmem:[%s15246_s20 + $0x30] sm:$0xe] }
  0x50   : > { %v527_v21 = vor.u32 %v526_v5, %v523_v2  ;;  %v822_v22 = vshrl.u32 %v15353_v3, 16  ;;  %v540_v25 = vshll.u32 %v432_v58, 16  ;;  %v811_v26 = vrot.slane %v809_v10, 4 }
  0x51   : > { %v537_v23 = vor.u32 %v536_v16, %v532_v6  ;;  %v814_v27 = vrot.slane %v812_v11, 5  ;;  %v820_v30 = vrot.slane %v818_v17, 5  ;;  %v880_v32 = vpack.c.b16 %v863_v19, %v862_v18 }
  0x52   : > { %12897 = vmatmul.msk.bf16.gmra.mxu2 %vm882_vm5, %v1443_v55  ;;  %v824_v31 = vrot.slane %v822_v22, 4  ;;  %v1319_v35 = vsel %vm15248_vm3, %v12881_v8, %v1318_v61  ;;  %v1322_v36 = vsel %vm15248_vm3, %v1320_v15, %v1321_v9  ;;  %v528_v37 = vrot.slane %v527_v21, 4 }
  0x53   : > { %v538_v38 = vrot.slane %v537_v23, 4  ;;  %v542_v39 = vrot.slane %v540_v25, 5  ;;  %v815_v40 = vor.u32 %v814_v27, %v811_v26  ;;  %v828_v41 = vshll.u32 %v15361_v29, 16  ;;  %v406_v26 = vld [vmem:[%s15246_s20 + $0x3c] sm:$0xf] }
  0x54   : > { %v825_v42 = vor.u32 %v824_v31, %v820_v30  ;;  %v1415_v45 = vunpack.c.l.b16 %v1319_v35  ;;  %v1416_v46 = vunpack.c.l.b16 %v1322_v36  ;;  %v533_v49 = vsel %vm15272_vm7, %v528_v37, %v532_v6  ;;  %v14551_v31 = vld [vmem:[%s15246_s20 + $0x30] sm:$0xff] }
  0x55   : > { %v543_v50 = vsel %vm15272_vm7, %v538_v38, %v542_v39  ;;  %v816_v51 = vrot.slane %v815_v40, 4  ;;  %v830_v52 = vrot.slane %v828_v41, 5  ;;  %v545_v53 = vshrl.u32 %v404_v44, 16 }
  0x56   : > { %v826_v54 = vrot.slane %v825_v42, 4  ;;  %v548_v55 = vshll.u32 %v404_v44, 16  ;;  %v554_v56 = vshll.u32 %v405_v48, 16  ;;  %v558_v57 = vshrl.u32 %v405_v48, 16 }
  0x57   : > { %12784 = vmatmul.msk.bf16.gmra.mxu0 %vm882_vm5, %v868_v14  ;;  %v1444_v58 = vpack.c.b16 %v1416_v46, %v1415_v45  ;;  %v1325_v59 = vrot.slane %v405_v48, 5  ;;  %v840_v60 = vunpack.c.l.b16 %v533_v49  ;;  %v841_v61 = vunpack.c.l.b16 %v543_v50  ;;  %v434_v46 = vld [vmem:[%s15246_s20 + $0x44] sm:$0x1] }
  0x58   : > { %v821_v62 = vsel %vm15272_vm7, %v816_v51, %v820_v30  ;;  %v547_v0 = vrot.slane %v545_v53, 4  ;;  %v831_v2 = vsel %vm15272_vm7, %v826_v54, %v830_v52  ;;  %v550_v4 = vrot.slane %v548_v55, 5 }
  0x59   : > { %v556_v5 = vrot.slane %v554_v56, 5  ;;  %v560_v6 = vrot.slane %v558_v57, 4  ;;  %v12882_v7 = vrot.slane %v1248_v1, 9  ;;  %v1327_v8 = vrot.slane %v1325_v59, 4 }
  0x5a   : > { %v1328_v9 = vrot.slane %v433_v63, 5  ;;  %v869_v10 = vpack.c.b16 %v841_v61, %v840_v60  ;;  %v864_v11 = vunpack.c.l.b16 %v821_v62  ;;  %v865_v14 = vunpack.c.l.b16 %v831_v2  ;;  %v14559_v61 = vld [vmem:[%s15246_s20 + $0x90] sm:$0xff]  ;;  %v409_v62 = vld [vmem:[%s15246_s20 + $0x4c] sm:$0xf] }
  0x5b   : > { %v551_v15 = vor.u32 %v550_v4, %v547_v0  ;;  %v561_v16 = vor.u32 %v560_v6, %v556_v5  ;;  %v564_v17 = vshll.u32 %v433_v63, 16  ;;  %v1326_v18 = vsel %vm15248_vm3, %v12882_v7, %v1325_v59  ;;  %v408_v63 = vld [vmem:[%s15246_s20 + $0x48] sm:$0xf]  ;;  %v14552_v6 = vld [vmem:[%s15246_s20 + $0x3c] sm:$0xff] }
  0x5c   : > { %12796 = vmatmul.msk.bf16.gmra.mxu3 %vm882_vm5, %v880_v32  ;;  %v1329_v19 = vsel %vm15248_vm3, %v1327_v8, %v1328_v9  ;;  %v881_v21 = vpack.c.b16 %v865_v14, %v864_v11  ;;  %v1417_v27 = vunpack.c.l.b16 %v1326_v18  ;;  %v407_v32 = vld [vmem:[%s15246_s20 + $0x40] sm:$0xf]  ;;  %v569_v35 = vshrl.u32 %v406_v26, 16  ;;  %v1250_v18 = vld [vmem:[%s15246_s20 + $0x48] sm:$0xe] }
  0x5d   : > { %12865 = vmatmul.msk.bf16.gmra.mxu1 %vm882_vm5, %v14550_v47  ;;  %v552_v22 = vrot.slane %v551_v15, 4  ;;  %v562_v23 = vrot.slane %v561_v16, 4  ;;  %v566_v25 = vrot.slane %v564_v17, 5  ;;  %v1418_v30 = vunpack.c.l.b16 %v1329_v19  ;;  %v1249_v47 = vld [vmem:[%s15246_s20 + $0x3c] sm:$0xe] }
  0x5e   : > { %v572_v36 = vshll.u32 %v406_v26, 16  ;;  %v578_v39 = vshll.u32 %v407_v32, 16  ;;  %v582_v40 = vshrl.u32 %v407_v32, 16  ;;  %v1332_v42 = vrot.slane %v407_v32, 5  ;;  %v435_v16 = vld [vmem:[%s15246_s20 + $0x50] sm:$0x1] }
  0x5f   : > { %v557_v37 = vsel %vm15272_vm7, %v552_v22, %v556_v5  ;;  %v567_v38 = vsel %vm15272_vm7, %v562_v23, %v566_v25  ;;  %v1445_v41 = vpack.c.b16 %v1418_v30, %v1417_v27  ;;  %v571_v48 = vrot.slane %v569_v35, 4 }
  0x60   : > { %v842_v44 = vunpack.c.l.b16 %v557_v37  ;;  %v843_v45 = vunpack.c.l.b16 %v567_v38  ;;  %v574_v49 = vrot.slane %v572_v36, 5  ;;  %v580_v50 = vrot.slane %v578_v39, 5 }
  0x61   : > { %v584_v51 = vrot.slane %v582_v40, 4  ;;  %v12883_v52 = vrot.slane %v1249_v47, 9  ;;  %v1334_v53 = vrot.slane %v1332_v42, 4  ;;  %v1335_v54 = vrot.slane %v434_v46, 5 }
  0x62   : > { %12898 = vmatmul.msk.bf16.gmra.mxu2 %vm882_vm5, %v1444_v58  ;;  %v870_v55 = vpack.c.b16 %v843_v45, %v842_v44  ;;  %v575_v56 = vor.u32 %v574_v49, %v571_v48  ;;  %v588_v58 = vshll.u32 %v434_v46, 16  ;;  %v593_v7 = vshrl.u32 %v408_v63, 16  ;;  %v14560_v44 = vld [vmem:[%s15246_s20 + $0x9c] sm:$0xff]  ;;  %v411_v45 = vld [vmem:[%s15246_s20 + $0x58] sm:$0xf]  ;;  %v14553_v49 = vld [vmem:[%s15246_s20 + $0x48] sm:$0xff] }
  0x63   : > { %v585_v57 = vor.u32 %v584_v51, %v580_v50  ;;  %v1333_v59 = vsel %vm15248_vm3, %v12883_v52, %v1332_v42  ;;  %v1336_v60 = vsel %vm15248_vm3, %v1334_v53, %v1335_v54  ;;  %v596_v8 = vshll.u32 %v408_v63, 16  ;;  %v410_v46 = vld [vmem:[%s15246_s20 + $0x54] sm:$0xf] }
  0x64   : > { %v576_v1 = vrot.slane %v575_v56, 4  ;;  %v590_v2 = vrot.slane %v588_v58, 5  ;;  %v1419_v4 = vunpack.c.l.b16 %v1333_v59  ;;  %v1420_v5 = vunpack.c.l.b16 %v1336_v60  ;;  %v1251_v60 = vld [vmem:[%s15246_s20 + $0x54] sm:$0xe] }
  0x65   : > { %v586_v0 = vrot.slane %v585_v57, 4  ;;  %v602_v9 = vshll.u32 %v409_v62, 16  ;;  %v1339_v17 = vrot.slane %v409_v62, 5  ;;  %v595_v19 = vrot.slane %v593_v7, 4 }
  0x66   : > { %v581_v11 = vsel %vm15272_vm7, %v576_v1, %v580_v50  ;;  %v1446_v15 = vpack.c.b16 %v1420_v5, %v1419_v4  ;;  %v12884_v27 = vrot.slane %v1250_v18, 9  ;;  %v1342_v30 = vrot.slane %v435_v16, 5 }
  0x67   : > { %12785 = vmatmul.msk.bf16.gmra.mxu0 %vm882_vm5, %v869_v10  ;;  %v606_v10 = vshrl.u32 %v409_v62, 16  ;;  %v591_v14 = vsel %vm15272_vm7, %v586_v0, %v590_v2  ;;  %v604_v22 = vrot.slane %v602_v9, 5  ;;  %v844_v25 = vunpack.c.l.b16 %v581_v11  ;;  %v436_v62 = vld [vmem:[%s15246_s20 + $0x5c] sm:$0x1] }
  0x68   : > { %v845_v26 = vunpack.c.l.b16 %v591_v14  ;;  %v612_v36 = vshll.u32 %v435_v16, 16  ;;  %v1340_v38 = vsel %vm15248_vm3, %v12884_v27, %v1339_v17  ;;  %v617_v52 = vshrl.u32 %v410_v46, 16  ;;  %v1256_v14 = vld [vmem:[%s15246_s20 + $0x90] sm:$0xe]  ;;  %v412_v27 = vld [vmem:[%s15246_s20 + $0x60] sm:$0xf] }
  0x69   : > { %v608_v23 = vrot.slane %v606_v10, 4  ;;  %v1421_v47 = vunpack.c.l.b16 %v1340_v38  ;;  %v620_v53 = vshll.u32 %v410_v46, 16  ;;  %v626_v54 = vshll.u32 %v411_v45, 16 }
  0x6a   : > { %v871_v37 = vpack.c.b16 %v845_v26, %v844_v25  ;;  %v614_v42 = vrot.slane %v612_v36, 5  ;;  %v1381_v57 = vrot.slane %v15260_v28, 5  ;;  %v619_v63 = vrot.slane %v617_v52, 4 }
  0x6b   : > { %v609_v35 = vor.u32 %v608_v23, %v604_v22  ;;  %v622_v1 = vrot.slane %v620_v53, 5  ;;  %v628_v0 = vrot.slane %v626_v54, 5  ;;  %v1384_v4 = vrot.slane %v15263_v33, 5 }
  0x6c   : > { %12797 = vmatmul.msk.bf16.gmra.mxu3 %vm882_vm5, %v881_v21  ;;  %v598_v21 = vrot.slane %v596_v8, 5  ;;  %v12885_v5 = vrot.slane %v1251_v60, 9  ;;  %v1349_v8 = vrot.slane %v436_v62, 5  ;;  %v636_v28 = vshll.u32 %v436_v62, 16 }
  0x6d   : > { %12866 = vmatmul.msk.bf16.gmra.mxu1 %vm882_vm5, %v14551_v31  ;;  %v1341_v31 = vrot.slane %v1339_v17, 4  ;;  %v623_v10 = vor.u32 %v622_v1, %v619_v63 }
  0x6e   : > { %v599_v32 = vor.u32 %v598_v21, %v595_v19  ;;  %v638_v17 = vrot.slane %v636_v28, 5  ;;  %v14561_v21 = vld [vmem:[%s15246_s20 + $0xa8] sm:$0xff]  ;;  %v14555_v28 = vld [vmem:[%s15246_s20 + $0x60] sm:$0xff] }
  0x6f   : > { %v1343_v39 = vsel %vm15248_vm3, %v1341_v31, %v1342_v30 }
  0x70   : > { %v600_v40 = vrot.slane %v599_v32, 4  ;;  %v1422_v48 = vunpack.c.l.b16 %v1343_v39  ;;  %v14554_v32 = vld [vmem:[%s15246_s20 + $0x54] sm:$0xff]  ;;  %v641_v39 = vshrl.u32 %v412_v27, 16 }
  0x72   : > { %12899 = vmatmul.msk.bf16.gmra.mxu2 %vm882_vm5, %v1445_v41  ;;  %v610_v41 = vrot.slane %v609_v35, 4  ;;  %v605_v50 = vsel %vm15272_vm7, %v600_v40, %v604_v22  ;;  %v1447_v56 = vpack.c.b16 %v1422_v48, %v1421_v47  ;;  %v624_v22 = vrot.slane %v623_v10, 4  ;;  %v413_v35 = vld [vmem:[%s15246_s20 + $0x64] sm:$0xf]  ;;  %v12943_v40 = vld [vmem:[%s20013_s3 + $0xc] sm:$0xf] }
  0x73   : > { %v846_v58 = vunpack.c.l.b16 %v605_v50  ;;  %v1353_v47 = vrot.slane %v413_v35, 5  ;;  %v437_v50 = vld [vmem:[%s15246_s20 + $0x68] sm:$0x1]  ;;  %v643_v52 = vrot.slane %v641_v39, 4 }
  0x74   : > { %v615_v51 = vsel %vm15272_vm7, %v610_v41, %v614_v42  ;;  %v644_v41 = vshll.u32 %v412_v27, 16  ;;  %v650_v42 = vshll.u32 %v413_v35, 16  ;;  %v660_v62 = vshll.u32 %v437_v50, 16 }
  0x75   : > { %v847_v59 = vunpack.c.l.b16 %v615_v51  ;;  %v1252_v51 = vld [vmem:[%s15246_s20 + $0x60] sm:$0xe] }
  0x76   : > { %v646_v53 = vrot.slane %v644_v41, 5  ;;  %v652_v54 = vrot.slane %v650_v42, 5 }
  0x77   : > { %12786 = vmatmul.msk.bf16.gmra.mxu0 %vm882_vm5, %v870_v55  ;;  %v630_v55 = vshrl.u32 %v411_v45, 16  ;;  %v872_v9 = vpack.c.b16 %v847_v59, %v846_v58  ;;  %v1356_v58 = vrot.slane %v437_v50, 5 }
  0x78   : > { %v647_v60 = vor.u32 %v646_v53, %v643_v52  ;;  %v416_v52 = vld [vmem:[%s15246_s20 + $0x78] sm:$0xf] }
  0x79   : > { %v632_v2 = vrot.slane %v630_v55, 4 }
  0x7b   : > { %v633_v11 = vor.u32 %v632_v2, %v628_v0  ;;  %v648_v2 = vrot.slane %v647_v60, 4 }
  0x7c   : > { %12874 = vmatmul.msk.bf16.vlgmr.msrb.gmra.mxu3 %vm882_vm5, %v14559_v61  ;;  %v1346_v61 = vrot.slane %v411_v45, 5  ;;  %v1793_v45 = vsel %vm931_vm0, %v12943_v40, 0 }
  0x7d   : > { %12867 = vmatmul.msk.bf16.gmra.mxu1 %vm882_vm5, %v14552_v6  ;;  %v1383_v6 = vrot.slane %v1381_v57, 4  ;;  %v634_v23 = vrot.slane %v633_v11, 4  ;;  %1802 = vmatpush.bf16.msrb.mxu3 %v1793_v45 }
  0x7e   : > { %v1348_v7 = vrot.slane %v1346_v61, 4  ;;  %v1347_v16 = vsel %vm15248_vm3, %v12885_v5, %v1346_v61  ;;  %v662_v5 = vrot.slane %v660_v62, 5  ;;  %v689_v62 = vshrl.u32 %v416_v52, 16 }
  0x7f   : > { %v1385_v19 = vsel %vm15248_vm3, %v1383_v6, %v1384_v4  ;;  %v1423_v30 = vunpack.c.l.b16 %v1347_v16  ;;  %v639_v38 = vsel %vm15272_vm7, %v634_v23, %v638_v17  ;;  %v414_v6 = vld [vmem:[%s15246_s20 + $0x6c] sm:$0xf]  ;;  %v438_v23 = vld [vmem:[%s15246_s20 + $0x74] sm:$0x1] }
  0x80   : > { %v1350_v33 = vsel %vm15248_vm3, %v1348_v7, %v1349_v8  ;;  %v1434_v26 = vunpack.c.l.b16 %v1385_v19  ;;  %v665_v11 = vshrl.u32 %v414_v6, 16  ;;  %v684_v45 = vshll.u32 %v438_v23, 16 }
  0x81   : > { %v1424_v31 = vunpack.c.l.b16 %v1350_v33 }
  0x82   : > { %12900 = vmatmul.msk.bf16.gmra.mxu2 %vm882_vm5, %v1446_v15  ;;  %v12890_v15 = vrot.slane %v1256_v14, 9  ;;  %v668_v14 = vshll.u32 %v414_v6, 16 }
  0x83   : > { %v1448_v46 = vpack.c.b16 %v1424_v31, %v1423_v30 }
  0x84   : > { %v1382_v18 = vsel %vm15248_vm3, %v12890_v15, %v1381_v57  ;;  %v1355_v57 = vrot.slane %v1353_v47, 4  ;;  %v653_v15 = vsel %vm15272_vm7, %v648_v2, %v652_v54  ;;  %v670_v27 = vrot.slane %v668_v14, 5 }
  0x85   : > { %v1433_v25 = vunpack.c.l.b16 %v1382_v18  ;;  %v691_v14 = vrot.slane %v689_v62, 4 }
  0x86   : > { %v1357_v1 = vsel %vm15248_vm3, %v1355_v57, %v1356_v58 }
  0x87   : > { %12787 = vmatmul.msk.bf16.gmra.mxu0 %vm882_vm5, %v871_v37  ;;  %v15454_v36 = vpack.c.b16 %v1434_v26, %v1433_v25  ;;  %v629_v37 = vsel %vm15272_vm7, %v624_v22, %v628_v0  ;;  %v14562_v0 = vld [vmem:[%s15246_s20 + $0xb4] sm:$0xff]  ;;  %v1426_v8 = vunpack.c.l.b16 %v1357_v1  ;;  %v1253_v25 = vld [vmem:[%s15246_s20 + $0x6c] sm:$0xe]  ;;  %v667_v26 = vrot.slane %v665_v11, 4 }
  0x88   : > { %v848_v48 = vunpack.c.l.b16 %v629_v37 }
  0x89   : > { %v671_v40 = vor.u32 %v670_v27, %v667_v26 }
  0x8c   : > { %12875 = vmatmul.msk.bf16.gmra.mxu3 %vm882_vm5, %v14560_v44  ;;  %v654_v44 = vshrl.u32 %v413_v35, 16  ;;  %v12887_v35 = vrot.slane %v1253_v25, 9 }
  0x8d   : > { %12868 = vmatmul.msk.bf16.gmra.mxu1 %vm882_vm5, %v14553_v49  ;;  %v849_v49 = vunpack.c.l.b16 %v639_v38  ;;  %v1363_v38 = vrot.slane %v438_v23, 5 }
  0x8e   : > { %v656_v55 = vrot.slane %v654_v44, 4 }
  0x8f   : > { %v873_v59 = vpack.c.b16 %v849_v49, %v848_v48  ;;  %v1257_v49 = vld [vmem:[%s15246_s20 + $0x9c] sm:$0xe] }
  0x90   : > { %v657_v61 = vor.u32 %v656_v55, %v652_v54  ;;  %v686_v54 = vrot.slane %v684_v45, 5  ;;  %v1388_v55 = vrot.slane %v15295_v20, 5  ;;  %v12891_v60 = vrot.slane %v1257_v49, 9 }
  0x92   : > { %12901 = vmatmul.msk.bf16.gmra.mxu2 %vm882_vm5, %v1447_v56  ;;  %v12886_v56 = vrot.slane %v1252_v51, 9  ;;  %v658_v4 = vrot.slane %v657_v61, 4  ;;  %v672_v51 = vrot.slane %v671_v40, 4  ;;  %v1390_v6 = vrot.slane %v1388_v55, 4 }
  0x94   : > { %v1354_v63 = vsel %vm15248_vm3, %v12886_v56, %v1353_v47  ;;  %v663_v16 = vsel %vm15272_vm7, %v658_v4, %v662_v5  ;;  %v417_v56 = vld [vmem:[%s15246_s20 + $0x7c] sm:$0xf] }
  0x95   : > { %v1425_v7 = vunpack.c.l.b16 %v1354_v63  ;;  %v851_v22 = vunpack.c.l.b16 %v663_v16  ;;  %v692_v63 = vshll.u32 %v416_v52, 16  ;;  %v702_v2 = vshrl.u32 %v417_v56, 16  ;;  %v1258_v52 = vld [vmem:[%s15246_s20 + $0xa8] sm:$0xe] }
  0x96   : > { %v1367_v11 = vrot.slane %v417_v56, 5 }
  0x97   : > { %12788 = vmatmul.msk.bf16.gmra.mxu0 %vm882_vm5, %v872_v9  ;;  %v415_v9 = vld [vmem:[%s15246_s20 + $0x70] sm:$0xf]  ;;  %v1449_v18 = vpack.c.b16 %v1426_v8, %v1425_v7  ;;  %v1391_v7 = vrot.slane %v15302_v34, 5  ;;  %v704_v34 = vrot.slane %v702_v2, 4 }
  0x98   : > { %v674_v33 = vshll.u32 %v415_v9, 16  ;;  %v678_v17 = vshrl.u32 %v415_v9, 16  ;;  %v1360_v19 = vrot.slane %v415_v9, 5  ;;  %v1369_v26 = vrot.slane %v1367_v11, 4 }
  0x9a   : > { %v676_v30 = vrot.slane %v674_v33, 5  ;;  %v680_v31 = vrot.slane %v678_v17, 4  ;;  %v1362_v37 = vrot.slane %v1360_v19, 4  ;;  %v1361_v47 = vsel %vm15248_vm3, %v12887_v35, %v1360_v19  ;;  %v439_v17 = vld [vmem:[%s15246_s20 + $0x80] sm:$0x1] }
  0x9b   : > { %v1427_v57 = vunpack.c.l.b16 %v1361_v47  ;;  %v1370_v27 = vrot.slane %v439_v17, 5 }
  0x9c   : > { %12876 = vmatmul.msk.bf16.gmra.mxu3 %vm882_vm5, %v14561_v21  ;;  %v850_v21 = vunpack.c.l.b16 %v653_v15  ;;  %v681_v44 = vor.u32 %v680_v31, %v676_v30  ;;  %v1364_v48 = vsel %vm15248_vm3, %v1362_v37, %v1363_v38  ;;  %v677_v1 = vsel %vm15272_vm7, %v672_v51, %v676_v30 }
  0x9d   : > { %12869 = vmatmul.msk.bf16.gmra.mxu1 %vm882_vm5, %v14554_v32  ;;  %v1428_v58 = vunpack.c.l.b16 %v1364_v48  ;;  %v694_v15 = vrot.slane %v692_v63, 5  ;;  %v708_v37 = vshll.u32 %v439_v17, 16 }
  0x9e   : > { %v874_v39 = vpack.c.b16 %v851_v22, %v850_v21  ;;  %v682_v53 = vrot.slane %v681_v44, 4  ;;  %v1392_v21 = vsel %vm15248_vm3, %v1390_v6, %v1391_v7  ;;  %v1371_v44 = vsel %vm15248_vm3, %v1369_v26, %v1370_v27 }
  0x9f   : > { %v695_v30 = vor.u32 %v694_v15, %v691_v14  ;;  %v710_v51 = vrot.slane %v708_v37, 5 }
  0xa0   : > { %v687_v20 = vsel %vm15272_vm7, %v682_v53, %v686_v54  ;;  %v419_v53 = vld [vmem:[%s15246_s20 + $0x88] sm:$0xf]  ;;  %v418_v54 = vld [vmem:[%s15246_s20 + $0x84] sm:$0xf] }
  0xa1   : > { %v853_v33 = vunpack.c.l.b16 %v687_v20  ;;  %v696_v45 = vrot.slane %v695_v30, 4  ;;  %v1374_v63 = vrot.slane %v419_v53, 5  ;;  %v1255_v20 = vld [vmem:[%s15246_s20 + $0x84] sm:$0xe]  ;;  %v722_v6 = vshll.u32 %v419_v53, 16 }
  0xa2   : > { %12902 = vmatmul.msk.bf16.gmra.mxu2 %vm882_vm5, %v1448_v46  ;;  %v726_v7 = vshrl.u32 %v419_v53, 16  ;;  %v13025_v53 = vld [vmem:[%s15246_s20 + $0x10] sm:$0xf] }
  0xa3   : > { %v1376_v17 = vrot.slane %v1374_v63, 4 }
  0xa7   : > { %12789 = vmatmul.msk.bf16.gmra.mxu0 %vm882_vm5, %v873_v59  ;;  %v14556_v59 = vld [vmem:[%s15246_s20 + $0x6c] sm:$0xff] }
  0xaa   : > { %v1164_v10 = vpop.f32.mrf.mxu1 }
  0xac   : > { %12877 = vmatmul.msk.bf16.gmra.mxu3 %vm882_vm5, %v14562_v0  ;;  %v698_v0 = vshll.u32 %v417_v56, 16  ;;  %v1430_v56 = vunpack.c.l.b16 %v1371_v44 }
  0xad   : > { %12870 = vmatmul.msk.bf16.gmra.mxu1 %vm882_vm5, %v14555_v28  ;;  %v1450_v28 = vpack.c.b16 %v1428_v58, %v1427_v57  ;;  %v14557_v57 = vld [vmem:[%s15246_s20 + $0x78] sm:$0xff] }
  0xae   : > { %v700_v19 = vrot.slane %v698_v0, 5  ;;  %v716_v0 = vshll.u32 %v418_v54, 16 }
  0xb0   : > { %v705_v35 = vor.u32 %v704_v34, %v700_v19  ;;  %v718_v34 = vrot.slane %v716_v0, 5  ;;  %v1405_v0 = vrot.slane %v15361_v29, 5 }
  0xb2   : > { %12903 = vmatmul.msk.bf16.gmra.mxu2 %vm882_vm5, %v1449_v18  ;;  %v1166_v32 = vpop.f32.mrf.mxu1  ;;  %v1254_v18 = vld [vmem:[%s15246_s20 + $0x78] sm:$0xe]  ;;  %v706_v49 = vrot.slane %v705_v35, 4 }
  0xb3   : > { %v12888_v25 = vrot.slane %v1254_v18, 9 }
  0xb4   : > { %v944_v41 = vpop.f32.mrf.mxu0  ;;  %v711_v62 = vsel %vm15272_vm7, %v706_v49, %v710_v51 }
  0xb5   : > { %v1517_v42 = vpop.f32.mrf.mxu2  ;;  %v1165_v46 = vadd.f32 %v1164_v10, %v944_v41  ;;  %v852_v10 = vunpack.c.l.b16 %v677_v1  ;;  %v713_v1 = vshrl.u32 %v418_v54, 16 }
  0xb7   : > { %v15492_v50 = vadd.f32 %v1517_v42, %v1165_v46  ;;  %12790 = vmatmul.msk.bf16.gmra.mxu0 %vm882_vm5, %v874_v39  ;;  %v875_v31 = vpack.c.b16 %v853_v33, %v852_v10  ;;  %v1368_v42 = vsel %vm15248_vm3, %v12888_v25, %v1367_v11  ;;  %v1395_v46 = vrot.slane %v15325_v13, 5 }
  0xb8   : > { %v12892_v13 = vrot.slane %v1258_v52, 9  ;;  %v855_v10 = vunpack.c.l.b16 %v711_v62  ;;  %v12889_v33 = vrot.slane %v1255_v20, 9  ;;  %v1402_v52 = vrot.slane %v15353_v3, 5  ;;  %v13299_v3 = vld [vmem:[%s20013_s3 + $0x1c] sm:$0xf] }
  0xb9   : > { %v2636_v62 = vrot.slane %v13025_v53, 5 }
  0xba   : > { %v1169_v61 = vpop.f32.mrf.mxu1  ;;  %v1396_v11 = vsel %vm15248_vm3, %v12892_v13, %v1395_v46  ;;  %v1375_v30 = vsel %vm15248_vm3, %v12889_v33, %v1374_v63 }
  0xbb   : > { %v1431_v49 = vunpack.c.l.b16 %v1375_v30 }
  0xbc   : > { %12907 = vmatmul.msk.bf16.vlgmr.msra.gmra.mxu3 %vm882_vm5, %v15454_v36  ;;  %v946_v4 = vpop.f32.mrf.mxu0  ;;  %v1389_v36 = vsel %vm15248_vm3, %v12891_v60, %v1388_v55  ;;  %v1429_v55 = vunpack.c.l.b16 %v1368_v42  ;;  %v1397_v60 = vrot.slane %v1395_v46, 4  ;;  %v13024_v46 = vld [vmem:[%s15246_s20 + $0xc] sm:$0xf] }
  0xbd   : > { %v1519_v5 = vpop.f32.mrf.mxu2  ;;  %v1167_v8 = vadd.f32 %v1166_v32, %v946_v4  ;;  %12871 = vmatmul.msk.bf16.gmra.mxu1 %vm882_vm5, %v14556_v59  ;;  %v1435_v22 = vunpack.c.l.b16 %v1389_v36  ;;  %v1436_v32 = vunpack.c.l.b16 %v1392_v21  ;;  %v701_v59 = vsel %vm15272_vm7, %v696_v45, %v700_v19  ;;  %v1259_v45 = vld [vmem:[%s15246_s20 + $0xb4] sm:$0xe] }
  0xbe   : > { %v715_v19 = vrot.slane %v713_v1, 4  ;;  %v724_v21 = vrot.slane %v722_v6, 5  ;;  %v1968_v13 = vshll.u32 %v13024_v46, 16  ;;  %v1404_v1 = vrot.slane %v1402_v52, 4 }
  0xbf   : > { %v15509_v9 = vpop.f32.mrf.mxu3  ;;  %v15511_v16 = vadd.f32 %v1519_v5, %v1167_v8  ;;  %v1454_v48 = vpack.c.b16 %v1436_v32, %v1435_v22  ;;  %v440_v5 = vld [vmem:[%s15246_s20 + $0x8c] sm:$0x1]  ;;  %v728_v22 = vrot.slane %v726_v7, 4  ;;  %v1978_v7 = vshrl.u32 %v13025_v53, 16 }
  0xc0   : > { %v1377_v18 = vrot.slane %v440_v5, 5  ;;  %v719_v37 = vor.u32 %v718_v34, %v715_v19 }
  0xc1   : > { %v1980_v30 = vrot.slane %v1978_v7, 4 }
  0xc2   : > { %12904 = vmatmul.msk.bf16.gmra.mxu2 %vm882_vm5, %v1450_v28  ;;  %v1171_v23 = vpop.f32.mrf.mxu1  ;;  %v1451_v28 = vpack.c.b16 %v1430_v56, %v1429_v55  ;;  %v1378_v35 = vsel %vm15248_vm3, %v1376_v17, %v1377_v18  ;;  %v720_v54 = vrot.slane %v719_v37, 4  ;;  %v2638_v18 = vrot.slane %v2636_v62, 4 }
  0xc3   : > { %v1432_v51 = vunpack.c.l.b16 %v1378_v35 }
  0xc4   : > { %v949_v38 = vpop.f32.mrf.mxu0  ;;  %v725_v20 = vsel %vm15272_vm7, %v720_v54, %v724_v21 }
  0xc5   : > { %v1522_v39 = vpop.f32.mrf.mxu2  ;;  %v1170_v40 = vadd.f32 %v1169_v61, %v949_v38  ;;  %v1398_v61 = vrot.slane %v15332_v24, 5  ;;  %v854_v24 = vunpack.c.l.b16 %v701_v59  ;;  %v729_v38 = vor.u32 %v728_v22, %v724_v21 }
  0xc6   : > { %v1965_v59 = vshrl.u32 %v13024_v46, 16  ;;  %v1452_v63 = vpack.c.b16 %v1432_v51, %v1431_v49  ;;  %v856_v21 = vunpack.c.l.b16 %v725_v20 }
  0xc7   : > { %v15518_v41 = vpop.f32.mrf.mxu3  ;;  %v15525_v47 = vadd.f32 %v1522_v39, %v1170_v40  ;;  %12791 = vmatmul.msk.bf16.gmra.mxu0 %vm882_vm5, %v875_v31  ;;  %v1399_v14 = vsel %vm15248_vm3, %v1397_v60, %v1398_v61  ;;  %v876_v27 = vpack.c.b16 %v855_v10, %v854_v24  ;;  %v732_v39 = vshll.u32 %v440_v5, 16  ;;  %v13026_v24 = vld [vmem:[%s15246_s20 + $0x14] sm:$0x1] }
  0xc8   : > { %v1438_v25 = vunpack.c.l.b16 %v1399_v14  ;;  %v730_v55 = vrot.slane %v729_v38, 4  ;;  %v1974_v61 = vshll.u32 %v13025_v53, 16  ;;  %v1967_v10 = vrot.slane %v1965_v59, 4  ;;  %v13028_v59 = vld [vmem:[%s15246_s20 + $0x1c] sm:$0xf] }
  0xc9   : > { %v734_v56 = vrot.slane %v732_v39, 5  ;;  %v2639_v19 = vrot.slane %v13026_v24, 5  ;;  %v1984_v53 = vshll.u32 %v13026_v24, 16  ;;  %v2643_v20 = vrot.slane %v13028_v59, 5 }
  0xca   : > { %v1174_v58 = vpop.f32.mrf.mxu1  ;;  %v15581_v33 = vrot.slane %v1974_v61, 5 }
  0xcb   : > { %v735_v6 = vsel %vm15272_vm7, %v730_v55, %v734_v56  ;;  %v2640_v39 = vsel %vm15248_vm3, %v2638_v18, %v2639_v19 }
  0xcc   : > { %12908 = vmatmul.msk.bf16.gmra.mxu3 %vm882_vm5, %v1454_v48  ;;  %v951_v2 = vpop.f32.mrf.mxu0  ;;  %v857_v22 = vunpack.c.l.b16 %v735_v6  ;;  %v2749_v56 = vunpack.c.l.b16 %v2640_v39  ;;  %v13090_v6 = vld [vmem:[%s15246_s20 + $0x18] sm:$0xe] }
  0xcd   : > { %v1524_v4 = vpop.f32.mrf.mxu2  ;;  %v1172_v8 = vadd.f32 %v1171_v23, %v951_v2  ;;  %12872 = vmatmul.msk.bf16.gmra.mxu1 %vm882_vm5, %v14557_v57  ;;  %v1437_v23 = vunpack.c.l.b16 %v1396_v11  ;;  %v14558_v57 = vld [vmem:[%s15246_s20 + $0x84] sm:$0xff]  ;;  %v13089_v2 = vld [vmem:[%s15246_s20 + $0xc] sm:$0xe]  ;;  %v1970_v11 = vrot.slane %v1968_v13, 5 }
  0xce   : > { %v13105_v17 = vrot.slane %v13089_v2, 9  ;;  %v1998_v2 = vshll.u32 %v13028_v59, 16 }
  0xcf   : > { %v15541_v36 = vpop.f32.mrf.mxu3  ;;  %v15547_v15 = vadd.f32 %v1524_v4, %v1172_v8  ;;  %v1455_v44 = vpack.c.b16 %v1438_v25, %v1437_v23  ;;  %v3786_v8 = vsel %vm931_vm0, %v13299_v3, 0  ;;  %v1406_v23 = vsel %vm15248_vm3, %v1404_v1, %v1405_v0  ;;  %v13446_v25 = vld [vmem:[%s20013_s3 + $0x28] sm:$0xf] }
  0xd0   : > { %3795 = vmatpush.bf16.msra.mxu3 %v3786_v8  ;;  %v2637_v38 = vsel %vm15248_vm3, %v13105_v17, %v2636_v62  ;;  %v1971_v51 = vor.u32 %v1970_v11, %v1967_v10  ;;  %v1986_v1 = vrot.slane %v1984_v53, 5  ;;  %v14579_v10 = vld [vmem:[%s15246_s20 + $0x18] sm:$0xff]  ;;  %v13029_v11 = vld [vmem:[%s15246_s20 + $0x20] sm:$0x1]  ;;  %v2000_v19 = vrot.slane %v1998_v2, 5 }
  0xd1   : > { %v2748_v55 = vunpack.c.l.b16 %v2637_v38 }
  0xd2   : > { %12905 = vmatmul.msk.bf16.gmra.mxu2 %vm882_vm5, %v1451_v28  ;;  %v1176_v26 = vpop.f32.mrf.mxu1  ;;  %v1972_v62 = vrot.slane %v1971_v51, 4 }
  0xd3   : > { %v2780_v0 = vpack.c.b16 %v2749_v56, %v2748_v55  ;;  %v13030_v56 = vld [vmem:[%s15246_s20 + $0x24] sm:$0xf] }
  0xd4   : > { %v954_v31 = vpop.f32.mrf.mxu0 }
  0xd5   : > { %v1527_v32 = vpop.f32.mrf.mxu2  ;;  %v1175_v40 = vadd.f32 %v1174_v58, %v954_v31  ;;  %v12893_v58 = vrot.slane %v1259_v45, 9  ;;  %v5124_v31 = vsel %vm931_vm0, %v13446_v25, 0  ;;  %v1440_v45 = vunpack.c.l.b16 %v1406_v23 }
  0xd6   : > { %5133 = vmatpush.bf16.msra.mxu2 %v5124_v31  ;;  %v13106_v23 = vrot.slane %v13090_v6, 9  ;;  %v2645_v25 = vrot.slane %v2643_v20, 4  ;;  %v2008_v31 = vshll.u32 %v13029_v11, 16 }
  0xd7   : > { %v15554_v42 = vpop.f32.mrf.mxu3  ;;  %v15558_v48 = vadd.f32 %v1527_v32, %v1175_v40  ;;  %12792 = vmatmul.msk.bf16.gmra.mxu0 %vm882_vm5, %v876_v27  ;;  %v1403_v29 = vsel %vm15248_vm3, %v12893_v58, %v1402_v52  ;;  %v13365_v27 = vld [vmem:[%s20013_s3 + $0x24] sm:$0xf]  ;;  %v877_v40 = vpack.c.b16 %v857_v22, %v856_v21  ;;  %v1981_v52 = vor.u32 %v1980_v30, %v15581_v33  ;;  %v13027_v58 = vld [vmem:[%s15246_s20 + $0x18] sm:$0xf] }
  0xd8   : > { %v4470_v35 = vsel %vm931_vm0, %v13365_v27, 0  ;;  %v1989_v3 = vshrl.u32 %v13027_v58, 16  ;;  %v2644_v38 = vsel %vm15248_vm3, %v13106_v23, %v2643_v20  ;;  %v2010_v55 = vrot.slane %v2008_v31, 5  ;;  %v13091_v20 = vld [vmem:[%s15246_s20 + $0x24] sm:$0xe] }
  0xd9   : > { %4479 = vmatpush.bf16.msra.mxu1 %v4470_v35 }
  0xda   : > { %v1179_v60 = vpop.f32.mrf.mxu1  ;;  %v1991_v17 = vrot.slane %v1989_v3, 4 }
  0xdc   : > { %12909 = vmatmul.msk.bf16.gmra.mxu3 %vm882_vm5, %v1455_v44  ;;  %v956_v4 = vpop.f32.mrf.mxu0  ;;  %v1439_v44 = vunpack.c.l.b16 %v1403_v29 }
  0xdd   : > { %v1529_v5 = vpop.f32.mrf.mxu2  ;;  %v1177_v28 = vadd.f32 %v1176_v26, %v956_v4  ;;  %12873 = vmatmul.msk.bf16.gmra.mxu1 %vm882_vm5, %v14558_v57  ;;  %v13348_v26 = vld [vmem:[%s20013_s3 + $0x20] sm:$0xf] }
  0xde   : > { %v4184_v32 = vsel %vm931_vm0, %v13348_v26, 0  ;;  %v1456_v61 = vpack.c.b16 %v1440_v45, %v1439_v44  ;;  %v2646_v26 = vrot.slane %v13029_v11, 5 }
  0xdf   : > { %v15579_v14 = vpop.f32.mrf.mxu3  ;;  %v15583_v34 = vadd.f32 %v1529_v5, %v1177_v28  ;;  %4193 = vmatpush.bf16.msra.mxu0 %v4184_v32  ;;  %v2002_v5 = vshrl.u32 %v13028_v59, 16  ;;  %v1977_v28 = vsel %vm15272_vm7, %v1972_v62, %v15581_v33  ;;  %v14563_v59 = vld [vmem:[%s15246_s20 + $0xc] sm:$0xff] }
  0xe0   : > { %v2350_v33 = vunpack.c.l.b16 %v1977_v28  ;;  %v2647_v39 = vsel %vm15248_vm3, %v2645_v25, %v2646_v26  ;;  %v14580_v28 = vld [vmem:[%s15246_s20 + $0x24] sm:$0xff] }
  0xe1   : > { %v2004_v22 = vrot.slane %v2002_v5, 4  ;;  %v2751_v51 = vunpack.c.l.b16 %v2647_v39 }
  0xe2   : > { %12906 = vmatmul.msk.bf16.gmra.mxu2 %vm882_vm5, %v1452_v63  ;;  %v1181_v37 = vpop.f32.mrf.mxu1  ;;  %v1982_v63 = vrot.slane %v1981_v52, 4 }
  0xe4   : > { %v959_v46 = vpop.f32.mrf.mxu0  ;;  %v1987_v29 = vsel %vm15272_vm7, %v1982_v63, %v1986_v1  ;;  %v2013_v63 = vshrl.u32 %v13030_v56, 16 }
  0xe5   : > { %v1532_v49 = vpop.f32.mrf.mxu2  ;;  %v1180_v54 = vadd.f32 %v1179_v60, %v959_v46  ;;  %v1992_v60 = vshll.u32 %v13027_v58, 16  ;;  %v2351_v30 = vunpack.c.l.b16 %v1987_v29 }
  0xe6   : > { %v2015_v11 = vrot.slane %v2013_v63, 4  ;;  %v13033_v63 = vld [vmem:[%s15246_s20 + $0x30] sm:$0xf] }
  0xe7   : > { %v15605_v57 = vpop.f32.mrf.mxu3  ;;  %v15609_v13 = vadd.f32 %v1532_v49, %v1180_v54  ;;  %12793 = vmatmul.msk.bf16.gmra.mxu0 %vm882_vm5, %v877_v40  ;;  %v1994_v18 = vrot.slane %v1992_v60, 5  ;;  %v2382_v40 = vpack.c.b16 %v2351_v30, %v2350_v33  ;;  %v2750_v49 = vunpack.c.l.b16 %v2644_v38 }
  0xe8   : > { %v2016_v60 = vshll.u32 %v13030_v56, 16  ;;  %v14564_v56 = vld [vmem:[%s15246_s20 + $0x18] sm:$0xff] }
  0xe9   : > { %v1995_v35 = vor.u32 %v1994_v18, %v1991_v17  ;;  %v2781_v62 = vpack.c.b16 %v2751_v51, %v2750_v49 }
  0xea   : > { %v1184_v4 = vpop.f32.mrf.mxu1  ;;  %v2018_v18 = vrot.slane %v2016_v60, 5 }
  0xeb   : > { %v1996_v53 = vrot.slane %v1995_v35, 4 }
  0xec   : > { %12910 = vmatmul.msk.bf16.gmra.mxu3 %vm882_vm5, %v1456_v61  ;;  %v961_v7 = vpop.f32.mrf.mxu0  ;;  %v13031_v61 = vld [vmem:[%s15246_s20 + $0x28] sm:$0xf] }
  0xed   : > { %v1534_v8 = vpop.f32.mrf.mxu2  ;;  %v1182_v24 = vadd.f32 %v1181_v37, %v961_v7  ;;  %13122 = vmatmul.msk.bf16.vlgmr.msrb.gmra.mxu1 %vm882_vm5, %v2780_v0  ;;  %v2005_v37 = vor.u32 %v2004_v22, %v2000_v19  ;;  %v2001_v0 = vsel %vm15272_vm7, %v1996_v53, %v2000_v19  ;;  %v2650_v2 = vrot.slane %v13031_v61, 5 }
  0xee   : > { %v2026_v5 = vshrl.u32 %v13031_v61, 16  ;;  %v2352_v29 = vunpack.c.l.b16 %v2001_v0  ;;  %v13107_v19 = vrot.slane %v13091_v20, 9  ;;  %v13034_v0 = vld [vmem:[%s15246_s20 + $0x34] sm:$0xf]  ;;  %v2037_v20 = vshrl.u32 %v13033_v63, 16 }
  0xef   : > { %v15622_v21 = vpop.f32.mrf.mxu3  ;;  %v15624_v27 = vadd.f32 %v1534_v8, %v1182_v24  ;;  %v2006_v54 = vrot.slane %v2005_v37, 4  ;;  %v2652_v22 = vrot.slane %v2650_v2, 4 }
  0xf0   : > { %v2028_v30 = vrot.slane %v2026_v5, 4  ;;  %v2651_v35 = vsel %vm15248_vm3, %v13107_v19, %v2650_v2  ;;  %v13092_v2 = vld [vmem:[%s15246_s20 + $0x30] sm:$0xe] }
  0xf1   : > { %v2011_v3 = vsel %vm15272_vm7, %v2006_v54, %v2010_v55 }
  0xf2   : > { %13235 = vmatmul.msk.bf16.vlgmr.msrb.gmra.mxu2 %vm882_vm5, %v14579_v10  ;;  %v1186_v32 = vpop.f32.mrf.mxu1  ;;  %v2353_v24 = vunpack.c.l.b16 %v2011_v3  ;;  %v13032_v10 = vld [vmem:[%s15246_s20 + $0x2c] sm:$0x1]  ;;  %v2657_v3 = vrot.slane %v13034_v0, 5 }
  0xf3   : > { %v2653_v23 = vrot.slane %v13032_v10, 5 }
  0xf4   : > { %v964_v44 = vpop.f32.mrf.mxu0  ;;  %v2383_v38 = vpack.c.b16 %v2353_v24, %v2352_v29  ;;  %v14581_v29 = vld [vmem:[%s15246_s20 + $0x30] sm:$0xff]  ;;  %v13035_v24 = vld [vmem:[%s15246_s20 + $0x38] sm:$0x1] }
  0xf5   : > { %v1537_v45 = vpop.f32.mrf.mxu2  ;;  %v1185_v46 = vadd.f32 %v1184_v4, %v964_v44  ;;  %v2022_v4 = vshll.u32 %v13031_v61, 16  ;;  %v2654_v37 = vsel %vm15248_vm3, %v2652_v22, %v2653_v23 }
  0xf6   : > { %v2753_v49 = vunpack.c.l.b16 %v2654_v37 }
  0xf7   : > { %v15631_v52 = vpop.f32.mrf.mxu3  ;;  %v15634_v58 = vadd.f32 %v1537_v45, %v1185_v46  ;;  %13073 = vmatmul.msk.bf16.vlgmr.msrb.gmra.mxu0 %vm882_vm5, %v2382_v40  ;;  %v2024_v33 = vrot.slane %v2022_v4, 5  ;;  %v2752_v46 = vunpack.c.l.b16 %v2651_v35 }
  0xf9   : > { %v2029_v39 = vor.u32 %v2028_v30, %v2024_v33  ;;  %v2039_v30 = vrot.slane %v2037_v20, 4 }
  0xfa   : > { %v1189_v1 = vpop.f32.mrf.mxu1 }
  0xfc   : > { %13008 = vmatmul.msk.bf16.vlgmr.msrb.gmra.mxu3 %vm882_vm5, %v14563_v59  ;;  %v966_v6 = vpop.f32.mrf.mxu0  ;;  %v2030_v59 = vrot.slane %v2029_v39, 4 }
  0xfd   : > { %v1539_v7 = vpop.f32.mrf.mxu2  ;;  %v1187_v8 = vadd.f32 %v1186_v32, %v966_v6  ;;  %13123 = vmatmul.msk.bf16.gmra.mxu1 %vm882_vm5, %v2781_v62  ;;  %v2019_v32 = vor.u32 %v2018_v18, %v2015_v11  ;;  %v2782_v62 = vpack.c.b16 %v2753_v49, %v2752_v46  ;;  %v2040_v6 = vshll.u32 %v13033_v63, 16 }
  0xfe   : > { %v13108_v11 = vrot.slane %v13092_v2, 9  ;;  %v2660_v18 = vrot.slane %v13035_v24, 5  ;;  %v2056_v46 = vshll.u32 %v13035_v24, 16 }
  0xff   : > { %v1224_v17 = vpop.f32.mrf.mxu3  ;;  %v15651_v26 = vadd.f32 %v1539_v7, %v1187_v8  ;;  %v2020_v53 = vrot.slane %v2019_v32, 4  ;;  %v2046_v7 = vshll.u32 %v13034_v0, 16  ;;  %v2050_v8 = vshrl.u32 %v13034_v0, 16  ;;  %v14565_v0 = vld [vmem:[%s15246_s20 + $0x24] sm:$0xff] }
 0x100   : > { %v15649_v25 = vadd.f32 %v1224_v17, %v15509_v9  ;;  %v2032_v9 = vshll.u32 %v13032_v10, 16  ;;  %v2659_v17 = vrot.slane %v2657_v3, 4  ;;  %v2042_v32 = vrot.slane %v2040_v6, 5 }
 0x101   : > { %v2048_v35 = vrot.slane %v2046_v7, 5 }
 0x102   : > { %13236 = vmatmul.msk.bf16.gmra.mxu2 %vm882_vm5, %v14580_v28  ;;  %v1191_v31 = vpop.f32.mrf.mxu1  ;;  %v2034_v61 = vrot.slane %v2032_v9, 5 }
 0x104   : > { %v969_v40 = vpop.f32.mrf.mxu0  ;;  %v2035_v60 = vsel %vm15272_vm7, %v2030_v59, %v2034_v61  ;;  %v13036_v59 = vld [vmem:[%s15246_s20 + $0x3c] sm:$0xf]  ;;  %v13037_v61 = vld [vmem:[%s15246_s20 + $0x40] sm:$0xf] }
 0x105   : > { %v1542_v44 = vpop.f32.mrf.mxu2  ;;  %v1190_v45 = vadd.f32 %v1189_v1, %v969_v40  ;;  %v2074_v6 = vshrl.u32 %v13037_v61, 16  ;;  %v2664_v7 = vrot.slane %v13037_v61, 5 }
 0x107   : > { %v1226_v51 = vpop.f32.mrf.mxu3  ;;  %v15661_v55 = vadd.f32 %v1542_v44, %v1190_v45  ;;  %13074 = vmatmul.msk.bf16.gmra.mxu0 %vm882_vm5, %v2383_v38  ;;  %v2658_v38 = vsel %vm15248_vm3, %v13108_v11, %v2657_v3  ;;  %v2043_v44 = vor.u32 %v2042_v32, %v2039_v30  ;;  %v14582_v11 = vld [vmem:[%s15246_s20 + $0x3c] sm:$0xff]  ;;  %v2076_v32 = vrot.slane %v2074_v6, 4  ;;  %v14566_v6 = vld [vmem:[%s15246_s20 + $0x30] sm:$0xff] }
 0x108   : > { %v15659_v54 = vadd.f32 %v1226_v51, %v15518_v41  ;;  %v2025_v41 = vsel %vm15272_vm7, %v2020_v53, %v2024_v33  ;;  %v2355_v33 = vunpack.c.l.b16 %v2035_v60  ;;  %v2754_v51 = vunpack.c.l.b16 %v2658_v38 }
 0x109   : > { %v2354_v23 = vunpack.c.l.b16 %v2025_v41  ;;  %v2044_v3 = vrot.slane %v2043_v44, 4  ;;  %v2058_v60 = vrot.slane %v2056_v46, 5  ;;  %v2666_v38 = vrot.slane %v2664_v7, 4 }
 0x10a   : > { %v1194_v1 = vpop.f32.mrf.mxu1 }
 0x10b   : > { %v2384_v39 = vpack.c.b16 %v2355_v33, %v2354_v23 }
 0x10c   : > { %13009 = vmatmul.msk.bf16.gmra.mxu3 %vm882_vm5, %v14564_v56  ;;  %v971_v4 = vpop.f32.mrf.mxu0 }
 0x10d   : > { %v1544_v5 = vpop.f32.mrf.mxu2  ;;  %v1192_v28 = vadd.f32 %v1191_v31, %v971_v4  ;;  %13124 = vmatmul.msk.bf16.gmra.mxu1 %vm882_vm5, %v2782_v62  ;;  %v2052_v31 = vrot.slane %v2050_v8, 4  ;;  %v2064_v4 = vshll.u32 %v13036_v59, 16 }
 0x10f   : > { %v1229_v10 = vpop.f32.mrf.mxu3  ;;  %v15679_v22 = vadd.f32 %v1544_v5, %v1192_v28  ;;  %v2053_v45 = vor.u32 %v2052_v31, %v2048_v35  ;;  %v2070_v5 = vshll.u32 %v13037_v61, 16  ;;  %v2066_v23 = vrot.slane %v2064_v4, 5 }
 0x110   : > { %v15677_v19 = vadd.f32 %v1229_v10, %v15541_v36  ;;  %v2661_v36 = vsel %vm15248_vm3, %v2659_v17, %v2660_v18  ;;  %v13038_v17 = vld [vmem:[%s15246_s20 + $0x44] sm:$0x1] }
 0x111   : > { %v2755_v53 = vunpack.c.l.b16 %v2661_v36  ;;  %v2054_v41 = vrot.slane %v2053_v45, 4  ;;  %v2072_v33 = vrot.slane %v2070_v5, 5  ;;  %v2667_v36 = vrot.slane %v13038_v17, 5 }
 0x112   : > { %13237 = vmatmul.msk.bf16.gmra.mxu2 %vm882_vm5, %v14581_v29  ;;  %v1196_v37 = vpop.f32.mrf.mxu1  ;;  %v2049_v29 = vsel %vm15272_vm7, %v2044_v3, %v2048_v35  ;;  %v2080_v46 = vshll.u32 %v13038_v17, 16  ;;  %v13094_v17 = vld [vmem:[%s15246_s20 + $0x48] sm:$0xe] }
 0x113   : > { %v2783_v2 = vpack.c.b16 %v2755_v53, %v2754_v51  ;;  %v2059_v24 = vsel %vm15272_vm7, %v2054_v41, %v2058_v60  ;;  %v2077_v45 = vor.u32 %v2076_v32, %v2072_v33  ;;  %v2668_v51 = vsel %vm15248_vm3, %v2666_v38, %v2667_v36  ;;  %v14583_v32 = vld [vmem:[%s15246_s20 + $0x48] sm:$0xff]  ;;  %v13041_v36 = vld [vmem:[%s15246_s20 + $0x50] sm:$0x1] }
 0x114   : > { %v974_v9 = vpop.f32.mrf.mxu0 }
 0x115   : > { %v1547_v40 = vpop.f32.mrf.mxu2  ;;  %v1195_v49 = vadd.f32 %v1194_v1, %v974_v9  ;;  %v2061_v1 = vshrl.u32 %v13036_v59, 16  ;;  %v2356_v9 = vunpack.c.l.b16 %v2049_v29  ;;  %v2078_v60 = vrot.slane %v2077_v45, 4 }
 0x117   : > { %v1231_v56 = vpop.f32.mrf.mxu3  ;;  %v15691_v63 = vadd.f32 %v1547_v40, %v1195_v49  ;;  %13075 = vmatmul.msk.bf16.gmra.mxu0 %vm882_vm5, %v2384_v39  ;;  %v2063_v18 = vrot.slane %v2061_v1, 4  ;;  %v2357_v40 = vunpack.c.l.b16 %v2059_v24  ;;  %v13039_v1 = vld [vmem:[%s15246_s20 + $0x48] sm:$0xf] }
 0x118   : > { %v15689_v62 = vadd.f32 %v1231_v56, %v15554_v42  ;;  %v13093_v42 = vld [vmem:[%s15246_s20 + $0x3c] sm:$0xe]  ;;  %v2088_v24 = vshll.u32 %v13039_v1, 16 }
 0x119   : > { %v13109_v31 = vrot.slane %v13093_v42, 9 }
 0x11a   : > { %v1199_v20 = vpop.f32.mrf.mxu1 }
 0x11b   : > { %v2665_v49 = vsel %vm15248_vm3, %v13109_v31, %v2664_v7  ;;  %v13040_v7 = vld [vmem:[%s15246_s20 + $0x4c] sm:$0xf] }
 0x11c   : > { %13010 = vmatmul.msk.bf16.gmra.mxu3 %vm882_vm5, %v14565_v0  ;;  %v976_v8 = vpop.f32.mrf.mxu0  ;;  %v2756_v61 = vunpack.c.l.b16 %v2665_v49  ;;  %v2757_v0 = vunpack.c.l.b16 %v2668_v51 }
 0x11d   : > { %v1549_v28 = vpop.f32.mrf.mxu2  ;;  %v1197_v10 = vadd.f32 %v1196_v37, %v976_v8  ;;  %13125 = vmatmul.msk.bf16.gmra.mxu1 %vm882_vm5, %v2783_v2  ;;  %v2067_v37 = vor.u32 %v2066_v23, %v2063_v18  ;;  %v2082_v2 = vrot.slane %v2080_v46, 5  ;;  %v2674_v46 = vrot.slane %v13041_v36, 5 }
 0x11e   : > { %v2784_v42 = vpack.c.b16 %v2757_v0, %v2756_v61 }
 0x11f   : > { %v1234_v30 = vpop.f32.mrf.mxu3  ;;  %v15707_v35 = vadd.f32 %v1549_v28, %v1197_v10  ;;  %v2068_v41 = vrot.slane %v2067_v37, 4  ;;  %v2083_v29 = vsel %vm15272_vm7, %v2078_v60, %v2082_v2  ;;  %v2094_v10 = vshll.u32 %v13040_v7, 16 }
 0x120   : > { %v15705_v39 = vadd.f32 %v1234_v30, %v15579_v14  ;;  %v2385_v14 = vpack.c.b16 %v2357_v40, %v2356_v9  ;;  %v2359_v38 = vunpack.c.l.b16 %v2083_v29  ;;  %v2090_v40 = vrot.slane %v2088_v24, 5  ;;  %v14567_v29 = vld [vmem:[%s15246_s20 + $0x3c] sm:$0xff] }
 0x121   : > { %v2073_v28 = vsel %vm15272_vm7, %v2068_v41, %v2072_v33  ;;  %v13110_v37 = vrot.slane %v13094_v17, 9  ;;  %v13043_v17 = vld [vmem:[%s15246_s20 + $0x58] sm:$0xf] }
 0x122   : > { %13238 = vmatmul.msk.bf16.gmra.mxu2 %vm882_vm5, %v14582_v11  ;;  %v1201_v44 = vpop.f32.mrf.mxu1  ;;  %v2098_v11 = vshrl.u32 %v13040_v7, 16  ;;  %v2358_v31 = vunpack.c.l.b16 %v2073_v28 }
 0x124   : > { %v979_v53 = vpop.f32.mrf.mxu0  ;;  %v2386_v0 = vpack.c.b16 %v2359_v38, %v2358_v31 }
 0x125   : > { %v1552_v56 = vpop.f32.mrf.mxu2  ;;  %v1200_v59 = vadd.f32 %v1199_v20, %v979_v53  ;;  %v2085_v20 = vshrl.u32 %v13039_v1, 16  ;;  %v2100_v53 = vrot.slane %v2098_v11, 4  ;;  %v13042_v11 = vld [vmem:[%s15246_s20 + $0x54] sm:$0xf] }
 0x126   : > { %v2109_v38 = vshrl.u32 %v13042_v11, 16 }
 0x127   : > { %v1236_v3 = vpop.f32.mrf.mxu3  ;;  %v15718_v5 = vadd.f32 %v1552_v56, %v1200_v59  ;;  %13076 = vmatmul.msk.bf16.gmra.mxu0 %vm882_vm5, %v2385_v14  ;;  %v2087_v33 = vrot.slane %v2085_v20, 4  ;;  %v2096_v14 = vrot.slane %v2094_v10, 5 }
 0x128   : > { %v15716_v4 = vadd.f32 %v1236_v3, %v15605_v57  ;;  %v2671_v57 = vrot.slane %v13040_v7, 5 }
 0x129   : > { %v2091_v56 = vor.u32 %v2090_v40, %v2087_v33  ;;  %v2101_v3 = vor.u32 %v2100_v53, %v2096_v14  ;;  %v2118_v33 = vshll.u32 %v13043_v17, 16 }
 0x12a   : > { %v1204_v8 = vpop.f32.mrf.mxu1  ;;  %v2673_v45 = vrot.slane %v2671_v57, 4  ;;  %v2672_v59 = vsel %vm15248_vm3, %v13110_v37, %v2671_v57  ;;  %v14584_v37 = vld [vmem:[%s15246_s20 + $0x54] sm:$0xff] }
 0x12b   : > { %v2758_v1 = vunpack.c.l.b16 %v2672_v59  ;;  %v2102_v24 = vrot.slane %v2101_v3, 4 }
 0x12c   : > { %13011 = vmatmul.msk.bf16.gmra.mxu3 %vm882_vm5, %v14566_v6  ;;  %v981_v18 = vpop.f32.mrf.mxu0  ;;  %v2675_v61 = vsel %vm15248_vm3, %v2673_v45, %v2674_v46  ;;  %v13044_v45 = vld [vmem:[%s15246_s20 + $0x5c] sm:$0x1] }
 0x12d   : > { %v1554_v23 = vpop.f32.mrf.mxu2  ;;  %v1202_v30 = vadd.f32 %v1201_v44, %v981_v18  ;;  %13126 = vmatmul.msk.bf16.gmra.mxu1 %vm882_vm5, %v2784_v42  ;;  %v2759_v6 = vunpack.c.l.b16 %v2675_v61  ;;  %v2092_v42 = vrot.slane %v2091_v56, 4  ;;  %v2678_v18 = vrot.slane %v13043_v17, 5 }
 0x12e   : > { %v2681_v59 = vrot.slane %v13044_v45, 5 }
 0x12f   : > { %v1239_v9 = vpop.f32.mrf.mxu3  ;;  %v15735_v51 = vadd.f32 %v1554_v23, %v1202_v30  ;;  %v2785_v10 = vpack.c.b16 %v2759_v6, %v2758_v1  ;;  %v13095_v30 = vld [vmem:[%s15246_s20 + $0x54] sm:$0xe]  ;;  %v2680_v56 = vrot.slane %v2678_v18, 4 }
 0x130   : > { %v15733_v49 = vadd.f32 %v1239_v9, %v15622_v21  ;;  %v2104_v21 = vshll.u32 %v13041_v36, 16  ;;  %v2112_v36 = vshll.u32 %v13042_v11, 16  ;;  %v2122_v9 = vshrl.u32 %v13043_v17, 16 }
 0x131   : > { %v13111_v53 = vrot.slane %v13095_v30, 9  ;;  %v13046_v30 = vld [vmem:[%s15246_s20 + $0x64] sm:$0xf] }
 0x132   : > { %13239 = vmatmul.msk.bf16.gmra.mxu2 %vm882_vm5, %v14583_v32  ;;  %v1206_v44 = vpop.f32.mrf.mxu1  ;;  %v2106_v57 = vrot.slane %v2104_v21, 5  ;;  %v2111_v21 = vrot.slane %v2109_v38, 4 }
 0x133   : > { %v2679_v1 = vsel %vm15248_vm3, %v13111_v53, %v2678_v18  ;;  %v2685_v53 = vrot.slane %v13046_v30, 5 }
 0x134   : > { %v984_v41 = vpop.f32.mrf.mxu0  ;;  %v2107_v23 = vsel %vm15272_vm7, %v2102_v24, %v2106_v57  ;;  %v2128_v57 = vshll.u32 %v13044_v45, 16  ;;  %v2760_v11 = vunpack.c.l.b16 %v2679_v1 }
 0x135   : > { %v1557_v60 = vpop.f32.mrf.mxu2  ;;  %v1205_v2 = vadd.f32 %v1204_v8, %v984_v41  ;;  %v2361_v3 = vunpack.c.l.b16 %v2107_v23  ;;  %v2114_v41 = vrot.slane %v2112_v36, 5  ;;  %v13045_v23 = vld [vmem:[%s15246_s20 + $0x60] sm:$0xf] }
 0x137   : > { %v1241_v7 = vpop.f32.mrf.mxu3  ;;  %v15745_v28 = vadd.f32 %v1557_v60, %v1205_v2  ;;  %13077 = vmatmul.msk.bf16.gmra.mxu0 %vm882_vm5, %v2386_v0  ;;  %v2120_v60 = vrot.slane %v2118_v33, 5  ;;  %v2130_v33 = vrot.slane %v2128_v57, 5 }
 0x138   : > { %v15743_v20 = vadd.f32 %v1241_v7, %v15631_v52  ;;  %v2097_v52 = vsel %vm15272_vm7, %v2092_v42, %v2096_v14 }
 0x139   : > { %v2360_v0 = vunpack.c.l.b16 %v2097_v52 }
 0x13a   : > { %v1209_v8 = vpop.f32.mrf.mxu1 }
 0x13b   : > { %v2387_v6 = vpack.c.b16 %v2361_v3, %v2360_v0 }
 0x13c   : > { %13012 = vmatmul.msk.bf16.gmra.mxu3 %vm882_vm5, %v14567_v29  ;;  %v986_v32 = vpop.f32.mrf.mxu0  ;;  %v2115_v29 = vor.u32 %v2114_v41, %v2111_v21  ;;  %v14585_v41 = vld [vmem:[%s15246_s20 + $0x60] sm:$0xff] }
 0x13d   : > { %v1559_v31 = vpop.f32.mrf.mxu2  ;;  %v1207_v40 = vadd.f32 %v1206_v44, %v986_v32  ;;  %13127 = vmatmul.msk.bf16.gmra.mxu1 %vm882_vm5, %v2785_v10  ;;  %v2124_v44 = vrot.slane %v2122_v9, 4 }
 0x13e   : > { %v2116_v38 = vrot.slane %v2115_v29, 4 }
 0x13f   : > { %v1577_v46 = vpop.f32.mrf.mxu3  ;;  %v15763_v61 = vadd.f32 %v1559_v31, %v1207_v40  ;;  %v2125_v24 = vor.u32 %v2124_v44, %v2120_v60  ;;  %v14568_v31 = vld [vmem:[%s15246_s20 + $0x48] sm:$0xff]  ;;  %v2136_v40 = vshll.u32 %v13045_v23, 16 }
 0x140   : > { %v15761_v14 = vadd.f32 %v1577_v46, %v15649_v25  ;;  %v2682_v25 = vsel %vm15248_vm3, %v2680_v56, %v2681_v59  ;;  %v2146_v46 = vshrl.u32 %v13046_v30, 16  ;;  %v2121_v0 = vsel %vm15272_vm7, %v2116_v38, %v2120_v60  ;;  %v13047_v44 = vld [vmem:[%s15246_s20 + $0x68] sm:$0x1] }
 0x141   : > { %v2761_v17 = vunpack.c.l.b16 %v2682_v25  ;;  %v2126_v36 = vrot.slane %v2125_v24, 4  ;;  %v2138_v25 = vrot.slane %v2136_v40, 5  ;;  %v2687_v24 = vrot.slane %v2685_v53, 4 }
 0x142   : > { %13240 = vmatmul.msk.bf16.gmra.mxu2 %vm882_vm5, %v14584_v37  ;;  %v1211_v2 = vpop.f32.mrf.mxu1  ;;  %v2142_v37 = vshll.u32 %v13046_v30, 16  ;;  %v2688_v57 = vrot.slane %v13047_v44, 5  ;;  %v2152_v30 = vshll.u32 %v13047_v44, 16 }
 0x143   : > { %v2786_v9 = vpack.c.b16 %v2761_v17, %v2760_v11  ;;  %v2131_v3 = vsel %vm15272_vm7, %v2126_v36, %v2130_v33  ;;  %v2362_v11 = vunpack.c.l.b16 %v2121_v0 }
 0x144   : > { %v989_v7 = vpop.f32.mrf.mxu0  ;;  %v2363_v17 = vunpack.c.l.b16 %v2131_v3  ;;  %v2689_v38 = vsel %vm15248_vm3, %v2687_v24, %v2688_v57  ;;  %v14569_v3 = vld [vmem:[%s15246_s20 + $0x54] sm:$0xff]  ;;  %v13097_v24 = vld [vmem:[%s15246_s20 + $0x6c] sm:$0xe] }
 0x145   : > { %v1562_v42 = vpop.f32.mrf.mxu2  ;;  %v1210_v10 = vadd.f32 %v1209_v8, %v989_v7  ;;  %v2133_v8 = vshrl.u32 %v13045_v23, 16  ;;  %v2763_v40 = vunpack.c.l.b16 %v2689_v38 }
 0x147   : > { %v1579_v52 = vpop.f32.mrf.mxu3  ;;  %v15775_v18 = vadd.f32 %v1562_v42, %v1210_v10  ;;  %13078 = vmatmul.msk.bf16.gmra.mxu0 %vm882_vm5, %v2387_v6  ;;  %v2135_v1 = vrot.slane %v2133_v8, 4  ;;  %v2144_v6 = vrot.slane %v2142_v37, 5  ;;  %v2148_v42 = vrot.slane %v2146_v46, 4 }
 0x148   : > { %v15773_v32 = vadd.f32 %v1579_v52, %v15659_v54  ;;  %v13096_v54 = vld [vmem:[%s15246_s20 + $0x60] sm:$0xe] }
 0x149   : > { %v13112_v29 = vrot.slane %v13096_v54, 9  ;;  %v2149_v23 = vor.u32 %v2148_v42, %v2144_v6 }
 0x14a   : > { %v1214_v45 = vpop.f32.mrf.mxu1 }
 0x14b   : > { %v2150_v54 = vrot.slane %v2149_v23, 4 }
 0x14c   : > { %13013 = vmatmul.msk.bf16.gmra.mxu3 %vm882_vm5, %v14568_v31  ;;  %v991_v56 = vpop.f32.mrf.mxu0  ;;  %v2686_v31 = vsel %vm15248_vm3, %v13112_v29, %v2685_v53 }
 0x14d   : > { %v1564_v59 = vpop.f32.mrf.mxu2  ;;  %v1212_v21 = vadd.f32 %v1211_v2, %v991_v56  ;;  %13128 = vmatmul.msk.bf16.gmra.mxu1 %vm882_vm5, %v2786_v9  ;;  %v2139_v2 = vor.u32 %v2138_v25, %v2135_v1  ;;  %v2762_v8 = vunpack.c.l.b16 %v2686_v31  ;;  %v2154_v56 = vrot.slane %v2152_v30, 5  ;;  %v13050_v31 = vld [vmem:[%s15246_s20 + $0x74] sm:$0x1] }
 0x14f   : > { %v1582_v7 = vpop.f32.mrf.mxu3  ;;  %v15791_v60 = vadd.f32 %v1564_v59, %v1212_v21  ;;  %v2140_v46 = vrot.slane %v2139_v2, 4  ;;  %v13048_v59 = vld [vmem:[%s15246_s20 + $0x6c] sm:$0xf]  ;;  %v13049_v21 = vld [vmem:[%s15246_s20 + $0x70] sm:$0xf]  ;;  %v2155_v25 = vsel %vm15272_vm7, %v2150_v54, %v2154_v56 }
 0x150   : > { %v15789_v10 = vadd.f32 %v1582_v7, %v15677_v19  ;;  %v2388_v19 = vpack.c.b16 %v2363_v17, %v2362_v11  ;;  %v2160_v7 = vshll.u32 %v13048_v59, 16  ;;  %v2166_v42 = vshll.u32 %v13049_v21, 16  ;;  %v14586_v2 = vld [vmem:[%s15246_s20 + $0x6c] sm:$0xff] }
 0x151   : > { %v2145_v1 = vsel %vm15272_vm7, %v2140_v46, %v2144_v6  ;;  %v2170_v29 = vshrl.u32 %v13049_v21, 16  ;;  %v2365_v30 = vunpack.c.l.b16 %v2155_v25 }
 0x152   : > { %13241 = vmatmul.msk.bf16.gmra.mxu2 %vm882_vm5, %v14585_v41  ;;  %v1216_v52 = vpop.f32.mrf.mxu1  ;;  %v2787_v41 = vpack.c.b16 %v2763_v40, %v2762_v8  ;;  %v2364_v23 = vunpack.c.l.b16 %v2145_v1 }
 0x153   : > { %v2172_v46 = vrot.slane %v2170_v29, 4 }
 0x154   : > { %v994_v36 = vpop.f32.mrf.mxu0 }
 0x155   : > { %v1567_v33 = vpop.f32.mrf.mxu2  ;;  %v1215_v9 = vadd.f32 %v1214_v45, %v994_v36  ;;  %v2157_v45 = vshrl.u32 %v13048_v59, 16  ;;  %v13113_v36 = vrot.slane %v13097_v24, 9 }
 0x157   : > { %v1584_v37 = vpop.f32.mrf.mxu3  ;;  %v15802_v53 = vadd.f32 %v1567_v33, %v1215_v9  ;;  %13079 = vmatmul.msk.bf16.gmra.mxu0 %vm882_vm5, %v2388_v19  ;;  %v2159_v6 = vrot.slane %v2157_v45, 4  ;;  %v2162_v19 = vrot.slane %v2160_v7, 5  ;;  %v2695_v9 = vrot.slane %v13050_v31, 5 }
 0x158   : > { %v15800_v0 = vadd.f32 %v1584_v37, %v15689_v62  ;;  %v2692_v62 = vrot.slane %v13049_v21, 5  ;;  %v2168_v37 = vrot.slane %v2166_v42, 5 }
 0x159   : > { %v2163_v54 = vor.u32 %v2162_v19, %v2159_v6 }
 0x15a   : > { %v1219_v44 = vpop.f32.mrf.mxu1  ;;  %v2694_v33 = vrot.slane %v2692_v62, 4  ;;  %v2693_v56 = vsel %vm15248_vm3, %v13113_v36, %v2692_v62  ;;  %v2173_v21 = vor.u32 %v2172_v46, %v2168_v37  ;;  %v13098_v36 = vld [vmem:[%s15246_s20 + $0x78] sm:$0xe] }
 0x15b   : > { %v2764_v25 = vunpack.c.l.b16 %v2693_v56  ;;  %v2164_v29 = vrot.slane %v2163_v54, 4 }
 0x15c   : > { %13014 = vmatmul.msk.bf16.gmra.mxu3 %vm882_vm5, %v14569_v3  ;;  %v996_v57 = vpop.f32.mrf.mxu0  ;;  %v2696_v59 = vsel %vm15248_vm3, %v2694_v33, %v2695_v9  ;;  %v2389_v3 = vpack.c.b16 %v2365_v30, %v2364_v23  ;;  %v13052_v30 = vld [vmem:[%s15246_s20 + $0x7c] sm:$0xf] }
 0x15d   : > { %v1569_v11 = vpop.f32.mrf.mxu2  ;;  %v1217_v17 = vadd.f32 %v1216_v52, %v996_v57  ;;  %13129 = vmatmul.msk.bf16.gmra.mxu1 %vm882_vm5, %v2787_v41  ;;  %v2765_v7 = vunpack.c.l.b16 %v2696_v59  ;;  %v14570_v57 = vld [vmem:[%s15246_s20 + $0x60] sm:$0xff]  ;;  %v2190_v46 = vshll.u32 %v13052_v30, 16  ;;  %v2194_v54 = vshrl.u32 %v13052_v30, 16  ;;  %v14587_v59 = vld [vmem:[%s15246_s20 + $0x78] sm:$0xff] }
 0x15f   : > { %v1587_v38 = vpop.f32.mrf.mxu3  ;;  %v15819_v40 = vadd.f32 %v1569_v11, %v1217_v17  ;;  %v2174_v11 = vrot.slane %v2173_v21, 4  ;;  %v2788_v23 = vpack.c.b16 %v2765_v7, %v2764_v25  ;;  %v13053_v21 = vld [vmem:[%s15246_s20 + $0x80] sm:$0x1] }
 0x160   : > { %v15817_v8 = vadd.f32 %v1587_v38, %v15705_v39  ;;  %v2176_v39 = vshll.u32 %v13050_v31, 16  ;;  %v2169_v31 = vsel %vm15272_vm7, %v2164_v29, %v2168_v37 }
 0x162   : > { %13242 = vmatmul.msk.bf16.gmra.mxu2 %vm882_vm5, %v14586_v2  ;;  %v1221_v52 = vpop.f32.mrf.mxu1  ;;  %v2178_v17 = vrot.slane %v2176_v39, 5  ;;  %v13051_v2 = vld [vmem:[%s15246_s20 + $0x78] sm:$0xf] }
 0x163   : > { %v2181_v38 = vshrl.u32 %v13051_v2, 16  ;;  %v2184_v19 = vshll.u32 %v13051_v2, 16 }
 0x164   : > { %v999_v41 = vpop.f32.mrf.mxu0  ;;  %v2179_v6 = vsel %vm15272_vm7, %v2174_v11, %v2178_v17 }
 0x165   : > { %v1572_v45 = vpop.f32.mrf.mxu2  ;;  %v1220_v1 = vadd.f32 %v1219_v44, %v999_v41  ;;  %v2367_v39 = vunpack.c.l.b16 %v2179_v6  ;;  %v13114_v41 = vrot.slane %v13098_v36, 9  ;;  %v2186_v29 = vrot.slane %v2184_v19, 5 }
 0x167   : > { %v1589_v42 = vpop.f32.mrf.mxu3  ;;  %v15829_v62 = vadd.f32 %v1572_v45, %v1220_v1  ;;  %13080 = vmatmul.msk.bf16.gmra.mxu0 %vm882_vm5, %v2389_v3  ;;  %v2366_v3 = vunpack.c.l.b16 %v2169_v31  ;;  %v2702_v1 = vrot.slane %v13053_v21, 5 }
 0x168   : > { %v15827_v24 = vadd.f32 %v1589_v42, %v15716_v4  ;;  %v2699_v4 = vrot.slane %v13052_v30, 5  ;;  %v2183_v42 = vrot.slane %v2181_v38, 4  ;;  %v2200_v38 = vshll.u32 %v13053_v21, 16 }
 0x16a   : > { %20019 = vst [vmem:[#allocation9_spill] sm:$0xff] %v15827_v24  ;;  %v15835_v44 = vpop.f32.mrf.mxu1  ;;  %v2701_v45 = vrot.slane %v2699_v4, 4  ;;  %v2700_v17 = vsel %vm15248_vm3, %v13114_v41, %v2699_v4 }
 0x16b   : > { %v2766_v19 = vunpack.c.l.b16 %v2700_v17 }
 0x16c   : > { %13015 = vmatmul.msk.bf16.gmra.mxu3 %vm882_vm5, %v14570_v57  ;;  %v1001_v33 = vpop.f32.mrf.mxu0  ;;  %v2192_v57 = vrot.slane %v2190_v46, 5  ;;  %v2703_v2 = vsel %vm15248_vm3, %v2701_v45, %v2702_v1  ;;  %v14571_v46 = vld [vmem:[%s15246_s20 + $0x6c] sm:$0xff]  ;;  %v13099_v1 = vld [vmem:[%s15246_s20 + $0x84] sm:$0xe] }
 0x16d   : > { %v1574_v9 = vpop.f32.mrf.mxu2  ;;  %v1222_v56 = vadd.f32 %v1221_v52, %v1001_v33  ;;  %13130 = vmatmul.msk.bf16.gmra.mxu1 %vm882_vm5, %v2788_v23  ;;  %v2196_v52 = vrot.slane %v2194_v54, 4  ;;  %v2187_v23 = vor.u32 %v2186_v29, %v2183_v42  ;;  %v2767_v36 = vunpack.c.l.b16 %v2703_v2 }
 0x16f   : > { %v1592_v37 = vpop.f32.mrf.mxu3  ;;  %v15849_v7 = vadd.f32 %v1574_v9, %v1222_v56  ;;  %v2197_v6 = vor.u32 %v2196_v52, %v2192_v57  ;;  %v2188_v4 = vrot.slane %v2187_v23, 4  ;;  %v2202_v56 = vrot.slane %v2200_v38, 5  ;;  %v13056_v23 = vld [vmem:[%s15246_s20 + $0x8c] sm:$0x1] }
 0x170   : > { %v15847_v25 = vadd.f32 %v1592_v37, %v15733_v49  ;;  %v2390_v49 = vpack.c.b16 %v2367_v39, %v2366_v3  ;;  %v2789_v3 = vpack.c.b16 %v2767_v36, %v2766_v19  ;;  %v13055_v37 = vld [vmem:[%s15246_s20 + $0x88] sm:$0xf]  ;;  %v13115_v19 = vrot.slane %v13099_v1, 9 }
 0x171   : > { %v2198_v54 = vrot.slane %v2197_v6, 4  ;;  %v2706_v21 = vrot.slane %v13055_v37, 5  ;;  %v2214_v17 = vshll.u32 %v13055_v37, 16  ;;  %v2218_v2 = vshrl.u32 %v13055_v37, 16 }
 0x172   : > { %20020 = vst [vmem:[#allocation10_spill] sm:$0xff] %v15847_v25  ;;  %13243 = vmatmul.msk.bf16.gmra.mxu2 %vm882_vm5, %v14587_v59  ;;  %v15852_v11 = vpop.f32.mrf.mxu1  ;;  %v13054_v59 = vld [vmem:[%s15246_s20 + $0x84] sm:$0xf]  ;;  %v2224_v1 = vshll.u32 %v13056_v23, 16 }
 0x173   : > { %v2205_v41 = vshrl.u32 %v13054_v59, 16  ;;  %v2208_v45 = vshll.u32 %v13054_v59, 16  ;;  %v2203_v52 = vsel %vm15272_vm7, %v2198_v54, %v2202_v56  ;;  %v2708_v36 = vrot.slane %v2706_v21, 4 }
 0x174   : > { %v2458_v30 = vpop.f32.mrf.mxu0  ;;  %v2220_v25 = vrot.slane %v2218_v2, 4  ;;  %v2707_v56 = vsel %vm15248_vm3, %v13115_v19, %v2706_v21 }
 0x175   : > { %v3143_v31 = vpop.f32.mrf.mxu2  ;;  %v2210_v59 = vrot.slane %v2208_v45, 5 }
 0x177   : > { %v1594_v33 = vpop.f32.mrf.mxu3  ;;  %13081 = vmatmul.msk.bf16.gmra.mxu0 %vm882_vm5, %v2390_v49  ;;  %v14588_v49 = vld [vmem:[%s15246_s20 + $0x84] sm:$0xff] }
 0x178   : > { %v15859_v9 = vadd.f32 %v1594_v33, %v15743_v20  ;;  %v2193_v20 = vsel %vm15272_vm7, %v2188_v4, %v2192_v57  ;;  %v2709_v33 = vrot.slane %v13056_v23, 5  ;;  %v2207_v4 = vrot.slane %v2205_v41, 4 }
 0x179   : > { %v2368_v38 = vunpack.c.l.b16 %v2193_v20 }
 0x17a   : > { %20021 = vst [vmem:[#allocation11_spill] sm:$0xff] %v15859_v9  ;;  %v15865_v39 = vpop.f32.mrf.mxu1  ;;  %v2216_v9 = vrot.slane %v2214_v17, 5  ;;  %v2211_v20 = vor.u32 %v2210_v59, %v2207_v4  ;;  %v13100_v4 = vld [vmem:[%s15246_s20 + $0x90] sm:$0xe] }
 0x17c   : > { %13016 = vmatmul.msk.bf16.gmra.mxu3 %vm882_vm5, %v14571_v46  ;;  %v2460_v42 = vpop.f32.mrf.mxu0  ;;  %v2369_v46 = vunpack.c.l.b16 %v2203_v52  ;;  %v2768_v52 = vunpack.c.l.b16 %v2707_v56 }
 0x17d   : > { %v3145_v29 = vpop.f32.mrf.mxu2  ;;  %13131 = vmatmul.msk.bf16.gmra.mxu1 %vm882_vm5, %v2789_v3  ;;  %v2710_v3 = vsel %vm15248_vm3, %v2708_v36, %v2709_v33  ;;  %v2226_v36 = vrot.slane %v2224_v1, 5 }
 0x17e   : > { %v2391_v37 = vpack.c.b16 %v2369_v46, %v2368_v38  ;;  %v2769_v17 = vunpack.c.l.b16 %v2710_v3  ;;  %v2212_v38 = vrot.slane %v2211_v20, 4 }
 0x17f   : > { %v1804_v6 = vpop.f32.mrf.mxu3 }
 0x180   : > { %v1884_v57 = vadd.f32 %v1804_v6, %v15492_v50  ;;  %v14572_v6 = vld [vmem:[%s15246_s20 + $0x78] sm:$0xff]  ;;  %v2790_v33 = vpack.c.b16 %v2769_v17, %v2768_v52  ;;  %v13116_v17 = vrot.slane %v13100_v4, 9 }
 0x182   : > { %v2538_v24 = vadd.f32 %v2458_v30, %v1884_v57  ;;  %13244 = vmatmul.msk.bf16.gmra.mxu2 %vm882_vm5, %v14588_v49  ;;  %v15878_v54 = vpop.f32.mrf.mxu1  ;;  %v2221_v30 = vor.u32 %v2220_v25, %v2216_v9  ;;  %v13058_v25 = vld [vmem:[%s15246_s20 + $0x94] sm:$0xf] }
 0x183   : > { %v2242_v20 = vshrl.u32 %v13058_v25, 16 }
 0x184   : > { %v2936_v50 = vadd.f32 %v15835_v44, %v2538_v24  ;;  %v2463_v41 = vpop.f32.mrf.mxu0  ;;  %v2222_v19 = vrot.slane %v2221_v30, 4  ;;  %v13057_v24 = vld [vmem:[%s15246_s20 + $0x90] sm:$0xf]  ;;  %v13059_v30 = vld [vmem:[%s15246_s20 + $0x98] sm:$0x1] }
 0x185   : > { %v3148_v45 = vpop.f32.mrf.mxu2  ;;  %v2229_v57 = vshrl.u32 %v13057_v24, 16  ;;  %v2232_v46 = vshll.u32 %v13057_v24, 16 }
 0x186   : > { %v15885_v2 = vadd.f32 %v3143_v31, %v2936_v50  ;;  %v2713_v31 = vrot.slane %v13058_v25, 5  ;;  %v14589_v50 = vld [vmem:[%s15246_s20 + $0x90] sm:$0xff] }
 0x187   : > { %v1806_v49 = vpop.f32.mrf.mxu3  ;;  %13082 = vmatmul.msk.bf16.gmra.mxu0 %vm882_vm5, %v2391_v37  ;;  %v2238_v37 = vshll.u32 %v13058_v25, 16  ;;  %v2234_v24 = vrot.slane %v2232_v46, 5 }
 0x188   : > { %v1885_v21 = vadd.f32 %v1806_v49, %v15511_v16  ;;  %v2217_v16 = vsel %vm15272_vm7, %v2212_v38, %v2216_v9  ;;  %v2715_v49 = vrot.slane %v2713_v31, 4  ;;  %v2231_v38 = vrot.slane %v2229_v57, 4 }
 0x189   : > { %v2370_v9 = vunpack.c.l.b16 %v2217_v16 }
 0x18a   : > { %v2539_v44 = vadd.f32 %v2460_v42, %v1885_v21  ;;  %v15892_v23 = vpop.f32.mrf.mxu1  ;;  %v2227_v42 = vsel %vm15272_vm7, %v2222_v19, %v2226_v36  ;;  %v2716_v21 = vrot.slane %v13059_v30, 5  ;;  %v2244_v19 = vrot.slane %v2242_v20, 4 }
 0x18b   : > { %v2235_v4 = vor.u32 %v2234_v24, %v2231_v38 }
 0x18c   : > { %13017 = vmatmul.msk.bf16.gmra.mxu3 %vm882_vm5, %v14572_v6  ;;  %v2937_v59 = vadd.f32 %v15852_v11, %v2539_v44  ;;  %v2465_v56 = vpop.f32.mrf.mxu0  ;;  %v2371_v6 = vunpack.c.l.b16 %v2227_v42  ;;  %v2240_v44 = vrot.slane %v2238_v37, 5  ;;  %v2717_v25 = vsel %vm15248_vm3, %v2715_v49, %v2716_v21 }
 0x18d   : > { %v3150_v3 = vpop.f32.mrf.mxu2  ;;  %13132 = vmatmul.msk.bf16.gmra.mxu1 %vm882_vm5, %v2790_v33  ;;  %v2771_v37 = vunpack.c.l.b16 %v2717_v25 }
 0x18e   : > { %v15904_v1 = vadd.f32 %v3145_v29, %v2937_v59  ;;  %v2714_v29 = vsel %vm15248_vm3, %v13116_v17, %v2713_v31  ;;  %v2392_v16 = vpack.c.b16 %v2371_v6, %v2370_v9  ;;  %v2248_v59 = vshll.u32 %v13059_v30, 16  ;;  %v13061_v6 = vld [vmem:[%s15246_s20 + $0xa0] sm:$0xf] }
 0x18f   : > { %v1809_v52 = vpop.f32.mrf.mxu3  ;;  %v2770_v42 = vunpack.c.l.b16 %v2714_v29  ;;  %v2236_v9 = vrot.slane %v2235_v4, 4  ;;  %v2266_v4 = vshrl.u32 %v13061_v6, 16 }
 0x190   : > { %v1886_v11 = vadd.f32 %v1809_v52, %v15525_v47  ;;  %v14573_v52 = vld [vmem:[%s15246_s20 + $0x84] sm:$0xff]  ;;  %v2250_v49 = vrot.slane %v2248_v59, 5 }
 0x192   : > { %v2540_v36 = vadd.f32 %v2463_v41, %v1886_v11  ;;  %13245 = vmatmul.msk.bf16.gmra.mxu2 %vm882_vm5, %v14589_v50  ;;  %v15908_v33 = vpop.f32.mrf.mxu1  ;;  %v2245_v41 = vor.u32 %v2244_v19, %v2240_v44  ;;  %v2791_v11 = vpack.c.b16 %v2771_v37, %v2770_v42  ;;  %v13101_v19 = vld [vmem:[%s15246_s20 + $0x9c] sm:$0xe] }
 0x193   : > { %v13117_v37 = vrot.slane %v13101_v19, 9 }
 0x194   : > { %v2938_v47 = vadd.f32 %v15865_v39, %v2540_v36  ;;  %v2468_v57 = vpop.f32.mrf.mxu0  ;;  %v2246_v17 = vrot.slane %v2245_v41, 4  ;;  %v13060_v39 = vld [vmem:[%s15246_s20 + $0x9c] sm:$0xf]  ;;  %v13062_v41 = vld [vmem:[%s15246_s20 + $0xa4] sm:$0x1] }
 0x195   : > { %v3153_v46 = vpop.f32.mrf.mxu2  ;;  %v2253_v38 = vshrl.u32 %v13060_v39, 16  ;;  %v2256_v24 = vshll.u32 %v13060_v39, 16 }
 0x196   : > { %v15915_v20 = vadd.f32 %v3148_v45, %v2938_v47  ;;  %v2720_v45 = vrot.slane %v13061_v6, 5  ;;  %v14590_v47 = vld [vmem:[%s15246_s20 + $0x9c] sm:$0xff] }
 0x197   : > { %v1811_v50 = vpop.f32.mrf.mxu3  ;;  %13083 = vmatmul.msk.bf16.gmra.mxu0 %vm882_vm5, %v2392_v16  ;;  %v2262_v16 = vshll.u32 %v13061_v6, 16  ;;  %v2258_v39 = vrot.slane %v2256_v24, 5 }
 0x198   : > { %v1887_v31 = vadd.f32 %v1811_v50, %v15547_v15  ;;  %v2241_v15 = vsel %vm15272_vm7, %v2236_v9, %v2240_v44  ;;  %v2722_v50 = vrot.slane %v2720_v45, 4  ;;  %v2255_v9 = vrot.slane %v2253_v38, 4 }
 0x199   : > { %v2372_v44 = vunpack.c.l.b16 %v2241_v15 }
 0x19a   : > { %v2541_v21 = vadd.f32 %v2465_v56, %v1887_v31  ;;  %v15922_v30 = vpop.f32.mrf.mxu1  ;;  %v2251_v56 = vsel %vm15272_vm7, %v2246_v17, %v2250_v49  ;;  %v2723_v31 = vrot.slane %v13062_v41, 5  ;;  %v2268_v17 = vrot.slane %v2266_v4, 4 }
 0x19b   : > { %v2259_v19 = vor.u32 %v2258_v39, %v2255_v9 }
 0x19c   : > { %13018 = vmatmul.msk.bf16.gmra.mxu3 %vm882_vm5, %v14573_v52  ;;  %v2939_v36 = vadd.f32 %v15878_v54, %v2541_v21  ;;  %v2470_v29 = vpop.f32.mrf.mxu0  ;;  %v2373_v52 = vunpack.c.l.b16 %v2251_v56  ;;  %v2264_v21 = vrot.slane %v2262_v16, 5  ;;  %v2724_v6 = vsel %vm15248_vm3, %v2722_v50, %v2723_v31 }
 0x19d   : > { %v3155_v25 = vpop.f32.mrf.mxu2  ;;  %13133 = vmatmul.msk.bf16.gmra.mxu1 %vm882_vm5, %v2791_v11  ;;  %v2773_v16 = vunpack.c.l.b16 %v2724_v6 }
 0x19e   : > { %v15934_v59 = vadd.f32 %v3150_v3, %v2939_v36  ;;  %v2721_v3 = vsel %vm15248_vm3, %v13117_v37, %v2720_v45  ;;  %v2393_v15 = vpack.c.b16 %v2373_v52, %v2372_v44  ;;  %v2272_v36 = vshll.u32 %v13062_v41, 16  ;;  %v13064_v52 = vld [vmem:[%s15246_s20 + $0xac] sm:$0xf] }
 0x19f   : > { %v1814_v42 = vpop.f32.mrf.mxu3  ;;  %v2772_v56 = vunpack.c.l.b16 %v2721_v3  ;;  %v2260_v44 = vrot.slane %v2259_v19, 4  ;;  %v2290_v19 = vshrl.u32 %v13064_v52, 16 }
 0x1a0   : > { %v1888_v54 = vadd.f32 %v1814_v42, %v15558_v48  ;;  %v14574_v42 = vld [vmem:[%s15246_s20 + $0x90] sm:$0xff]  ;;  %v2274_v50 = vrot.slane %v2272_v36, 5 }
 0x1a2   : > { %v2542_v49 = vadd.f32 %v2468_v57, %v1888_v54  ;;  %13246 = vmatmul.msk.bf16.gmra.mxu2 %vm882_vm5, %v14590_v47  ;;  %v15938_v11 = vpop.f32.mrf.mxu1  ;;  %v2269_v57 = vor.u32 %v2268_v17, %v2264_v21  ;;  %v2792_v54 = vpack.c.b16 %v2773_v16, %v2772_v56  ;;  %v13102_v17 = vld [vmem:[%s15246_s20 + $0xa8] sm:$0xe] }
 0x1a3   : > { %v13118_v16 = vrot.slane %v13102_v17, 9 }
 0x1a4   : > { %v2940_v48 = vadd.f32 %v15892_v23, %v2542_v49  ;;  %v2473_v38 = vpop.f32.mrf.mxu0  ;;  %v2270_v37 = vrot.slane %v2269_v57, 4  ;;  %v13063_v23 = vld [vmem:[%s15246_s20 + $0xa8] sm:$0xf]  ;;  %v13065_v57 = vld [vmem:[%s15246_s20 + $0xb0] sm:$0x1] }
 0x1a5   : > { %v3158_v24 = vpop.f32.mrf.mxu2  ;;  %v2277_v9 = vshrl.u32 %v13063_v23, 16  ;;  %v2280_v39 = vshll.u32 %v13063_v23, 16 }
 0x1a6   : > { %v15945_v4 = vadd.f32 %v3153_v46, %v2940_v48  ;;  %v2727_v46 = vrot.slane %v13064_v52, 5  ;;  %v14591_v48 = vld [vmem:[%s15246_s20 + $0xa8] sm:$0xff] }
 0x1a7   : > { %v1816_v47 = vpop.f32.mrf.mxu3  ;;  %13084 = vmatmul.msk.bf16.gmra.mxu0 %vm882_vm5, %v2393_v15  ;;  %v2286_v15 = vshll.u32 %v13064_v52, 16  ;;  %v2282_v23 = vrot.slane %v2280_v39, 5 }
 0x1a8   : > { %v1889_v45 = vadd.f32 %v1816_v47, %v15583_v34  ;;  %v2265_v34 = vsel %vm15272_vm7, %v2260_v44, %v2264_v21  ;;  %v2729_v47 = vrot.slane %v2727_v46, 4  ;;  %v2279_v44 = vrot.slane %v2277_v9, 4 }
 0x1a9   : > { %v2374_v56 = vunpack.c.l.b16 %v2265_v34 }
 0x1aa   : > { %v2543_v31 = vadd.f32 %v2470_v29, %v1889_v45  ;;  %v15952_v41 = vpop.f32.mrf.mxu1  ;;  %v2275_v29 = vsel %vm15272_vm7, %v2270_v37, %v2274_v50  ;;  %v2730_v45 = vrot.slane %v13065_v57, 5  ;;  %v2292_v37 = vrot.slane %v2290_v19, 4 }
 0x1ac   : > { %13019 = vmatmul.msk.bf16.gmra.mxu3 %vm882_vm5, %v14574_v42  ;;  %v2941_v49 = vadd.f32 %v15908_v33, %v2543_v31  ;;  %v2475_v3 = vpop.f32.mrf.mxu0  ;;  %v2375_v42 = vunpack.c.l.b16 %v2275_v29  ;;  %v2288_v31 = vrot.slane %v2286_v15, 5  ;;  %v2731_v52 = vsel %vm15248_vm3, %v2729_v47, %v2730_v45  ;;  %v13066_v47 = vld [vmem:[%s15246_s20 + $0xb4] sm:$0xf]  ;;  %v13067_v45 = vld [vmem:[%s15246_s20 + $0xb8] sm:$0xf] }
 0x1ad   : > { %v15959_v6 = vpop.f32.mrf.mxu2  ;;  %13134 = vmatmul.msk.bf16.gmra.mxu1 %vm882_vm5, %v2792_v54  ;;  %v2775_v15 = vunpack.c.l.b16 %v2731_v52 }
 0x1ae   : > { %v15966_v36 = vadd.f32 %v3155_v25, %v2941_v49  ;;  %v2728_v25 = vsel %vm15248_vm3, %v13118_v16, %v2727_v46  ;;  %v2394_v34 = vpack.c.b16 %v2375_v42, %v2374_v56  ;;  %v2293_v17 = vor.u32 %v2292_v37, %v2288_v31 }
 0x1af   : > { %v1819_v21 = vpop.f32.mrf.mxu3  ;;  %v2296_v49 = vshll.u32 %v13065_v57, 16  ;;  %v2774_v29 = vunpack.c.l.b16 %v2728_v25  ;;  %v2734_v42 = vrot.slane %v13067_v45, 5  ;;  %v2304_v37 = vshll.u32 %v13066_v47, 16 }
 0x1b0   : > { %20022 = vst [vmem:[#allocation12_spill] sm:$0xff] %v15966_v36  ;;  %v1890_v33 = vadd.f32 %v1819_v21, %v15609_v13  ;;  %v2283_v13 = vor.u32 %v2282_v23, %v2279_v44  ;;  %v14575_v21 = vld [vmem:[%s15246_s20 + $0x9c] sm:$0xff]  ;;  %v2294_v56 = vrot.slane %v2293_v17, 4  ;;  %v13103_v44 = vld [vmem:[%s15246_s20 + $0xb4] sm:$0xe]  ;;  %v2301_v23 = vshrl.u32 %v13066_v47, 16 }
 0x1b1   : > { %v2298_v16 = vrot.slane %v2296_v49, 5  ;;  %v14592_v17 = vld [vmem:[%s15246_s20 + $0xb4] sm:$0xff]  ;;  %v13119_v49 = vrot.slane %v13103_v44, 9 }
 0x1b2   : > { %v2544_v50 = vadd.f32 %v2473_v38, %v1890_v33  ;;  %13247 = vmatmul.msk.bf16.gmra.mxu2 %vm882_vm5, %v14591_v48  ;;  %v15970_v54 = vpop.f32.mrf.mxu1  ;;  %v2793_v33 = vpack.c.b16 %v2775_v15, %v2774_v29  ;;  %v4598_v36 = vld [vmem:[%s16048_s18 + $0x14] sm:$0x1] }
 0x1b3   : > { %v2299_v52 = vsel %vm15272_vm7, %v2294_v56, %v2298_v16  ;;  %v2306_v56 = vrot.slane %v2304_v37, 5 }
 0x1b4   : > { %v2942_v9 = vadd.f32 %v15922_v30, %v2544_v50  ;;  %v2478_v39 = vpop.f32.mrf.mxu0  ;;  %v2284_v30 = vrot.slane %v2283_v13, 4  ;;  %v2310_v13 = vshll.u32 %v13067_v45, 16 }
 0x1b5   : > { %v15977_v38 = vpop.f32.mrf.mxu2 }
 0x1b6   : > { %v15979_v19 = vadd.f32 %v3158_v24, %v2942_v9  ;;  %v2314_v9 = vshrl.u32 %v13067_v45, 16  ;;  %v2312_v16 = vrot.slane %v2310_v13, 5 }
 0x1b7   : > { %v1821_v46 = vpop.f32.mrf.mxu3  ;;  %13085 = vmatmul.msk.bf16.gmra.mxu0 %vm882_vm5, %v2394_v34  ;;  %v13068_v34 = vld [vmem:[%s15246_s20 + $0xbc] sm:$0x1] }
 0x1b8   : > { %20023 = vst [vmem:[#allocation13_spill] sm:$0xff] %v15979_v19  ;;  %v1891_v48 = vadd.f32 %v1821_v46, %v15624_v27  ;;  %v2289_v27 = vsel %vm15272_vm7, %v2284_v30, %v2288_v31  ;;  %v2736_v31 = vrot.slane %v2734_v42, 4  ;;  %v2737_v29 = vrot.slane %v13068_v34, 5  ;;  %v14595_v19 = vld [vmem:[%s16048_s18] sm:$0xff] }
 0x1b9   : > { %v2303_v30 = vrot.slane %v2301_v23, 4  ;;  %v2316_v47 = vrot.slane %v2314_v9, 4 }
 0x1ba   : > { %v2545_v57 = vadd.f32 %v2475_v3, %v1891_v48  ;;  %v15987_v24 = vpop.f32.mrf.mxu1 }
 0x1bb   : > { %v2307_v44 = vor.u32 %v2306_v56, %v2303_v30  ;;  %v2317_v37 = vor.u32 %v2316_v47, %v2312_v16 }
 0x1bc   : > { %13020 = vmatmul.msk.bf16.gmra.mxu3 %vm882_vm5, %v14575_v21  ;;  %v2943_v3 = vadd.f32 %v15938_v11, %v2545_v57  ;;  %v2480_v50 = vpop.f32.mrf.mxu0  ;;  %v2376_v11 = vunpack.c.l.b16 %v2289_v27  ;;  %v2377_v21 = vunpack.c.l.b16 %v2299_v52  ;;  %v2738_v57 = vsel %vm15248_vm3, %v2736_v31, %v2737_v29  ;;  %v14576_v29 = vld [vmem:[%s15246_s20 + $0xa8] sm:$0xff] }
 0x1bd   : > { %v16000_v25 = vpop.f32.mrf.mxu2  ;;  %13135 = vmatmul.msk.bf16.gmra.mxu1 %vm882_vm5, %v2793_v33 }
 0x1be   : > { %v16008_v15 = vadd.f32 %v15959_v6, %v2943_v3  ;;  %v2735_v6 = vsel %vm15248_vm3, %v13119_v49, %v2734_v42  ;;  %v2320_v3 = vshll.u32 %v13068_v34, 16  ;;  %v2777_v42 = vunpack.c.l.b16 %v2738_v57  ;;  %v13070_v49 = vld [vmem:[%s15246_s20 + $0xc4] sm:$0xf] }
 0x1bf   : > { %v1824_v46 = vpop.f32.mrf.mxu3  ;;  %v2776_v52 = vunpack.c.l.b16 %v2735_v6  ;;  %v2338_v47 = vshrl.u32 %v13070_v49, 16 }
 0x1c0   : > { %20025 = vst [vmem:[#allocation14_spill] sm:$0xff] %v16008_v15  ;;  %v1892_v48 = vadd.f32 %v1824_v46, %v15634_v58  ;;  %v2395_v58 = vpack.c.b16 %v2377_v21, %v2376_v11  ;;  %v2318_v46 = vrot.slane %v2317_v37, 4  ;;  %v2322_v11 = vrot.slane %v2320_v3, 5  ;;  %v13071_v37 = vld [vmem:[%s15246_s20 + $0xc8] sm:$0x1] }
 0x1c2   : > { %v2546_v45 = vadd.f32 %v2478_v39, %v1892_v48  ;;  %13248 = vmatmul.msk.bf16.gmra.mxu2 %vm882_vm5, %v14592_v17  ;;  %v16020_v33 = vpop.f32.mrf.mxu1  ;;  %v13069_v17 = vld [vmem:[%s15246_s20 + $0xc0] sm:$0xf]  ;;  %v2794_v48 = vpack.c.b16 %v2777_v42, %v2776_v52 }
 0x1c3   : > { %v2325_v21 = vshrl.u32 %v13069_v17, 16  ;;  %v2328_v30 = vshll.u32 %v13069_v17, 16 }
 0x1c4   : > { %v2944_v27 = vadd.f32 %v15952_v41, %v2546_v45  ;;  %v2483_v39 = vpop.f32.mrf.mxu0  ;;  %v2308_v41 = vrot.slane %v2307_v44, 4  ;;  %v2741_v45 = vrot.slane %v13070_v49, 5  ;;  %v2323_v44 = vsel %vm15272_vm7, %v2318_v46, %v2322_v11  ;;  %v4593_v11 = vld [vmem:[%s16048_s18] sm:$0xf] }
 0x1c5   : > { %v16023_v23 = vpop.f32.mrf.mxu2  ;;  %v2330_v3 = vrot.slane %v2328_v30, 5  ;;  %v2379_v46 = vunpack.c.l.b16 %v2323_v44 }
 0x1c6   : > { %v16026_v13 = vadd.f32 %v15977_v38, %v2944_v27  ;;  %v2334_v38 = vshll.u32 %v13070_v49, 16  ;;  %v14593_v27 = vld [vmem:[%s15246_s20 + $0xc0] sm:$0xff]  ;;  %v2743_v49 = vrot.slane %v2741_v45, 4 }
 0x1c7   : > { %v1826_v9 = vpop.f32.mrf.mxu3  ;;  %13086 = vmatmul.msk.bf16.gmra.mxu0 %vm882_vm5, %v2395_v58 }
 0x1c8   : > { %20026 = vst [vmem:[#allocation15_spill] sm:$0xff] %v16026_v13  ;;  %v1893_v31 = vadd.f32 %v1826_v9, %v15651_v26  ;;  %v13104_v26 = vld [vmem:[%s15246_s20 + $0xc0] sm:$0xe]  ;;  %v16053_v52 = vrot.slane %v2334_v38, 5  ;;  %v2340_v9 = vrot.slane %v2338_v47, 4  ;;  %v2344_v38 = vshll.u32 %v13071_v37, 16 }
 0x1c9   : > { %v13120_v17 = vrot.slane %v13104_v26, 9 }
 0x1ca   : > { %v2547_v34 = vadd.f32 %v2480_v50, %v1893_v31  ;;  %v16034_v56 = vpop.f32.mrf.mxu1  ;;  %v2313_v50 = vsel %vm15272_vm7, %v2308_v41, %v2312_v16  ;;  %v2744_v31 = vrot.slane %v13071_v37, 5 }
 0x1cb   : > { %v2378_v41 = vunpack.c.l.b16 %v2313_v50  ;;  %v2742_v47 = vsel %vm15248_vm3, %v13120_v17, %v2741_v45  ;;  %v4645_v50 = vshll.u32 %v4593_v11, 16 }
 0x1cc   : > { %13021 = vmatmul.msk.bf16.gmra.mxu3 %vm882_vm5, %v14576_v29  ;;  %v2945_v6 = vadd.f32 %v15970_v54, %v2547_v34  ;;  %v2485_v57 = vpop.f32.mrf.mxu0  ;;  %v2327_v54 = vrot.slane %v2325_v21, 4  ;;  %v4594_v21 = vld [vmem:[%s16048_s18 + $0x4] sm:$0xf]  ;;  %v2745_v26 = vsel %vm15248_vm3, %v2743_v49, %v2744_v31  ;;  %v2778_v37 = vunpack.c.l.b16 %v2742_v47 }
 0x1cd   : > { %v16039_v58 = vpop.f32.mrf.mxu2  ;;  %13136 = vmatmul.msk.bf16.gmra.mxu1 %vm882_vm5, %v2794_v48  ;;  %v2346_v49 = vrot.slane %v2344_v38, 5 }
 0x1ce   : > { %v16056_v16 = vadd.f32 %v16000_v25, %v2945_v6  ;;  %v2331_v34 = vor.u32 %v2330_v3, %v2327_v54  ;;  %v2341_v25 = vor.u32 %v2340_v9, %v16053_v52  ;;  %v4642_v6 = vshrl.u32 %v4593_v11, 16 }
 0x1cf   : > { %v1829_v42 = vpop.f32.mrf.mxu3  ;;  %v4651_v54 = vshll.u32 %v4594_v21, 16  ;;  %v4655_v3 = vshrl.u32 %v4594_v21, 16 }
 0x1d0   : > { %20028 = vst [vmem:[#allocation16_spill] sm:$0xff] %v16056_v16  ;;  %v1894_v29 = vadd.f32 %v1829_v42, %v15661_v55  ;;  %v2396_v55 = vpack.c.b16 %v2379_v46, %v2378_v41  ;;  %v2779_v42 = vunpack.c.l.b16 %v2745_v26  ;;  %v2332_v9 = vrot.slane %v2331_v34, 4  ;;  %v13251_v46 = vld [vmem:[%s15246_s20 + $0x18] sm:$0xf]  ;;  %v16083_v26 = vld [vmem:[%s15246_s20 + $0x1c] sm:$0xf] }
 0x1d1   : > { %v2342_v17 = vrot.slane %v2341_v25, 4  ;;  %v4647_v41 = vrot.slane %v4645_v50, 5  ;;  %v16080_v21 = vrot.slane %v4651_v54, 5  ;;  %v4657_v47 = vrot.slane %v4655_v3, 4  ;;  %v4596_v16 = vld [vmem:[%s16048_s18 + $0xc] sm:$0xf] }
 0x1d2   : > { %v2548_v48 = vadd.f32 %v2483_v39, %v1894_v29  ;;  %13249 = vmatmul.msk.bf16.gmra.mxu2 %vm882_vm5, %v14593_v27  ;;  %v16062_v30 = vpop.f32.mrf.mxu1  ;;  %v14577_v29 = vld [vmem:[%s15246_s20 + $0xb4] sm:$0xff]  ;;  %v2795_v25 = vpack.c.b16 %v2779_v42, %v2778_v37  ;;  %v3313_v54 = vshll.u32 %v16083_v26, 16 }
 0x1d3   : > { %v4658_v42 = vor.u32 %v4657_v47, %v16080_v21 }
 0x1d4   : > { %v2946_v39 = vadd.f32 %v15987_v24, %v2548_v48  ;;  %v2488_v44 = vpop.f32.mrf.mxu0  ;;  %v4644_v24 = vrot.slane %v4642_v6, 4  ;;  %v4595_v48 = vld [vmem:[%s16048_s18 + $0x8] sm:$0x1]  ;;  %v3307_v6 = vshll.u32 %v13251_v46, 16 }
 0x1d5   : > { %v16070_v27 = vpop.f32.mrf.mxu2 }
 0x1d6   : > { %v16077_v11 = vadd.f32 %v16023_v23, %v2946_v39  ;;  %v3304_v23 = vshrl.u32 %v13251_v46, 16  ;;  %v4648_v50 = vor.u32 %v4647_v41, %v4644_v24  ;;  %v4661_v39 = vshll.u32 %v4595_v48, 16 }
 0x1d7   : > { %v1831_v45 = vpop.f32.mrf.mxu3  ;;  %13087 = vmatmul.msk.bf16.gmra.mxu0 %vm882_vm5, %v2396_v55  ;;  %v2347_v55 = vsel %vm15272_vm7, %v2342_v17, %v2346_v49  ;;  %v14594_v17 = vld [vmem:[%s15246_s20 + $0xcc] sm:$0xff]  ;;  %v3309_v41 = vrot.slane %v3307_v6, 5 }
 0x1d8   : > { %v1895_v31 = vadd.f32 %v1831_v45, %v15679_v22  ;;  %20029 = vst [vmem:[#allocation17_spill] sm:$0xff] %v16077_v11  ;;  %v2337_v22 = vsel %vm15272_vm7, %v2332_v9, %v16053_v52  ;;  %v3317_v45 = vshrl.u32 %v16083_v26, 16  ;;  %v3306_v24 = vrot.slane %v3304_v23, 4 }
 0x1d9   : > { %v4649_v48 = vrot.slane %v4648_v50, 4  ;;  %v4663_v47 = vrot.slane %v4661_v39, 5  ;;  %v4659_v11 = vrot.slane %v4658_v42, 4  ;;  %v3975_v23 = vrot.slane %v16083_v26, 5 }
 0x1da   : > { %v2549_v34 = vadd.f32 %v2485_v57, %v1895_v31  ;;  %v16085_v38 = vpop.f32.mrf.mxu1  ;;  %v13479_v57 = vld [vmem:[%s20013_s3 + $0x2c] sm:$0xf]  ;;  %v2380_v31 = vunpack.c.l.b16 %v2337_v22  ;;  %v13657_v22 = vld [vmem:[%s20013_s3 + $0x34] sm:$0xf]  ;;  %v4669_v42 = vshll.u32 %v4596_v16, 16 }
 0x1db   : > { %v5522_v9 = vsel %vm931_vm0, %v13479_v57, 0  ;;  %v16112_v57 = vrot.slane %v3313_v54, 5  ;;  %v6463_v50 = vsel %vm931_vm0, %v13657_v22, 0  ;;  %v13316_v54 = vld [vmem:[%s15246_s20 + $0x18] sm:$0xe] }
 0x1dc   : > { %13022 = vmatmul.msk.bf16.gmra.mxu3 %vm882_vm5, %v14577_v29  ;;  %v2947_v3 = vadd.f32 %v16020_v33, %v2549_v34  ;;  %v16098_v37 = vpop.f32.mrf.mxu0  ;;  %v2381_v29 = vunpack.c.l.b16 %v2347_v55  ;;  %v13253_v34 = vld [vmem:[%s15246_s20 + $0x20] sm:$0x1]  ;;  %6472 = vmatpush.bf16.msrb.mxu1 %v6463_v50  ;;  %v13332_v22 = vrot.slane %v13316_v54, 9 }
 0x1dd   : > { %v16100_v52 = vpop.f32.mrf.mxu2  ;;  %13137 = vmatmul.msk.bf16.gmra.mxu1 %vm882_vm5, %v2795_v25  ;;  %5531 = vmatpush.bf16.msrb.mxu3 %v5522_v9  ;;  %v3319_v25 = vrot.slane %v3317_v45, 4  ;;  %v4597_v9 = vld [vmem:[%s16048_s18 + $0x10] sm:$0xf]  ;;  %v14578_v50 = vld [vmem:[%s15246_s20 + $0xc0] sm:$0xff] }
 0x1de   : > { %v16108_v49 = vadd.f32 %v16039_v58, %v2947_v3  ;;  %v13706_v58 = vld [vmem:[%s20013_s3 + $0x38] sm:$0xf]  ;;  %v2397_v39 = vpack.c.b16 %v2381_v29, %v2380_v31  ;;  %v4666_v3 = vshrl.u32 %v4596_v16, 16  ;;  %v4675_v26 = vshll.u32 %v4597_v9, 16 }
 0x1df   : > { %v1834_v33 = vpop.f32.mrf.mxu3  ;;  %v3310_v31 = vor.u32 %v3309_v41, %v3306_v24  ;;  %v3320_v16 = vor.u32 %v3319_v25, %v16112_v57  ;;  %v13254_v24 = vld [vmem:[%s15246_s20 + $0x24] sm:$0xf] }
 0x1e0   : > { %20030 = vst [vmem:[#allocation18_spill] sm:$0xff] %v16108_v49  ;;  %v1896_v46 = vadd.f32 %v1834_v33, %v15691_v63  ;;  %v13528_v63 = vld [vmem:[%s20013_s3 + $0x30] sm:$0xf]  ;;  %v3323_v33 = vshll.u32 %v13253_v34, 16  ;;  %v4668_v49 = vrot.slane %v4666_v3, 4  ;;  %v16147_v15 = vrot.slane %v4675_v26, 5 }
 0x1e1   : > { %v5809_v6 = vsel %vm931_vm0, %v13528_v63, 0  ;;  %v4664_v63 = vsel %vm15272_vm7, %v4659_v11, %v4663_v47  ;;  %v3311_v54 = vrot.slane %v3310_v31, 4  ;;  %v3976_v3 = vsel %vm15248_vm3, %v13332_v22, %v3975_v23 }
 0x1e2   : > { %v2550_v13 = vadd.f32 %v2488_v44, %v1896_v46  ;;  %13250 = vmatmul.msk.bf16.gmra.mxu2 %vm882_vm5, %v14594_v17  ;;  %v16126_v55 = vpop.f32.mrf.mxu1  ;;  %v6861_v44 = vsel %vm931_vm0, %v13706_v58, 0  ;;  %5818 = vmatpush.bf16.msrb.mxu0 %v5809_v6  ;;  %v4679_v46 = vshrl.u32 %v4597_v9, 16  ;;  %v4654_v58 = vsel %vm15272_vm7, %v4649_v48, %v16080_v21 }
 0x1e3   : > { %6870 = vmatpush.bf16.msrb.mxu2 %v6861_v44  ;;  %v3977_v44 = vrot.slane %v3975_v23, 4  ;;  %v3978_v9 = vrot.slane %v13253_v34, 5  ;;  %v4671_v21 = vrot.slane %v4669_v42, 5  ;;  %v5027_v41 = vunpack.c.l.b16 %v4654_v58 }
 0x1e4   : > { %v16133_v45 = vpop.f32.mrf.mxu0  ;;  %v3325_v48 = vrot.slane %v3323_v33, 5  ;;  %v4681_v11 = vrot.slane %v4679_v46, 4  ;;  %v5028_v25 = vunpack.c.l.b16 %v4664_v63  ;;  %v3321_v34 = vrot.slane %v3320_v16, 4 }
 0x1e5   : > { %v16135_v17 = vpop.f32.mrf.mxu2  ;;  %v3328_v42 = vshrl.u32 %v13254_v24, 16  ;;  %v3331_v33 = vshll.u32 %v13254_v24, 16  ;;  %v4672_v26 = vor.u32 %v4671_v21, %v4668_v49  ;;  %v4685_v63 = vshll.u32 %v4598_v36, 16 }
 0x1e6   : > { %v4682_v31 = vor.u32 %v4681_v11, %v16147_v15  ;;  %v5059_v22 = vpack.c.b16 %v5028_v25, %v5027_v41  ;;  %v13256_v41 = vld [vmem:[%s15246_s20 + $0x2c] sm:$0x1]  ;;  %v4599_v25 = vld [vmem:[%s16048_s18 + $0x18] sm:$0xf] }
 0x1e7   : > { %v1836_v29 = vpop.f32.mrf.mxu3  ;;  %13088 = vmatmul.msk.bf16.gmra.mxu0 %vm882_vm5, %v2397_v39  ;;  %v3333_v36 = vrot.slane %v3331_v33, 5  ;;  %v3347_v33 = vshll.u32 %v13256_v41, 16 }
 0x1e8   : > { %v1897_v6 = vadd.f32 %v1836_v29, %v15707_v35  ;;  %v16153_v35 = vld [vmem:[%s15246_s20 + $0x28] sm:$0xf]  ;;  %v2948_v29 = vadd.f32 %v16034_v56, %v2550_v13  ;;  %v4683_v24 = vrot.slane %v4682_v31, 4 }
 0x1e9   : > { %v3337_v23 = vshll.u32 %v16153_v35, 16  ;;  %v3341_v16 = vshrl.u32 %v16153_v35, 16 }
 0x1ea   : > { %v2551_v47 = vadd.f32 %v16098_v37, %v1897_v6  ;;  %v16156_v39 = vpop.f32.mrf.mxu1  ;;  %v3979_v37 = vsel %vm15248_vm3, %v3977_v44, %v3978_v9  ;;  %v16164_v46 = vadd.f32 %v16070_v27, %v2948_v29  ;;  %v4087_v44 = vunpack.c.l.b16 %v3976_v3 }
 0x1eb   : > { %v3330_v6 = vrot.slane %v3328_v42, 4  ;;  %v3326_v9 = vsel %vm15272_vm7, %v3321_v34, %v3325_v48  ;;  %v4088_v21 = vunpack.c.l.b16 %v3979_v37  ;;  %v16183_v11 = vrot.slane %v3337_v23, 5  ;;  %v4600_v48 = vld [vmem:[%s16048_s18 + $0x1c] sm:$0xf]  ;;  %v13317_v37 = vld [vmem:[%s15246_s20 + $0x24] sm:$0xe] }
 0x1ec   : > { %13023 = vmatmul.msk.bf16.gmra.mxu3 %vm882_vm5, %v14578_v50  ;;  %v2949_v58 = vadd.f32 %v16062_v30, %v2551_v47  ;;  %v2495_v13 = vpop.f32.mrf.mxu0  ;;  %v3316_v30 = vsel %vm15272_vm7, %v3311_v54, %v16112_v57  ;;  %v3343_v47 = vrot.slane %v3341_v16, 4  ;;  %v4690_v23 = vshrl.u32 %v4599_v25, 16 }
 0x1ed   : > { %v16167_v56 = vpop.f32.mrf.mxu2  ;;  %13430 = vmatmul.msk.bf16.vlgmr.msra.gmra.mxu1 %vm882_vm5, %v14595_v19  ;;  %v4673_v19 = vrot.slane %v4672_v26, 4  ;;  %v3689_v54 = vunpack.c.l.b16 %v3316_v30  ;;  %v3334_v3 = vor.u32 %v3333_v36, %v3330_v6  ;;  %v4119_v34 = vpack.c.b16 %v4088_v21, %v4087_v44 }
 0x1ee   : > { %v16174_v49 = vadd.f32 %v16100_v52, %v2949_v58  ;;  %v4687_v52 = vrot.slane %v4685_v63, 5  ;;  %v3344_v31 = vor.u32 %v3343_v47, %v16183_v11  ;;  %v3982_v63 = vrot.slane %v16153_v35, 5 }
 0x1ef   : > { %v1839_v27 = vpop.f32.mrf.mxu3  ;;  %v4678_v42 = vsel %vm15272_vm7, %v4673_v19, %v16147_v15  ;;  %v4693_v16 = vshll.u32 %v4599_v25, 16  ;;  %v3335_v6 = vrot.slane %v3334_v3, 4  ;;  %v13333_v36 = vrot.slane %v13317_v37, 9 }
 0x1f0   : > { %20031 = vst [vmem:[#allocation19_spill] sm:$0xff] %v16174_v49  ;;  %v1898_v50 = vadd.f32 %v1839_v27, %v15718_v5  ;;  %v3690_v5 = vunpack.c.l.b16 %v3326_v9  ;;  %v4703_v27 = vshrl.u32 %v4600_v48, 16  ;;  %v5029_v44 = vunpack.c.l.b16 %v4678_v42  ;;  %v14596_v49 = vld [vmem:[%s16048_s18 + $0xc] sm:$0xff]  ;;  %v4601_v42 = vld [vmem:[%s16048_s18 + $0x20] sm:$0x1] }
 0x1f1   : > { %v3349_v21 = vrot.slane %v3347_v33, 5  ;;  %v3985_v19 = vrot.slane %v13256_v41, 5  ;;  %v3345_v35 = vrot.slane %v3344_v31, 4  ;;  %v4692_v47 = vrot.slane %v4690_v23, 4 }
 0x1f2   : > { %v2552_v57 = vadd.f32 %v16133_v45, %v1898_v50  ;;  %13447 = vmatmul.msk.bf16.vlgmr.msra.gmra.mxu2 %vm882_vm5, %v5059_v22  ;;  %v16188_v29 = vpop.f32.mrf.mxu1  ;;  %v4688_v45 = vsel %vm15272_vm7, %v4683_v24, %v4687_v52  ;;  %v4699_v22 = vshll.u32 %v4600_v48, 16  ;;  %v3721_v15 = vpack.c.b16 %v3690_v5, %v3689_v54  ;;  %v13257_v24 = vld [vmem:[%s15246_s20 + $0x30] sm:$0xf] }
 0x1f3   : > { %v5030_v9 = vunpack.c.l.b16 %v4688_v45  ;;  %v3984_v52 = vrot.slane %v3982_v63, 4  ;;  %v4695_v54 = vrot.slane %v4693_v16, 5  ;;  %v4705_v3 = vrot.slane %v4703_v27, 4  ;;  %v16228_v16 = vld [vmem:[%s15246_s20 + $0x34] sm:$0xf] }
 0x1f4   : > { %v2498_v26 = vpop.f32.mrf.mxu0  ;;  %v2950_v25 = vadd.f32 %v16085_v38, %v2552_v57  ;;  %v16206_v5 = vrot.slane %v4699_v22, 5  ;;  %v3355_v37 = vshll.u32 %v13257_v24, 16  ;;  %v3983_v38 = vsel %vm15248_vm3, %v13333_v36, %v3982_v63 }
 0x1f5   : > { %v16195_v58 = vpop.f32.mrf.mxu2  ;;  %v5060_v45 = vpack.c.b16 %v5030_v9, %v5029_v44  ;;  %v3340_v31 = vsel %vm15272_vm7, %v3335_v6, %v16183_v11  ;;  %v3350_v23 = vsel %vm15272_vm7, %v3345_v35, %v3349_v21  ;;  %v4696_v63 = vor.u32 %v4695_v54, %v4692_v47 }
 0x1f6   : > { %v16212_v41 = vadd.f32 %v16135_v17, %v2950_v25  ;;  %v3986_v17 = vsel %vm15248_vm3, %v3984_v52, %v3985_v19  ;;  %v4709_v22 = vshll.u32 %v4601_v42, 16  ;;  %v3357_v44 = vrot.slane %v3355_v37, 5  ;;  %v4602_v25 = vld [vmem:[%s16048_s18 + $0x24] sm:$0xf]  ;;  %v4603_v42 = vld [vmem:[%s16048_s18 + $0x28] sm:$0xf] }
 0x1f7   : > { %v1841_v30 = vpop.f32.mrf.mxu3  ;;  %13349 = vmatmul.msk.bf16.vlgmr.msra.gmra.mxu0 %vm882_vm5, %v4119_v34  ;;  %v3352_v34 = vshrl.u32 %v13257_v24, 16  ;;  %v4090_v36 = vunpack.c.l.b16 %v3986_v17  ;;  %v3691_v9 = vunpack.c.l.b16 %v3340_v31  ;;  %v3692_v21 = vunpack.c.l.b16 %v3350_v23 }
 0x1f8   : > { %v1899_v50 = vadd.f32 %v1841_v30, %v15735_v51  ;;  %v4711_v35 = vrot.slane %v4709_v22, 5  ;;  %v4714_v17 = vshrl.u32 %v4602_v25, 16 }
 0x1f9   : > { %v3354_v11 = vrot.slane %v3352_v34, 4 }
 0x1fa   : > { %v2553_v48 = vadd.f32 %v2495_v13, %v1899_v50  ;;  %v16208_v51 = vpop.f32.mrf.mxu1  ;;  %v3361_v50 = vshll.u32 %v16228_v16, 16 }
 0x1fb   : > { %v3358_v47 = vor.u32 %v3357_v44, %v3354_v11 }
 0x1fc   : > { %13300 = vmatmul.msk.bf16.vlgmr.msra.gmra.mxu3 %vm882_vm5, %v3721_v15  ;;  %v2951_v13 = vadd.f32 %v16126_v55, %v2553_v48  ;;  %v2500_v57 = vpop.f32.mrf.mxu0  ;;  %v4706_v55 = vor.u32 %v4705_v3, %v16206_v5  ;;  %v4089_v15 = vunpack.c.l.b16 %v3983_v38  ;;  %v13259_v48 = vld [vmem:[%s15246_s20 + $0x38] sm:$0x1]  ;;  %v16243_v54 = vrot.slane %v3361_v50, 5 }
 0x1fd   : > { %v16218_v33 = vpop.f32.mrf.mxu2  ;;  %13431 = vmatmul.msk.bf16.gmra.mxu1 %vm882_vm5, %v14596_v49  ;;  %v3365_v49 = vshrl.u32 %v16228_v16, 16  ;;  %v3359_v22 = vrot.slane %v3358_v47, 4 }
 0x1fe   : > { %v16233_v27 = vadd.f32 %v16167_v56, %v2951_v13  ;;  %v4697_v56 = vrot.slane %v4696_v63, 4  ;;  %v4707_v24 = vrot.slane %v4706_v55, 4  ;;  %v13318_v13 = vld [vmem:[%s15246_s20 + $0x30] sm:$0xe]  ;;  %v4717_v63 = vshll.u32 %v4602_v25, 16 }
 0x1ff   : > { %v1844_v30 = vpop.f32.mrf.mxu3  ;;  %v3367_v3 = vrot.slane %v3365_v49, 4  ;;  %v3992_v49 = vrot.slane %v13259_v48, 5 }
 0x200   : > { %v1900_v6 = vadd.f32 %v1844_v30, %v15745_v28  ;;  %v4120_v28 = vpack.c.b16 %v4090_v36, %v4089_v15  ;;  %v4702_v31 = vsel %vm15272_vm7, %v4697_v56, %v16206_v5  ;;  %v4712_v23 = vsel %vm15272_vm7, %v4707_v24, %v4711_v35  ;;  %v13260_v24 = vld [vmem:[%s15246_s20 + $0x3c] sm:$0xf] }
 0x201   : > { %v4723_v30 = vshll.u32 %v4603_v42, 16  ;;  %v4727_v15 = vshrl.u32 %v4603_v42, 16  ;;  %v13334_v5 = vrot.slane %v13318_v13, 9  ;;  %v5032_v36 = vunpack.c.l.b16 %v4712_v23 }
 0x202   : > { %v2554_v19 = vadd.f32 %v2498_v26, %v1900_v6  ;;  %13448 = vmatmul.msk.bf16.gmra.mxu2 %vm882_vm5, %v5060_v45  ;;  %v16239_v52 = vpop.f32.mrf.mxu1  ;;  %v3722_v26 = vpack.c.b16 %v3692_v21, %v3691_v9  ;;  %v3989_v45 = vrot.slane %v16228_v16, 5  ;;  %v3368_v16 = vor.u32 %v3367_v3, %v16243_v54  ;;  %v14597_v21 = vld [vmem:[%s16048_s18 + $0x18] sm:$0xff]  ;;  %v4604_v3 = vld [vmem:[%s16048_s18 + $0x2c] sm:$0x1] }
 0x203   : > { %v5031_v6 = vunpack.c.l.b16 %v4702_v31  ;;  %v4719_v56 = vrot.slane %v4717_v63, 5  ;;  %v16266_v47 = vrot.slane %v4723_v30, 5  ;;  %v4729_v25 = vrot.slane %v4727_v15, 4 }
 0x204   : > { %v2952_v34 = vadd.f32 %v16156_v39, %v2554_v19  ;;  %v2503_v37 = vpop.f32.mrf.mxu0  ;;  %v3371_v39 = vshll.u32 %v13259_v48, 16  ;;  %v3991_v50 = vrot.slane %v3989_v45, 4  ;;  %v4716_v19 = vrot.slane %v4714_v17, 4 }
 0x205   : > { %v16247_v38 = vpop.f32.mrf.mxu2  ;;  %v3369_v48 = vrot.slane %v3368_v16, 4  ;;  %v5061_v31 = vpack.c.b16 %v5032_v36, %v5031_v6  ;;  %v3379_v17 = vshll.u32 %v13260_v24, 16  ;;  %v4605_v16 = vld [vmem:[%s16048_s18 + $0x30] sm:$0xf] }
 0x206   : > { %v16260_v44 = vadd.f32 %v16195_v58, %v2952_v34  ;;  %v3373_v35 = vrot.slane %v3371_v39, 5  ;;  %v3364_v58 = vsel %vm15272_vm7, %v3359_v22, %v16243_v54  ;;  %v3993_v23 = vsel %vm15248_vm3, %v3991_v50, %v3992_v49 }
 0x207   : > { %v1846_v55 = vpop.f32.mrf.mxu3  ;;  %13350 = vmatmul.msk.bf16.gmra.mxu0 %vm882_vm5, %v4120_v28  ;;  %v16269_v28 = vld [vmem:[%s15246_s20 + $0x40] sm:$0xf]  ;;  %v4720_v54 = vor.u32 %v4719_v56, %v4716_v19  ;;  %v4730_v22 = vor.u32 %v4729_v25, %v16266_v47  ;;  %v4733_v39 = vshll.u32 %v4604_v3, 16  ;;  %v3693_v6 = vunpack.c.l.b16 %v3364_v58  ;;  %v4606_v19 = vld [vmem:[%s16048_s18 + $0x34] sm:$0xf] }
 0x208   : > { %v1901_v11 = vadd.f32 %v1846_v55, %v15763_v61  ;;  %v3385_v63 = vshll.u32 %v16269_v28, 16  ;;  %v3381_v50 = vrot.slane %v3379_v17, 5  ;;  %v13262_v25 = vld [vmem:[%s15246_s20 + $0x44] sm:$0x1]  ;;  %v4741_v3 = vshll.u32 %v4605_v16, 16 }
 0x209   : > { %v4721_v49 = vrot.slane %v4720_v54, 4  ;;  %v4731_v56 = vrot.slane %v4730_v22, 4  ;;  %v4751_v17 = vshrl.u32 %v4606_v19, 16 }
 0x20a   : > { %v2555_v9 = vadd.f32 %v2500_v57, %v1901_v11  ;;  %v16264_v61 = vpop.f32.mrf.mxu1  ;;  %v3990_v57 = vsel %vm15248_vm3, %v13334_v5, %v3989_v45  ;;  %v3389_v45 = vshrl.u32 %v16269_v28, 16  ;;  %v4092_v11 = vunpack.c.l.b16 %v3993_v23 }
 0x20b   : > { %v4091_v15 = vunpack.c.l.b16 %v3990_v57  ;;  %v3374_v5 = vsel %vm15272_vm7, %v3369_v48, %v3373_v35  ;;  %v4738_v57 = vshrl.u32 %v4605_v16, 16  ;;  %v13319_v48 = vld [vmem:[%s15246_s20 + $0x3c] sm:$0xe]  ;;  %v4726_v54 = vsel %vm15272_vm7, %v4721_v49, %v16266_v47 }
 0x20c   : > { %13301 = vmatmul.msk.bf16.gmra.mxu3 %vm882_vm5, %v3722_v26  ;;  %v2953_v42 = vadd.f32 %v16188_v29, %v2555_v9  ;;  %v2505_v34 = vpop.f32.mrf.mxu0  ;;  %v3376_v26 = vshrl.u32 %v13260_v24, 16  ;;  %v16295_v9 = vrot.slane %v3385_v63, 5  ;;  %v4735_v24 = vrot.slane %v4733_v39, 5 }
 0x20d   : > { %v16279_v13 = vpop.f32.mrf.mxu2  ;;  %13432 = vmatmul.msk.bf16.gmra.mxu1 %vm882_vm5, %v14597_v21  ;;  %v3391_v21 = vrot.slane %v3389_v45, 4  ;;  %v3694_v35 = vunpack.c.l.b16 %v3374_v5  ;;  %v4121_v58 = vpack.c.b16 %v4092_v11, %v4091_v15  ;;  %v13335_v39 = vrot.slane %v13319_v48, 9 }
 0x20e   : > { %v16287_v55 = vadd.f32 %v16218_v33, %v2953_v42  ;;  %v3378_v36 = vrot.slane %v3376_v26, 4  ;;  %v3996_v42 = vrot.slane %v16269_v28, 5  ;;  %v4747_v26 = vshll.u32 %v4606_v19, 16 }
 0x20f   : > { %v1849_v29 = vpop.f32.mrf.mxu3  ;;  %v3392_v45 = vor.u32 %v3391_v21, %v16295_v9  ;;  %v4736_v28 = vsel %vm15272_vm7, %v4731_v56, %v4735_v24  ;;  %v3723_v11 = vpack.c.b16 %v3694_v35, %v3693_v6  ;;  %v3999_v16 = vrot.slane %v13262_v25, 5  ;;  %v14598_v24 = vld [vmem:[%s16048_s18 + $0x24] sm:$0xff] }
 0x210   : > { %v1902_v30 = vadd.f32 %v1849_v29, %v15775_v18  ;;  %v3382_v63 = vor.u32 %v3381_v50, %v3378_v36  ;;  %v3395_v29 = vshll.u32 %v13262_v25, 16  ;;  %v3998_v47 = vrot.slane %v3996_v42, 4  ;;  %v13263_v50 = vld [vmem:[%s15246_s20 + $0x48] sm:$0xf] }
 0x211   : > { %v16314_v5 = vrot.slane %v4747_v26, 5  ;;  %v4753_v36 = vrot.slane %v4751_v17, 4  ;;  %v5033_v21 = vunpack.c.l.b16 %v4726_v54  ;;  %v5034_v19 = vunpack.c.l.b16 %v4736_v28 }
 0x212   : > { %v2556_v33 = vadd.f32 %v2503_v37, %v1902_v30  ;;  %13449 = vmatmul.msk.bf16.gmra.mxu2 %vm882_vm5, %v5061_v31  ;;  %v16298_v18 = vpop.f32.mrf.mxu1  ;;  %v4743_v30 = vrot.slane %v4741_v3, 5  ;;  %v3397_v56 = vrot.slane %v3395_v29, 5  ;;  %v16323_v3 = vld [vmem:[%s15246_s20 + $0x4c] sm:$0xf]  ;;  %v3383_v6 = vrot.slane %v3382_v63, 4 }
 0x213   : > { %v3393_v35 = vrot.slane %v3392_v45, 4  ;;  %v3997_v25 = vsel %vm15248_vm3, %v13335_v39, %v3996_v42  ;;  %v3403_v48 = vshll.u32 %v13263_v50, 16  ;;  %v4754_v54 = vor.u32 %v4753_v36, %v16314_v5 }
 0x214   : > { %v2954_v37 = vadd.f32 %v16208_v51, %v2556_v33  ;;  %v2508_v31 = vpop.f32.mrf.mxu0  ;;  %v4740_v51 = vrot.slane %v4738_v57, 4  ;;  %v4607_v57 = vld [vmem:[%s16048_s18 + $0x38] sm:$0x1]  ;;  %v3409_v45 = vshll.u32 %v16323_v3, 16  ;;  %v3413_v42 = vshrl.u32 %v16323_v3, 16 }
 0x215   : > { %v16304_v23 = vpop.f32.mrf.mxu2  ;;  %v4757_v63 = vshll.u32 %v4607_v57, 16  ;;  %v5062_v29 = vpack.c.b16 %v5034_v19, %v5033_v21  ;;  %v3398_v39 = vsel %vm15272_vm7, %v3393_v35, %v3397_v56  ;;  %v4755_v36 = vrot.slane %v4754_v54, 4  ;;  %v13320_v57 = vld [vmem:[%s15246_s20 + $0x48] sm:$0xe] }
 0x216   : > { %v16318_v33 = vadd.f32 %v16247_v38, %v2954_v37  ;;  %v4000_v38 = vsel %vm15248_vm3, %v3998_v47, %v3999_v16  ;;  %v3405_v16 = vrot.slane %v3403_v48, 5  ;;  %v3415_v21 = vrot.slane %v3413_v42, 4 }
 0x217   : > { %v1851_v22 = vpop.f32.mrf.mxu3  ;;  %13351 = vmatmul.msk.bf16.gmra.mxu0 %vm882_vm5, %v4121_v58  ;;  %v4744_v58 = vor.u32 %v4743_v30, %v4740_v51  ;;  %v4093_v51 = vunpack.c.l.b16 %v3997_v25  ;;  %v3696_v56 = vunpack.c.l.b16 %v3398_v39  ;;  %v13336_v42 = vrot.slane %v13320_v57, 9 }
 0x218   : > { %v1903_v15 = vadd.f32 %v1851_v22, %v15791_v60 }
 0x219   : > { %v4745_v30 = vrot.slane %v4744_v58, 4  ;;  %v4608_v58 = vld [vmem:[%s16048_s18 + $0x3c] sm:$0xf] }
 0x21a   : > { %v2557_v49 = vadd.f32 %v2505_v34, %v1903_v15  ;;  %v16325_v60 = vpop.f32.mrf.mxu1  ;;  %v3400_v34 = vshrl.u32 %v13263_v50, 16  ;;  %v13265_v50 = vld [vmem:[%s15246_s20 + $0x50] sm:$0x1] }
 0x21b   : > { %v3419_v25 = vshll.u32 %v13265_v50, 16 }
 0x21c   : > { %13302 = vmatmul.msk.bf16.gmra.mxu3 %vm882_vm5, %v3723_v11  ;;  %v2955_v37 = vadd.f32 %v16239_v52, %v2557_v49  ;;  %v2510_v26 = vpop.f32.mrf.mxu0  ;;  %v3388_v52 = vsel %vm15272_vm7, %v3383_v6, %v16295_v9  ;;  %v4094_v11 = vunpack.c.l.b16 %v4000_v38  ;;  %v3402_v47 = vrot.slane %v3400_v34, 4  ;;  %v4609_v38 = vld [vmem:[%s16048_s18 + $0x40] sm:$0xf] }
 0x21d   : > { %v16333_v17 = vpop.f32.mrf.mxu2  ;;  %13433 = vmatmul.msk.bf16.gmra.mxu1 %vm882_vm5, %v14598_v24  ;;  %v16349_v49 = vrot.slane %v3409_v45, 5  ;;  %v3695_v19 = vunpack.c.l.b16 %v3388_v52  ;;  %v4765_v52 = vshll.u32 %v4608_v58, 16  ;;  %v4771_v39 = vshll.u32 %v4609_v38, 16 }
 0x21e   : > { %v16340_v22 = vadd.f32 %v16279_v13, %v2955_v37  ;;  %v4759_v13 = vrot.slane %v4757_v63, 5  ;;  %v4122_v6 = vpack.c.b16 %v4094_v11, %v4093_v51  ;;  %v3406_v35 = vor.u32 %v3405_v16, %v3402_v47 }
 0x21f   : > { %v1854_v28 = vpop.f32.mrf.mxu3  ;;  %v3416_v54 = vor.u32 %v3415_v21, %v16349_v49  ;;  %v4003_v63 = vrot.slane %v16323_v3, 5  ;;  %v3724_v45 = vpack.c.b16 %v3696_v56, %v3695_v19  ;;  %v3421_v11 = vrot.slane %v3419_v25, 5  ;;  %v14599_v21 = vld [vmem:[%s16048_s18 + $0x30] sm:$0xff] }
 0x220   : > { %v1904_v15 = vadd.f32 %v1854_v28, %v15802_v53  ;;  %v4750_v53 = vsel %vm15272_vm7, %v4745_v30, %v16314_v5  ;;  %v4760_v37 = vsel %vm15272_vm7, %v4755_v36, %v4759_v13  ;;  %v4762_v28 = vshrl.u32 %v4608_v58, 16 }
 0x221   : > { %v5035_v5 = vunpack.c.l.b16 %v4750_v53  ;;  %v5036_v30 = vunpack.c.l.b16 %v4760_v37  ;;  %v3417_v3 = vrot.slane %v3416_v54, 4  ;;  %v4005_v47 = vrot.slane %v4003_v63, 4 }
 0x222   : > { %v2558_v9 = vadd.f32 %v2508_v31, %v1904_v15  ;;  %13450 = vmatmul.msk.bf16.gmra.mxu2 %vm882_vm5, %v5062_v29  ;;  %v16352_v24 = vpop.f32.mrf.mxu1  ;;  %v3407_v15 = vrot.slane %v3406_v35, 4  ;;  %v4006_v16 = vrot.slane %v13265_v50, 5  ;;  %v4764_v56 = vrot.slane %v4762_v28, 4  ;;  %v4610_v35 = vld [vmem:[%s16048_s18 + $0x44] sm:$0x1] }
 0x223   : > { %v16376_v53 = vrot.slane %v4771_v39, 5  ;;  %v4004_v50 = vsel %vm15248_vm3, %v13336_v42, %v4003_v63  ;;  %v5063_v58 = vpack.c.b16 %v5036_v30, %v5035_v5 }
 0x224   : > { %v2956_v34 = vadd.f32 %v16264_v61, %v2558_v9  ;;  %v2513_v48 = vpop.f32.mrf.mxu0  ;;  %v4775_v61 = vshrl.u32 %v4609_v38, 16  ;;  %v13266_v9 = vld [vmem:[%s15246_s20 + $0x54] sm:$0xf]  ;;  %v3412_v38 = vsel %vm15272_vm7, %v3407_v15, %v16349_v49  ;;  %v4007_v37 = vsel %vm15248_vm3, %v4005_v47, %v4006_v16  ;;  %v4611_v15 = vld [vmem:[%s16048_s18 + $0x48] sm:$0xf] }
 0x225   : > { %v16361_v31 = vpop.f32.mrf.mxu2  ;;  %v3424_v54 = vshrl.u32 %v13266_v9, 16  ;;  %v3427_v63 = vshll.u32 %v13266_v9, 16  ;;  %v4095_v39 = vunpack.c.l.b16 %v4004_v50  ;;  %v4612_v16 = vld [vmem:[%s16048_s18 + $0x4c] sm:$0xf]  ;;  %v13321_v50 = vld [vmem:[%s15246_s20 + $0x54] sm:$0xe] }
 0x226   : > { %v16370_v36 = vadd.f32 %v16304_v23, %v2956_v34  ;;  %v4777_v57 = vrot.slane %v4775_v61, 4  ;;  %v3422_v34 = vsel %vm15272_vm7, %v3417_v3, %v3421_v11  ;;  %v4096_v61 = vunpack.c.l.b16 %v4007_v37 }
 0x227   : > { %v1856_v29 = vpop.f32.mrf.mxu3  ;;  %13352 = vmatmul.msk.bf16.gmra.mxu0 %vm882_vm5, %v4122_v6  ;;  %v16379_v6 = vld [vmem:[%s15246_s20 + $0x58] sm:$0xf]  ;;  %v3698_v30 = vunpack.c.l.b16 %v3422_v34  ;;  %v3429_v3 = vrot.slane %v3427_v63, 5  ;;  %v4789_v34 = vshll.u32 %v4611_v15, 16  ;;  %v4795_v37 = vshll.u32 %v4612_v16, 16 }
 0x228   : > { %v1905_v51 = vadd.f32 %v1856_v29, %v15819_v40  ;;  %v4767_v40 = vrot.slane %v4765_v52, 5  ;;  %v4778_v49 = vor.u32 %v4777_v57, %v16376_v53  ;;  %v4781_v29 = vshll.u32 %v4610_v35, 16 }
 0x229   : > { %v3437_v28 = vshrl.u32 %v16379_v6, 16  ;;  %v4123_v57 = vpack.c.b16 %v4096_v61, %v4095_v39  ;;  %v4010_v35 = vrot.slane %v16379_v6, 5 }
 0x22a   : > { %v2559_v13 = vadd.f32 %v2510_v26, %v1905_v51  ;;  %v16374_v19 = vpop.f32.mrf.mxu1  ;;  %v4768_v42 = vor.u32 %v4767_v40, %v4764_v56  ;;  %v3697_v51 = vunpack.c.l.b16 %v3412_v38  ;;  %v4779_v9 = vrot.slane %v4778_v49, 4  ;;  %v13268_v56 = vld [vmem:[%s15246_s20 + $0x5c] sm:$0x1] }
 0x22b   : > { %v3439_v40 = vrot.slane %v3437_v28, 4  ;;  %v4013_v39 = vrot.slane %v13268_v56, 5 }
 0x22c   : > { %13303 = vmatmul.msk.bf16.gmra.mxu3 %vm882_vm5, %v3724_v45  ;;  %v2957_v23 = vadd.f32 %v16298_v18, %v2559_v13  ;;  %v2515_v26 = vpop.f32.mrf.mxu0  ;;  %v3433_v18 = vshll.u32 %v16379_v6, 16  ;;  %v3725_v63 = vpack.c.b16 %v3698_v30, %v3697_v51  ;;  %v4791_v51 = vrot.slane %v4789_v34, 5 }
 0x22d   : > { %v16386_v25 = vpop.f32.mrf.mxu2  ;;  %13434 = vmatmul.msk.bf16.gmra.mxu1 %vm882_vm5, %v14599_v21  ;;  %v4769_v21 = vrot.slane %v4768_v42, 4  ;;  %v16424_v30 = vrot.slane %v4795_v37, 5 }
 0x22e   : > { %v16398_v45 = vadd.f32 %v16333_v17, %v2957_v23  ;;  %v3426_v17 = vrot.slane %v3424_v54, 4  ;;  %v16405_v47 = vrot.slane %v3433_v18, 5  ;;  %v4786_v23 = vshrl.u32 %v4611_v15, 16  ;;  %v13269_v15 = vld [vmem:[%s15246_s20 + $0x60] sm:$0xf] }
 0x22f   : > { %v1859_v5 = vpop.f32.mrf.mxu3  ;;  %v4799_v54 = vshrl.u32 %v4612_v16, 16  ;;  %v4774_v49 = vsel %vm15272_vm7, %v4769_v21, %v16376_v53 }
 0x230   : > { %v1906_v52 = vadd.f32 %v1859_v5, %v15829_v62  ;;  %v4783_v62 = vrot.slane %v4781_v29, 5  ;;  %v3430_v18 = vor.u32 %v3429_v3, %v3426_v17  ;;  %v3443_v5 = vshll.u32 %v13268_v56, 16 }
 0x231   : > { %v13337_v29 = vrot.slane %v13321_v50, 9  ;;  %v4788_v61 = vrot.slane %v4786_v23, 4  ;;  %v4801_v53 = vrot.slane %v4799_v54, 4  ;;  %v5037_v3 = vunpack.c.l.b16 %v4774_v49  ;;  %v16438_v50 = vld [vmem:[%s15246_s20 + $0x64] sm:$0xf] }
 0x232   : > { %v2560_v11 = vadd.f32 %v2513_v48, %v1906_v52  ;;  %13451 = vmatmul.msk.bf16.gmra.mxu2 %vm882_vm5, %v5063_v58  ;;  %v16408_v13 = vpop.f32.mrf.mxu1  ;;  %v4784_v6 = vsel %vm15272_vm7, %v4779_v9, %v4783_v62  ;;  %v4012_v52 = vrot.slane %v4010_v35, 4  ;;  %v3431_v21 = vrot.slane %v3430_v18, 4  ;;  %v14600_v9 = vld [vmem:[%s16048_s18 + $0x3c] sm:$0xff] }
 0x233   : > { %v5038_v16 = vunpack.c.l.b16 %v4784_v6  ;;  %v3445_v56 = vrot.slane %v3443_v5, 5  ;;  %v3448_v23 = vshrl.u32 %v13269_v15, 16  ;;  %v4792_v54 = vor.u32 %v4791_v51, %v4788_v61 }
 0x234   : > { %v2958_v48 = vadd.f32 %v16325_v60, %v2560_v11  ;;  %v2518_v58 = vpop.f32.mrf.mxu0  ;;  %v3440_v60 = vor.u32 %v3439_v40, %v16405_v47  ;;  %v4014_v37 = vsel %vm15248_vm3, %v4012_v52, %v4013_v39  ;;  %v4802_v18 = vor.u32 %v4801_v53, %v16424_v30 }
 0x235   : > { %v16414_v38 = vpop.f32.mrf.mxu2  ;;  %v4098_v52 = vunpack.c.l.b16 %v4014_v37  ;;  %v4793_v61 = vrot.slane %v4792_v54, 4  ;;  %v4017_v54 = vrot.slane %v16438_v50, 5 }
 0x236   : > { %v16428_v11 = vadd.f32 %v16361_v31, %v2958_v48  ;;  %v3441_v40 = vrot.slane %v3440_v60, 4  ;;  %v3451_v31 = vshll.u32 %v13269_v15, 16  ;;  %v3457_v60 = vshll.u32 %v16438_v50, 16  ;;  %v4614_v15 = vld [vmem:[%s16048_s18 + $0x54] sm:$0xf] }
 0x237   : > { %v1861_v42 = vpop.f32.mrf.mxu3  ;;  %13353 = vmatmul.msk.bf16.gmra.mxu0 %vm882_vm5, %v4123_v57  ;;  %v4011_v57 = vsel %vm15248_vm3, %v13337_v29, %v4010_v35  ;;  %v3436_v35 = vsel %vm15272_vm7, %v3431_v21, %v16405_v47  ;;  %v3461_v29 = vshrl.u32 %v16438_v50, 16  ;;  %v3450_v47 = vrot.slane %v3448_v23, 4 }
 0x238   : > { %v1907_v28 = vadd.f32 %v1861_v42, %v15849_v7  ;;  %v4613_v7 = vld [vmem:[%s16048_s18 + $0x50] sm:$0x1]  ;;  %v3446_v49 = vsel %vm15272_vm7, %v3441_v40, %v3445_v56  ;;  %v4097_v6 = vunpack.c.l.b16 %v4011_v57  ;;  %v3453_v39 = vrot.slane %v3451_v31, 5  ;;  %v13271_v40 = vld [vmem:[%s15246_s20 + $0x68] sm:$0x1] }
 0x239   : > { %v4805_v5 = vshll.u32 %v4613_v7, 16  ;;  %v16462_v21 = vrot.slane %v3457_v60, 5  ;;  %v13322_v57 = vld [vmem:[%s15246_s20 + $0x60] sm:$0xe] }
 0x23a   : > { %v2561_v17 = vadd.f32 %v2515_v26, %v1907_v28  ;;  %v16432_v62 = vpop.f32.mrf.mxu1  ;;  %v4124_v7 = vpack.c.b16 %v4098_v52, %v4097_v6  ;;  %v3454_v56 = vor.u32 %v3453_v39, %v3450_v47  ;;  %v3467_v6 = vshll.u32 %v13271_v40, 16 }
 0x23b   : > { %v4807_v51 = vrot.slane %v4805_v5, 5  ;;  %v4813_v5 = vshll.u32 %v4614_v15, 16  ;;  %v13338_v60 = vrot.slane %v13322_v57, 9  ;;  %v4019_v52 = vrot.slane %v4017_v54, 4 }
 0x23c   : > { %13304 = vmatmul.msk.bf16.gmra.mxu3 %vm882_vm5, %v3725_v63  ;;  %v2959_v26 = vadd.f32 %v16352_v24, %v2561_v17  ;;  %v2520_v48 = vpop.f32.mrf.mxu0  ;;  %v5064_v63 = vpack.c.b16 %v5038_v16, %v5037_v3  ;;  %v3699_v17 = vunpack.c.l.b16 %v3436_v35  ;;  %v3700_v3 = vunpack.c.l.b16 %v3446_v49 }
 0x23d   : > { %v16441_v34 = vpop.f32.mrf.mxu2  ;;  %13435 = vmatmul.msk.bf16.gmra.mxu1 %vm882_vm5, %v14600_v9  ;;  %v3463_v9 = vrot.slane %v3461_v29, 4  ;;  %v3455_v50 = vrot.slane %v3454_v56, 4  ;;  %v4020_v47 = vrot.slane %v13271_v40, 5  ;;  %v4018_v56 = vsel %vm15248_vm3, %v13338_v60, %v4017_v54 }
 0x23e   : > { %v16451_v24 = vadd.f32 %v16386_v25, %v2959_v26  ;;  %v4803_v25 = vrot.slane %v4802_v18, 4  ;;  %v4810_v18 = vshrl.u32 %v4614_v15, 16  ;;  %v3726_v49 = vpack.c.b16 %v3700_v3, %v3699_v17 }
 0x23f   : > { %v1864_v42 = vpop.f32.mrf.mxu3 }
 0x240   : > { %v1908_v28 = vadd.f32 %v1864_v42, %v15761_v14  ;;  %v4615_v14 = vld [vmem:[%s16048_s18 + $0x58] sm:$0xf]  ;;  %v4808_v37 = vsel %vm15272_vm7, %v4803_v25, %v4807_v51  ;;  %v4812_v39 = vrot.slane %v4810_v18, 4  ;;  %v14601_v51 = vld [vmem:[%s16048_s18 + $0x48] sm:$0xff] }
 0x241   : > { %v4823_v35 = vshrl.u32 %v4615_v14, 16 }
 0x242   : > { %v2562_v53 = vadd.f32 %v2518_v58, %v1908_v28  ;;  %13452 = vmatmul.msk.bf16.gmra.mxu2 %vm882_vm5, %v5064_v63  ;;  %v16460_v16 = vpop.f32.mrf.mxu1  ;;  %v4798_v58 = vsel %vm15272_vm7, %v4793_v61, %v16424_v30  ;;  %v4819_v63 = vshll.u32 %v4615_v14, 16  ;;  %v5040_v28 = vunpack.c.l.b16 %v4808_v37  ;;  %v4616_v14 = vld [vmem:[%s16048_s18 + $0x5c] sm:$0x1] }
 0x243   : > { %v5039_v30 = vunpack.c.l.b16 %v4798_v58  ;;  %v4825_v17 = vrot.slane %v4823_v35, 4  ;;  %v3460_v58 = vsel %vm15272_vm7, %v3455_v50, %v16462_v21  ;;  %v4021_v37 = vsel %vm15248_vm3, %v4019_v52, %v4020_v47 }
 0x244   : > { %v2960_v23 = vadd.f32 %v16374_v19, %v2562_v53  ;;  %v2523_v31 = vpop.f32.mrf.mxu0  ;;  %v3464_v19 = vor.u32 %v3463_v9, %v16462_v21  ;;  %v4815_v53 = vrot.slane %v4813_v5, 5  ;;  %v16483_v15 = vrot.slane %v4819_v63, 5 }
 0x245   : > { %v16468_v26 = vpop.f32.mrf.mxu2  ;;  %v3469_v9 = vrot.slane %v3467_v6, 5  ;;  %v4829_v35 = vshll.u32 %v4616_v14, 16  ;;  %v4099_v6 = vunpack.c.l.b16 %v4018_v56  ;;  %v4100_v60 = vunpack.c.l.b16 %v4021_v37 }
 0x246   : > { %v16480_v61 = vadd.f32 %v16414_v38, %v2960_v23  ;;  %v3465_v40 = vrot.slane %v3464_v19, 4  ;;  %v16493_v38 = vld [vmem:[%s15246_s20 + $0x70] sm:$0xf]  ;;  %v4816_v54 = vor.u32 %v4815_v53, %v4812_v39  ;;  %v4826_v63 = vor.u32 %v4825_v17, %v16483_v15 }
 0x247   : > { %v1866_v42 = vpop.f32.mrf.mxu3  ;;  %13354 = vmatmul.msk.bf16.gmra.mxu0 %vm882_vm5, %v4124_v7  ;;  %v5065_v7 = vpack.c.b16 %v5040_v28, %v5039_v30  ;;  %v3485_v21 = vshrl.u32 %v16493_v38, 16  ;;  %v3701_v28 = vunpack.c.l.b16 %v3460_v58  ;;  %v4024_v58 = vrot.slane %v16493_v38, 5 }
 0x248   : > { %v1909_v29 = vadd.f32 %v1866_v42, %v15773_v32  ;;  %v13272_v32 = vld [vmem:[%s15246_s20 + $0x6c] sm:$0xf]  ;;  %v3470_v30 = vsel %vm15272_vm7, %v3465_v40, %v3469_v9  ;;  %v4817_v47 = vrot.slane %v4816_v54, 4  ;;  %v4827_v39 = vrot.slane %v4826_v63, 4 }
 0x249   : > { %v3472_v18 = vshrl.u32 %v13272_v32, 16  ;;  %v3475_v5 = vshll.u32 %v13272_v32, 16  ;;  %v3487_v32 = vrot.slane %v3485_v21, 4  ;;  %v3702_v9 = vunpack.c.l.b16 %v3470_v30 }
 0x24a   : > { %v2563_v25 = vadd.f32 %v2520_v48, %v1909_v29  ;;  %v16486_v3 = vpop.f32.mrf.mxu1  ;;  %v4617_v29 = vld [vmem:[%s16048_s18 + $0x60] sm:$0xf]  ;;  %v4125_v40 = vpack.c.b16 %v4100_v60, %v4099_v6  ;;  %v4822_v54 = vsel %vm15272_vm7, %v4817_v47, %v16483_v15  ;;  %v4026_v15 = vrot.slane %v4024_v58, 4 }
 0x24b   : > { %v3474_v50 = vrot.slane %v3472_v18, 4  ;;  %v4834_v14 = vshrl.u32 %v4617_v29, 16  ;;  %v4837_v56 = vshll.u32 %v4617_v29, 16  ;;  %v3727_v60 = vpack.c.b16 %v3702_v9, %v3701_v28 }
 0x24c   : > { %13305 = vmatmul.msk.bf16.gmra.mxu3 %vm882_vm5, %v3726_v49  ;;  %v2961_v48 = vadd.f32 %v16408_v13, %v2563_v25  ;;  %v2525_v57 = vpop.f32.mrf.mxu0  ;;  %v3481_v49 = vshll.u32 %v16493_v38, 16  ;;  %v4831_v25 = vrot.slane %v4829_v35, 5 }
 0x24d   : > { %v16496_v23 = vpop.f32.mrf.mxu2  ;;  %13436 = vmatmul.msk.bf16.gmra.mxu1 %vm882_vm5, %v14601_v51  ;;  %v4618_v51 = vld [vmem:[%s16048_s18 + $0x64] sm:$0xf] }
 0x24e   : > { %v16506_v13 = vadd.f32 %v16441_v34, %v2961_v48  ;;  %v3477_v34 = vrot.slane %v3475_v5, 5  ;;  %v16519_v17 = vrot.slane %v3481_v49, 5  ;;  %v13323_v48 = vld [vmem:[%s15246_s20 + $0x6c] sm:$0xe]  ;;  %v4843_v18 = vshll.u32 %v4618_v51, 16 }
 0x24f   : > { %v1869_v42 = vpop.f32.mrf.mxu3  ;;  %v4847_v5 = vshrl.u32 %v4618_v51, 16  ;;  %v4832_v63 = vsel %vm15272_vm7, %v4827_v39, %v4831_v25  ;;  %v13339_v21 = vrot.slane %v13323_v48, 9  ;;  %v5041_v39 = vunpack.c.l.b16 %v4822_v54 }
 0x250   : > { %v1910_v19 = vadd.f32 %v1869_v42, %v15789_v10  ;;  %v13274_v10 = vld [vmem:[%s15246_s20 + $0x74] sm:$0x1]  ;;  %v3478_v35 = vor.u32 %v3477_v34, %v3474_v50  ;;  %v3488_v38 = vor.u32 %v3487_v32, %v16519_v17  ;;  %v16534_v30 = vrot.slane %v4843_v18, 5  ;;  %v13275_v34 = vld [vmem:[%s15246_s20 + $0x78] sm:$0xf] }
 0x251   : > { %v3491_v42 = vshll.u32 %v13274_v10, 16  ;;  %v4027_v29 = vrot.slane %v13274_v10, 5  ;;  %v4849_v50 = vrot.slane %v4847_v5, 4  ;;  %v5042_v25 = vunpack.c.l.b16 %v4832_v63  ;;  %v14602_v32 = vld [vmem:[%s16048_s18 + $0x54] sm:$0xff] }
 0x252   : > { %v2564_v52 = vadd.f32 %v2523_v31, %v1910_v19  ;;  %13453 = vmatmul.msk.bf16.gmra.mxu2 %vm882_vm5, %v5065_v7  ;;  %v16516_v53 = vpop.f32.mrf.mxu1  ;;  %v4839_v19 = vrot.slane %v4837_v56, 5  ;;  %v3479_v51 = vrot.slane %v3478_v35, 4  ;;  %v16543_v56 = vld [vmem:[%s15246_s20 + $0x7c] sm:$0xf]  ;;  %v3489_v28 = vrot.slane %v3488_v38, 4 }
 0x253   : > { %v3493_v9 = vrot.slane %v3491_v42, 5  ;;  %v4025_v10 = vsel %vm15248_vm3, %v13339_v21, %v4024_v58  ;;  %v3499_v48 = vshll.u32 %v13275_v34, 16  ;;  %v4850_v54 = vor.u32 %v4849_v50, %v16534_v30 }
 0x254   : > { %v2962_v31 = vadd.f32 %v16432_v62, %v2564_v52  ;;  %v2528_v7 = vpop.f32.mrf.mxu0  ;;  %v4836_v62 = vrot.slane %v4834_v14, 4  ;;  %v4619_v14 = vld [vmem:[%s16048_s18 + $0x68] sm:$0x1]  ;;  %v3505_v35 = vshll.u32 %v16543_v56, 16  ;;  %v3509_v58 = vshrl.u32 %v16543_v56, 16 }
 0x255   : > { %v16524_v37 = vpop.f32.mrf.mxu2  ;;  %v4853_v63 = vshll.u32 %v4619_v14, 16  ;;  %v5066_v42 = vpack.c.b16 %v5042_v25, %v5041_v39  ;;  %v3494_v21 = vsel %vm15272_vm7, %v3489_v28, %v3493_v9  ;;  %v4851_v50 = vrot.slane %v4850_v54, 4  ;;  %v13324_v14 = vld [vmem:[%s15246_s20 + $0x78] sm:$0xe] }
 0x256   : > { %v16538_v52 = vadd.f32 %v16468_v26, %v2962_v31  ;;  %v4028_v26 = vsel %vm15248_vm3, %v4026_v15, %v4027_v29  ;;  %v3501_v29 = vrot.slane %v3499_v48, 5  ;;  %v3511_v39 = vrot.slane %v3509_v58, 4 }
 0x257   : > { %v1871_v49 = vpop.f32.mrf.mxu3  ;;  %13355 = vmatmul.msk.bf16.gmra.mxu0 %vm882_vm5, %v4125_v40  ;;  %v4840_v40 = vor.u32 %v4839_v19, %v4836_v62  ;;  %v4101_v62 = vunpack.c.l.b16 %v4025_v10  ;;  %v13340_v58 = vrot.slane %v13324_v14, 9 }
 0x258   : > { %v1911_v6 = vadd.f32 %v1871_v49, %v15800_v0 }
 0x259   : > { %v4841_v19 = vrot.slane %v4840_v40, 4  ;;  %v4620_v40 = vld [vmem:[%s16048_s18 + $0x6c] sm:$0xf] }
 0x25a   : > { %v2565_v47 = vadd.f32 %v2525_v57, %v1911_v6  ;;  %v16545_v0 = vpop.f32.mrf.mxu1  ;;  %v3496_v57 = vshrl.u32 %v13275_v34, 16  ;;  %v13277_v34 = vld [vmem:[%s15246_s20 + $0x80] sm:$0x1] }
 0x25b   : > { %v3515_v10 = vshll.u32 %v13277_v34, 16 }
 0x25c   : > { %13306 = vmatmul.msk.bf16.gmra.mxu3 %vm882_vm5, %v3727_v60  ;;  %v2963_v31 = vadd.f32 %v16460_v16, %v2565_v47  ;;  %v2530_v18 = vpop.f32.mrf.mxu0  ;;  %v3484_v16 = vsel %vm15272_vm7, %v3479_v51, %v16519_v17  ;;  %v4102_v60 = vunpack.c.l.b16 %v4028_v26  ;;  %v3498_v15 = vrot.slane %v3496_v57, 4  ;;  %v4621_v26 = vld [vmem:[%s16048_s18 + $0x70] sm:$0xf] }
 0x25d   : > { %v16553_v5 = vpop.f32.mrf.mxu2  ;;  %13437 = vmatmul.msk.bf16.gmra.mxu1 %vm882_vm5, %v14602_v32  ;;  %v16569_v47 = vrot.slane %v3505_v35, 5  ;;  %v3703_v25 = vunpack.c.l.b16 %v3484_v16  ;;  %v3704_v51 = vunpack.c.l.b16 %v3494_v21  ;;  %v4861_v16 = vshll.u32 %v4620_v40, 16 }
 0x25e   : > { %v16560_v49 = vadd.f32 %v16496_v23, %v2963_v31  ;;  %v4855_v23 = vrot.slane %v4853_v63, 5  ;;  %v4126_v28 = vpack.c.b16 %v4102_v60, %v4101_v62  ;;  %v3502_v9 = vor.u32 %v3501_v29, %v3498_v15  ;;  %v20032_v62 = vld [vmem:[#allocation9_spill] sm:$0xff] }
 0x25f   : > { %v1874_v38 = vpop.f32.mrf.mxu3  ;;  %v3512_v54 = vor.u32 %v3511_v39, %v16569_v47  ;;  %v4031_v63 = vrot.slane %v16543_v56, 5  ;;  %v3728_v35 = vpack.c.b16 %v3704_v51, %v3703_v25  ;;  %v4867_v21 = vshll.u32 %v4621_v26, 16  ;;  %v13278_v25 = vld [vmem:[%s15246_s20 + $0x84] sm:$0xf] }
 0x260   : > { %v1912_v6 = vadd.f32 %v1874_v38, %v15817_v8  ;;  %v4846_v8 = vsel %vm15272_vm7, %v4841_v19, %v16534_v30  ;;  %v4856_v31 = vsel %vm15272_vm7, %v4851_v50, %v4855_v23  ;;  %v4858_v38 = vshrl.u32 %v4620_v40, 16 }
 0x261   : > { %v5043_v30 = vunpack.c.l.b16 %v4846_v8  ;;  %v3503_v60 = vrot.slane %v3502_v9, 4  ;;  %v3517_v15 = vrot.slane %v3515_v10, 5  ;;  %v3513_v56 = vrot.slane %v3512_v54, 4  ;;  %v4622_v9 = vld [vmem:[%s16048_s18 + $0x74] sm:$0x1] }
 0x262   : > { %v2566_v17 = vadd.f32 %v2528_v7, %v1912_v6  ;;  %13454 = vmatmul.msk.bf16.gmra.mxu2 %vm882_vm5, %v5066_v42  ;;  %v16572_v32 = vpop.f32.mrf.mxu1  ;;  %v5044_v6 = vunpack.c.l.b16 %v4856_v31  ;;  %v4033_v29 = vrot.slane %v4031_v63, 4  ;;  %v4034_v50 = vrot.slane %v13277_v34, 5 }
 0x263   : > { %v4860_v8 = vrot.slane %v4858_v38, 4  ;;  %v4863_v14 = vrot.slane %v4861_v16, 5  ;;  %v16596_v40 = vrot.slane %v4867_v21, 5  ;;  %v4032_v34 = vsel %vm15248_vm3, %v13340_v58, %v4031_v63 }
 0x264   : > { %v2964_v57 = vadd.f32 %v16486_v3, %v2566_v17  ;;  %v2533_v48 = vpop.f32.mrf.mxu0  ;;  %v4871_v3 = vshrl.u32 %v4621_v26, 16  ;;  %v14603_v17 = vld [vmem:[%s16048_s18 + $0x60] sm:$0xff]  ;;  %v16599_v26 = vld [vmem:[%s15246_s20 + $0x88] sm:$0xf]  ;;  %v3508_v31 = vsel %vm15272_vm7, %v3503_v60, %v16569_v47  ;;  %v3518_v54 = vsel %vm15272_vm7, %v3513_v56, %v3517_v15  ;;  %v4623_v56 = vld [vmem:[%s16048_s18 + $0x78] sm:$0xf] }
 0x265   : > { %v16581_v7 = vpop.f32.mrf.mxu2  ;;  %v3520_v63 = vshrl.u32 %v13278_v25, 16  ;;  %v3523_v58 = vshll.u32 %v13278_v25, 16  ;;  %v4864_v38 = vor.u32 %v4863_v14, %v4860_v8  ;;  %v4877_v16 = vshll.u32 %v4622_v9, 16  ;;  %v13280_v9 = vld [vmem:[%s15246_s20 + $0x8c] sm:$0x1] }
 0x266   : > { %v16590_v23 = vadd.f32 %v16524_v37, %v2964_v57  ;;  %v5067_v57 = vpack.c.b16 %v5044_v6, %v5043_v30  ;;  %v3533_v21 = vshrl.u32 %v16599_v26, 16  ;;  %v3705_v60 = vunpack.c.l.b16 %v3508_v31  ;;  %v13325_v31 = vld [vmem:[%s15246_s20 + $0x84] sm:$0xe] }
 0x267   : > { %v1876_v42 = vpop.f32.mrf.mxu3  ;;  %13356 = vmatmul.msk.bf16.gmra.mxu0 %vm882_vm5, %v4126_v28  ;;  %v4873_v28 = vrot.slane %v4871_v3, 4  ;;  %v20034_v3 = vld [vmem:[#allocation10_spill] sm:$0xff]  ;;  %v3706_v15 = vunpack.c.l.b16 %v3518_v54  ;;  %v4865_v8 = vrot.slane %v4864_v38, 4  ;;  %v4038_v54 = vrot.slane %v16599_v26, 5 }
 0x268   : > { %v1913_v19 = vadd.f32 %v1876_v42, %v20032_v62 }
 0x269   : > { %v4874_v47 = vor.u32 %v4873_v28, %v16596_v40  ;;  %v4879_v28 = vrot.slane %v4877_v16, 5 }
 0x26a   : > { %v2567_v39 = vadd.f32 %v2530_v18, %v1913_v19  ;;  %v16594_v51 = vpop.f32.mrf.mxu1  ;;  %v4103_v19 = vunpack.c.l.b16 %v4032_v34  ;;  %v3535_v34 = vrot.slane %v3533_v21, 4  ;;  %v4870_v21 = vsel %vm15272_vm7, %v4865_v8, %v16596_v40 }
 0x26b   : > { %v4875_v14 = vrot.slane %v4874_v47, 4  ;;  %v3539_v47 = vshll.u32 %v13280_v9, 16 }
 0x26c   : > { %13307 = vmatmul.msk.bf16.gmra.mxu3 %vm882_vm5, %v3728_v35  ;;  %v2965_v37 = vadd.f32 %v16516_v53, %v2567_v39  ;;  %v2535_v18 = vpop.f32.mrf.mxu0  ;;  %v4035_v35 = vsel %vm15248_vm3, %v4033_v29, %v4034_v50  ;;  %v3529_v53 = vshll.u32 %v16599_v26, 16  ;;  %v3525_v50 = vrot.slane %v3523_v58, 5 }
 0x26d   : > { %v16606_v10 = vpop.f32.mrf.mxu2  ;;  %13438 = vmatmul.msk.bf16.gmra.mxu1 %vm882_vm5, %v14603_v17  ;;  %v4104_v6 = vunpack.c.l.b16 %v4035_v35  ;;  %v4624_v17 = vld [vmem:[%s16048_s18 + $0x7c] sm:$0xf]  ;;  %v4882_v35 = vshrl.u32 %v4623_v56, 16  ;;  %v4885_v58 = vshll.u32 %v4623_v56, 16  ;;  %v4880_v26 = vsel %vm15272_vm7, %v4875_v14, %v4879_v28 }
 0x26e   : > { %v16618_v42 = vadd.f32 %v16553_v5, %v2965_v37  ;;  %v3522_v5 = vrot.slane %v3520_v63, 4  ;;  %v16625_v39 = vrot.slane %v3529_v53, 5  ;;  %v4891_v53 = vshll.u32 %v4624_v17, 16 }
 0x26f   : > { %v1879_v30 = vpop.f32.mrf.mxu3  ;;  %v4127_v37 = vpack.c.b16 %v4104_v6, %v4103_v19  ;;  %v20035_v19 = vld [vmem:[#allocation11_spill] sm:$0xff]  ;;  %v4884_v56 = vrot.slane %v4882_v35, 4  ;;  %v5045_v14 = vunpack.c.l.b16 %v4870_v21  ;;  %v5046_v28 = vunpack.c.l.b16 %v4880_v26 }
 0x270   : > { %20033 = vst [vmem:[#allocation9_spill] sm:$0xff] %v16618_v42  ;;  %v1914_v62 = vadd.f32 %v1879_v30, %v20034_v3  ;;  %v4895_v30 = vshrl.u32 %v4624_v17, 16  ;;  %v3729_v3 = vpack.c.b16 %v3706_v15, %v3705_v60  ;;  %v3526_v38 = vor.u32 %v3525_v50, %v3522_v5  ;;  %v13281_v50 = vld [vmem:[%s15246_s20 + $0x90] sm:$0xf]  ;;  %v16655_v42 = vld [vmem:[%s15246_s20 + $0x94] sm:$0xf] }
 0x271   : > { %v4040_v60 = vrot.slane %v4038_v54, 4  ;;  %v4041_v15 = vrot.slane %v13280_v9, 5  ;;  %v16644_v5 = vrot.slane %v4891_v53, 5  ;;  %v3541_v9 = vrot.slane %v3539_v47, 5 }
 0x272   : > { %v2568_v29 = vadd.f32 %v2533_v48, %v1914_v62  ;;  %13455 = vmatmul.msk.bf16.gmra.mxu2 %vm882_vm5, %v5067_v57  ;;  %v16628_v25 = vpop.f32.mrf.mxu1  ;;  %v13341_v62 = vrot.slane %v13325_v31, 9  ;;  %v4897_v40 = vrot.slane %v4895_v30, 4  ;;  %v4625_v31 = vld [vmem:[%s16048_s18 + $0x80] sm:$0x1]  ;;  %v3547_v21 = vshll.u32 %v13281_v50, 16 }
 0x273   : > { %v4901_v47 = vshll.u32 %v4625_v31, 16  ;;  %v3557_v26 = vshrl.u32 %v16655_v42, 16  ;;  %v13283_v31 = vld [vmem:[%s15246_s20 + $0x98] sm:$0x1] }
 0x274   : > { %v2966_v48 = vadd.f32 %v16545_v0, %v2568_v29  ;;  %v4195_v57 = vpop.f32.mrf.mxu0  ;;  %v3536_v0 = vor.u32 %v3535_v34, %v16625_v39  ;;  %v4887_v29 = vrot.slane %v4885_v58, 5  ;;  %v14604_v34 = vld [vmem:[%s16048_s18 + $0x6c] sm:$0xff]  ;;  %v4039_v35 = vsel %vm15248_vm3, %v13341_v62, %v4038_v54 }
 0x275   : > { %v16634_v63 = vpop.f32.mrf.mxu2  ;;  %v3553_v54 = vshll.u32 %v16655_v42, 16 }
 0x276   : > { %v16648_v17 = vadd.f32 %v16581_v7, %v2966_v48  ;;  %v4042_v7 = vsel %vm15248_vm3, %v4040_v60, %v4041_v15  ;;  %v4888_v30 = vor.u32 %v4887_v29, %v4884_v56 }
 0x277   : > { %v1881_v16 = vpop.f32.mrf.mxu3  ;;  %13357 = vmatmul.msk.bf16.gmra.mxu0 %vm882_vm5, %v4127_v37  ;;  %v3527_v37 = vrot.slane %v3526_v38, 4  ;;  %v4898_v38 = vor.u32 %v4897_v40, %v16644_v5  ;;  %v4106_v56 = vunpack.c.l.b16 %v4042_v7  ;;  %v4626_v40 = vld [vmem:[%s16048_s18 + $0x84] sm:$0xf]  ;;  %v13326_v7 = vld [vmem:[%s15246_s20 + $0x90] sm:$0xe] }
 0x278   : > { %v1915_v6 = vadd.f32 %v1881_v16, %v20035_v19  ;;  %v3537_v19 = vrot.slane %v3536_v0, 4 }
 0x279   : > { %v3532_v62 = vsel %vm15272_vm7, %v3527_v37, %v16625_v39  ;;  %v16684_v39 = vrot.slane %v3553_v54, 5  ;;  %v3559_v37 = vrot.slane %v3557_v26, 4 }
 0x27a   : > { %v2569_v8 = vadd.f32 %v2535_v18, %v1915_v6  ;;  %v16652_v16 = vpop.f32.mrf.mxu1  ;;  %v3544_v18 = vshrl.u32 %v13281_v50, 16  ;;  %v4105_v6 = vunpack.c.l.b16 %v4039_v35  ;;  %v3542_v15 = vsel %vm15272_vm7, %v3537_v19, %v3541_v9 }
 0x27b   : > { %v4889_v50 = vrot.slane %v4888_v30, 4  ;;  %v3707_v35 = vunpack.c.l.b16 %v3532_v62  ;;  %v3708_v19 = vunpack.c.l.b16 %v3542_v15  ;;  %v3560_v62 = vor.u32 %v3559_v37, %v16684_v39 }
 0x27c   : > { %13308 = vmatmul.msk.bf16.gmra.mxu3 %vm882_vm5, %v3729_v3  ;;  %v2967_v48 = vadd.f32 %v16572_v32, %v2569_v8  ;;  %v16663_v58 = vpop.f32.mrf.mxu0  ;;  %v5068_v3 = vpack.c.b16 %v5046_v28, %v5045_v14  ;;  %v3546_v29 = vrot.slane %v3544_v18, 4  ;;  %v4899_v8 = vrot.slane %v4898_v38, 4  ;;  %v4627_v28 = vld [vmem:[%s16048_s18 + $0x88] sm:$0xf] }
 0x27d   : > { %v16665_v53 = vpop.f32.mrf.mxu2  ;;  %13439 = vmatmul.msk.bf16.gmra.mxu1 %vm882_vm5, %v14604_v34  ;;  %v3549_v14 = vrot.slane %v3547_v21, 5  ;;  %v4906_v18 = vshrl.u32 %v4626_v40, 16  ;;  %v4128_v30 = vpack.c.b16 %v4106_v56, %v4105_v6  ;;  %v4915_v38 = vshll.u32 %v4627_v28, 16 }
 0x27e   : > { %v16672_v32 = vadd.f32 %v16606_v10, %v2967_v48  ;;  %v4903_v10 = vrot.slane %v4901_v47, 5  ;;  %v4909_v48 = vshll.u32 %v4626_v40, 16  ;;  %v4919_v47 = vshrl.u32 %v4627_v28, 16 }
 0x27f   : > { %v3797_v0 = vpop.f32.mrf.mxu3  ;;  %v4894_v54 = vsel %vm15272_vm7, %v4889_v50, %v16644_v5  ;;  %v3550_v26 = vor.u32 %v3549_v14, %v3546_v29  ;;  %v13342_v6 = vrot.slane %v13326_v7, 9  ;;  %v3730_v56 = vpack.c.b16 %v3708_v19, %v3707_v35 }
 0x280   : > { %v3877_v60 = vadd.f32 %v3797_v0, %v15885_v2  ;;  %v4045_v2 = vrot.slane %v16655_v42, 5  ;;  %v4904_v42 = vsel %vm15272_vm7, %v4899_v8, %v4903_v10  ;;  %v3563_v0 = vshll.u32 %v13283_v31, 16  ;;  %v13284_v8 = vld [vmem:[%s15246_s20 + $0x9c] sm:$0xf]  ;;  %v16705_v10 = vld [vmem:[%s15246_s20 + $0xa0] sm:$0xf] }
 0x281   : > { %v4908_v40 = vrot.slane %v4906_v18, 4  ;;  %v4911_v28 = vrot.slane %v4909_v48, 5  ;;  %v5047_v5 = vunpack.c.l.b16 %v4894_v54  ;;  %v16701_v50 = vrot.slane %v4915_v38, 5 }
 0x282   : > { %v4275_v34 = vadd.f32 %v4195_v57, %v3877_v60  ;;  %13456 = vmatmul.msk.bf16.gmra.mxu2 %vm882_vm5, %v5068_v3  ;;  %v16687_v9 = vpop.f32.mrf.mxu1  ;;  %v4047_v60 = vrot.slane %v4045_v2, 4  ;;  %v4921_v29 = vrot.slane %v4919_v47, 4  ;;  %v5048_v14 = vunpack.c.l.b16 %v4904_v42 }
 0x283   : > { %v3551_v37 = vrot.slane %v3550_v26, 4  ;;  %v3565_v7 = vrot.slane %v3563_v0, 5  ;;  %v4046_v18 = vsel %vm15248_vm3, %v13342_v6, %v4045_v2  ;;  %v4912_v47 = vor.u32 %v4911_v28, %v4908_v40 }
 0x284   : > { %v4561_v57 = vadd.f32 %v16594_v51, %v4275_v34  ;;  %v4200_v21 = vpop.f32.mrf.mxu0  ;;  %v4048_v51 = vrot.slane %v13283_v31, 5  ;;  %v4628_v31 = vld [vmem:[%s16048_s18 + $0x8c] sm:$0x1]  ;;  %v3568_v54 = vshrl.u32 %v13284_v8, 16  ;;  %v3571_v42 = vshll.u32 %v13284_v8, 16 }
 0x285   : > { %v16691_v3 = vpop.f32.mrf.mxu2  ;;  %v3577_v26 = vshll.u32 %v16705_v10, 16  ;;  %v5069_v6 = vpack.c.b16 %v5048_v14, %v5047_v5  ;;  %v4913_v28 = vrot.slane %v4912_v47, 4 }
 0x286   : > { %v16709_v35 = vadd.f32 %v16634_v63, %v4561_v57  ;;  %v4049_v48 = vsel %vm15248_vm3, %v4047_v60, %v4048_v51  ;;  %v4922_v63 = vor.u32 %v4921_v29, %v16701_v50  ;;  %v3581_v57 = vshrl.u32 %v16705_v10, 16 }
 0x287   : > { %v3799_v15 = vpop.f32.mrf.mxu3  ;;  %13358 = vmatmul.msk.bf16.gmra.mxu0 %vm882_vm5, %v4128_v30  ;;  %v14605_v30 = vld [vmem:[%s16048_s18 + $0x78] sm:$0xff]  ;;  %v3556_v60 = vsel %vm15272_vm7, %v3551_v37, %v16684_v39  ;;  %v3573_v29 = vrot.slane %v3571_v42, 5  ;;  %v16735_v5 = vrot.slane %v3577_v26, 5  ;;  %v13286_v37 = vld [vmem:[%s15246_s20 + $0xa4] sm:$0x1]  ;;  %v4052_v42 = vrot.slane %v16705_v10, 5 }
 0x288   : > { %v3878_v34 = vadd.f32 %v3799_v15, %v15904_v1  ;;  %v3561_v1 = vrot.slane %v3560_v62, 4  ;;  %v4107_v15 = vunpack.c.l.b16 %v4046_v18  ;;  %v4923_v8 = vrot.slane %v4922_v63, 4 }
 0x289   : > { %v3587_v47 = vshll.u32 %v13286_v37, 16  ;;  %v4918_v26 = vsel %vm15272_vm7, %v4913_v28, %v16701_v50 }
 0x28a   : > { %v4276_v19 = vadd.f32 %v16663_v58, %v3878_v34  ;;  %v16717_v38 = vpop.f32.mrf.mxu1  ;;  %v4925_v58 = vshll.u32 %v4628_v31, 16  ;;  %v3566_v51 = vsel %vm15272_vm7, %v3561_v1, %v3565_v7  ;;  %v3570_v34 = vrot.slane %v3568_v54, 4  ;;  %v4629_v1 = vld [vmem:[%s16048_s18 + $0x90] sm:$0xf]  ;;  %v13327_v54 = vld [vmem:[%s15246_s20 + $0x9c] sm:$0xe] }
 0x28b   : > { %v3583_v7 = vrot.slane %v3581_v57, 4  ;;  %v13343_v10 = vrot.slane %v13327_v54, 9 }
 0x28c   : > { %13309 = vmatmul.msk.bf16.gmra.mxu3 %vm882_vm5, %v3730_v56  ;;  %v4562_v2 = vadd.f32 %v16628_v25, %v4276_v19  ;;  %v4202_v0 = vpop.f32.mrf.mxu0  ;;  %v4108_v56 = vunpack.c.l.b16 %v4049_v48  ;;  %v4927_v14 = vrot.slane %v4925_v58, 5  ;;  %v3709_v19 = vunpack.c.l.b16 %v3556_v60 }
 0x28d   : > { %v16724_v62 = vpop.f32.mrf.mxu2  ;;  %13440 = vmatmul.msk.bf16.gmra.mxu1 %vm882_vm5, %v14605_v30  ;;  %v3574_v30 = vor.u32 %v3573_v29, %v3570_v34  ;;  %v3584_v63 = vor.u32 %v3583_v7, %v16735_v5  ;;  %v4933_v60 = vshll.u32 %v4629_v1, 16  ;;  %v5049_v34 = vunpack.c.l.b16 %v4918_v26  ;;  %v14606_v7 = vld [vmem:[%s16048_s18 + $0x84] sm:$0xff] }
 0x28e   : > { %v16733_v40 = vadd.f32 %v16665_v53, %v4562_v2  ;;  %v3710_v53 = vunpack.c.l.b16 %v3566_v51  ;;  %v4129_v18 = vpack.c.b16 %v4108_v56, %v4107_v15  ;;  %v3589_v29 = vrot.slane %v3587_v47, 5  ;;  %v16765_v47 = vld [vmem:[%s15246_s20 + $0xac] sm:$0xf] }
 0x28f   : > { %v3802_v25 = vpop.f32.mrf.mxu3  ;;  %v3575_v28 = vrot.slane %v3574_v30, 4  ;;  %v13287_v30 = vld [vmem:[%s15246_s20 + $0xa8] sm:$0xf] }
 0x290   : > { %v3879_v39 = vadd.f32 %v3802_v25, %v15915_v20  ;;  %v4630_v20 = vld [vmem:[%s16048_s18 + $0x94] sm:$0xf]  ;;  %v3731_v51 = vpack.c.b16 %v3710_v53, %v3709_v19  ;;  %v4935_v19 = vrot.slane %v4933_v60, 5  ;;  %v3592_v60 = vshrl.u32 %v13287_v30, 16 }
 0x291   : > { %v4939_v15 = vshll.u32 %v4630_v20, 16  ;;  %v4943_v56 = vshrl.u32 %v4630_v20, 16 }
 0x292   : > { %v4277_v31 = vadd.f32 %v4200_v21, %v3879_v39  ;;  %13457 = vmatmul.msk.bf16.gmra.mxu2 %vm882_vm5, %v5069_v6  ;;  %v16741_v48 = vpop.f32.mrf.mxu1  ;;  %v4928_v21 = vsel %vm15272_vm7, %v4923_v8, %v4927_v14  ;;  %v4930_v6 = vshrl.u32 %v4629_v1, 16  ;;  %v4054_v8 = vrot.slane %v4052_v42, 4 }
 0x293   : > { %v5050_v50 = vunpack.c.l.b16 %v4928_v21  ;;  %v4055_v14 = vrot.slane %v13286_v37, 5  ;;  %v16761_v54 = vrot.slane %v4939_v15, 5  ;;  %v4945_v20 = vrot.slane %v4943_v56, 4  ;;  %v4631_v37 = vld [vmem:[%s16048_s18 + $0x98] sm:$0x1] }
 0x294   : > { %v4563_v58 = vadd.f32 %v16652_v16, %v4277_v31  ;;  %v4205_v57 = vpop.f32.mrf.mxu0  ;;  %v3585_v16 = vrot.slane %v3584_v63, 4  ;;  %v4932_v31 = vrot.slane %v4930_v6, 4  ;;  %v4949_v15 = vshll.u32 %v4631_v37, 16 }
 0x295   : > { %v16753_v2 = vpop.f32.mrf.mxu2  ;;  %v4056_v21 = vsel %vm15248_vm3, %v4054_v8, %v4055_v14  ;;  %v3605_v56 = vshrl.u32 %v16765_v47, 16  ;;  %v3594_v14 = vrot.slane %v3592_v60, 4 }
 0x296   : > { %v16759_v53 = vadd.f32 %v16691_v3, %v4563_v58  ;;  %v3580_v3 = vsel %vm15272_vm7, %v3575_v28, %v16735_v5  ;;  %v4946_v5 = vor.u32 %v4945_v20, %v16761_v54  ;;  %v4951_v20 = vrot.slane %v4949_v15, 5 }
 0x297   : > { %v3804_v25 = vpop.f32.mrf.mxu3  ;;  %13359 = vmatmul.msk.bf16.gmra.mxu0 %vm882_vm5, %v4129_v18  ;;  %v4053_v18 = vsel %vm15248_vm3, %v13343_v10, %v4052_v42  ;;  %v4936_v42 = vor.u32 %v4935_v19, %v4932_v31  ;;  %v3595_v10 = vshll.u32 %v13287_v30, 16  ;;  %v4633_v19 = vld [vmem:[%s16048_s18 + $0xa0] sm:$0xf]  ;;  %v3607_v30 = vrot.slane %v3605_v56, 4 }
 0x298   : > { %v3880_v39 = vadd.f32 %v3804_v25, %v15934_v59  ;;  %v5070_v59 = vpack.c.b16 %v5050_v50, %v5049_v34  ;;  %v4109_v34 = vunpack.c.l.b16 %v4053_v18  ;;  %v4110_v50 = vunpack.c.l.b16 %v4056_v21  ;;  %v13328_v21 = vld [vmem:[%s15246_s20 + $0xa8] sm:$0xe] }
 0x299   : > { %v4937_v8 = vrot.slane %v4936_v42, 4  ;;  %v4963_v42 = vshll.u32 %v4633_v19, 16  ;;  %v4967_v60 = vshrl.u32 %v4633_v19, 16 }
 0x29a   : > { %v4278_v1 = vadd.f32 %v4202_v0, %v3880_v39  ;;  %v16767_v26 = vpop.f32.mrf.mxu1  ;;  %v3590_v0 = vsel %vm15272_vm7, %v3585_v16, %v3589_v29  ;;  %v3711_v29 = vunpack.c.l.b16 %v3580_v3  ;;  %v4632_v16 = vld [vmem:[%s16048_s18 + $0x9c] sm:$0xf]  ;;  %v4130_v18 = vpack.c.b16 %v4110_v50, %v4109_v34 }
 0x29b   : > { %v3712_v39 = vunpack.c.l.b16 %v3590_v0  ;;  %v4059_v3 = vrot.slane %v16765_v47, 5  ;;  %v4954_v0 = vshrl.u32 %v4632_v16, 16  ;;  %v13344_v50 = vrot.slane %v13328_v21, 9  ;;  %v14607_v21 = vld [vmem:[%s16048_s18 + $0x90] sm:$0xff] }
 0x29c   : > { %13310 = vmatmul.msk.bf16.gmra.mxu3 %vm882_vm5, %v3731_v51  ;;  %v4564_v63 = vadd.f32 %v16687_v9, %v4278_v1  ;;  %v4207_v58 = vpop.f32.mrf.mxu0  ;;  %v3601_v51 = vshll.u32 %v16765_v47, 16 }
 0x29d   : > { %v16781_v6 = vpop.f32.mrf.mxu2  ;;  %13441 = vmatmul.msk.bf16.gmra.mxu1 %vm882_vm5, %v14606_v7  ;;  %v3597_v7 = vrot.slane %v3595_v10, 5 }
 0x29e   : > { %v16788_v25 = vadd.f32 %v16724_v62, %v4564_v63  ;;  %v16792_v31 = vrot.slane %v3601_v51, 5  ;;  %v4947_v62 = vrot.slane %v4946_v5, 4  ;;  %v4957_v63 = vshll.u32 %v4632_v16, 16 }
 0x29f   : > { %v3807_v9 = vpop.f32.mrf.mxu3  ;;  %v4942_v5 = vsel %vm15272_vm7, %v4937_v8, %v16761_v54  ;;  %v16812_v54 = vrot.slane %v4963_v42, 5  ;;  %v4969_v8 = vrot.slane %v4967_v60, 4  ;;  %v16827_v42 = vld [vmem:[%s15246_s20 + $0xb8] sm:$0xf] }
 0x2a0   : > { %v3881_v28 = vadd.f32 %v3807_v9, %v15945_v4  ;;  %v13289_v4 = vld [vmem:[%s15246_s20 + $0xb0] sm:$0x1]  ;;  %v4952_v47 = vsel %vm15272_vm7, %v4947_v62, %v4951_v20  ;;  %v3608_v15 = vor.u32 %v3607_v30, %v16792_v31  ;;  %v5051_v62 = vunpack.c.l.b16 %v4942_v5 }
 0x2a1   : > { %v3611_v56 = vshll.u32 %v13289_v4, 16  ;;  %v5052_v20 = vunpack.c.l.b16 %v4952_v47 }
 0x2a2   : > { %v4279_v1 = vadd.f32 %v4205_v57, %v3881_v28  ;;  %13458 = vmatmul.msk.bf16.gmra.mxu2 %vm882_vm5, %v5070_v59  ;;  %v16796_v37 = vpop.f32.mrf.mxu1  ;;  %v3732_v57 = vpack.c.b16 %v3712_v39, %v3711_v29  ;;  %v3598_v59 = vor.u32 %v3597_v7, %v3594_v14  ;;  %v4062_v28 = vrot.slane %v13289_v4, 5  ;;  %v20036_v39 = vld [vmem:[#allocation12_spill] sm:$0xff]  ;;  %v4634_v7 = vld [vmem:[%s16048_s18 + $0xa4] sm:$0x1]  ;;  %v13290_v4 = vld [vmem:[%s15246_s20 + $0xb4] sm:$0xf] }
 0x2a3   : > { %v4956_v29 = vrot.slane %v4954_v0, 4  ;;  %v4959_v14 = vrot.slane %v4957_v63, 5  ;;  %v4973_v60 = vshll.u32 %v4634_v7, 16  ;;  %v3616_v47 = vshrl.u32 %v13290_v4, 16 }
 0x2a4   : > { %v4565_v10 = vadd.f32 %v16717_v38, %v4279_v1  ;;  %v4210_v51 = vpop.f32.mrf.mxu0  ;;  %v4061_v38 = vrot.slane %v4059_v3, 4  ;;  %v3599_v30 = vrot.slane %v3598_v59, 4 }
 0x2a5   : > { %v16802_v9 = vpop.f32.mrf.mxu2 }
 0x2a6   : > { %v16816_v19 = vadd.f32 %v16753_v2, %v4565_v10  ;;  %v4063_v63 = vsel %vm15248_vm3, %v4061_v38, %v4062_v28  ;;  %v4960_v2 = vor.u32 %v4959_v14, %v4956_v29  ;;  %v20038_v14 = vld [vmem:[#allocation13_spill] sm:$0xff] }
 0x2a7   : > { %v3809_v34 = vpop.f32.mrf.mxu3  ;;  %13360 = vmatmul.msk.bf16.gmra.mxu0 %vm882_vm5, %v4130_v18  ;;  %v4060_v18 = vsel %vm15248_vm3, %v13344_v50, %v4059_v3  ;;  %v3625_v3 = vshll.u32 %v16827_v42, 16  ;;  %v3629_v50 = vshrl.u32 %v16827_v42, 16 }
 0x2a8   : > { %v3882_v16 = vadd.f32 %v3809_v34, %v20036_v39  ;;  %v3609_v34 = vrot.slane %v3608_v15, 4  ;;  %v3613_v39 = vrot.slane %v3611_v56, 5  ;;  %v3619_v15 = vshll.u32 %v13290_v4, 16 }
 0x2a9   : > { %v5071_v56 = vpack.c.b16 %v5052_v20, %v5051_v62  ;;  %v4111_v29 = vunpack.c.l.b16 %v4060_v18  ;;  %v4961_v7 = vrot.slane %v4960_v2, 4  ;;  %v4975_v62 = vrot.slane %v4973_v60, 5 }
 0x2aa   : > { %v4280_v1 = vadd.f32 %v4207_v58, %v3882_v16  ;;  %v16820_v0 = vpop.f32.mrf.mxu1  ;;  %v4970_v58 = vor.u32 %v4969_v8, %v16812_v54  ;;  %v3614_v28 = vsel %vm15272_vm7, %v3609_v34, %v3613_v39  ;;  %v4112_v16 = vunpack.c.l.b16 %v4063_v63 }
 0x2ab   : > { %v3621_v20 = vrot.slane %v3619_v15, 5  ;;  %v16847_v4 = vrot.slane %v3625_v3, 5  ;;  %v3714_v39 = vunpack.c.l.b16 %v3614_v28  ;;  %v4966_v2 = vsel %vm15272_vm7, %v4961_v7, %v16812_v54 }
 0x2ac   : > { %13311 = vmatmul.msk.bf16.gmra.mxu3 %vm882_vm5, %v3732_v57  ;;  %v4566_v10 = vadd.f32 %v16741_v48, %v4280_v1  ;;  %v4212_v59 = vpop.f32.mrf.mxu0  ;;  %v3604_v48 = vsel %vm15272_vm7, %v3599_v30, %v16792_v31  ;;  %v4971_v1 = vrot.slane %v4970_v58, 4  ;;  %v3631_v31 = vrot.slane %v3629_v50, 4  ;;  %v4635_v30 = vld [vmem:[%s16048_s18 + $0xa8] sm:$0xf]  ;;  %v13329_v58 = vld [vmem:[%s15246_s20 + $0xb4] sm:$0xe] }
 0x2ad   : > { %v16832_v5 = vpop.f32.mrf.mxu2  ;;  %13442 = vmatmul.msk.bf16.gmra.mxu1 %vm882_vm5, %v14607_v21  ;;  %v3713_v34 = vunpack.c.l.b16 %v3604_v48  ;;  %v4131_v18 = vpack.c.b16 %v4112_v16, %v4111_v29  ;;  %v4066_v60 = vrot.slane %v16827_v42, 5  ;;  %v4978_v3 = vshrl.u32 %v4635_v30, 16 }
 0x2ae   : > { %v16838_v57 = vadd.f32 %v16781_v6, %v4566_v10  ;;  %v3618_v6 = vrot.slane %v3616_v47, 4  ;;  %v4636_v10 = vld [vmem:[%s16048_s18 + $0xac] sm:$0xf]  ;;  %v4981_v50 = vshll.u32 %v4635_v30, 16  ;;  %v3632_v16 = vor.u32 %v3631_v31, %v16847_v4 }
 0x2af   : > { %v3812_v38 = vpop.f32.mrf.mxu3  ;;  %v4987_v48 = vshll.u32 %v4636_v10, 16  ;;  %v4991_v28 = vshrl.u32 %v4636_v10, 16  ;;  %v3733_v7 = vpack.c.b16 %v3714_v39, %v3713_v34  ;;  %v5053_v42 = vunpack.c.l.b16 %v4966_v2 }
 0x2b0   : > { %20037 = vst [vmem:[#allocation10_spill] sm:$0xff] %v16838_v57  ;;  %v3883_v8 = vadd.f32 %v3812_v38, %v20038_v14  ;;  %v13292_v38 = vld [vmem:[%s15246_s20 + $0xbc] sm:$0x1]  ;;  %v3622_v29 = vor.u32 %v3621_v20, %v3618_v6  ;;  %v4068_v30 = vrot.slane %v4066_v60, 4  ;;  %v4980_v20 = vrot.slane %v4978_v3, 4 }
 0x2b1   : > { %v3635_v14 = vshll.u32 %v13292_v38, 16  ;;  %v4069_v6 = vrot.slane %v13292_v38, 5  ;;  %v4983_v31 = vrot.slane %v4981_v50, 5  ;;  %v16870_v10 = vrot.slane %v4987_v48, 5  ;;  %v16881_v38 = vld [vmem:[%s15246_s20 + $0xc4] sm:$0xf] }
 0x2b2   : > { %v4281_v21 = vadd.f32 %v4210_v51, %v3883_v8  ;;  %13459 = vmatmul.msk.bf16.gmra.mxu2 %vm882_vm5, %v5071_v56  ;;  %v16851_v63 = vpop.f32.mrf.mxu1  ;;  %v4976_v51 = vsel %vm15272_vm7, %v4971_v1, %v4975_v62  ;;  %v20040_v1 = vld [vmem:[#allocation14_spill] sm:$0xff]  ;;  %v3623_v34 = vrot.slane %v3622_v29, 4  ;;  %v3633_v39 = vrot.slane %v3632_v16, 4 }
 0x2b3   : > { %v3637_v2 = vrot.slane %v3635_v14, 5 }
 0x2b4   : > { %v4567_v47 = vadd.f32 %v16767_v26, %v4281_v21  ;;  %v4215_v15 = vpop.f32.mrf.mxu0  ;;  %v13345_v26 = vrot.slane %v13329_v58, 9  ;;  %v5054_v21 = vunpack.c.l.b16 %v4976_v51  ;;  %v4637_v58 = vld [vmem:[%s16048_s18 + $0xb0] sm:$0x1]  ;;  %v13293_v51 = vld [vmem:[%s15246_s20 + $0xc0] sm:$0xf] }
 0x2b5   : > { %v16862_v56 = vpop.f32.mrf.mxu2  ;;  %v4997_v16 = vshll.u32 %v4637_v58, 16 }
 0x2b6   : > { %v16866_v54 = vadd.f32 %v16802_v9, %v4567_v47  ;;  %v4993_v9 = vrot.slane %v4991_v28, 4  ;;  %v4984_v28 = vor.u32 %v4983_v31, %v4980_v20  ;;  %v5072_v14 = vpack.c.b16 %v5054_v21, %v5053_v42  ;;  %v20042_v21 = vld [vmem:[#allocation15_spill] sm:$0xff] }
 0x2b7   : > { %v3814_v8 = vpop.f32.mrf.mxu3  ;;  %13361 = vmatmul.msk.bf16.gmra.mxu0 %vm882_vm5, %v4131_v18  ;;  %v4067_v18 = vsel %vm15248_vm3, %v13345_v26, %v4066_v60  ;;  %v3628_v60 = vsel %vm15272_vm7, %v3623_v34, %v16847_v4  ;;  %v3640_v26 = vshrl.u32 %v13293_v51, 16  ;;  %v3653_v42 = vshrl.u32 %v16881_v38, 16  ;;  %v4638_v34 = vld [vmem:[%s16048_s18 + $0xb4] sm:$0xf] }
 0x2b8   : > { %20039 = vst [vmem:[#allocation11_spill] sm:$0xff] %v16866_v54  ;;  %v3884_v62 = vadd.f32 %v3814_v8, %v20040_v1  ;;  %v14608_v54 = vld [vmem:[%s16048_s18 + $0x9c] sm:$0xff]  ;;  %v4994_v29 = vor.u32 %v4993_v9, %v16870_v10  ;;  %v3638_v8 = vsel %vm15272_vm7, %v3633_v39, %v3637_v2  ;;  %v3643_v1 = vshll.u32 %v13293_v51, 16 }
 0x2b9   : > { %v4113_v4 = vunpack.c.l.b16 %v4067_v18  ;;  %v4985_v20 = vrot.slane %v4984_v28, 4  ;;  %v3642_v2 = vrot.slane %v3640_v26, 4  ;;  %v4639_v18 = vld [vmem:[%s16048_s18 + $0xb8] sm:$0xf]  ;;  %v4073_v28 = vrot.slane %v16881_v38, 5 }
 0x2ba   : > { %v4282_v47 = vadd.f32 %v4212_v59, %v3884_v62  ;;  %v16874_v57 = vpop.f32.mrf.mxu1  ;;  %v4070_v59 = vsel %vm15248_vm3, %v4068_v30, %v4069_v6  ;;  %v3649_v62 = vshll.u32 %v16881_v38, 16  ;;  %v4995_v31 = vrot.slane %v4994_v29, 4 }
 0x2bb   : > { %v4114_v6 = vunpack.c.l.b16 %v4070_v59  ;;  %v3645_v58 = vrot.slane %v3643_v1, 5  ;;  %v5002_v26 = vshrl.u32 %v4638_v34, 16  ;;  %v5005_v1 = vshll.u32 %v4638_v34, 16 }
 0x2bc   : > { %13312 = vmatmul.msk.bf16.gmra.mxu3 %vm882_vm5, %v3733_v7  ;;  %v4568_v3 = vadd.f32 %v16796_v37, %v4282_v47  ;;  %v4217_v50 = vpop.f32.mrf.mxu0  ;;  %v3716_v47 = vunpack.c.l.b16 %v3638_v8  ;;  %v16905_v51 = vrot.slane %v3649_v62, 5  ;;  %v13330_v8 = vld [vmem:[%s15246_s20 + $0xc0] sm:$0xe] }
 0x2bd   : > { %v16884_v48 = vpop.f32.mrf.mxu2  ;;  %13443 = vmatmul.msk.bf16.gmra.mxu1 %vm882_vm5, %v14608_v54  ;;  %v4999_v54 = vrot.slane %v4997_v16, 5  ;;  %v4132_v59 = vpack.c.b16 %v4114_v6, %v4113_v4  ;;  %v5004_v34 = vrot.slane %v5002_v26, 4 }
 0x2be   : > { %v16896_v37 = vadd.f32 %v16832_v5, %v4568_v3  ;;  %v3715_v5 = vunpack.c.l.b16 %v3628_v60  ;;  %v3655_v3 = vrot.slane %v3653_v42, 4  ;;  %v5011_v42 = vshll.u32 %v4639_v18, 16 }
 0x2bf   : > { %v3817_v7 = vpop.f32.mrf.mxu3  ;;  %v5000_v60 = vsel %vm15272_vm7, %v4995_v31, %v4999_v54 }
 0x2c0   : > { %20041 = vst [vmem:[#allocation12_spill] sm:$0xff] %v16896_v37  ;;  %v3885_v30 = vadd.f32 %v3817_v7, %v20042_v21  ;;  %v13295_v7 = vld [vmem:[%s15246_s20 + $0xc8] sm:$0x1]  ;;  %v3734_v62 = vpack.c.b16 %v3716_v47, %v3715_v5  ;;  %v5015_v21 = vshrl.u32 %v4639_v18, 16  ;;  %v5056_v54 = vunpack.c.l.b16 %v5000_v60 }
 0x2c1   : > { %v3659_v4 = vshll.u32 %v13295_v7, 16  ;;  %v4075_v5 = vrot.slane %v4073_v28, 4  ;;  %v4076_v47 = vrot.slane %v13295_v7, 5  ;;  %v16926_v18 = vrot.slane %v5011_v42, 5  ;;  %v16936_v7 = vld [vmem:[%s15246_s20 + $0xd0] sm:$0xf] }
 0x2c2   : > { %v4283_v9 = vadd.f32 %v4215_v15, %v3885_v30  ;;  %13460 = vmatmul.msk.bf16.gmra.mxu2 %vm882_vm5, %v5072_v14  ;;  %v16903_v39 = vpop.f32.mrf.mxu1  ;;  %v4990_v14 = vsel %vm15272_vm7, %v4985_v20, %v16870_v10  ;;  %v3646_v30 = vor.u32 %v3645_v58, %v3642_v2  ;;  %v20044_v10 = vld [vmem:[#allocation16_spill] sm:$0xff]  ;;  %v5007_v2 = vrot.slane %v5005_v1, 5 }
 0x2c3   : > { %v5055_v31 = vunpack.c.l.b16 %v4990_v14  ;;  %v5017_v37 = vrot.slane %v5015_v21, 4  ;;  %v3661_v60 = vrot.slane %v3659_v4, 5  ;;  %v4077_v42 = vsel %vm15248_vm3, %v4075_v5, %v4076_v47 }
 0x2c4   : > { %v4569_v15 = vadd.f32 %v16820_v0, %v4283_v9  ;;  %v4220_v29 = vpop.f32.mrf.mxu0  ;;  %v3656_v0 = vor.u32 %v3655_v3, %v16905_v51  ;;  %v13346_v9 = vrot.slane %v13330_v8, 9  ;;  %v14609_v3 = vld [vmem:[%s16048_s18 + $0xa8] sm:$0xff]  ;;  %v5008_v21 = vor.u32 %v5007_v2, %v5004_v34 }
 0x2c5   : > { %v16911_v16 = vpop.f32.mrf.mxu2  ;;  %v5073_v1 = vpack.c.b16 %v5056_v54, %v5055_v31  ;;  %v20045_v31 = vld [vmem:[#allocation17_spill] sm:$0xff]  ;;  %v4116_v5 = vunpack.c.l.b16 %v4077_v42 }
 0x2c6   : > { %v16921_v6 = vadd.f32 %v16862_v56, %v4569_v15  ;;  %v13296_v56 = vld [vmem:[%s15246_s20 + $0xcc] sm:$0xf]  ;;  %v3657_v14 = vrot.slane %v3656_v0, 4  ;;  %v4074_v8 = vsel %vm15248_vm3, %v13346_v9, %v4073_v28 }
 0x2c7   : > { %v3819_v38 = vpop.f32.mrf.mxu3  ;;  %13362 = vmatmul.msk.bf16.gmra.mxu0 %vm882_vm5, %v4132_v59  ;;  %v3647_v59 = vrot.slane %v3646_v30, 4  ;;  %v3667_v0 = vshll.u32 %v13296_v56, 16  ;;  %v4115_v9 = vunpack.c.l.b16 %v4074_v8 }
 0x2c8   : > { %20043 = vst [vmem:[#allocation13_spill] sm:$0xff] %v16921_v6  ;;  %v3886_v20 = vadd.f32 %v3819_v38, %v20044_v10  ;;  %v4640_v6 = vld [vmem:[%s16048_s18 + $0xbc] sm:$0x1]  ;;  %v3664_v38 = vshrl.u32 %v13296_v56, 16  ;;  %v3673_v10 = vshll.u32 %v16936_v7, 16 }
 0x2c9   : > { %v5021_v30 = vshll.u32 %v4640_v6, 16  ;;  %v5009_v6 = vrot.slane %v5008_v21, 4  ;;  %v3669_v56 = vrot.slane %v3667_v0, 5 }
 0x2ca   : > { %v4284_v58 = vadd.f32 %v4217_v50, %v3886_v20  ;;  %v16929_v15 = vpop.f32.mrf.mxu1  ;;  %v3677_v20 = vshrl.u32 %v16936_v7, 16  ;;  %v3666_v34 = vrot.slane %v3664_v38, 4  ;;  %v16960_v42 = vrot.slane %v3673_v10, 5  ;;  %v16975_v10 = vld [vmem:[%s16048_s18 + $0x10] sm:$0xf] }
 0x2cb   : > { %v5014_v21 = vsel %vm15272_vm7, %v5009_v6, %v16926_v18  ;;  %v4080_v38 = vrot.slane %v16936_v7, 5 }
 0x2cc   : > { %13313 = vmatmul.msk.bf16.gmra.mxu3 %vm882_vm5, %v3734_v62  ;;  %v4222_v26 = vpop.f32.mrf.mxu0  ;;  %v5018_v62 = vor.u32 %v5017_v37, %v16926_v18  ;;  %v4570_v4 = vadd.f32 %v16851_v63, %v4284_v58  ;;  %v3652_v37 = vsel %vm15272_vm7, %v3647_v59, %v16905_v51  ;;  %v3662_v63 = vsel %vm15272_vm7, %v3657_v14, %v3661_v60  ;;  %v13331_v14 = vld [vmem:[%s15246_s20 + $0xcc] sm:$0xe] }
 0x2cd   : > { %v16938_v50 = vpop.f32.mrf.mxu2  ;;  %13444 = vmatmul.msk.bf16.gmra.mxu1 %vm882_vm5, %v14609_v3  ;;  %v5023_v3 = vrot.slane %v5021_v30, 5  ;;  %v3679_v51 = vrot.slane %v3677_v20, 4  ;;  %v3717_v59 = vunpack.c.l.b16 %v3652_v37  ;;  %v3670_v30 = vor.u32 %v3669_v56, %v3666_v34  ;;  %v13609_v20 = vld [vmem:[%s16048_s18 + $0xc] sm:$0xf] }
 0x2ce   : > { %v16949_v47 = vadd.f32 %v16884_v48, %v4570_v4  ;;  %v5019_v58 = vrot.slane %v5018_v62, 4  ;;  %v13298_v48 = vld [vmem:[%s15246_s20 + $0xd4] sm:$0x1]  ;;  %v3718_v4 = vunpack.c.l.b16 %v3662_v63  ;;  %v5984_v18 = vshll.u32 %v13609_v20, 16  ;;  %v20047_v37 = vld [vmem:[#allocation18_spill] sm:$0xff] }
 0x2cf   : > { %v3822_v28 = vpop.f32.mrf.mxu3  ;;  %v3683_v0 = vshll.u32 %v13298_v48, 16  ;;  %v5057_v6 = vunpack.c.l.b16 %v5014_v21  ;;  %v5990_v34 = vshll.u32 %v16975_v10, 16 }
 0x2d0   : > { %v3887_v54 = vadd.f32 %v3822_v28, %v20045_v31  ;;  %v4133_v28 = vpack.c.b16 %v4116_v5, %v4115_v9  ;;  %v5024_v62 = vsel %vm15272_vm7, %v5019_v58, %v5023_v3  ;;  %v13347_v9 = vrot.slane %v13331_v14, 9 }
 0x2d1   : > { %v5981_v5 = vshrl.u32 %v13609_v20, 16  ;;  %v3735_v63 = vpack.c.b16 %v3718_v4, %v3717_v59  ;;  %v4082_v58 = vrot.slane %v4080_v38, 4  ;;  %v4083_v3 = vrot.slane %v13298_v48, 5 }
 0x2d2   : > { %v4285_v2 = vadd.f32 %v4220_v29, %v3887_v54  ;;  %13461 = vmatmul.msk.bf16.gmra.mxu2 %vm882_vm5, %v5073_v1  ;;  %v16957_v8 = vpop.f32.mrf.mxu1  ;;  %v3680_v54 = vor.u32 %v3679_v51, %v16960_v42  ;;  %v14610_v51 = vld [vmem:[%s16048_s18 + $0xb4] sm:$0xff]  ;;  %v3685_v59 = vrot.slane %v3683_v0, 5  ;;  %v4081_v4 = vsel %vm15248_vm3, %v13347_v9, %v4080_v38 }
 0x2d3   : > { %v5983_v14 = vrot.slane %v5981_v5, 4  ;;  %v6652_v48 = vrot.slane %v16975_v10, 5  ;;  %v5992_v21 = vrot.slane %v5990_v34, 5  ;;  %v4084_v0 = vsel %vm15248_vm3, %v4082_v58, %v4083_v3 }
 0x2d4   : > { %v4571_v60 = vadd.f32 %v16874_v57, %v4285_v2  ;;  %v16964_v29 = vpop.f32.mrf.mxu0  ;;  %v5058_v2 = vunpack.c.l.b16 %v5024_v62 }
 0x2d5   : > { %v16966_v1 = vpop.f32.mrf.mxu2 }
 0x2d6   : > { %v16979_v57 = vadd.f32 %v16911_v16, %v4571_v60  ;;  %v5994_v16 = vshrl.u32 %v16975_v10, 16  ;;  %v3671_v60 = vrot.slane %v3670_v30, 4  ;;  %v5074_v5 = vpack.c.b16 %v5058_v2, %v5057_v6 }
 0x2d7   : > { %v3824_v31 = vpop.f32.mrf.mxu3  ;;  %13363 = vmatmul.msk.bf16.gmra.mxu0 %vm882_vm5, %v4133_v28  ;;  %v4118_v2 = vunpack.c.l.b16 %v4084_v0 }
 0x2d8   : > { %20046 = vst [vmem:[#allocation14_spill] sm:$0xff] %v16979_v57  ;;  %v3888_v7 = vadd.f32 %v3824_v31, %v20047_v37  ;;  %v5986_v57 = vrot.slane %v5984_v18, 5  ;;  %v3681_v31 = vrot.slane %v3680_v54, 4  ;;  %v13674_v54 = vld [vmem:[%s16048_s18 + $0xc] sm:$0xe]  ;;  %v5996_v9 = vrot.slane %v5994_v16, 4 }
 0x2d9   : > { %v3676_v10 = vsel %vm15272_vm7, %v3671_v60, %v16960_v42  ;;  %v4117_v18 = vunpack.c.l.b16 %v4081_v4  ;;  %v13690_v16 = vrot.slane %v13674_v54, 9 }
 0x2da   : > { %v4286_v56 = vadd.f32 %v4222_v26, %v3888_v7  ;;  %v16987_v20 = vpop.f32.mrf.mxu1  ;;  %v13755_v26 = vld [vmem:[%s20013_s3 + $0x3c] sm:$0xf]  ;;  %v5987_v28 = vor.u32 %v5986_v57, %v5983_v14  ;;  %v13611_v57 = vld [vmem:[%s16048_s18 + $0x14] sm:$0x1]  ;;  %v5997_v34 = vor.u32 %v5996_v9, %v5992_v21  ;;  %v6654_v14 = vrot.slane %v6652_v48, 4 }
 0x2db   : > { %v7148_v38 = vsel %vm931_vm0, %v13755_v26, 0  ;;  %v6000_v58 = vshll.u32 %v13611_v57, 16  ;;  %v6655_v42 = vrot.slane %v13611_v57, 5  ;;  %v3719_v0 = vunpack.c.l.b16 %v3676_v10 }
 0x2dc   : > { %13314 = vmatmul.msk.bf16.gmra.mxu3 %vm882_vm5, %v3735_v63  ;;  %v16996_v62 = vpop.f32.mrf.mxu0  ;;  %v5988_v37 = vrot.slane %v5987_v28, 4  ;;  %v3686_v63 = vsel %vm15272_vm7, %v3681_v31, %v3685_v59  ;;  %v4572_v3 = vadd.f32 %v16903_v39, %v4286_v56  ;;  %v5998_v60 = vrot.slane %v5997_v34, 4  ;;  %v13884_v39 = vld [vmem:[%s20013_s3 + $0x40] sm:$0xf] }
 0x2dd   : > { %v16998_v30 = vpop.f32.mrf.mxu2  ;;  %13445 = vmatmul.msk.bf16.gmra.mxu1 %vm882_vm5, %v14610_v51  ;;  %7157 = vmatpush.bf16.msra.mxu3 %v7148_v38  ;;  %v6002_v4 = vrot.slane %v6000_v58, 5  ;;  %v7802_v28 = vsel %vm931_vm0, %v13884_v39, 0  ;;  %v3720_v54 = vunpack.c.l.b16 %v3686_v63  ;;  %v4134_v38 = vpack.c.b16 %v4118_v2, %v4117_v18  ;;  %v17044_v63 = vld [vmem:[%s16048_s18 + $0x1c] sm:$0xf]  ;;  %v13612_v18 = vld [vmem:[%s16048_s18 + $0x18] sm:$0xf] }
 0x2de   : > { %v17014_v51 = vadd.f32 %v16938_v50, %v4572_v3  ;;  %v5993_v31 = vsel %vm15272_vm7, %v5988_v37, %v5992_v21  ;;  %v13933_v50 = vld [vmem:[%s20013_s3 + $0x44] sm:$0xf]  ;;  %7811 = vmatpush.bf16.msra.mxu0 %v7802_v28  ;;  %v6653_v37 = vsel %vm15248_vm3, %v13690_v16, %v6652_v48  ;;  %v6005_v3 = vshrl.u32 %v13612_v18, 16  ;;  %v20048_v2 = vld [vmem:[#allocation19_spill] sm:$0xff] }
 0x2df   : > { %v3827_v7 = vpop.f32.mrf.mxu3  ;;  %v8200_v21 = vsel %vm931_vm0, %v13933_v50, 0  ;;  %v6366_v34 = vunpack.c.l.b16 %v5993_v31  ;;  %v3736_v48 = vpack.c.b16 %v3720_v54, %v3719_v0  ;;  %v6014_v16 = vshll.u32 %v17044_v63, 16 }
 0x2e0   : > { %v3889_v6 = vadd.f32 %v3827_v7, %v16164_v46  ;;  %v13950_v46 = vld [vmem:[%s20013_s3 + $0x48] sm:$0xf]  ;;  %8209 = vmatpush.bf16.msra.mxu1 %v8200_v21  ;;  %v6656_v7 = vsel %vm15248_vm3, %v6654_v14, %v6655_v42  ;;  %v6764_v14 = vunpack.c.l.b16 %v6653_v37  ;;  %v6007_v50 = vrot.slane %v6005_v3, 4  ;;  %v13614_v21 = vld [vmem:[%s16048_s18 + $0x20] sm:$0x1] }
 0x2e1   : > { %v8486_v59 = vsel %vm931_vm0, %v13950_v46, 0  ;;  %v6765_v42 = vunpack.c.l.b16 %v6656_v7  ;;  %v6016_v54 = vrot.slane %v6014_v16, 5  ;;  %v14878_v7 = vld [vmem:[%s16048_s18 + $0x8] sm:$0x1]  ;;  %v6659_v3 = vrot.slane %v17044_v63, 5 }
 0x2e2   : > { %v4287_v26 = vadd.f32 %v16964_v29, %v3889_v6  ;;  %13462 = vmatmul.msk.bf16.gmra.mxu2 %vm882_vm5, %v5074_v5  ;;  %v17029_v56 = vpop.f32.mrf.mxu1  ;;  %v6003_v29 = vsel %vm15272_vm7, %v5998_v60, %v6002_v4  ;;  %v6008_v6 = vshll.u32 %v13612_v18, 16  ;;  %v5247_v4 = vld [vmem:[%s16048_s18] sm:$0xe]  ;;  %v5316_v18 = vrot.slane %v14878_v7, 5 }
 0x2e3   : > { %8495 = vmatpush.bf16.msra.mxu2 %v8486_v59  ;;  %v6367_v10 = vunpack.c.l.b16 %v6003_v29  ;;  %v13463_v28 = vrot.slane %v5247_v4, 9 }
 0x2e4   : > { %v4573_v9 = vadd.f32 %v16929_v15, %v4287_v26  ;;  %v4230_v5 = vpop.f32.mrf.mxu0  ;;  %v14877_v26 = vld [vmem:[%s16048_s18 + $0x4] sm:$0xf]  ;;  %v6010_v29 = vrot.slane %v6008_v6, 5 }
 0x2e5   : > { %v17037_v57 = vpop.f32.mrf.mxu2  ;;  %v5313_v31 = vrot.slane %v14877_v26, 5  ;;  %v6398_v39 = vpack.c.b16 %v6367_v10, %v6366_v34  ;;  %v6796_v34 = vpack.c.b16 %v6765_v42, %v6764_v14  ;;  %v13675_v10 = vld [vmem:[%s16048_s18 + $0x18] sm:$0xe] }
 0x2e6   : > { %v17048_v58 = vadd.f32 %v16966_v1, %v4573_v9  ;;  %v6018_v1 = vshrl.u32 %v17044_v63, 16  ;;  %v6011_v0 = vor.u32 %v6010_v29, %v6007_v50  ;;  %v13691_v42 = vrot.slane %v13675_v10, 9 }
 0x2e7   : > { %v3829_v15 = vpop.f32.mrf.mxu3  ;;  %13364 = vmatmul.msk.bf16.gmra.mxu0 %vm882_vm5, %v4134_v38  ;;  %v5315_v37 = vrot.slane %v5313_v31, 4  ;;  %v5314_v26 = vsel %vm15248_vm3, %v13463_v28, %v5313_v31  ;;  %v6661_v50 = vrot.slane %v6659_v3, 4 }
 0x2e8   : > { %v3890_v60 = vadd.f32 %v3829_v15, %v20048_v2  ;;  %v6020_v15 = vrot.slane %v6018_v1, 4  ;;  %v6012_v2 = vrot.slane %v6011_v0, 4  ;;  %v5425_v29 = vunpack.c.l.b16 %v5314_v26  ;;  %v14611_v0 = vld [vmem:[%s16048_s18 + $0xc] sm:$0xff] }
 0x2e9   : > { %v5317_v14 = vsel %vm15248_vm3, %v5315_v37, %v5316_v18  ;;  %v6660_v7 = vsel %vm15248_vm3, %v13691_v42, %v6659_v3  ;;  %v14879_v26 = vld [vmem:[%s16048_s18 + $0x10] sm:$0xf] }
 0x2ea   : > { %v4288_v46 = vadd.f32 %v16996_v62, %v3890_v60  ;;  %v17057_v59 = vpop.f32.mrf.mxu1  ;;  %v6024_v62 = vshll.u32 %v13614_v21, 16  ;;  %v6021_v60 = vor.u32 %v6020_v15, %v6016_v54  ;;  %v5426_v28 = vunpack.c.l.b16 %v5317_v14  ;;  %v17092_v15 = vld [vmem:[%s16048_s18 + $0x28] sm:$0xf] }
 0x2eb   : > { %v6038_v3 = vshll.u32 %v17092_v15, 16  ;;  %v5320_v14 = vrot.slane %v14879_v26, 5 }
 0x2ec   : > { %13315 = vmatmul.msk.bf16.gmra.mxu3 %vm882_vm5, %v3736_v48  ;;  %v4232_v38 = vpop.f32.mrf.mxu0  ;;  %v6026_v48 = vrot.slane %v6024_v62, 5  ;;  %v4574_v16 = vadd.f32 %v16957_v8, %v4288_v46  ;;  %v6022_v1 = vrot.slane %v6021_v60, 4  ;;  %v6662_v8 = vrot.slane %v13614_v21, 5  ;;  %v13615_v62 = vld [vmem:[%s16048_s18 + $0x24] sm:$0xf] }
 0x2ed   : > { %v17061_v9 = vpop.f32.mrf.mxu2  ;;  %13658 = vmatmul.msk.bf16.vlgmr.msrb.gmra.mxu1 %vm882_vm5, %v6398_v39  ;;  %v6029_v10 = vshrl.u32 %v13615_v62, 16  ;;  %v5457_v60 = vpack.c.b16 %v5426_v28, %v5425_v29  ;;  %v6040_v29 = vrot.slane %v6038_v3, 5 }
 0x2ee   : > { %v17074_v39 = vadd.f32 %v16998_v30, %v4574_v16  ;;  %v6027_v31 = vsel %vm15272_vm7, %v6022_v1, %v6026_v48  ;;  %v6663_v21 = vsel %vm15248_vm3, %v6661_v50, %v6662_v8  ;;  %v6766_v48 = vunpack.c.l.b16 %v6660_v7  ;;  %v14880_v7 = vld [vmem:[%s16048_s18 + $0x14] sm:$0x1] }
 0x2ef   : > { %v3832_v6 = vpop.f32.mrf.mxu3  ;;  %v6369_v18 = vunpack.c.l.b16 %v6027_v31  ;;  %v6767_v16 = vunpack.c.l.b16 %v6663_v21  ;;  %v5323_v21 = vrot.slane %v14880_v7, 5 }
 0x2f0   : > { %v3891_v4 = vadd.f32 %v3832_v6, %v16212_v41  ;;  %v6017_v41 = vsel %vm15272_vm7, %v6012_v2, %v6016_v54  ;;  %v6032_v6 = vshll.u32 %v13615_v62, 16 }
 0x2f1   : > { %v6368_v54 = vunpack.c.l.b16 %v6017_v41  ;;  %v13617_v41 = vld [vmem:[%s16048_s18 + $0x2c] sm:$0x1] }
 0x2f2   : > { %v4289_v63 = vadd.f32 %v4230_v5, %v3891_v4  ;;  %13707 = vmatmul.msk.bf16.vlgmr.msrb.gmra.mxu2 %vm882_vm5, %v6796_v34  ;;  %v17077_v46 = vpop.f32.mrf.mxu1  ;;  %v5248_v4 = vld [vmem:[%s16048_s18 + $0xc] sm:$0xe]  ;;  %v6034_v50 = vrot.slane %v6032_v6, 5 }
 0x2f3   : > { %v6399_v1 = vpack.c.b16 %v6369_v18, %v6368_v54  ;;  %v13464_v8 = vrot.slane %v5248_v4, 9  ;;  %v6797_v54 = vpack.c.b16 %v6767_v16, %v6766_v48  ;;  %v13676_v18 = vld [vmem:[%s16048_s18 + $0x24] sm:$0xe] }
 0x2f4   : > { %v4575_v30 = vadd.f32 %v16987_v20, %v4289_v63  ;;  %v4235_v5 = vpop.f32.mrf.mxu0  ;;  %v6031_v63 = vrot.slane %v6029_v10, 4  ;;  %v13692_v16 = vrot.slane %v13676_v18, 9 }
 0x2f5   : > { %v17085_v37 = vpop.f32.mrf.mxu2  ;;  %v5321_v26 = vsel %vm15248_vm3, %v13464_v8, %v5320_v14 }
 0x2f6   : > { %v17096_v34 = vadd.f32 %v17037_v57, %v4575_v30  ;;  %v6042_v57 = vshrl.u32 %v17092_v15, 16  ;;  %v6035_v31 = vor.u32 %v6034_v50, %v6031_v63  ;;  %v5322_v30 = vrot.slane %v5320_v14, 4 }
 0x2f7   : > { %v3834_v20 = vpop.f32.mrf.mxu3  ;;  %13593 = vmatmul.msk.bf16.vlgmr.msrb.gmra.mxu0 %vm882_vm5, %v14611_v0  ;;  %v5427_v50 = vunpack.c.l.b16 %v5321_v26  ;;  %v14881_v26 = vld [vmem:[%s16048_s18 + $0x1c] sm:$0xf] }
 0x2f8   : > { %v3892_v2 = vadd.f32 %v3834_v20, %v16233_v27  ;;  %v6044_v62 = vrot.slane %v6042_v57, 4  ;;  %v6666_v20 = vrot.slane %v17092_v15, 5  ;;  %v6036_v6 = vrot.slane %v6035_v31, 4  ;;  %v14612_v31 = vld [vmem:[%s16048_s18 + $0x18] sm:$0xff] }
 0x2f9   : > { %v5324_v48 = vsel %vm15248_vm3, %v5322_v30, %v5323_v21 }
 0x2fa   : > { %v4290_v42 = vadd.f32 %v4232_v38, %v3892_v2  ;;  %v17104_v27 = vpop.f32.mrf.mxu1  ;;  %v6048_v38 = vshll.u32 %v13617_v41, 16  ;;  %v6045_v2 = vor.u32 %v6044_v62, %v6040_v29  ;;  %v6668_v63 = vrot.slane %v6666_v20, 4  ;;  %v17139_v62 = vld [vmem:[%s16048_s18 + $0x34] sm:$0xf] }
 0x2fb   : > { %v5428_v8 = vunpack.c.l.b16 %v5324_v48  ;;  %v6667_v7 = vsel %vm15248_vm3, %v13692_v16, %v6666_v20  ;;  %v6062_v20 = vshll.u32 %v17139_v62, 16  ;;  %v5327_v48 = vrot.slane %v14881_v26, 5 }
 0x2fc   : > { %13480 = vmatmul.msk.bf16.vlgmr.msrb.gmra.mxu3 %vm882_vm5, %v5457_v60  ;;  %v4237_v28 = vpop.f32.mrf.mxu0  ;;  %v6050_v60 = vrot.slane %v6048_v38, 5  ;;  %v4576_v3 = vadd.f32 %v17029_v56, %v4290_v42  ;;  %v6046_v57 = vrot.slane %v6045_v2, 4  ;;  %v6669_v56 = vrot.slane %v13617_v41, 5  ;;  %v13618_v38 = vld [vmem:[%s16048_s18 + $0x30] sm:$0xf] }
 0x2fd   : > { %v17108_v0 = vpop.f32.mrf.mxu2  ;;  %13659 = vmatmul.msk.bf16.gmra.mxu1 %vm882_vm5, %v6399_v1  ;;  %v6053_v18 = vshrl.u32 %v13618_v38, 16  ;;  %v5458_v2 = vpack.c.b16 %v5428_v8, %v5427_v50  ;;  %v6064_v50 = vrot.slane %v6062_v20, 5 }
 0x2fe   : > { %v17121_v1 = vadd.f32 %v17061_v9, %v4576_v3  ;;  %v6051_v14 = vsel %vm15272_vm7, %v6046_v57, %v6050_v60  ;;  %v6670_v41 = vsel %vm15248_vm3, %v6668_v63, %v6669_v56  ;;  %v6768_v60 = vunpack.c.l.b16 %v6667_v7  ;;  %v14882_v7 = vld [vmem:[%s16048_s18 + $0x20] sm:$0x1] }
 0x2ff   : > { %v3837_v10 = vpop.f32.mrf.mxu3  ;;  %v6371_v21 = vunpack.c.l.b16 %v6051_v14  ;;  %v6769_v3 = vunpack.c.l.b16 %v6670_v41  ;;  %v5330_v41 = vrot.slane %v14882_v7, 5 }
 0x300   : > { %v3893_v4 = vadd.f32 %v3837_v10, %v16260_v44  ;;  %v6041_v44 = vsel %vm15272_vm7, %v6036_v6, %v6040_v29  ;;  %v6056_v10 = vshll.u32 %v13618_v38, 16 }
 0x301   : > { %v6370_v29 = vunpack.c.l.b16 %v6041_v44  ;;  %v13620_v44 = vld [vmem:[%s16048_s18 + $0x38] sm:$0x1] }
 0x302   : > { %v4291_v15 = vadd.f32 %v4235_v5, %v3893_v4  ;;  %13708 = vmatmul.msk.bf16.gmra.mxu2 %vm882_vm5, %v6797_v54  ;;  %v17124_v42 = vpop.f32.mrf.mxu1  ;;  %v5249_v4 = vld [vmem:[%s16048_s18 + $0x18] sm:$0xe]  ;;  %v6058_v63 = vrot.slane %v6056_v10, 5 }
 0x303   : > { %v6400_v57 = vpack.c.b16 %v6371_v21, %v6370_v29  ;;  %v13465_v56 = vrot.slane %v5249_v4, 9  ;;  %v6798_v29 = vpack.c.b16 %v6769_v3, %v6768_v60  ;;  %v13677_v21 = vld [vmem:[%s16048_s18 + $0x30] sm:$0xe] }
 0x304   : > { %v4577_v9 = vadd.f32 %v17057_v59, %v4291_v15  ;;  %v4240_v5 = vpop.f32.mrf.mxu0  ;;  %v6055_v15 = vrot.slane %v6053_v18, 4  ;;  %v13693_v3 = vrot.slane %v13677_v21, 9 }
 0x305   : > { %v17132_v30 = vpop.f32.mrf.mxu2  ;;  %v5328_v26 = vsel %vm15248_vm3, %v13465_v56, %v5327_v48 }
 0x306   : > { %v17143_v54 = vadd.f32 %v17085_v37, %v4577_v9  ;;  %v6066_v37 = vshrl.u32 %v17139_v62, 16  ;;  %v6059_v14 = vor.u32 %v6058_v63, %v6055_v15  ;;  %v5329_v9 = vrot.slane %v5327_v48, 4 }
 0x307   : > { %v3839_v59 = vpop.f32.mrf.mxu3  ;;  %13594 = vmatmul.msk.bf16.gmra.mxu0 %vm882_vm5, %v14612_v31  ;;  %v5429_v63 = vunpack.c.l.b16 %v5328_v26  ;;  %v14883_v26 = vld [vmem:[%s16048_s18 + $0x28] sm:$0xf] }
 0x308   : > { %v3894_v6 = vadd.f32 %v3839_v59, %v16287_v55  ;;  %v6068_v38 = vrot.slane %v6066_v37, 4  ;;  %v6673_v59 = vrot.slane %v17139_v62, 5  ;;  %v6060_v10 = vrot.slane %v6059_v14, 4  ;;  %v14613_v14 = vld [vmem:[%s16048_s18 + $0x24] sm:$0xff] }
 0x309   : > { %v5331_v60 = vsel %vm15248_vm3, %v5329_v9, %v5330_v41 }
 0x30a   : > { %v4292_v16 = vadd.f32 %v4237_v28, %v3894_v6  ;;  %v17151_v55 = vpop.f32.mrf.mxu1  ;;  %v6072_v28 = vshll.u32 %v13620_v44, 16  ;;  %v6069_v6 = vor.u32 %v6068_v38, %v6064_v50  ;;  %v6675_v15 = vrot.slane %v6673_v59, 4  ;;  %v17186_v38 = vld [vmem:[%s16048_s18 + $0x40] sm:$0xf] }
 0x30b   : > { %v5430_v56 = vunpack.c.l.b16 %v5331_v60  ;;  %v6674_v7 = vsel %vm15248_vm3, %v13693_v3, %v6673_v59  ;;  %v6086_v59 = vshll.u32 %v17186_v38, 16  ;;  %v5334_v60 = vrot.slane %v14883_v26, 5 }
 0x30c   : > { %13481 = vmatmul.msk.bf16.gmra.mxu3 %vm882_vm5, %v5458_v2  ;;  %v4242_v8 = vpop.f32.mrf.mxu0  ;;  %v6074_v2 = vrot.slane %v6072_v28, 5  ;;  %v4578_v20 = vadd.f32 %v17077_v46, %v4292_v16  ;;  %v6070_v37 = vrot.slane %v6069_v6, 4  ;;  %v6676_v46 = vrot.slane %v13620_v44, 5  ;;  %v13621_v28 = vld [vmem:[%s16048_s18 + $0x3c] sm:$0xf] }
 0x30d   : > { %v17155_v31 = vpop.f32.mrf.mxu2  ;;  %13660 = vmatmul.msk.bf16.gmra.mxu1 %vm882_vm5, %v6400_v57  ;;  %v6077_v21 = vshrl.u32 %v13621_v28, 16  ;;  %v5459_v6 = vpack.c.b16 %v5430_v56, %v5429_v63  ;;  %v6088_v63 = vrot.slane %v6086_v59, 5 }
 0x30e   : > { %v17168_v57 = vadd.f32 %v17108_v0, %v4578_v20  ;;  %v6075_v48 = vsel %vm15272_vm7, %v6070_v37, %v6074_v2  ;;  %v6677_v44 = vsel %vm15248_vm3, %v6675_v15, %v6676_v46  ;;  %v6770_v2 = vunpack.c.l.b16 %v6674_v7  ;;  %v14884_v7 = vld [vmem:[%s16048_s18 + $0x2c] sm:$0x1] }
 0x30f   : > { %v3842_v18 = vpop.f32.mrf.mxu3  ;;  %v6373_v41 = vunpack.c.l.b16 %v6075_v48  ;;  %v6771_v20 = vunpack.c.l.b16 %v6677_v44  ;;  %v5337_v44 = vrot.slane %v14884_v7, 5 }
 0x310   : > { %v3895_v4 = vadd.f32 %v3842_v18, %v16318_v33  ;;  %v6065_v33 = vsel %vm15272_vm7, %v6060_v10, %v6064_v50  ;;  %v6080_v18 = vshll.u32 %v13621_v28, 16 }
 0x311   : > { %v6372_v50 = vunpack.c.l.b16 %v6065_v33  ;;  %v13623_v33 = vld [vmem:[%s16048_s18 + $0x44] sm:$0x1] }
 0x312   : > { %v4293_v62 = vadd.f32 %v4240_v5, %v3895_v4  ;;  %13709 = vmatmul.msk.bf16.gmra.mxu2 %vm882_vm5, %v6798_v29  ;;  %v17171_v16 = vpop.f32.mrf.mxu1  ;;  %v5250_v4 = vld [vmem:[%s16048_s18 + $0x24] sm:$0xe]  ;;  %v6082_v15 = vrot.slane %v6080_v18, 5 }
 0x313   : > { %v6401_v37 = vpack.c.b16 %v6373_v41, %v6372_v50  ;;  %v13466_v46 = vrot.slane %v5250_v4, 9  ;;  %v6799_v50 = vpack.c.b16 %v6771_v20, %v6770_v2  ;;  %v13678_v41 = vld [vmem:[%s16048_s18 + $0x3c] sm:$0xe] }
 0x314   : > { %v4579_v0 = vadd.f32 %v17104_v27, %v4293_v62  ;;  %v4245_v5 = vpop.f32.mrf.mxu0  ;;  %v6079_v62 = vrot.slane %v6077_v21, 4  ;;  %v13694_v20 = vrot.slane %v13678_v41, 9 }
 0x315   : > { %v17179_v9 = vpop.f32.mrf.mxu2  ;;  %v5335_v26 = vsel %vm15248_vm3, %v13466_v46, %v5334_v60 }
 0x316   : > { %v17190_v29 = vadd.f32 %v17132_v30, %v4579_v0  ;;  %v6090_v30 = vshrl.u32 %v17186_v38, 16  ;;  %v6083_v48 = vor.u32 %v6082_v15, %v6079_v62  ;;  %v5336_v0 = vrot.slane %v5334_v60, 4 }
 0x317   : > { %v3844_v27 = vpop.f32.mrf.mxu3  ;;  %13595 = vmatmul.msk.bf16.gmra.mxu0 %vm882_vm5, %v14613_v14  ;;  %v5431_v15 = vunpack.c.l.b16 %v5335_v26  ;;  %v14885_v26 = vld [vmem:[%s16048_s18 + $0x34] sm:$0xf] }
 0x318   : > { %v3896_v10 = vadd.f32 %v3844_v27, %v16340_v22  ;;  %v6092_v28 = vrot.slane %v6090_v30, 4  ;;  %v6680_v27 = vrot.slane %v17186_v38, 5  ;;  %v6084_v18 = vrot.slane %v6083_v48, 4  ;;  %v14614_v48 = vld [vmem:[%s16048_s18 + $0x30] sm:$0xff] }
 0x319   : > { %v5338_v2 = vsel %vm15248_vm3, %v5336_v0, %v5337_v44 }
 0x31a   : > { %v4294_v3 = vadd.f32 %v4242_v8, %v3896_v10  ;;  %v17198_v22 = vpop.f32.mrf.mxu1  ;;  %v6096_v8 = vshll.u32 %v13623_v33, 16  ;;  %v6093_v10 = vor.u32 %v6092_v28, %v6088_v63  ;;  %v6682_v62 = vrot.slane %v6680_v27, 4  ;;  %v17233_v28 = vld [vmem:[%s16048_s18 + $0x4c] sm:$0xf] }
 0x31b   : > { %v5432_v46 = vunpack.c.l.b16 %v5338_v2  ;;  %v6681_v7 = vsel %vm15248_vm3, %v13694_v20, %v6680_v27  ;;  %v6110_v27 = vshll.u32 %v17233_v28, 16  ;;  %v5341_v2 = vrot.slane %v14885_v26, 5 }
 0x31c   : > { %13482 = vmatmul.msk.bf16.gmra.mxu3 %vm882_vm5, %v5459_v6  ;;  %v4247_v56 = vpop.f32.mrf.mxu0  ;;  %v6098_v6 = vrot.slane %v6096_v8, 5  ;;  %v4580_v59 = vadd.f32 %v17124_v42, %v4294_v3  ;;  %v6094_v30 = vrot.slane %v6093_v10, 4  ;;  %v6683_v42 = vrot.slane %v13623_v33, 5  ;;  %v13624_v8 = vld [vmem:[%s16048_s18 + $0x48] sm:$0xf] }
 0x31d   : > { %v17202_v14 = vpop.f32.mrf.mxu2  ;;  %13661 = vmatmul.msk.bf16.gmra.mxu1 %vm882_vm5, %v6401_v37  ;;  %v6101_v41 = vshrl.u32 %v13624_v8, 16  ;;  %v5460_v10 = vpack.c.b16 %v5432_v46, %v5431_v15  ;;  %v6112_v15 = vrot.slane %v6110_v27, 5 }
 0x31e   : > { %v17215_v37 = vadd.f32 %v17155_v31, %v4580_v59  ;;  %v6099_v60 = vsel %vm15272_vm7, %v6094_v30, %v6098_v6  ;;  %v6684_v33 = vsel %vm15248_vm3, %v6682_v62, %v6683_v42  ;;  %v6772_v6 = vunpack.c.l.b16 %v6681_v7  ;;  %v14886_v7 = vld [vmem:[%s16048_s18 + $0x38] sm:$0x1] }
 0x31f   : > { %v3847_v21 = vpop.f32.mrf.mxu3  ;;  %v6375_v44 = vunpack.c.l.b16 %v6099_v60  ;;  %v6773_v59 = vunpack.c.l.b16 %v6684_v33  ;;  %v5344_v33 = vrot.slane %v14886_v7, 5 }
 0x320   : > { %v3897_v4 = vadd.f32 %v3847_v21, %v16370_v36  ;;  %v6089_v36 = vsel %vm15272_vm7, %v6084_v18, %v6088_v63  ;;  %v6104_v21 = vshll.u32 %v13624_v8, 16 }
 0x321   : > { %v6374_v63 = vunpack.c.l.b16 %v6089_v36  ;;  %v13626_v36 = vld [vmem:[%s16048_s18 + $0x50] sm:$0x1] }
 0x322   : > { %v4295_v38 = vadd.f32 %v4245_v5, %v3897_v4  ;;  %13710 = vmatmul.msk.bf16.gmra.mxu2 %vm882_vm5, %v6799_v50  ;;  %v17218_v3 = vpop.f32.mrf.mxu1  ;;  %v5251_v4 = vld [vmem:[%s16048_s18 + $0x30] sm:$0xe]  ;;  %v6106_v62 = vrot.slane %v6104_v21, 5 }
 0x323   : > { %v6402_v30 = vpack.c.b16 %v6375_v44, %v6374_v63  ;;  %v13467_v42 = vrot.slane %v5251_v4, 9  ;;  %v6800_v63 = vpack.c.b16 %v6773_v59, %v6772_v6  ;;  %v13679_v44 = vld [vmem:[%s16048_s18 + $0x48] sm:$0xe] }
 0x324   : > { %v4581_v31 = vadd.f32 %v17151_v55, %v4295_v38  ;;  %v4250_v5 = vpop.f32.mrf.mxu0  ;;  %v6103_v38 = vrot.slane %v6101_v41, 4  ;;  %v13695_v59 = vrot.slane %v13679_v44, 9 }
 0x325   : > { %v17226_v0 = vpop.f32.mrf.mxu2  ;;  %v5342_v26 = vsel %vm15248_vm3, %v13467_v42, %v5341_v2 }
 0x326   : > { %v17237_v50 = vadd.f32 %v17179_v9, %v4581_v31  ;;  %v6114_v9 = vshrl.u32 %v17233_v28, 16  ;;  %v6107_v60 = vor.u32 %v6106_v62, %v6103_v38  ;;  %v5343_v31 = vrot.slane %v5341_v2, 4 }
 0x327   : > { %v3849_v55 = vpop.f32.mrf.mxu3  ;;  %13596 = vmatmul.msk.bf16.gmra.mxu0 %vm882_vm5, %v14614_v48  ;;  %v5433_v62 = vunpack.c.l.b16 %v5342_v26  ;;  %v14887_v26 = vld [vmem:[%s16048_s18 + $0x40] sm:$0xf] }
 0x328   : > { %v3898_v18 = vadd.f32 %v3849_v55, %v16398_v45  ;;  %v6116_v8 = vrot.slane %v6114_v9, 4  ;;  %v6687_v55 = vrot.slane %v17233_v28, 5  ;;  %v6108_v21 = vrot.slane %v6107_v60, 4  ;;  %v14615_v60 = vld [vmem:[%s16048_s18 + $0x3c] sm:$0xff] }
 0x329   : > { %v5345_v6 = vsel %vm15248_vm3, %v5343_v31, %v5344_v33 }
 0x32a   : > { %v4296_v20 = vadd.f32 %v4247_v56, %v3898_v18  ;;  %v17245_v45 = vpop.f32.mrf.mxu1  ;;  %v6120_v56 = vshll.u32 %v13626_v36, 16  ;;  %v6117_v18 = vor.u32 %v6116_v8, %v6112_v15  ;;  %v6689_v38 = vrot.slane %v6687_v55, 4  ;;  %v17280_v8 = vld [vmem:[%s16048_s18 + $0x58] sm:$0xf] }
 0x32b   : > { %v5434_v42 = vunpack.c.l.b16 %v5345_v6  ;;  %v6688_v7 = vsel %vm15248_vm3, %v13695_v59, %v6687_v55  ;;  %v6134_v55 = vshll.u32 %v17280_v8, 16  ;;  %v5348_v6 = vrot.slane %v14887_v26, 5 }
 0x32c   : > { %13483 = vmatmul.msk.bf16.gmra.mxu3 %vm882_vm5, %v5460_v10  ;;  %v4252_v46 = vpop.f32.mrf.mxu0  ;;  %v6122_v10 = vrot.slane %v6120_v56, 5  ;;  %v4582_v27 = vadd.f32 %v17171_v16, %v4296_v20  ;;  %v6118_v9 = vrot.slane %v6117_v18, 4  ;;  %v6690_v16 = vrot.slane %v13626_v36, 5  ;;  %v13627_v56 = vld [vmem:[%s16048_s18 + $0x54] sm:$0xf] }
 0x32d   : > { %v17249_v48 = vpop.f32.mrf.mxu2  ;;  %13662 = vmatmul.msk.bf16.gmra.mxu1 %vm882_vm5, %v6402_v30  ;;  %v6125_v44 = vshrl.u32 %v13627_v56, 16  ;;  %v5461_v18 = vpack.c.b16 %v5434_v42, %v5433_v62  ;;  %v6136_v62 = vrot.slane %v6134_v55, 5 }
 0x32e   : > { %v17262_v30 = vadd.f32 %v17202_v14, %v4582_v27  ;;  %v6123_v2 = vsel %vm15272_vm7, %v6118_v9, %v6122_v10  ;;  %v6691_v36 = vsel %vm15248_vm3, %v6689_v38, %v6690_v16  ;;  %v6774_v10 = vunpack.c.l.b16 %v6688_v7  ;;  %v14888_v7 = vld [vmem:[%s16048_s18 + $0x44] sm:$0x1] }
 0x32f   : > { %v3852_v41 = vpop.f32.mrf.mxu3  ;;  %v6377_v33 = vunpack.c.l.b16 %v6123_v2  ;;  %v6775_v27 = vunpack.c.l.b16 %v6691_v36  ;;  %v5351_v36 = vrot.slane %v14888_v7, 5 }
 0x330   : > { %v3899_v4 = vadd.f32 %v3852_v41, %v16428_v11  ;;  %v6113_v11 = vsel %vm15272_vm7, %v6108_v21, %v6112_v15  ;;  %v6128_v41 = vshll.u32 %v13627_v56, 16 }
 0x331   : > { %v6376_v15 = vunpack.c.l.b16 %v6113_v11  ;;  %v13629_v11 = vld [vmem:[%s16048_s18 + $0x5c] sm:$0x1] }
 0x332   : > { %v4297_v28 = vadd.f32 %v4250_v5, %v3899_v4  ;;  %13711 = vmatmul.msk.bf16.gmra.mxu2 %vm882_vm5, %v6800_v63  ;;  %v17265_v20 = vpop.f32.mrf.mxu1  ;;  %v5252_v4 = vld [vmem:[%s16048_s18 + $0x3c] sm:$0xe]  ;;  %v6130_v38 = vrot.slane %v6128_v41, 5 }
 0x333   : > { %v6403_v9 = vpack.c.b16 %v6377_v33, %v6376_v15  ;;  %v13468_v16 = vrot.slane %v5252_v4, 9  ;;  %v6801_v15 = vpack.c.b16 %v6775_v27, %v6774_v10  ;;  %v13680_v33 = vld [vmem:[%s16048_s18 + $0x54] sm:$0xe] }
 0x334   : > { %v4583_v14 = vadd.f32 %v17198_v22, %v4297_v28  ;;  %v4255_v5 = vpop.f32.mrf.mxu0  ;;  %v6127_v28 = vrot.slane %v6125_v44, 4  ;;  %v13696_v27 = vrot.slane %v13680_v33, 9 }
 0x335   : > { %v17273_v31 = vpop.f32.mrf.mxu2  ;;  %v5349_v26 = vsel %vm15248_vm3, %v13468_v16, %v5348_v6 }
 0x336   : > { %v17284_v63 = vadd.f32 %v17226_v0, %v4583_v14  ;;  %v6138_v0 = vshrl.u32 %v17280_v8, 16  ;;  %v6131_v2 = vor.u32 %v6130_v38, %v6127_v28  ;;  %v5350_v14 = vrot.slane %v5348_v6, 4 }
 0x337   : > { %v3854_v22 = vpop.f32.mrf.mxu3  ;;  %13597 = vmatmul.msk.bf16.gmra.mxu0 %vm882_vm5, %v14615_v60  ;;  %v5435_v38 = vunpack.c.l.b16 %v5349_v26  ;;  %v14889_v26 = vld [vmem:[%s16048_s18 + $0x4c] sm:$0xf] }
 0x338   : > { %v3900_v21 = vadd.f32 %v3854_v22, %v16451_v24  ;;  %v6140_v56 = vrot.slane %v6138_v0, 4  ;;  %v6694_v22 = vrot.slane %v17280_v8, 5  ;;  %v6132_v41 = vrot.slane %v6131_v2, 4  ;;  %v14616_v2 = vld [vmem:[%s16048_s18 + $0x48] sm:$0xff] }
 0x339   : > { %v5352_v10 = vsel %vm15248_vm3, %v5350_v14, %v5351_v36 }
 0x33a   : > { %v4298_v59 = vadd.f32 %v4252_v46, %v3900_v21  ;;  %v17292_v24 = vpop.f32.mrf.mxu1  ;;  %v6144_v46 = vshll.u32 %v13629_v11, 16  ;;  %v6141_v21 = vor.u32 %v6140_v56, %v6136_v62  ;;  %v6696_v28 = vrot.slane %v6694_v22, 4  ;;  %v17327_v56 = vld [vmem:[%s16048_s18 + $0x64] sm:$0xf] }
 0x33b   : > { %v5436_v16 = vunpack.c.l.b16 %v5352_v10  ;;  %v6695_v7 = vsel %vm15248_vm3, %v13696_v27, %v6694_v22  ;;  %v6158_v22 = vshll.u32 %v17327_v56, 16  ;;  %v5355_v10 = vrot.slane %v14889_v26, 5 }
 0x33c   : > { %13484 = vmatmul.msk.bf16.gmra.mxu3 %vm882_vm5, %v5461_v18  ;;  %v4257_v42 = vpop.f32.mrf.mxu0  ;;  %v6146_v18 = vrot.slane %v6144_v46, 5  ;;  %v4584_v55 = vadd.f32 %v17218_v3, %v4298_v59  ;;  %v6142_v0 = vrot.slane %v6141_v21, 4  ;;  %v6697_v3 = vrot.slane %v13629_v11, 5  ;;  %v13630_v46 = vld [vmem:[%s16048_s18 + $0x60] sm:$0xf] }
 0x33d   : > { %v17296_v60 = vpop.f32.mrf.mxu2  ;;  %13663 = vmatmul.msk.bf16.gmra.mxu1 %vm882_vm5, %v6403_v9  ;;  %v6149_v33 = vshrl.u32 %v13630_v46, 16  ;;  %v5462_v21 = vpack.c.b16 %v5436_v16, %v5435_v38  ;;  %v6160_v38 = vrot.slane %v6158_v22, 5 }
 0x33e   : > { %v17309_v9 = vadd.f32 %v17249_v48, %v4584_v55  ;;  %v6147_v6 = vsel %vm15272_vm7, %v6142_v0, %v6146_v18  ;;  %v6698_v11 = vsel %vm15248_vm3, %v6696_v28, %v6697_v3  ;;  %v6776_v18 = vunpack.c.l.b16 %v6695_v7  ;;  %v14890_v7 = vld [vmem:[%s16048_s18 + $0x50] sm:$0x1] }
 0x33f   : > { %v3857_v44 = vpop.f32.mrf.mxu3  ;;  %v6379_v36 = vunpack.c.l.b16 %v6147_v6  ;;  %v6777_v55 = vunpack.c.l.b16 %v6698_v11  ;;  %v5358_v11 = vrot.slane %v14890_v7, 5 }
 0x340   : > { %v3901_v4 = vadd.f32 %v3857_v44, %v16480_v61  ;;  %v6137_v61 = vsel %vm15272_vm7, %v6132_v41, %v6136_v62  ;;  %v6152_v44 = vshll.u32 %v13630_v46, 16 }
 0x341   : > { %v6378_v62 = vunpack.c.l.b16 %v6137_v61  ;;  %v13632_v61 = vld [vmem:[%s16048_s18 + $0x68] sm:$0x1] }
 0x342   : > { %v4299_v8 = vadd.f32 %v4255_v5, %v3901_v4  ;;  %13712 = vmatmul.msk.bf16.gmra.mxu2 %vm882_vm5, %v6801_v15  ;;  %v17312_v59 = vpop.f32.mrf.mxu1  ;;  %v5253_v4 = vld [vmem:[%s16048_s18 + $0x48] sm:$0xe]  ;;  %v6154_v28 = vrot.slane %v6152_v44, 5 }
 0x343   : > { %v6404_v0 = vpack.c.b16 %v6379_v36, %v6378_v62  ;;  %v13469_v3 = vrot.slane %v5253_v4, 9  ;;  %v6802_v62 = vpack.c.b16 %v6777_v55, %v6776_v18  ;;  %v13681_v36 = vld [vmem:[%s16048_s18 + $0x60] sm:$0xe] }
 0x344   : > { %v4585_v48 = vadd.f32 %v17245_v45, %v4299_v8  ;;  %v4260_v5 = vpop.f32.mrf.mxu0  ;;  %v6151_v8 = vrot.slane %v6149_v33, 4  ;;  %v13697_v55 = vrot.slane %v13681_v36, 9 }
 0x345   : > { %v17320_v14 = vpop.f32.mrf.mxu2  ;;  %v5356_v26 = vsel %vm15248_vm3, %v13469_v3, %v5355_v10 }
 0x346   : > { %v17331_v15 = vadd.f32 %v17273_v31, %v4585_v48  ;;  %v6162_v31 = vshrl.u32 %v17327_v56, 16  ;;  %v6155_v6 = vor.u32 %v6154_v28, %v6151_v8  ;;  %v5357_v48 = vrot.slane %v5355_v10, 4 }
 0x347   : > { %v3859_v45 = vpop.f32.mrf.mxu3  ;;  %13598 = vmatmul.msk.bf16.gmra.mxu0 %vm882_vm5, %v14616_v2  ;;  %v5437_v28 = vunpack.c.l.b16 %v5356_v26  ;;  %v14891_v26 = vld [vmem:[%s16048_s18 + $0x58] sm:$0xf] }
 0x348   : > { %v3902_v41 = vadd.f32 %v3859_v45, %v16506_v13  ;;  %v6164_v46 = vrot.slane %v6162_v31, 4  ;;  %v6701_v45 = vrot.slane %v17327_v56, 5  ;;  %v6156_v44 = vrot.slane %v6155_v6, 4  ;;  %v14617_v6 = vld [vmem:[%s16048_s18 + $0x54] sm:$0xff] }
 0x349   : > { %v5359_v18 = vsel %vm15248_vm3, %v5357_v48, %v5358_v11 }
 0x34a   : > { %v4300_v27 = vadd.f32 %v4257_v42, %v3902_v41  ;;  %v17339_v13 = vpop.f32.mrf.mxu1  ;;  %v6168_v42 = vshll.u32 %v13632_v61, 16  ;;  %v6165_v41 = vor.u32 %v6164_v46, %v6160_v38  ;;  %v6703_v8 = vrot.slane %v6701_v45, 4  ;;  %v17374_v46 = vld [vmem:[%s16048_s18 + $0x70] sm:$0xf] }
 0x34b   : > { %v5438_v3 = vunpack.c.l.b16 %v5359_v18  ;;  %v6702_v7 = vsel %vm15248_vm3, %v13697_v55, %v6701_v45  ;;  %v6182_v45 = vshll.u32 %v17374_v46, 16  ;;  %v5362_v18 = vrot.slane %v14891_v26, 5 }
 0x34c   : > { %13485 = vmatmul.msk.bf16.gmra.mxu3 %vm882_vm5, %v5462_v21  ;;  %v4262_v16 = vpop.f32.mrf.mxu0  ;;  %v6170_v21 = vrot.slane %v6168_v42, 5  ;;  %v4586_v22 = vadd.f32 %v17265_v20, %v4300_v27  ;;  %v6166_v31 = vrot.slane %v6165_v41, 4  ;;  %v6704_v20 = vrot.slane %v13632_v61, 5  ;;  %v13633_v42 = vld [vmem:[%s16048_s18 + $0x6c] sm:$0xf] }
 0x34d   : > { %v17343_v2 = vpop.f32.mrf.mxu2  ;;  %13664 = vmatmul.msk.bf16.gmra.mxu1 %vm882_vm5, %v6404_v0  ;;  %v6173_v36 = vshrl.u32 %v13633_v42, 16  ;;  %v5463_v41 = vpack.c.b16 %v5438_v3, %v5437_v28  ;;  %v6184_v28 = vrot.slane %v6182_v45, 5 }
 0x34e   : > { %v17356_v0 = vadd.f32 %v17296_v60, %v4586_v22  ;;  %v6171_v10 = vsel %vm15272_vm7, %v6166_v31, %v6170_v21  ;;  %v6705_v61 = vsel %vm15248_vm3, %v6703_v8, %v6704_v20  ;;  %v6778_v21 = vunpack.c.l.b16 %v6702_v7  ;;  %v14892_v7 = vld [vmem:[%s16048_s18 + $0x5c] sm:$0x1] }
 0x34f   : > { %v3862_v33 = vpop.f32.mrf.mxu3  ;;  %v6381_v11 = vunpack.c.l.b16 %v6171_v10  ;;  %v6779_v22 = vunpack.c.l.b16 %v6705_v61  ;;  %v5365_v61 = vrot.slane %v14892_v7, 5 }
 0x350   : > { %v3903_v4 = vadd.f32 %v3862_v33, %v16538_v52  ;;  %v6161_v52 = vsel %vm15272_vm7, %v6156_v44, %v6160_v38  ;;  %v6176_v33 = vshll.u32 %v13633_v42, 16 }
 0x351   : > { %v6380_v38 = vunpack.c.l.b16 %v6161_v52  ;;  %v13635_v52 = vld [vmem:[%s16048_s18 + $0x74] sm:$0x1] }
 0x352   : > { %v4301_v56 = vadd.f32 %v4260_v5, %v3903_v4  ;;  %13713 = vmatmul.msk.bf16.gmra.mxu2 %vm882_vm5, %v6802_v62  ;;  %v17359_v27 = vpop.f32.mrf.mxu1  ;;  %v5254_v4 = vld [vmem:[%s16048_s18 + $0x54] sm:$0xe]  ;;  %v6178_v8 = vrot.slane %v6176_v33, 5 }
 0x353   : > { %v6405_v31 = vpack.c.b16 %v6381_v11, %v6380_v38  ;;  %v13470_v20 = vrot.slane %v5254_v4, 9  ;;  %v6803_v38 = vpack.c.b16 %v6779_v22, %v6778_v21  ;;  %v13682_v11 = vld [vmem:[%s16048_s18 + $0x6c] sm:$0xe] }
 0x354   : > { %v4587_v60 = vadd.f32 %v17292_v24, %v4301_v56  ;;  %v4265_v5 = vpop.f32.mrf.mxu0  ;;  %v6175_v56 = vrot.slane %v6173_v36, 4  ;;  %v13698_v22 = vrot.slane %v13682_v11, 9 }
 0x355   : > { %v17367_v48 = vpop.f32.mrf.mxu2  ;;  %v5363_v26 = vsel %vm15248_vm3, %v13470_v20, %v5362_v18 }
 0x356   : > { %v17378_v62 = vadd.f32 %v17320_v14, %v4587_v60  ;;  %v6186_v14 = vshrl.u32 %v17374_v46, 16  ;;  %v6179_v10 = vor.u32 %v6178_v8, %v6175_v56  ;;  %v5364_v60 = vrot.slane %v5362_v18, 4 }
 0x357   : > { %v3864_v24 = vpop.f32.mrf.mxu3  ;;  %13599 = vmatmul.msk.bf16.gmra.mxu0 %vm882_vm5, %v14617_v6  ;;  %v5439_v8 = vunpack.c.l.b16 %v5363_v26  ;;  %v5255_v26 = vld [vmem:[%s16048_s18 + $0x60] sm:$0xe] }
 0x358   : > { %v3904_v44 = vadd.f32 %v3864_v24, %v16560_v49  ;;  %v6188_v42 = vrot.slane %v6186_v14, 4  ;;  %v6708_v24 = vrot.slane %v17374_v46, 5  ;;  %v6180_v33 = vrot.slane %v6179_v10, 4  ;;  %v14618_v10 = vld [vmem:[%s16048_s18 + $0x60] sm:$0xff] }
 0x359   : > { %v5366_v21 = vsel %vm15248_vm3, %v5364_v60, %v5365_v61 }
 0x35a   : > { %v4302_v55 = vadd.f32 %v4262_v16, %v3904_v44  ;;  %v17386_v49 = vpop.f32.mrf.mxu1  ;;  %v6192_v16 = vshll.u32 %v13635_v52, 16  ;;  %v6189_v44 = vor.u32 %v6188_v42, %v6184_v28  ;;  %v6710_v56 = vrot.slane %v6708_v24, 4  ;;  %v17421_v42 = vld [vmem:[%s16048_s18 + $0x7c] sm:$0xf] }
 0x35b   : > { %v5440_v20 = vunpack.c.l.b16 %v5366_v21  ;;  %v6709_v7 = vsel %vm15248_vm3, %v13698_v22, %v6708_v24  ;;  %v6206_v24 = vshll.u32 %v17421_v42, 16  ;;  %v14893_v21 = vld [vmem:[%s16048_s18 + $0x64] sm:$0xf] }
 0x35c   : > { %13486 = vmatmul.msk.bf16.gmra.mxu3 %vm882_vm5, %v5463_v41  ;;  %v4267_v3 = vpop.f32.mrf.mxu0  ;;  %v6194_v41 = vrot.slane %v6192_v16, 5  ;;  %v4588_v45 = vadd.f32 %v17312_v59, %v4302_v55  ;;  %v6190_v14 = vrot.slane %v6189_v44, 4  ;;  %v6711_v59 = vrot.slane %v13635_v52, 5  ;;  %v13636_v16 = vld [vmem:[%s16048_s18 + $0x78] sm:$0xf] }
 0x35d   : > { %v17390_v6 = vpop.f32.mrf.mxu2  ;;  %13665 = vmatmul.msk.bf16.gmra.mxu1 %vm882_vm5, %v6405_v31  ;;  %v6197_v11 = vshrl.u32 %v13636_v16, 16  ;;  %v5369_v22 = vrot.slane %v14893_v21, 5 }
 0x35e   : > { %v17403_v31 = vadd.f32 %v17343_v2, %v4588_v45  ;;  %v6195_v18 = vsel %vm15272_vm7, %v6190_v14, %v6194_v41  ;;  %v6712_v52 = vsel %vm15248_vm3, %v6710_v56, %v6711_v59  ;;  %v5464_v41 = vpack.c.b16 %v5440_v20, %v5439_v8  ;;  %v13638_v8 = vld [vmem:[%s16048_s18 + $0x80] sm:$0x1] }
 0x35f   : > { %v3867_v36 = vpop.f32.mrf.mxu3  ;;  %v6383_v61 = vunpack.c.l.b16 %v6195_v18  ;;  %v6780_v45 = vunpack.c.l.b16 %v6709_v7  ;;  %v6199_v56 = vrot.slane %v6197_v11, 4  ;;  %v13471_v18 = vrot.slane %v5255_v26, 9 }
 0x360   : > { %v3905_v4 = vadd.f32 %v3867_v36, %v16590_v23  ;;  %v6185_v23 = vsel %vm15272_vm7, %v6180_v33, %v6184_v28  ;;  %v6200_v36 = vshll.u32 %v13636_v16, 16  ;;  %v20049_v33 = vld [vmem:[#allocation9_spill] sm:$0xff]  ;;  %v14894_v16 = vld [vmem:[%s16048_s18 + $0x68] sm:$0x1]  ;;  %v6715_v11 = vrot.slane %v17421_v42, 5 }
 0x361   : > { %v6382_v28 = vunpack.c.l.b16 %v6185_v23 }
 0x362   : > { %v4303_v46 = vadd.f32 %v4265_v5, %v3905_v4  ;;  %13714 = vmatmul.msk.bf16.gmra.mxu2 %vm882_vm5, %v6803_v38  ;;  %v17406_v55 = vpop.f32.mrf.mxu1  ;;  %v6781_v4 = vunpack.c.l.b16 %v6712_v52  ;;  %v6202_v59 = vrot.slane %v6200_v36, 5  ;;  %v5371_v52 = vrot.slane %v5369_v22, 4 }
 0x364   : > { %v4589_v2 = vadd.f32 %v17339_v13, %v4303_v46  ;;  %v4270_v5 = vpop.f32.mrf.mxu0  ;;  %v6406_v46 = vpack.c.b16 %v6383_v61, %v6382_v28  ;;  %v6203_v20 = vor.u32 %v6202_v59, %v6199_v56  ;;  %v6804_v28 = vpack.c.b16 %v6781_v4, %v6780_v45  ;;  %v13683_v61 = vld [vmem:[%s16048_s18 + $0x78] sm:$0xe] }
 0x365   : > { %v17414_v60 = vpop.f32.mrf.mxu2  ;;  %v5370_v56 = vsel %vm15248_vm3, %v13471_v18, %v5369_v22  ;;  %v13699_v4 = vrot.slane %v13683_v61, 9  ;;  %v6717_v59 = vrot.slane %v6715_v11, 4 }
 0x366   : > { %v17425_v38 = vadd.f32 %v17367_v48, %v4589_v2  ;;  %v6210_v48 = vshrl.u32 %v17421_v42, 16  ;;  %v5441_v18 = vunpack.c.l.b16 %v5370_v56  ;;  %v5256_v56 = vld [vmem:[%s16048_s18 + $0x6c] sm:$0xe] }
 0x367   : > { %v3869_v13 = vpop.f32.mrf.mxu3  ;;  %13600 = vmatmul.msk.bf16.gmra.mxu0 %vm882_vm5, %v14618_v10  ;;  %v6208_v10 = vrot.slane %v6206_v24, 5 }
 0x368   : > { %v3906_v44 = vadd.f32 %v3869_v13, %v20049_v33  ;;  %v5372_v13 = vrot.slane %v14894_v16, 5  ;;  %v6212_v33 = vrot.slane %v6210_v48, 4 }
 0x36a   : > { %v4304_v14 = vadd.f32 %v4267_v3, %v3906_v44  ;;  %v17433_v23 = vpop.f32.mrf.mxu1  ;;  %v6216_v3 = vshll.u32 %v13638_v8, 16  ;;  %v6204_v44 = vrot.slane %v6203_v20, 4  ;;  %v5373_v45 = vsel %vm15248_vm3, %v5371_v52, %v5372_v13  ;;  %v14619_v52 = vld [vmem:[%s16048_s18 + $0x6c] sm:$0xff] }
 0x36b   : > { %v5442_v20 = vunpack.c.l.b16 %v5373_v45  ;;  %v6716_v13 = vsel %vm15248_vm3, %v13699_v4, %v6715_v11  ;;  %v14895_v45 = vld [vmem:[%s16048_s18 + $0x70] sm:$0xf] }
 0x36c   : > { %13487 = vmatmul.msk.bf16.gmra.mxu3 %vm882_vm5, %v5464_v41  ;;  %v4272_v2 = vpop.f32.mrf.mxu0  ;;  %v6213_v41 = vor.u32 %v6212_v33, %v6208_v10  ;;  %v6218_v26 = vrot.slane %v6216_v3, 5  ;;  %v4590_v24 = vadd.f32 %v17359_v27, %v4304_v14  ;;  %v6718_v27 = vrot.slane %v13638_v8, 5  ;;  %v17468_v3 = vld [vmem:[%s16048_s18 + $0x88] sm:$0xf] }
 0x36d   : > { %v17437_v7 = vpop.f32.mrf.mxu2  ;;  %13666 = vmatmul.msk.bf16.gmra.mxu1 %vm882_vm5, %v6406_v46  ;;  %v6230_v11 = vshll.u32 %v17468_v3, 16  ;;  %v5376_v4 = vrot.slane %v14895_v45, 5 }
 0x36e   : > { %v6214_v48 = vrot.slane %v6213_v41, 4  ;;  %v17450_v46 = vadd.f32 %v17390_v6, %v4590_v24  ;;  %v6719_v8 = vsel %vm15248_vm3, %v6717_v59, %v6718_v27  ;;  %v6782_v24 = vunpack.c.l.b16 %v6716_v13 }
 0x36f   : > { %v3872_v36 = vpop.f32.mrf.mxu3  ;;  %v5378_v13 = vrot.slane %v5376_v4, 4 }
 0x370   : > { %v3907_v21 = vadd.f32 %v3872_v36, %v16648_v17  ;;  %v6209_v17 = vsel %vm15272_vm7, %v6204_v44, %v6208_v10  ;;  %v6219_v22 = vsel %vm15272_vm7, %v6214_v48, %v6218_v26  ;;  %v5465_v26 = vpack.c.b16 %v5442_v20, %v5441_v18 }
 0x371   : > { %v6384_v10 = vunpack.c.l.b16 %v6209_v17  ;;  %v6385_v33 = vunpack.c.l.b16 %v6219_v22  ;;  %v13472_v17 = vrot.slane %v5256_v56, 9  ;;  %v13641_v22 = vld [vmem:[%s16048_s18 + $0x8c] sm:$0x1]  ;;  %v6232_v20 = vrot.slane %v6230_v11, 5 }
 0x372   : > { %v4305_v42 = vadd.f32 %v4270_v5, %v3907_v21  ;;  %13715 = vmatmul.msk.bf16.gmra.mxu2 %vm882_vm5, %v6804_v28  ;;  %v17453_v14 = vpop.f32.mrf.mxu1  ;;  %v13639_v28 = vld [vmem:[%s16048_s18 + $0x84] sm:$0xf]  ;;  %v6783_v21 = vunpack.c.l.b16 %v6719_v8  ;;  %v14896_v8 = vld [vmem:[%s16048_s18 + $0x74] sm:$0x1] }
 0x373   : > { %v6221_v36 = vshrl.u32 %v13639_v28, 16  ;;  %v6224_v44 = vshll.u32 %v13639_v28, 16  ;;  %v5379_v28 = vrot.slane %v14896_v8, 5 }
 0x374   : > { %v4591_v6 = vadd.f32 %v17386_v49, %v4305_v42  ;;  %v5820_v5 = vpop.f32.mrf.mxu0  ;;  %v6407_v42 = vpack.c.b16 %v6385_v33, %v6384_v10  ;;  %v6805_v10 = vpack.c.b16 %v6783_v21, %v6782_v24  ;;  %v13684_v33 = vld [vmem:[%s16048_s18 + $0x84] sm:$0xe] }
 0x375   : > { %v17461_v16 = vpop.f32.mrf.mxu2  ;;  %v6223_v59 = vrot.slane %v6221_v36, 4  ;;  %v6226_v27 = vrot.slane %v6224_v44, 5  ;;  %v6722_v36 = vrot.slane %v17468_v3, 5  ;;  %v5380_v24 = vsel %vm15248_vm3, %v5378_v13, %v5379_v28  ;;  %v14620_v13 = vld [vmem:[%s16048_s18 + $0x78] sm:$0xff] }
 0x376   : > { %v17472_v61 = vadd.f32 %v17414_v60, %v4591_v6  ;;  %v6234_v60 = vshrl.u32 %v17468_v3, 16  ;;  %v13700_v21 = vrot.slane %v13684_v33, 9 }
 0x377   : > { %v3874_v49 = vpop.f32.mrf.mxu3  ;;  %13601 = vmatmul.msk.bf16.gmra.mxu0 %vm882_vm5, %v14619_v52  ;;  %v6227_v18 = vor.u32 %v6226_v27, %v6223_v59  ;;  %v5377_v59 = vsel %vm15248_vm3, %v13472_v17, %v5376_v4  ;;  %v6724_v27 = vrot.slane %v6722_v36, 4 }
 0x378   : > { %v3908_v41 = vadd.f32 %v3874_v49, %v16672_v32  ;;  %v6236_v49 = vrot.slane %v6234_v60, 4  ;;  %v5443_v17 = vunpack.c.l.b16 %v5377_v59  ;;  %v6723_v28 = vsel %vm15248_vm3, %v13700_v21, %v6722_v36  ;;  %v5257_v59 = vld [vmem:[%s16048_s18 + $0x78] sm:$0xe] }
 0x37a   : > { %v4306_v48 = vadd.f32 %v4272_v2, %v3908_v41  ;;  %v17480_v32 = vpop.f32.mrf.mxu1  ;;  %v6240_v2 = vshll.u32 %v13641_v22, 16  ;;  %v6228_v41 = vrot.slane %v6227_v18, 4  ;;  %v5444_v18 = vunpack.c.l.b16 %v5380_v24  ;;  %v14897_v24 = vld [vmem:[%s16048_s18 + $0x7c] sm:$0xf] }
 0x37b   : > { %v5383_v21 = vrot.slane %v14897_v24, 5 }
 0x37c   : > { %13488 = vmatmul.msk.bf16.gmra.mxu3 %vm882_vm5, %v5465_v26  ;;  %v5822_v52 = vpop.f32.mrf.mxu0  ;;  %v6237_v26 = vor.u32 %v6236_v49, %v6232_v20  ;;  %v6242_v56 = vrot.slane %v6240_v2, 5  ;;  %v4592_v11 = vadd.f32 %v17406_v55, %v4306_v48  ;;  %v6725_v55 = vrot.slane %v13641_v22, 5  ;;  %v17515_v2 = vld [vmem:[%s16048_s18 + $0x94] sm:$0xf] }
 0x37d   : > { %v17484_v6 = vpop.f32.mrf.mxu2  ;;  %13667 = vmatmul.msk.bf16.gmra.mxu1 %vm882_vm5, %v6407_v42  ;;  %v6254_v36 = vshll.u32 %v17515_v2, 16 }
 0x37e   : > { %v6238_v60 = vrot.slane %v6237_v26, 4  ;;  %v17497_v42 = vadd.f32 %v17437_v7, %v4592_v11  ;;  %v6726_v22 = vsel %vm15248_vm3, %v6724_v27, %v6725_v55  ;;  %v6784_v11 = vunpack.c.l.b16 %v6723_v28 }
 0x37f   : > { %v5533_v44 = vpop.f32.mrf.mxu3  ;;  %v5385_v28 = vrot.slane %v5383_v21, 4 }
 0x380   : > { %v5613_v45 = vadd.f32 %v5533_v44, %v16709_v35  ;;  %v6233_v35 = vsel %vm15272_vm7, %v6228_v41, %v6232_v20  ;;  %v6243_v4 = vsel %vm15272_vm7, %v6238_v60, %v6242_v56  ;;  %v5466_v56 = vpack.c.b16 %v5444_v18, %v5443_v17 }
 0x381   : > { %v6386_v20 = vunpack.c.l.b16 %v6233_v35  ;;  %v6387_v49 = vunpack.c.l.b16 %v6243_v4  ;;  %v13473_v35 = vrot.slane %v5257_v59, 9  ;;  %v13644_v4 = vld [vmem:[%s16048_s18 + $0x98] sm:$0x1]  ;;  %v6256_v18 = vrot.slane %v6254_v36, 5 }
 0x382   : > { %v5900_v3 = vadd.f32 %v5820_v5, %v5613_v45  ;;  %13716 = vmatmul.msk.bf16.gmra.mxu2 %vm882_vm5, %v6805_v10  ;;  %v17500_v48 = vpop.f32.mrf.mxu1  ;;  %v13642_v10 = vld [vmem:[%s16048_s18 + $0x90] sm:$0xf]  ;;  %v6785_v45 = vunpack.c.l.b16 %v6726_v22  ;;  %v14898_v22 = vld [vmem:[%s16048_s18 + $0x80] sm:$0x1] }
 0x383   : > { %v6245_v44 = vshrl.u32 %v13642_v10, 16  ;;  %v6248_v41 = vshll.u32 %v13642_v10, 16  ;;  %v5386_v10 = vrot.slane %v14898_v22, 5 }
 0x384   : > { %v6554_v7 = vadd.f32 %v17433_v23, %v5900_v3  ;;  %v5825_v5 = vpop.f32.mrf.mxu0  ;;  %v6408_v3 = vpack.c.b16 %v6387_v49, %v6386_v20  ;;  %v6806_v20 = vpack.c.b16 %v6785_v45, %v6784_v11  ;;  %v13685_v49 = vld [vmem:[%s16048_s18 + $0x90] sm:$0xe] }
 0x385   : > { %v17508_v8 = vpop.f32.mrf.mxu2  ;;  %v6247_v27 = vrot.slane %v6245_v44, 4  ;;  %v6250_v55 = vrot.slane %v6248_v41, 5  ;;  %v6729_v44 = vrot.slane %v17515_v2, 5  ;;  %v5387_v11 = vsel %vm15248_vm3, %v5385_v28, %v5386_v10  ;;  %v14621_v28 = vld [vmem:[%s16048_s18 + $0x84] sm:$0xff] }
 0x386   : > { %v17519_v33 = vadd.f32 %v17461_v16, %v6554_v7  ;;  %v6258_v16 = vshrl.u32 %v17515_v2, 16  ;;  %v13701_v45 = vrot.slane %v13685_v49, 9 }
 0x387   : > { %v5535_v23 = vpop.f32.mrf.mxu3  ;;  %13602 = vmatmul.msk.bf16.gmra.mxu0 %vm882_vm5, %v14620_v13  ;;  %v6251_v17 = vor.u32 %v6250_v55, %v6247_v27  ;;  %v5384_v27 = vsel %vm15248_vm3, %v13473_v35, %v5383_v21  ;;  %v6731_v55 = vrot.slane %v6729_v44, 4 }
 0x388   : > { %v5614_v26 = vadd.f32 %v5535_v23, %v16733_v40  ;;  %v6260_v23 = vrot.slane %v6258_v16, 4  ;;  %v5445_v35 = vunpack.c.l.b16 %v5384_v27  ;;  %v6730_v10 = vsel %vm15248_vm3, %v13701_v45, %v6729_v44  ;;  %v5258_v27 = vld [vmem:[%s16048_s18 + $0x84] sm:$0xe] }
 0x38a   : > { %v5901_v60 = vadd.f32 %v5822_v52, %v5614_v26  ;;  %v17527_v40 = vpop.f32.mrf.mxu1  ;;  %v6264_v52 = vshll.u32 %v13644_v4, 16  ;;  %v6252_v26 = vrot.slane %v6251_v17, 4  ;;  %v5446_v17 = vunpack.c.l.b16 %v5387_v11  ;;  %v14899_v11 = vld [vmem:[%s16048_s18 + $0x88] sm:$0xf] }
 0x38b   : > { %v5390_v45 = vrot.slane %v14899_v11, 5 }
 0x38c   : > { %13489 = vmatmul.msk.bf16.gmra.mxu3 %vm882_vm5, %v5466_v56  ;;  %v5827_v13 = vpop.f32.mrf.mxu0  ;;  %v6261_v56 = vor.u32 %v6260_v23, %v6256_v18  ;;  %v6266_v59 = vrot.slane %v6264_v52, 5  ;;  %v6555_v36 = vadd.f32 %v17453_v14, %v5901_v60  ;;  %v6732_v14 = vrot.slane %v13644_v4, 5  ;;  %v17562_v52 = vld [vmem:[%s16048_s18 + $0xa0] sm:$0xf] }
 0x38d   : > { %v17531_v7 = vpop.f32.mrf.mxu2  ;;  %13668 = vmatmul.msk.bf16.gmra.mxu1 %vm882_vm5, %v6408_v3  ;;  %v6278_v44 = vshll.u32 %v17562_v52, 16 }
 0x38e   : > { %v6262_v16 = vrot.slane %v6261_v56, 4  ;;  %v17544_v3 = vadd.f32 %v17484_v6, %v6555_v36  ;;  %v6733_v4 = vsel %vm15248_vm3, %v6731_v55, %v6732_v14  ;;  %v6786_v36 = vunpack.c.l.b16 %v6730_v10 }
 0x38f   : > { %v5538_v41 = vpop.f32.mrf.mxu3  ;;  %v5392_v10 = vrot.slane %v5390_v45, 4 }
 0x390   : > { %v5615_v24 = vadd.f32 %v5538_v41, %v16759_v53  ;;  %v6257_v53 = vsel %vm15272_vm7, %v6252_v26, %v6256_v18  ;;  %v6267_v21 = vsel %vm15272_vm7, %v6262_v16, %v6266_v59  ;;  %v5467_v59 = vpack.c.b16 %v5446_v17, %v5445_v35 }
 0x391   : > { %v6388_v18 = vunpack.c.l.b16 %v6257_v53  ;;  %v6389_v23 = vunpack.c.l.b16 %v6267_v21  ;;  %v13474_v53 = vrot.slane %v5258_v27, 9  ;;  %v13647_v21 = vld [vmem:[%s16048_s18 + $0xa4] sm:$0x1]  ;;  %v6280_v17 = vrot.slane %v6278_v44, 5 }
 0x392   : > { %v5902_v2 = vadd.f32 %v5825_v5, %v5615_v24  ;;  %13717 = vmatmul.msk.bf16.gmra.mxu2 %vm882_vm5, %v6806_v20  ;;  %v17547_v60 = vpop.f32.mrf.mxu1  ;;  %v13645_v20 = vld [vmem:[%s16048_s18 + $0x9c] sm:$0xf]  ;;  %v6787_v24 = vunpack.c.l.b16 %v6733_v4  ;;  %v14900_v4 = vld [vmem:[%s16048_s18 + $0x8c] sm:$0x1] }
 0x393   : > { %v6269_v41 = vshrl.u32 %v13645_v20, 16  ;;  %v6272_v26 = vshll.u32 %v13645_v20, 16  ;;  %v5393_v20 = vrot.slane %v14900_v4, 5 }
 0x394   : > { %v6556_v6 = vadd.f32 %v17480_v32, %v5902_v2  ;;  %v5830_v5 = vpop.f32.mrf.mxu0  ;;  %v6409_v2 = vpack.c.b16 %v6389_v23, %v6388_v18  ;;  %v6807_v18 = vpack.c.b16 %v6787_v24, %v6786_v36  ;;  %v13686_v23 = vld [vmem:[%s16048_s18 + $0x9c] sm:$0xe] }
 0x395   : > { %v17555_v22 = vpop.f32.mrf.mxu2  ;;  %v6271_v55 = vrot.slane %v6269_v41, 4  ;;  %v6274_v14 = vrot.slane %v6272_v26, 5  ;;  %v6736_v41 = vrot.slane %v17562_v52, 5  ;;  %v5394_v36 = vsel %vm15248_vm3, %v5392_v10, %v5393_v20  ;;  %v14622_v10 = vld [vmem:[%s16048_s18 + $0x90] sm:$0xff] }
 0x396   : > { %v17566_v49 = vadd.f32 %v17508_v8, %v6556_v6  ;;  %v6282_v8 = vshrl.u32 %v17562_v52, 16  ;;  %v13702_v24 = vrot.slane %v13686_v23, 9 }
 0x397   : > { %v5540_v32 = vpop.f32.mrf.mxu3  ;;  %13603 = vmatmul.msk.bf16.gmra.mxu0 %vm882_vm5, %v14621_v28  ;;  %v6275_v35 = vor.u32 %v6274_v14, %v6271_v55  ;;  %v5391_v55 = vsel %vm15248_vm3, %v13474_v53, %v5390_v45  ;;  %v6738_v14 = vrot.slane %v6736_v41, 4 }
 0x398   : > { %v5616_v56 = vadd.f32 %v5540_v32, %v16788_v25  ;;  %v6284_v32 = vrot.slane %v6282_v8, 4  ;;  %v5447_v53 = vunpack.c.l.b16 %v5391_v55  ;;  %v6737_v20 = vsel %vm15248_vm3, %v13702_v24, %v6736_v41  ;;  %v14901_v24 = vld [vmem:[%s16048_s18 + $0x94] sm:$0xf] }
 0x39a   : > { %v5903_v16 = vadd.f32 %v5827_v13, %v5616_v56  ;;  %v17574_v25 = vpop.f32.mrf.mxu1  ;;  %v6288_v13 = vshll.u32 %v13647_v21, 16  ;;  %v6276_v56 = vrot.slane %v6275_v35, 4  ;;  %v5448_v35 = vunpack.c.l.b16 %v5394_v36  ;;  %v5259_v36 = vld [vmem:[%s16048_s18 + $0x90] sm:$0xe] }
 0x39c   : > { %13490 = vmatmul.msk.bf16.gmra.mxu3 %vm882_vm5, %v5467_v59  ;;  %v5832_v28 = vpop.f32.mrf.mxu0  ;;  %v6285_v59 = vor.u32 %v6284_v32, %v6280_v17  ;;  %v6290_v27 = vrot.slane %v6288_v13, 5  ;;  %v6557_v44 = vadd.f32 %v17500_v48, %v5903_v16  ;;  %v6739_v48 = vrot.slane %v13647_v21, 5  ;;  %v17609_v13 = vld [vmem:[%s16048_s18 + $0xac] sm:$0xf] }
 0x39d   : > { %v17578_v6 = vpop.f32.mrf.mxu2  ;;  %13669 = vmatmul.msk.bf16.gmra.mxu1 %vm882_vm5, %v6409_v2  ;;  %v6302_v41 = vshll.u32 %v17609_v13, 16 }
 0x39e   : > { %v6286_v8 = vrot.slane %v6285_v59, 4  ;;  %v17591_v2 = vadd.f32 %v17531_v7, %v6557_v44  ;;  %v6740_v21 = vsel %vm15248_vm3, %v6738_v14, %v6739_v48  ;;  %v20050_v59 = vld [vmem:[#allocation10_spill] sm:$0xff]  ;;  %v5468_v44 = vpack.c.b16 %v5448_v35, %v5447_v53  ;;  %v13650_v35 = vld [vmem:[%s16048_s18 + $0xb0] sm:$0x1] }
 0x39f   : > { %v5543_v26 = vpop.f32.mrf.mxu3  ;;  %v6789_v55 = vunpack.c.l.b16 %v6740_v21  ;;  %v13475_v53 = vrot.slane %v5259_v36, 9 }
 0x3a0   : > { %v5617_v11 = vadd.f32 %v5543_v26, %v16816_v19  ;;  %v6281_v19 = vsel %vm15272_vm7, %v6276_v56, %v6280_v17  ;;  %v6291_v45 = vsel %vm15272_vm7, %v6286_v8, %v6290_v27  ;;  %v5397_v8 = vrot.slane %v14901_v24, 5 }
 0x3a1   : > { %v6390_v17 = vunpack.c.l.b16 %v6281_v19  ;;  %v6391_v32 = vunpack.c.l.b16 %v6291_v45 }
 0x3a2   : > { %v5904_v52 = vadd.f32 %v5830_v5, %v5617_v11  ;;  %13718 = vmatmul.msk.bf16.gmra.mxu2 %vm882_vm5, %v6807_v18  ;;  %v17594_v16 = vpop.f32.mrf.mxu1  ;;  %v13648_v18 = vld [vmem:[%s16048_s18 + $0xa8] sm:$0xf]  ;;  %v6788_v11 = vunpack.c.l.b16 %v6737_v20 }
 0x3a3   : > { %v6293_v26 = vshrl.u32 %v13648_v18, 16  ;;  %v6296_v56 = vshll.u32 %v13648_v18, 16  ;;  %v6410_v14 = vpack.c.b16 %v6391_v32, %v6390_v17  ;;  %v5399_v18 = vrot.slane %v5397_v8, 4  ;;  %v13687_v32 = vld [vmem:[%s16048_s18 + $0xa8] sm:$0xe] }
 0x3a4   : > { %v6558_v7 = vadd.f32 %v17527_v40, %v5904_v52  ;;  %v5835_v5 = vpop.f32.mrf.mxu0  ;;  %v6808_v17 = vpack.c.b16 %v6789_v55, %v6788_v11  ;;  %v13703_v55 = vrot.slane %v13687_v32, 9 }
 0x3a5   : > { %v17602_v4 = vpop.f32.mrf.mxu2  ;;  %v6295_v48 = vrot.slane %v6293_v26, 4  ;;  %v6298_v19 = vrot.slane %v6296_v56, 5  ;;  %v6743_v26 = vrot.slane %v17609_v13, 5 }
 0x3a6   : > { %v17613_v23 = vadd.f32 %v17555_v22, %v6558_v7  ;;  %v6306_v22 = vshrl.u32 %v17609_v13, 16  ;;  %v6304_v7 = vrot.slane %v6302_v41, 5 }
 0x3a7   : > { %v5545_v40 = vpop.f32.mrf.mxu3  ;;  %13604 = vmatmul.msk.bf16.gmra.mxu0 %vm882_vm5, %v14622_v10  ;;  %v6299_v10 = vor.u32 %v6298_v19, %v6295_v48  ;;  %v20051_v48 = vld [vmem:[#allocation11_spill] sm:$0xff] }
 0x3a8   : > { %v5618_v27 = vadd.f32 %v5545_v40, %v20050_v59  ;;  %v14902_v40 = vld [vmem:[%s16048_s18 + $0x98] sm:$0x1]  ;;  %v6308_v24 = vrot.slane %v6306_v22, 4 }
 0x3a9   : > { %v5400_v59 = vrot.slane %v14902_v40, 5  ;;  %v5398_v40 = vsel %vm15248_vm3, %v13475_v53, %v5397_v8 }
 0x3aa   : > { %v5905_v52 = vadd.f32 %v5832_v28, %v5618_v27  ;;  %v17621_v45 = vpop.f32.mrf.mxu1  ;;  %v6312_v28 = vshll.u32 %v13650_v35, 16  ;;  %v6300_v27 = vrot.slane %v6299_v10, 4  ;;  %v6745_v10 = vrot.slane %v6743_v26, 4 }
 0x3ab   : > { %v5401_v11 = vsel %vm15248_vm3, %v5399_v18, %v5400_v59  ;;  %v5449_v18 = vunpack.c.l.b16 %v5398_v40 }
 0x3ac   : > { %13491 = vmatmul.msk.bf16.gmra.mxu3 %vm882_vm5, %v5468_v44  ;;  %v5837_v20 = vpop.f32.mrf.mxu0  ;;  %v6309_v44 = vor.u32 %v6308_v24, %v6304_v7  ;;  %v6314_v36 = vrot.slane %v6312_v28, 5  ;;  %v6559_v41 = vadd.f32 %v17547_v60, %v5905_v52  ;;  %v6746_v60 = vrot.slane %v13650_v35, 5  ;;  %v14623_v24 = vld [vmem:[%s16048_s18 + $0x9c] sm:$0xff] }
 0x3ad   : > { %v17625_v21 = vpop.f32.mrf.mxu2  ;;  %13670 = vmatmul.msk.bf16.gmra.mxu1 %vm882_vm5, %v6410_v14  ;;  %v6305_v8 = vsel %vm15272_vm7, %v6300_v27, %v6304_v7  ;;  %v5450_v59 = vunpack.c.l.b16 %v5401_v11  ;;  %v13651_v27 = vld [vmem:[%s16048_s18 + $0xb4] sm:$0xf] }
 0x3ae   : > { %v6310_v22 = vrot.slane %v6309_v44, 4  ;;  %v17638_v14 = vadd.f32 %v17578_v6, %v6559_v41  ;;  %v6747_v35 = vsel %vm15248_vm3, %v6745_v10, %v6746_v60  ;;  %v6392_v7 = vunpack.c.l.b16 %v6305_v8 }
 0x3af   : > { %v5548_v56 = vpop.f32.mrf.mxu3  ;;  %v6320_v41 = vshll.u32 %v13651_v27, 16  ;;  %v5469_v40 = vpack.c.b16 %v5450_v59, %v5449_v18  ;;  %v13653_v59 = vld [vmem:[%s16048_s18 + $0xbc] sm:$0x1] }
 0x3b0   : > { %v5619_v19 = vadd.f32 %v5548_v56, %v20051_v48  ;;  %20052 = vst [vmem:[#allocation15_spill] sm:$0xff] %v17638_v14  ;;  %v6315_v53 = vsel %vm15272_vm7, %v6310_v22, %v6314_v36  ;;  %v17656_v56 = vld [vmem:[%s16048_s18 + $0xb8] sm:$0xf]  ;;  %v6317_v36 = vshrl.u32 %v13651_v27, 16  ;;  %v5260_v22 = vld [vmem:[%s16048_s18 + $0x9c] sm:$0xe] }
 0x3b1   : > { %v6393_v32 = vunpack.c.l.b16 %v6315_v53  ;;  %v20054_v48 = vld [vmem:[#allocation12_spill] sm:$0xff]  ;;  %v13476_v18 = vrot.slane %v5260_v22, 9 }
 0x3b2   : > { %v5906_v13 = vadd.f32 %v5835_v5, %v5619_v19  ;;  %13719 = vmatmul.msk.bf16.gmra.mxu2 %vm882_vm5, %v6808_v17  ;;  %v17641_v52 = vpop.f32.mrf.mxu1  ;;  %v6744_v17 = vsel %vm15248_vm3, %v13703_v55, %v6743_v26  ;;  %v6326_v26 = vshll.u32 %v17656_v56, 16  ;;  %v6791_v55 = vunpack.c.l.b16 %v6747_v35 }
 0x3b3   : > { %v6790_v11 = vunpack.c.l.b16 %v6744_v17  ;;  %v6411_v8 = vpack.c.b16 %v6393_v32, %v6392_v7  ;;  %v6319_v53 = vrot.slane %v6317_v36, 4  ;;  %v13688_v32 = vld [vmem:[%s16048_s18 + $0xb4] sm:$0xe]  ;;  %v6750_v36 = vrot.slane %v17656_v56, 5 }
 0x3b4   : > { %v6560_v6 = vadd.f32 %v17574_v25, %v5906_v13  ;;  %v5840_v5 = vpop.f32.mrf.mxu0  ;;  %v14903_v13 = vld [vmem:[%s16048_s18 + $0xa0] sm:$0xf]  ;;  %v6328_v17 = vrot.slane %v6326_v26, 5 }
 0x3b5   : > { %v17649_v28 = vpop.f32.mrf.mxu2  ;;  %v5404_v10 = vrot.slane %v14903_v13, 5  ;;  %v14904_v13 = vld [vmem:[%s16048_s18 + $0xa4] sm:$0x1]  ;;  %v6809_v7 = vpack.c.b16 %v6791_v55, %v6790_v11  ;;  %v13704_v55 = vrot.slane %v13688_v32, 9 }
 0x3b6   : > { %v17660_v44 = vadd.f32 %v17602_v4, %v6560_v6  ;;  %v6330_v4 = vshrl.u32 %v17656_v56, 16  ;;  %v6322_v6 = vrot.slane %v6320_v41, 5 }
 0x3b7   : > { %v5550_v25 = vpop.f32.mrf.mxu3  ;;  %13605 = vmatmul.msk.bf16.gmra.mxu0 %vm882_vm5, %v14623_v24 }
 0x3b8   : > { %20053 = vst [vmem:[#allocation16_spill] sm:$0xff] %v17660_v44  ;;  %v5620_v19 = vadd.f32 %v5550_v25, %v20054_v48  ;;  %v6323_v24 = vor.u32 %v6322_v6, %v6319_v53  ;;  %v5406_v48 = vrot.slane %v5404_v10, 4  ;;  %v5407_v44 = vrot.slane %v14904_v13, 5  ;;  %v20055_v53 = vld [vmem:[#allocation13_spill] sm:$0xff] }
 0x3b9   : > { %v6332_v14 = vrot.slane %v6330_v4, 4  ;;  %v5405_v13 = vsel %vm15248_vm3, %v13476_v18, %v5404_v10 }
 0x3ba   : > { %v5907_v60 = vadd.f32 %v5837_v20, %v5620_v19  ;;  %v17668_v27 = vpop.f32.mrf.mxu1  ;;  %v6336_v20 = vshll.u32 %v13653_v59, 16  ;;  %v6324_v19 = vrot.slane %v6323_v24, 4  ;;  %v5408_v11 = vsel %vm15248_vm3, %v5406_v48, %v5407_v44  ;;  %v14624_v48 = vld [vmem:[%s16048_s18 + $0xa8] sm:$0xff] }
 0x3bb   : > { %v5451_v18 = vunpack.c.l.b16 %v5405_v13  ;;  %v5452_v24 = vunpack.c.l.b16 %v5408_v11 }
 0x3bc   : > { %13492 = vmatmul.msk.bf16.gmra.mxu3 %vm882_vm5, %v5469_v40  ;;  %v5842_v35 = vpop.f32.mrf.mxu0  ;;  %v6333_v40 = vor.u32 %v6332_v14, %v6328_v17  ;;  %v6338_v22 = vrot.slane %v6336_v20, 5  ;;  %v6561_v26 = vadd.f32 %v17594_v16, %v5907_v60  ;;  %v6752_v14 = vrot.slane %v6750_v36, 4 }
 0x3bd   : > { %v17672_v25 = vpop.f32.mrf.mxu2  ;;  %13671 = vmatmul.msk.bf16.gmra.mxu1 %vm882_vm5, %v6411_v8  ;;  %v6753_v16 = vrot.slane %v13653_v59, 5  ;;  %v6329_v10 = vsel %vm15272_vm7, %v6324_v19, %v6328_v17  ;;  %v13654_v19 = vld [vmem:[%s16048_s18 + $0xc0] sm:$0xf] }
 0x3be   : > { %v6334_v4 = vrot.slane %v6333_v40, 4  ;;  %v17685_v8 = vadd.f32 %v17625_v21, %v6561_v26  ;;  %v6394_v32 = vunpack.c.l.b16 %v6329_v10  ;;  %v6344_v26 = vshll.u32 %v13654_v19, 16 }
 0x3bf   : > { %v5553_v41 = vpop.f32.mrf.mxu3  ;;  %v6754_v59 = vsel %vm15248_vm3, %v6752_v14, %v6753_v16  ;;  %v5261_v14 = vld [vmem:[%s16048_s18 + $0xa8] sm:$0xe] }
 0x3c0   : > { %v5621_v6 = vadd.f32 %v5553_v41, %v20055_v53  ;;  %v6339_v44 = vsel %vm15272_vm7, %v6334_v4, %v6338_v22  ;;  %v17703_v41 = vld [vmem:[%s16048_s18 + $0xc4] sm:$0xf]  ;;  %v6341_v22 = vshrl.u32 %v13654_v19, 16  ;;  %v6793_v11 = vunpack.c.l.b16 %v6754_v59 }
 0x3c1   : > { %v6395_v17 = vunpack.c.l.b16 %v6339_v44  ;;  %v6346_v44 = vrot.slane %v6344_v26, 5  ;;  %v13689_v26 = vld [vmem:[%s16048_s18 + $0xc0] sm:$0xe] }
 0x3c2   : > { %v5908_v56 = vadd.f32 %v5840_v5, %v5621_v6  ;;  %13720 = vmatmul.msk.bf16.gmra.mxu2 %vm882_vm5, %v6809_v7  ;;  %v17688_v60 = vpop.f32.mrf.mxu1  ;;  %v6751_v7 = vsel %vm15248_vm3, %v13704_v55, %v6750_v36  ;;  %v5470_v36 = vpack.c.b16 %v5452_v24, %v5451_v18  ;;  %v6350_v6 = vshll.u32 %v17703_v41, 16  ;;  %v14905_v55 = vld [vmem:[%s16048_s18 + $0xac] sm:$0xf]  ;;  %v13656_v24 = vld [vmem:[%s16048_s18 + $0xc8] sm:$0x1] }
 0x3c3   : > { %v6792_v13 = vunpack.c.l.b16 %v6751_v7  ;;  %v5411_v4 = vrot.slane %v14905_v55, 5  ;;  %v6412_v16 = vpack.c.b16 %v6395_v17, %v6394_v32  ;;  %v6343_v10 = vrot.slane %v6341_v22, 4 }
 0x3c4   : > { %v6562_v21 = vadd.f32 %v17621_v45, %v5908_v56  ;;  %v5845_v5 = vpop.f32.mrf.mxu0  ;;  %v6354_v56 = vshrl.u32 %v17703_v41, 16  ;;  %v6352_v7 = vrot.slane %v6350_v6, 5  ;;  %v6757_v17 = vrot.slane %v17703_v41, 5  ;;  %v20057_v6 = vld [vmem:[#allocation14_spill] sm:$0xff] }
 0x3c5   : > { %v17696_v20 = vpop.f32.mrf.mxu2  ;;  %v5413_v55 = vrot.slane %v5411_v4, 4  ;;  %v6810_v32 = vpack.c.b16 %v6793_v11, %v6792_v13 }
 0x3c6   : > { %v17707_v40 = vadd.f32 %v17649_v28, %v6562_v21 }
 0x3c7   : > { %v5555_v45 = vpop.f32.mrf.mxu3  ;;  %13606 = vmatmul.msk.bf16.gmra.mxu0 %vm882_vm5, %v14624_v48  ;;  %v6347_v48 = vor.u32 %v6346_v44, %v6343_v10 }
 0x3c8   : > { %20056 = vst [vmem:[#allocation17_spill] sm:$0xff] %v17707_v40  ;;  %v5622_v53 = vadd.f32 %v5555_v45, %v16949_v47  ;;  %v14906_v47 = vld [vmem:[%s16048_s18 + $0xb0] sm:$0x1]  ;;  %v13477_v45 = vrot.slane %v5261_v14, 9 }
 0x3c9   : > { %v5414_v18 = vrot.slane %v14906_v47, 5 }
 0x3ca   : > { %v5909_v28 = vadd.f32 %v5842_v35, %v5622_v53  ;;  %v17715_v21 = vpop.f32.mrf.mxu1  ;;  %v6356_v35 = vrot.slane %v6354_v56, 4  ;;  %v6360_v53 = vshll.u32 %v13656_v24, 16  ;;  %v5412_v14 = vsel %vm15248_vm3, %v13477_v45, %v5411_v4 }
 0x3cb   : > { %v5415_v13 = vsel %vm15248_vm3, %v5413_v55, %v5414_v18  ;;  %v5453_v18 = vunpack.c.l.b16 %v5412_v14 }
 0x3cc   : > { %13493 = vmatmul.msk.bf16.gmra.mxu3 %vm882_vm5, %v5470_v36  ;;  %v5847_v59 = vpop.f32.mrf.mxu0  ;;  %v6348_v36 = vrot.slane %v6347_v48, 4  ;;  %v6357_v40 = vor.u32 %v6356_v35, %v6352_v7  ;;  %v6362_v47 = vrot.slane %v6360_v53, 5  ;;  %v6563_v10 = vadd.f32 %v17641_v52, %v5909_v28 }
 0x3cd   : > { %v17720_v19 = vpop.f32.mrf.mxu2  ;;  %13672 = vmatmul.msk.bf16.gmra.mxu1 %vm882_vm5, %v6412_v16  ;;  %v13705_v16 = vrot.slane %v13689_v26, 9  ;;  %v6759_v52 = vrot.slane %v6757_v17, 4  ;;  %v6760_v28 = vrot.slane %v13656_v24, 5 }
 0x3ce   : > { %v6358_v11 = vrot.slane %v6357_v40, 4  ;;  %v17732_v56 = vadd.f32 %v17672_v25, %v6563_v10  ;;  %v6353_v35 = vsel %vm15272_vm7, %v6348_v36, %v6352_v7  ;;  %v5454_v40 = vunpack.c.l.b16 %v5415_v13  ;;  %v14625_v25 = vld [vmem:[%s16048_s18 + $0xb4] sm:$0xff] }
 0x3cf   : > { %v5558_v22 = vpop.f32.mrf.mxu3  ;;  %v6396_v53 = vunpack.c.l.b16 %v6353_v35  ;;  %v6761_v26 = vsel %vm15248_vm3, %v6759_v52, %v6760_v28  ;;  %v14907_v10 = vld [vmem:[%s16048_s18 + $0xb8] sm:$0xf] }
 0x3d0   : > { %v5623_v44 = vadd.f32 %v5558_v22, %v20057_v6  ;;  %v6363_v4 = vsel %vm15272_vm7, %v6358_v11, %v6362_v47  ;;  %v6758_v22 = vsel %vm15248_vm3, %v13705_v16, %v6757_v17  ;;  %v5471_v36 = vpack.c.b16 %v5454_v40, %v5453_v18  ;;  %v5262_v47 = vld [vmem:[%s16048_s18 + $0xb4] sm:$0xe]  ;;  %v14908_v16 = vld [vmem:[%s16048_s18 + $0xbc] sm:$0x1]  ;;  %v13901_v18 = vld [vmem:[%s16048_s18 + $0x18] sm:$0xe] }
 0x3d1   : > { %v6397_v24 = vunpack.c.l.b16 %v6363_v4  ;;  %v5418_v6 = vrot.slane %v14907_v10, 5  ;;  %v6795_v14 = vunpack.c.l.b16 %v6761_v26  ;;  %v5421_v52 = vrot.slane %v14908_v16, 5 }
 0x3d2   : > { %v5910_v41 = vadd.f32 %v5845_v5, %v5623_v44  ;;  %13721 = vmatmul.msk.bf16.gmra.mxu2 %vm882_vm5, %v6810_v32  ;;  %v17735_v48 = vpop.f32.mrf.mxu1  ;;  %v6794_v44 = vunpack.c.l.b16 %v6758_v22 }
 0x3d3   : > { %v6413_v13 = vpack.c.b16 %v6397_v24, %v6396_v53  ;;  %v5420_v53 = vrot.slane %v5418_v6, 4 }
 0x3d4   : > { %v6564_v5 = vadd.f32 %v17668_v27, %v5910_v41  ;;  %v5850_v45 = vpop.f32.mrf.mxu0  ;;  %v13478_v41 = vrot.slane %v5262_v47, 9  ;;  %v6811_v26 = vpack.c.b16 %v6795_v14, %v6794_v44 }
 0x3d5   : > { %v17743_v55 = vpop.f32.mrf.mxu2  ;;  %v5422_v44 = vsel %vm15248_vm3, %v5420_v53, %v5421_v52  ;;  %v14626_v53 = vld [vmem:[%s16048_s18 + $0xc0] sm:$0xff] }
 0x3d6   : > { %v17747_v7 = vadd.f32 %v17696_v20, %v6564_v5  ;;  %v13836_v20 = vld [vmem:[%s16048_s18 + $0x18] sm:$0xf] }
 0x3d7   : > { %v5560_v32 = vpop.f32.mrf.mxu3  ;;  %13607 = vmatmul.msk.bf16.gmra.mxu0 %vm882_vm5, %v14625_v25  ;;  %v7320_v35 = vshrl.u32 %v13836_v20, 16  ;;  %v7323_v4 = vshll.u32 %v13836_v20, 16 }
 0x3d8   : > { %20058 = vst [vmem:[#allocation18_spill] sm:$0xff] %v17747_v7  ;;  %v5624_v27 = vadd.f32 %v5560_v32, %v17014_v51  ;;  %v13837_v51 = vld [vmem:[%s16048_s18 + $0x1c] sm:$0xf] }
 0x3d9   : > { %v7991_v28 = vrot.slane %v13837_v51, 5  ;;  %v7329_v24 = vshll.u32 %v13837_v51, 16  ;;  %v7333_v32 = vshrl.u32 %v13837_v51, 16  ;;  %v7322_v16 = vrot.slane %v7320_v35, 4 }
 0x3da   : > { %v5911_v17 = vadd.f32 %v5847_v59, %v5624_v27  ;;  %v17765_v11 = vpop.f32.mrf.mxu1  ;;  %v14031_v59 = vld [vmem:[%s20013_s3 + $0x4c] sm:$0xf]  ;;  %v13838_v27 = vld [vmem:[%s16048_s18 + $0x20] sm:$0x1]  ;;  %v7325_v7 = vrot.slane %v7323_v4, 5  ;;  %v5419_v51 = vsel %vm15248_vm3, %v13478_v41, %v5418_v6 }
 0x3db   : > { %v9140_v22 = vsel %vm931_vm0, %v14031_v59, 0  ;;  %v7993_v10 = vrot.slane %v7991_v28, 4  ;;  %v7994_v20 = vrot.slane %v13838_v27, 5  ;;  %v7331_v14 = vrot.slane %v7329_v24, 5  ;;  %v14064_v6 = vld [vmem:[%s20013_s3 + $0x50] sm:$0xf] }
 0x3dc   : > { %13494 = vmatmul.msk.bf16.gmra.mxu3 %vm882_vm5, %v5471_v36  ;;  %v6565_v40 = vadd.f32 %v17688_v60, %v5911_v17  ;;  %v5852_v25 = vpop.f32.mrf.mxu0  ;;  %v13917_v36 = vrot.slane %v13901_v18, 9  ;;  %v14113_v41 = vld [vmem:[%s20013_s3 + $0x54] sm:$0xf]  ;;  %v9538_v35 = vsel %vm931_vm0, %v14064_v6, 0  ;;  %v5455_v18 = vunpack.c.l.b16 %v5419_v51  ;;  %v13840_v6 = vld [vmem:[%s16048_s18 + $0x28] sm:$0xf] }
 0x3dd   : > { %v17774_v5 = vpop.f32.mrf.mxu2  ;;  %13673 = vmatmul.msk.bf16.gmra.mxu1 %vm882_vm5, %v6413_v13  ;;  %9149 = vmatpush.bf16.msrb.mxu3 %v9140_v22  ;;  %v7335_v13 = vrot.slane %v7333_v32, 4  ;;  %v9825_v4 = vsel %vm931_vm0, %v14113_v41, 0  ;;  %v7326_v24 = vor.u32 %v7325_v7, %v7322_v16 }
 0x3de   : > { %v17786_v60 = vadd.f32 %v17720_v19, %v6565_v40  ;;  %v7992_v19 = vsel %vm15248_vm3, %v13917_v36, %v7991_v28  ;;  %v5456_v40 = vunpack.c.l.b16 %v5422_v44  ;;  %9547 = vmatpush.bf16.msrb.mxu0 %v9538_v35  ;;  %9834 = vmatpush.bf16.msrb.mxu1 %v9825_v4 }
 0x3df   : > { %v5563_v47 = vpop.f32.mrf.mxu3  ;;  %v7336_v36 = vor.u32 %v7335_v13, %v7331_v14  ;;  %v13839_v13 = vld [vmem:[%s16048_s18 + $0x24] sm:$0xf] }
 0x3e0   : > { %v5625_v17 = vadd.f32 %v5563_v47, %v17048_v58  ;;  %v14242_v58 = vld [vmem:[%s20013_s3 + $0x58] sm:$0xf]  ;;  %v7339_v47 = vshll.u32 %v13838_v27, 16  ;;  %v5472_v16 = vpack.c.b16 %v5456_v40, %v5455_v18  ;;  %v7344_v41 = vshrl.u32 %v13839_v13, 16 }
 0x3e1   : > { %v10479_v28 = vsel %vm931_vm0, %v14242_v58, 0  ;;  %v7337_v44 = vrot.slane %v7336_v36, 4  ;;  %v7353_v40 = vshll.u32 %v13840_v6, 16 }
 0x3e2   : > { %v5912_v59 = vadd.f32 %v5850_v45, %v5625_v17  ;;  %13722 = vmatmul.msk.bf16.gmra.mxu2 %vm882_vm5, %v6811_v26  ;;  %v17806_v52 = vpop.f32.mrf.mxu1  ;;  %v7995_v45 = vsel %vm15248_vm3, %v7993_v10, %v7994_v20  ;;  %v8103_v10 = vunpack.c.l.b16 %v7992_v19 }
 0x3e3   : > { %10488 = vmatpush.bf16.msrb.mxu2 %v10479_v28  ;;  %v8104_v20 = vunpack.c.l.b16 %v7995_v45  ;;  %v7347_v45 = vshll.u32 %v13839_v13, 16 }
 0x3e4   : > { %v6566_v32 = vadd.f32 %v17715_v21, %v5912_v59  ;;  %v5855_v22 = vpop.f32.mrf.mxu0  ;;  %v7327_v21 = vrot.slane %v7326_v24, 4  ;;  %v7341_v59 = vrot.slane %v7339_v47, 5  ;;  %v14643_v24 = vld [vmem:[%s17828_s8] sm:$0xff] }
 0x3e5   : > { %v17815_v26 = vpop.f32.mrf.mxu2  ;;  %v8135_v58 = vpack.c.b16 %v8104_v20, %v8103_v10 }
 0x3e6   : > { %v17819_v17 = vadd.f32 %v17743_v55, %v6566_v32  ;;  %v7998_v55 = vrot.slane %v13840_v6, 5  ;;  %v7332_v19 = vsel %vm15272_vm7, %v7327_v21, %v7331_v14  ;;  %v7342_v18 = vsel %vm15272_vm7, %v7337_v44, %v7341_v59  ;;  %v13841_v32 = vld [vmem:[%s16048_s18 + $0x2c] sm:$0x1] }
 0x3e7   : > { %v5565_v51 = vpop.f32.mrf.mxu3  ;;  %13608 = vmatmul.msk.bf16.gmra.mxu0 %vm882_vm5, %v14626_v53  ;;  %v7357_v53 = vshrl.u32 %v13840_v6, 16  ;;  %v7705_v47 = vunpack.c.l.b16 %v7332_v19  ;;  %v7349_v21 = vrot.slane %v7347_v45, 5  ;;  %v7355_v44 = vrot.slane %v7353_v40, 5 }
 0x3e8   : > { %v5626_v7 = vadd.f32 %v5565_v51, %v17074_v39  ;;  %v8000_v20 = vrot.slane %v7998_v55, 4  ;;  %v8001_v51 = vrot.slane %v13841_v32, 5 }
 0x3e9   : > { %v7359_v59 = vrot.slane %v7357_v53, 4 }
 0x3ea   : > { %v5913_v27 = vadd.f32 %v5852_v25, %v5626_v7  ;;  %v17830_v39 = vpop.f32.mrf.mxu1  ;;  %v13902_v25 = vld [vmem:[%s16048_s18 + $0x24] sm:$0xe]  ;;  %v7706_v7 = vunpack.c.l.b16 %v7342_v18 }
 0x3eb   : > { %v13918_v10 = vrot.slane %v13902_v25, 9  ;;  %v7363_v25 = vshll.u32 %v13841_v32, 16  ;;  %v13843_v32 = vld [vmem:[%s16048_s18 + $0x34] sm:$0xf] }
 0x3ec   : > { %13495 = vmatmul.msk.bf16.gmra.mxu3 %vm882_vm5, %v5472_v16  ;;  %v6567_v28 = vadd.f32 %v17735_v48, %v5913_v27  ;;  %v5857_v35 = vpop.f32.mrf.mxu0  ;;  %v7346_v16 = vrot.slane %v7344_v41, 4  ;;  %v7737_v6 = vpack.c.b16 %v7706_v7, %v7705_v47 }
 0x3ed   : > { %v6909_v4 = vpop.f32.mrf.mxu2  ;;  %13934 = vmatmul.msk.bf16.vlgmr.msra.gmra.mxu1 %vm882_vm5, %v8135_v58  ;;  %v8002_v58 = vsel %vm15248_vm3, %v8000_v20, %v8001_v51 }
 0x3ee   : > { %v17843_v36 = vadd.f32 %v17774_v5, %v6567_v28  ;;  %v7999_v5 = vsel %vm15248_vm3, %v13918_v10, %v7998_v55  ;;  %v7350_v19 = vor.u32 %v7349_v21, %v7346_v16  ;;  %v8106_v18 = vunpack.c.l.b16 %v8002_v58  ;;  %v13842_v10 = vld [vmem:[%s16048_s18 + $0x30] sm:$0xf] }
 0x3ef   : > { %v5568_v14 = vpop.f32.mrf.mxu3  ;;  %v8105_v28 = vunpack.c.l.b16 %v7999_v5  ;;  %v7368_v7 = vshrl.u32 %v13842_v10, 16  ;;  %v7371_v16 = vshll.u32 %v13842_v10, 16  ;;  %v13903_v21 = vld [vmem:[%s16048_s18 + $0x30] sm:$0xe]  ;;  %v7377_v58 = vshll.u32 %v13843_v32, 16 }
 0x3f0   : > { %v5627_v48 = vadd.f32 %v5568_v14, %v17096_v34  ;;  %v7351_v14 = vrot.slane %v7350_v19, 4  ;;  %v14644_v19 = vld [vmem:[%s17828_s8 + $0xc] sm:$0xff] }
 0x3f1   : > { %v8136_v51 = vpack.c.b16 %v8106_v18, %v8105_v28  ;;  %v13919_v28 = vrot.slane %v13903_v21, 9  ;;  %v7379_v10 = vrot.slane %v7377_v58, 5 }
 0x3f2   : > { %v5914_v13 = vadd.f32 %v5855_v22, %v5627_v48  ;;  %14015 = vmatmul.msk.bf16.vlgmr.msra.gmra.mxu2 %vm882_vm5, %v14643_v24  ;;  %v17847_v27 = vpop.f32.mrf.mxu1  ;;  %v7360_v22 = vor.u32 %v7359_v59, %v7355_v44  ;;  %v14627_v24 = vld [vmem:[%s16048_s18 + $0x18] sm:$0xff] }
 0x3f4   : > { %v6568_v34 = vadd.f32 %v17765_v11, %v5914_v13  ;;  %v5860_v41 = vpop.f32.mrf.mxu0  ;;  %v7361_v47 = vrot.slane %v7360_v22, 4  ;;  %v7365_v11 = vrot.slane %v7363_v25, 5 }
 0x3f5   : > { %v6912_v45 = vpop.f32.mrf.mxu2 }
 0x3f6   : > { %v17855_v40 = vadd.f32 %v17815_v26, %v6568_v34  ;;  %v8005_v26 = vrot.slane %v13843_v32, 5  ;;  %v13844_v34 = vld [vmem:[%s16048_s18 + $0x38] sm:$0x1] }
 0x3f7   : > { %v5570_v53 = vpop.f32.mrf.mxu3  ;;  %13885 = vmatmul.msk.bf16.vlgmr.msra.gmra.mxu0 %vm882_vm5, %v7737_v6  ;;  %v7381_v6 = vshrl.u32 %v13843_v32, 16  ;;  %v7387_v21 = vshll.u32 %v13844_v34, 16 }
 0x3f8   : > { %v5628_v55 = vadd.f32 %v5570_v53, %v17121_v1  ;;  %v7356_v1 = vsel %vm15272_vm7, %v7351_v14, %v7355_v44  ;;  %v8007_v18 = vrot.slane %v8005_v26, 4  ;;  %v8008_v53 = vrot.slane %v13844_v34, 5 }
 0x3f9   : > { %v7707_v44 = vunpack.c.l.b16 %v7356_v1  ;;  %v7373_v14 = vrot.slane %v7371_v16, 5 }
 0x3fa   : > { %v5915_v20 = vadd.f32 %v5857_v35, %v5628_v55  ;;  %v17862_v48 = vpop.f32.mrf.mxu1  ;;  %v7366_v35 = vsel %vm15272_vm7, %v7361_v47, %v7365_v11  ;;  %v7383_v47 = vrot.slane %v7381_v6, 4 }
 0x3fb   : > { %v7708_v55 = vunpack.c.l.b16 %v7366_v35 }
 0x3fc   : > { %13820 = vmatmul.msk.bf16.vlgmr.msra.gmra.mxu3 %vm882_vm5, %v14627_v24  ;;  %v6569_v59 = vadd.f32 %v17806_v52, %v5915_v20  ;;  %v5862_v13 = vpop.f32.mrf.mxu0  ;;  %v7370_v24 = vrot.slane %v7368_v7, 4 }
 0x3fd   : > { %v6914_v5 = vpop.f32.mrf.mxu2  ;;  %13935 = vmatmul.msk.bf16.gmra.mxu1 %vm882_vm5, %v8136_v51  ;;  %v8009_v51 = vsel %vm15248_vm3, %v8007_v18, %v8008_v53  ;;  %v7738_v32 = vpack.c.b16 %v7708_v55, %v7707_v44 }
 0x3fe   : > { %v17874_v22 = vadd.f32 %v6909_v4, %v6569_v59  ;;  %v8006_v4 = vsel %vm15248_vm3, %v13919_v28, %v8005_v26  ;;  %v7374_v1 = vor.u32 %v7373_v14, %v7370_v24  ;;  %v8108_v35 = vunpack.c.l.b16 %v8009_v51  ;;  %v13904_v14 = vld [vmem:[%s16048_s18 + $0x3c] sm:$0xe] }
 0x3ff   : > { %v5573_v25 = vpop.f32.mrf.mxu3  ;;  %v8107_v59 = vunpack.c.l.b16 %v8006_v4  ;;  %v7389_v28 = vrot.slane %v7387_v21, 5 }
 0x400   : > { %v5629_v52 = vadd.f32 %v5573_v25, %v17143_v54  ;;  %v7375_v25 = vrot.slane %v7374_v1, 4  ;;  %v14645_v1 = vld [vmem:[%s17828_s8 + $0x18] sm:$0xff] }
 0x401   : > { %v8137_v53 = vpack.c.b16 %v8108_v35, %v8107_v59  ;;  %v13920_v59 = vrot.slane %v13904_v14, 9 }
 0x402   : > { %v5916_v11 = vadd.f32 %v5860_v41, %v5629_v52  ;;  %14016 = vmatmul.msk.bf16.gmra.mxu2 %vm882_vm5, %v14644_v19  ;;  %v17878_v20 = vpop.f32.mrf.mxu1  ;;  %v7384_v41 = vor.u32 %v7383_v47, %v7379_v10  ;;  %v14628_v19 = vld [vmem:[%s16048_s18 + $0x24] sm:$0xff]  ;;  %v13846_v52 = vld [vmem:[%s16048_s18 + $0x40] sm:$0xf] }
 0x403   : > { %v7401_v51 = vshll.u32 %v13846_v52, 16 }
 0x404   : > { %v6570_v54 = vadd.f32 %v17830_v39, %v5916_v11  ;;  %v5865_v7 = vpop.f32.mrf.mxu0  ;;  %v7385_v44 = vrot.slane %v7384_v41, 4  ;;  %v13845_v39 = vld [vmem:[%s16048_s18 + $0x3c] sm:$0xf] }
 0x405   : > { %v6917_v16 = vpop.f32.mrf.mxu2  ;;  %v7392_v55 = vshrl.u32 %v13845_v39, 16  ;;  %v7395_v24 = vshll.u32 %v13845_v39, 16  ;;  %v7403_v39 = vrot.slane %v7401_v51, 5 }
 0x406   : > { %v17885_v58 = vadd.f32 %v6912_v45, %v6570_v54  ;;  %v8012_v45 = vrot.slane %v13846_v52, 5  ;;  %v13847_v54 = vld [vmem:[%s16048_s18 + $0x44] sm:$0x1] }
 0x407   : > { %v5575_v6 = vpop.f32.mrf.mxu3  ;;  %13886 = vmatmul.msk.bf16.gmra.mxu0 %vm882_vm5, %v7738_v32  ;;  %v7405_v32 = vshrl.u32 %v13846_v52, 16  ;;  %v7411_v14 = vshll.u32 %v13847_v54, 16 }
 0x408   : > { %v5630_v26 = vadd.f32 %v5575_v6, %v17168_v57  ;;  %v7380_v57 = vsel %vm15272_vm7, %v7375_v25, %v7379_v10  ;;  %v8014_v35 = vrot.slane %v8012_v45, 4  ;;  %v8015_v6 = vrot.slane %v13847_v54, 5 }
 0x409   : > { %v7709_v10 = vunpack.c.l.b16 %v7380_v57  ;;  %v7397_v25 = vrot.slane %v7395_v24, 5 }
 0x40a   : > { %v5917_v18 = vadd.f32 %v5862_v13, %v5630_v26  ;;  %v17892_v34 = vpop.f32.mrf.mxu1  ;;  %v7390_v13 = vsel %vm15272_vm7, %v7385_v44, %v7389_v28  ;;  %v7407_v44 = vrot.slane %v7405_v32, 4 }
 0x40b   : > { %v7710_v26 = vunpack.c.l.b16 %v7390_v13 }
 0x40c   : > { %13821 = vmatmul.msk.bf16.gmra.mxu3 %vm882_vm5, %v14628_v19  ;;  %v6571_v47 = vadd.f32 %v17847_v27, %v5917_v18  ;;  %v5867_v11 = vpop.f32.mrf.mxu0  ;;  %v7394_v19 = vrot.slane %v7392_v55, 4 }
 0x40d   : > { %v6919_v4 = vpop.f32.mrf.mxu2  ;;  %13936 = vmatmul.msk.bf16.gmra.mxu1 %vm882_vm5, %v8137_v53  ;;  %v8016_v53 = vsel %vm15248_vm3, %v8014_v35, %v8015_v6  ;;  %v7739_v52 = vpack.c.b16 %v7710_v26, %v7709_v10 }
 0x40e   : > { %v17904_v41 = vadd.f32 %v6914_v5, %v6571_v47  ;;  %v8013_v5 = vsel %vm15248_vm3, %v13920_v59, %v8012_v45  ;;  %v7398_v57 = vor.u32 %v7397_v25, %v7394_v19  ;;  %v8110_v13 = vunpack.c.l.b16 %v8016_v53  ;;  %v13905_v25 = vld [vmem:[%s16048_s18 + $0x48] sm:$0xe] }
 0x40f   : > { %v5578_v21 = vpop.f32.mrf.mxu3  ;;  %v8109_v47 = vunpack.c.l.b16 %v8013_v5  ;;  %v7413_v59 = vrot.slane %v7411_v14, 5 }
 0x410   : > { %v5631_v27 = vadd.f32 %v5578_v21, %v17190_v29  ;;  %v7399_v21 = vrot.slane %v7398_v57, 4  ;;  %v14646_v57 = vld [vmem:[%s17828_s8 + $0x24] sm:$0xff] }
 0x411   : > { %v8138_v6 = vpack.c.b16 %v8110_v13, %v8109_v47  ;;  %v13921_v47 = vrot.slane %v13905_v25, 9 }
 0x412   : > { %v5918_v28 = vadd.f32 %v5865_v7, %v5631_v27  ;;  %14017 = vmatmul.msk.bf16.gmra.mxu2 %vm882_vm5, %v14645_v1  ;;  %v17908_v18 = vpop.f32.mrf.mxu1  ;;  %v7408_v7 = vor.u32 %v7407_v44, %v7403_v39  ;;  %v14629_v1 = vld [vmem:[%s16048_s18 + $0x30] sm:$0xff]  ;;  %v13849_v27 = vld [vmem:[%s16048_s18 + $0x4c] sm:$0xf] }
 0x413   : > { %v7425_v53 = vshll.u32 %v13849_v27, 16 }
 0x414   : > { %v6572_v29 = vadd.f32 %v17862_v48, %v5918_v28  ;;  %v5870_v55 = vpop.f32.mrf.mxu0  ;;  %v7409_v10 = vrot.slane %v7408_v7, 4  ;;  %v13848_v48 = vld [vmem:[%s16048_s18 + $0x48] sm:$0xf] }
 0x415   : > { %v6922_v24 = vpop.f32.mrf.mxu2  ;;  %v7416_v26 = vshrl.u32 %v13848_v48, 16  ;;  %v7419_v19 = vshll.u32 %v13848_v48, 16  ;;  %v7427_v48 = vrot.slane %v7425_v53, 5 }
 0x416   : > { %v17915_v51 = vadd.f32 %v6917_v16, %v6572_v29  ;;  %v8019_v16 = vrot.slane %v13849_v27, 5  ;;  %v13850_v29 = vld [vmem:[%s16048_s18 + $0x50] sm:$0x1] }
 0x417   : > { %v5580_v32 = vpop.f32.mrf.mxu3  ;;  %13887 = vmatmul.msk.bf16.gmra.mxu0 %vm882_vm5, %v7739_v52  ;;  %v7429_v52 = vshrl.u32 %v13849_v27, 16  ;;  %v7435_v25 = vshll.u32 %v13850_v29, 16 }
 0x418   : > { %v5632_v45 = vadd.f32 %v5580_v32, %v17215_v37  ;;  %v7404_v37 = vsel %vm15272_vm7, %v7399_v21, %v7403_v39  ;;  %v8021_v13 = vrot.slane %v8019_v16, 4  ;;  %v8022_v32 = vrot.slane %v13850_v29, 5 }
 0x419   : > { %v7711_v39 = vunpack.c.l.b16 %v7404_v37  ;;  %v7421_v21 = vrot.slane %v7419_v19, 5 }
 0x41a   : > { %v5919_v35 = vadd.f32 %v5867_v11, %v5632_v45  ;;  %v17922_v54 = vpop.f32.mrf.mxu1  ;;  %v7414_v11 = vsel %vm15272_vm7, %v7409_v10, %v7413_v59  ;;  %v7431_v10 = vrot.slane %v7429_v52, 4 }
 0x41b   : > { %v7712_v45 = vunpack.c.l.b16 %v7414_v11 }
 0x41c   : > { %13822 = vmatmul.msk.bf16.gmra.mxu3 %vm882_vm5, %v14629_v1  ;;  %v6573_v44 = vadd.f32 %v17878_v20, %v5919_v35  ;;  %v5872_v28 = vpop.f32.mrf.mxu0  ;;  %v7418_v1 = vrot.slane %v7416_v26, 4 }
 0x41d   : > { %v6924_v5 = vpop.f32.mrf.mxu2  ;;  %13937 = vmatmul.msk.bf16.gmra.mxu1 %vm882_vm5, %v8138_v6  ;;  %v8023_v6 = vsel %vm15248_vm3, %v8021_v13, %v8022_v32  ;;  %v7740_v27 = vpack.c.b16 %v7712_v45, %v7711_v39 }
 0x41e   : > { %v17934_v7 = vadd.f32 %v6919_v4, %v6573_v44  ;;  %v8020_v4 = vsel %vm15248_vm3, %v13921_v47, %v8019_v16  ;;  %v7422_v37 = vor.u32 %v7421_v21, %v7418_v1  ;;  %v8112_v11 = vunpack.c.l.b16 %v8023_v6  ;;  %v13906_v21 = vld [vmem:[%s16048_s18 + $0x54] sm:$0xe] }
 0x41f   : > { %v5583_v14 = vpop.f32.mrf.mxu3  ;;  %v8111_v44 = vunpack.c.l.b16 %v8020_v4  ;;  %v7437_v47 = vrot.slane %v7435_v25, 5 }
 0x420   : > { %v5633_v20 = vadd.f32 %v5583_v14, %v17237_v50  ;;  %v7423_v14 = vrot.slane %v7422_v37, 4  ;;  %v14647_v37 = vld [vmem:[%s17828_s8 + $0x30] sm:$0xff] }
 0x421   : > { %v8139_v32 = vpack.c.b16 %v8112_v11, %v8111_v44  ;;  %v13922_v44 = vrot.slane %v13906_v21, 9 }
 0x422   : > { %v5920_v59 = vadd.f32 %v5870_v55, %v5633_v20  ;;  %14018 = vmatmul.msk.bf16.gmra.mxu2 %vm882_vm5, %v14646_v57  ;;  %v17938_v35 = vpop.f32.mrf.mxu1  ;;  %v7432_v55 = vor.u32 %v7431_v10, %v7427_v48  ;;  %v14630_v57 = vld [vmem:[%s16048_s18 + $0x3c] sm:$0xff]  ;;  %v13852_v20 = vld [vmem:[%s16048_s18 + $0x58] sm:$0xf] }
 0x423   : > { %v7449_v6 = vshll.u32 %v13852_v20, 16 }
 0x424   : > { %v6574_v50 = vadd.f32 %v17892_v34, %v5920_v59  ;;  %v5875_v26 = vpop.f32.mrf.mxu0  ;;  %v7433_v39 = vrot.slane %v7432_v55, 4  ;;  %v13851_v34 = vld [vmem:[%s16048_s18 + $0x54] sm:$0xf] }
 0x425   : > { %v6927_v19 = vpop.f32.mrf.mxu2  ;;  %v7440_v45 = vshrl.u32 %v13851_v34, 16  ;;  %v7443_v1 = vshll.u32 %v13851_v34, 16  ;;  %v7451_v34 = vrot.slane %v7449_v6, 5 }
 0x426   : > { %v17945_v53 = vadd.f32 %v6922_v24, %v6574_v50  ;;  %v8026_v24 = vrot.slane %v13852_v20, 5  ;;  %v13853_v50 = vld [vmem:[%s16048_s18 + $0x5c] sm:$0x1] }
 0x427   : > { %v5585_v52 = vpop.f32.mrf.mxu3  ;;  %13888 = vmatmul.msk.bf16.gmra.mxu0 %vm882_vm5, %v7740_v27  ;;  %v7453_v27 = vshrl.u32 %v13852_v20, 16  ;;  %v7459_v21 = vshll.u32 %v13853_v50, 16 }
 0x428   : > { %v5634_v16 = vadd.f32 %v5585_v52, %v17262_v30  ;;  %v7428_v30 = vsel %vm15272_vm7, %v7423_v14, %v7427_v48  ;;  %v8028_v11 = vrot.slane %v8026_v24, 4  ;;  %v8029_v52 = vrot.slane %v13853_v50, 5 }
 0x429   : > { %v7713_v48 = vunpack.c.l.b16 %v7428_v30  ;;  %v7445_v14 = vrot.slane %v7443_v1, 5 }
 0x42a   : > { %v5921_v13 = vadd.f32 %v5872_v28, %v5634_v16  ;;  %v17952_v29 = vpop.f32.mrf.mxu1  ;;  %v7438_v28 = vsel %vm15272_vm7, %v7433_v39, %v7437_v47  ;;  %v7455_v39 = vrot.slane %v7453_v27, 4 }
 0x42b   : > { %v7714_v16 = vunpack.c.l.b16 %v7438_v28 }
 0x42c   : > { %13823 = vmatmul.msk.bf16.gmra.mxu3 %vm882_vm5, %v14630_v57  ;;  %v6575_v10 = vadd.f32 %v17908_v18, %v5921_v13  ;;  %v5877_v59 = vpop.f32.mrf.mxu0  ;;  %v7442_v57 = vrot.slane %v7440_v45, 4 }
 0x42d   : > { %v6929_v4 = vpop.f32.mrf.mxu2  ;;  %13938 = vmatmul.msk.bf16.gmra.mxu1 %vm882_vm5, %v8139_v32  ;;  %v8030_v32 = vsel %vm15248_vm3, %v8028_v11, %v8029_v52  ;;  %v7741_v20 = vpack.c.b16 %v7714_v16, %v7713_v48 }
 0x42e   : > { %v17964_v55 = vadd.f32 %v6924_v5, %v6575_v10  ;;  %v8027_v5 = vsel %vm15248_vm3, %v13922_v44, %v8026_v24  ;;  %v7446_v30 = vor.u32 %v7445_v14, %v7442_v57  ;;  %v8114_v28 = vunpack.c.l.b16 %v8030_v32  ;;  %v13907_v14 = vld [vmem:[%s16048_s18 + $0x60] sm:$0xe] }
 0x42f   : > { %v5588_v25 = vpop.f32.mrf.mxu3  ;;  %v8113_v10 = vunpack.c.l.b16 %v8027_v5  ;;  %v7461_v44 = vrot.slane %v7459_v21, 5 }
 0x430   : > { %v5635_v18 = vadd.f32 %v5588_v25, %v17284_v63  ;;  %v7447_v25 = vrot.slane %v7446_v30, 4  ;;  %v14648_v30 = vld [vmem:[%s17828_s8 + $0x3c] sm:$0xff] }
 0x431   : > { %v8140_v52 = vpack.c.b16 %v8114_v28, %v8113_v10  ;;  %v13923_v10 = vrot.slane %v13907_v14, 9 }
 0x432   : > { %v5922_v47 = vadd.f32 %v5875_v26, %v5635_v18  ;;  %14019 = vmatmul.msk.bf16.gmra.mxu2 %vm882_vm5, %v14647_v37  ;;  %v17968_v13 = vpop.f32.mrf.mxu1  ;;  %v7456_v26 = vor.u32 %v7455_v39, %v7451_v34  ;;  %v14631_v37 = vld [vmem:[%s16048_s18 + $0x48] sm:$0xff]  ;;  %v13855_v18 = vld [vmem:[%s16048_s18 + $0x64] sm:$0xf] }
 0x433   : > { %v7473_v32 = vshll.u32 %v13855_v18, 16 }
 0x434   : > { %v6576_v63 = vadd.f32 %v17922_v54, %v5922_v47  ;;  %v5880_v45 = vpop.f32.mrf.mxu0  ;;  %v7457_v48 = vrot.slane %v7456_v26, 4  ;;  %v13854_v54 = vld [vmem:[%s16048_s18 + $0x60] sm:$0xf] }
 0x435   : > { %v6932_v1 = vpop.f32.mrf.mxu2  ;;  %v7464_v16 = vshrl.u32 %v13854_v54, 16  ;;  %v7467_v57 = vshll.u32 %v13854_v54, 16  ;;  %v7475_v54 = vrot.slane %v7473_v32, 5 }
 0x436   : > { %v17975_v6 = vadd.f32 %v6927_v19, %v6576_v63  ;;  %v8033_v19 = vrot.slane %v13855_v18, 5  ;;  %v13856_v63 = vld [vmem:[%s16048_s18 + $0x68] sm:$0x1] }
 0x437   : > { %v5590_v27 = vpop.f32.mrf.mxu3  ;;  %13889 = vmatmul.msk.bf16.gmra.mxu0 %vm882_vm5, %v7741_v20  ;;  %v7477_v20 = vshrl.u32 %v13855_v18, 16  ;;  %v7483_v14 = vshll.u32 %v13856_v63, 16 }
 0x438   : > { %v5636_v24 = vadd.f32 %v5590_v27, %v17309_v9  ;;  %v7452_v9 = vsel %vm15272_vm7, %v7447_v25, %v7451_v34  ;;  %v8035_v28 = vrot.slane %v8033_v19, 4  ;;  %v8036_v27 = vrot.slane %v13856_v63, 5 }
 0x439   : > { %v7715_v34 = vunpack.c.l.b16 %v7452_v9  ;;  %v7469_v25 = vrot.slane %v7467_v57, 5 }
 0x43a   : > { %v5923_v11 = vadd.f32 %v5877_v59, %v5636_v24  ;;  %v17982_v50 = vpop.f32.mrf.mxu1  ;;  %v7462_v59 = vsel %vm15272_vm7, %v7457_v48, %v7461_v44  ;;  %v7479_v48 = vrot.slane %v7477_v20, 4 }
 0x43b   : > { %v7716_v24 = vunpack.c.l.b16 %v7462_v59 }
 0x43c   : > { %13824 = vmatmul.msk.bf16.gmra.mxu3 %vm882_vm5, %v14631_v37  ;;  %v6577_v39 = vadd.f32 %v17938_v35, %v5923_v11  ;;  %v5882_v47 = vpop.f32.mrf.mxu0  ;;  %v7466_v37 = vrot.slane %v7464_v16, 4 }
 0x43d   : > { %v6934_v5 = vpop.f32.mrf.mxu2  ;;  %13939 = vmatmul.msk.bf16.gmra.mxu1 %vm882_vm5, %v8140_v52  ;;  %v8037_v52 = vsel %vm15248_vm3, %v8035_v28, %v8036_v27  ;;  %v7742_v18 = vpack.c.b16 %v7716_v24, %v7715_v34 }
 0x43e   : > { %v17994_v26 = vadd.f32 %v6929_v4, %v6577_v39  ;;  %v8034_v4 = vsel %vm15248_vm3, %v13923_v10, %v8033_v19  ;;  %v7470_v9 = vor.u32 %v7469_v25, %v7466_v37  ;;  %v8116_v59 = vunpack.c.l.b16 %v8037_v52  ;;  %v13908_v25 = vld [vmem:[%s16048_s18 + $0x6c] sm:$0xe] }
 0x43f   : > { %v5593_v21 = vpop.f32.mrf.mxu3  ;;  %v8115_v39 = vunpack.c.l.b16 %v8034_v4  ;;  %v7485_v10 = vrot.slane %v7483_v14, 5 }
 0x440   : > { %v5637_v35 = vadd.f32 %v5593_v21, %v17331_v15  ;;  %v7471_v21 = vrot.slane %v7470_v9, 4  ;;  %v14649_v9 = vld [vmem:[%s17828_s8 + $0x48] sm:$0xff] }
 0x441   : > { %v8141_v27 = vpack.c.b16 %v8116_v59, %v8115_v39  ;;  %v13924_v39 = vrot.slane %v13908_v25, 9 }
 0x442   : > { %v5924_v44 = vadd.f32 %v5880_v45, %v5637_v35  ;;  %14020 = vmatmul.msk.bf16.gmra.mxu2 %vm882_vm5, %v14648_v30  ;;  %v17998_v11 = vpop.f32.mrf.mxu1  ;;  %v7480_v45 = vor.u32 %v7479_v48, %v7475_v54  ;;  %v14632_v30 = vld [vmem:[%s16048_s18 + $0x54] sm:$0xff]  ;;  %v13858_v35 = vld [vmem:[%s16048_s18 + $0x70] sm:$0xf] }
 0x443   : > { %v7497_v52 = vshll.u32 %v13858_v35, 16 }
 0x444   : > { %v6578_v15 = vadd.f32 %v17952_v29, %v5924_v44  ;;  %v5885_v16 = vpop.f32.mrf.mxu0  ;;  %v7481_v34 = vrot.slane %v7480_v45, 4  ;;  %v13857_v29 = vld [vmem:[%s16048_s18 + $0x6c] sm:$0xf] }
 0x445   : > { %v6937_v57 = vpop.f32.mrf.mxu2  ;;  %v7488_v24 = vshrl.u32 %v13857_v29, 16  ;;  %v7491_v37 = vshll.u32 %v13857_v29, 16  ;;  %v7499_v29 = vrot.slane %v7497_v52, 5 }
 0x446   : > { %v18005_v32 = vadd.f32 %v6932_v1, %v6578_v15  ;;  %v8040_v1 = vrot.slane %v13858_v35, 5  ;;  %v13859_v15 = vld [vmem:[%s16048_s18 + $0x74] sm:$0x1] }
 0x447   : > { %v5595_v20 = vpop.f32.mrf.mxu3  ;;  %13890 = vmatmul.msk.bf16.gmra.mxu0 %vm882_vm5, %v7742_v18  ;;  %v7501_v18 = vshrl.u32 %v13858_v35, 16  ;;  %v7507_v25 = vshll.u32 %v13859_v15, 16 }
 0x448   : > { %v5638_v19 = vadd.f32 %v5595_v20, %v17356_v0  ;;  %v7476_v0 = vsel %vm15272_vm7, %v7471_v21, %v7475_v54  ;;  %v8042_v59 = vrot.slane %v8040_v1, 4  ;;  %v8043_v20 = vrot.slane %v13859_v15, 5 }
 0x449   : > { %v7717_v54 = vunpack.c.l.b16 %v7476_v0  ;;  %v7493_v21 = vrot.slane %v7491_v37, 5 }
 0x44a   : > { %v5925_v28 = vadd.f32 %v5882_v47, %v5638_v19  ;;  %v18012_v63 = vpop.f32.mrf.mxu1  ;;  %v7486_v47 = vsel %vm15272_vm7, %v7481_v34, %v7485_v10  ;;  %v7503_v34 = vrot.slane %v7501_v18, 4 }
 0x44b   : > { %v7718_v19 = vunpack.c.l.b16 %v7486_v47 }
 0x44c   : > { %13825 = vmatmul.msk.bf16.gmra.mxu3 %vm882_vm5, %v14632_v30  ;;  %v6579_v48 = vadd.f32 %v17968_v13, %v5925_v28  ;;  %v5887_v44 = vpop.f32.mrf.mxu0  ;;  %v7490_v30 = vrot.slane %v7488_v24, 4 }
 0x44d   : > { %v6939_v4 = vpop.f32.mrf.mxu2  ;;  %13940 = vmatmul.msk.bf16.gmra.mxu1 %vm882_vm5, %v8141_v27  ;;  %v8044_v27 = vsel %vm15248_vm3, %v8042_v59, %v8043_v20  ;;  %v7743_v35 = vpack.c.b16 %v7718_v19, %v7717_v54 }
 0x44e   : > { %v18024_v45 = vadd.f32 %v6934_v5, %v6579_v48  ;;  %v8041_v5 = vsel %vm15248_vm3, %v13924_v39, %v8040_v1  ;;  %v7494_v0 = vor.u32 %v7493_v21, %v7490_v30  ;;  %v8118_v47 = vunpack.c.l.b16 %v8044_v27  ;;  %v13909_v21 = vld [vmem:[%s16048_s18 + $0x78] sm:$0xe] }
 0x44f   : > { %v5598_v14 = vpop.f32.mrf.mxu3  ;;  %v8117_v48 = vunpack.c.l.b16 %v8041_v5  ;;  %v7509_v39 = vrot.slane %v7507_v25, 5 }
 0x450   : > { %v5639_v13 = vadd.f32 %v5598_v14, %v17378_v62  ;;  %v7495_v14 = vrot.slane %v7494_v0, 4  ;;  %v14650_v0 = vld [vmem:[%s17828_s8 + $0x54] sm:$0xff] }
 0x451   : > { %v8142_v20 = vpack.c.b16 %v8118_v47, %v8117_v48  ;;  %v13925_v48 = vrot.slane %v13909_v21, 9 }
 0x452   : > { %v5926_v10 = vadd.f32 %v5885_v16, %v5639_v13  ;;  %14021 = vmatmul.msk.bf16.gmra.mxu2 %vm882_vm5, %v14649_v9  ;;  %v18028_v28 = vpop.f32.mrf.mxu1  ;;  %v7504_v16 = vor.u32 %v7503_v34, %v7499_v29  ;;  %v14633_v9 = vld [vmem:[%s16048_s18 + $0x60] sm:$0xff]  ;;  %v13861_v13 = vld [vmem:[%s16048_s18 + $0x7c] sm:$0xf] }
 0x453   : > { %v7521_v27 = vshll.u32 %v13861_v13, 16 }
 0x454   : > { %v6580_v62 = vadd.f32 %v17982_v50, %v5926_v10  ;;  %v5890_v24 = vpop.f32.mrf.mxu0  ;;  %v7505_v54 = vrot.slane %v7504_v16, 4  ;;  %v13860_v50 = vld [vmem:[%s16048_s18 + $0x78] sm:$0xf] }
 0x455   : > { %v6942_v37 = vpop.f32.mrf.mxu2  ;;  %v7512_v19 = vshrl.u32 %v13860_v50, 16  ;;  %v7515_v30 = vshll.u32 %v13860_v50, 16  ;;  %v7523_v50 = vrot.slane %v7521_v27, 5 }
 0x456   : > { %v18035_v52 = vadd.f32 %v6937_v57, %v6580_v62  ;;  %v8047_v57 = vrot.slane %v13861_v13, 5  ;;  %v13862_v62 = vld [vmem:[%s16048_s18 + $0x80] sm:$0x1] }
 0x457   : > { %v5600_v18 = vpop.f32.mrf.mxu3  ;;  %13891 = vmatmul.msk.bf16.gmra.mxu0 %vm882_vm5, %v7743_v35  ;;  %v7525_v35 = vshrl.u32 %v13861_v13, 16  ;;  %v7531_v21 = vshll.u32 %v13862_v62, 16 }
 0x458   : > { %v5640_v1 = vadd.f32 %v5600_v18, %v17403_v31  ;;  %v7500_v31 = vsel %vm15272_vm7, %v7495_v14, %v7499_v29  ;;  %v8049_v47 = vrot.slane %v8047_v57, 4  ;;  %v8050_v18 = vrot.slane %v13862_v62, 5 }
 0x459   : > { %v7719_v29 = vunpack.c.l.b16 %v7500_v31  ;;  %v7517_v14 = vrot.slane %v7515_v30, 5 }
 0x45a   : > { %v5927_v59 = vadd.f32 %v5887_v44, %v5640_v1  ;;  %v18042_v15 = vpop.f32.mrf.mxu1  ;;  %v7510_v44 = vsel %vm15272_vm7, %v7505_v54, %v7509_v39  ;;  %v7527_v54 = vrot.slane %v7525_v35, 4 }
 0x45b   : > { %v7720_v1 = vunpack.c.l.b16 %v7510_v44 }
 0x45c   : > { %13826 = vmatmul.msk.bf16.gmra.mxu3 %vm882_vm5, %v14633_v9  ;;  %v6581_v34 = vadd.f32 %v17998_v11, %v5927_v59  ;;  %v5892_v10 = vpop.f32.mrf.mxu0  ;;  %v7514_v9 = vrot.slane %v7512_v19, 4 }
 0x45d   : > { %v6944_v5 = vpop.f32.mrf.mxu2  ;;  %13941 = vmatmul.msk.bf16.gmra.mxu1 %vm882_vm5, %v8142_v20  ;;  %v8051_v20 = vsel %vm15248_vm3, %v8049_v47, %v8050_v18  ;;  %v7744_v13 = vpack.c.b16 %v7720_v1, %v7719_v29 }
 0x45e   : > { %v18054_v16 = vadd.f32 %v6939_v4, %v6581_v34  ;;  %v8048_v4 = vsel %vm15248_vm3, %v13925_v48, %v8047_v57  ;;  %v7518_v31 = vor.u32 %v7517_v14, %v7514_v9  ;;  %v8120_v44 = vunpack.c.l.b16 %v8051_v20  ;;  %v13910_v14 = vld [vmem:[%s16048_s18 + $0x84] sm:$0xe] }
 0x45f   : > { %v5603_v25 = vpop.f32.mrf.mxu3  ;;  %v8119_v34 = vunpack.c.l.b16 %v8048_v4  ;;  %v7533_v48 = vrot.slane %v7531_v21, 5 }
 0x460   : > { %v5641_v11 = vadd.f32 %v5603_v25, %v17425_v38  ;;  %v7519_v25 = vrot.slane %v7518_v31, 4  ;;  %v14651_v31 = vld [vmem:[%s17828_s8 + $0x60] sm:$0xff] }
 0x461   : > { %v8143_v18 = vpack.c.b16 %v8120_v44, %v8119_v34  ;;  %v13926_v34 = vrot.slane %v13910_v14, 9 }
 0x462   : > { %v5928_v39 = vadd.f32 %v5890_v24, %v5641_v11  ;;  %14022 = vmatmul.msk.bf16.gmra.mxu2 %vm882_vm5, %v14650_v0  ;;  %v18058_v59 = vpop.f32.mrf.mxu1  ;;  %v7528_v24 = vor.u32 %v7527_v54, %v7523_v50  ;;  %v14634_v0 = vld [vmem:[%s16048_s18 + $0x6c] sm:$0xff]  ;;  %v13864_v11 = vld [vmem:[%s16048_s18 + $0x88] sm:$0xf] }
 0x463   : > { %v7545_v20 = vshll.u32 %v13864_v11, 16 }
 0x464   : > { %v6582_v38 = vadd.f32 %v18012_v63, %v5928_v39  ;;  %v5895_v19 = vpop.f32.mrf.mxu0  ;;  %v7529_v29 = vrot.slane %v7528_v24, 4  ;;  %v13863_v63 = vld [vmem:[%s16048_s18 + $0x84] sm:$0xf] }
 0x465   : > { %v6947_v30 = vpop.f32.mrf.mxu2  ;;  %v7536_v1 = vshrl.u32 %v13863_v63, 16  ;;  %v7539_v9 = vshll.u32 %v13863_v63, 16  ;;  %v7547_v63 = vrot.slane %v7545_v20, 5 }
 0x466   : > { %v18065_v27 = vadd.f32 %v6942_v37, %v6582_v38  ;;  %v8054_v37 = vrot.slane %v13864_v11, 5  ;;  %v13865_v38 = vld [vmem:[%s16048_s18 + $0x8c] sm:$0x1] }
 0x467   : > { %v5605_v35 = vpop.f32.mrf.mxu3  ;;  %13892 = vmatmul.msk.bf16.gmra.mxu0 %vm882_vm5, %v7744_v13  ;;  %v7549_v13 = vshrl.u32 %v13864_v11, 16  ;;  %v7555_v14 = vshll.u32 %v13865_v38, 16 }
 0x468   : > { %v5642_v57 = vadd.f32 %v5605_v35, %v17450_v46  ;;  %v7524_v46 = vsel %vm15272_vm7, %v7519_v25, %v7523_v50  ;;  %v8056_v44 = vrot.slane %v8054_v37, 4  ;;  %v8057_v35 = vrot.slane %v13865_v38, 5 }
 0x469   : > { %v7721_v50 = vunpack.c.l.b16 %v7524_v46  ;;  %v7541_v25 = vrot.slane %v7539_v9, 5 }
 0x46a   : > { %v5929_v47 = vadd.f32 %v5892_v10, %v5642_v57  ;;  %v18072_v62 = vpop.f32.mrf.mxu1  ;;  %v7534_v10 = vsel %vm15272_vm7, %v7529_v29, %v7533_v48  ;;  %v7551_v29 = vrot.slane %v7549_v13, 4 }
 0x46b   : > { %v7722_v57 = vunpack.c.l.b16 %v7534_v10 }
 0x46c   : > { %13827 = vmatmul.msk.bf16.gmra.mxu3 %vm882_vm5, %v14634_v0  ;;  %v6583_v54 = vadd.f32 %v18028_v28, %v5929_v47  ;;  %v5897_v39 = vpop.f32.mrf.mxu0  ;;  %v7538_v0 = vrot.slane %v7536_v1, 4 }
 0x46d   : > { %v6949_v4 = vpop.f32.mrf.mxu2  ;;  %13942 = vmatmul.msk.bf16.gmra.mxu1 %vm882_vm5, %v8143_v18  ;;  %v8058_v18 = vsel %vm15248_vm3, %v8056_v44, %v8057_v35  ;;  %v7745_v11 = vpack.c.b16 %v7722_v57, %v7721_v50 }
 0x46e   : > { %v18084_v24 = vadd.f32 %v6944_v5, %v6583_v54  ;;  %v8055_v5 = vsel %vm15248_vm3, %v13926_v34, %v8054_v37  ;;  %v7542_v46 = vor.u32 %v7541_v25, %v7538_v0  ;;  %v8122_v10 = vunpack.c.l.b16 %v8058_v18  ;;  %v13911_v25 = vld [vmem:[%s16048_s18 + $0x90] sm:$0xe] }
 0x46f   : > { %v5608_v21 = vpop.f32.mrf.mxu3  ;;  %v8121_v54 = vunpack.c.l.b16 %v8055_v5  ;;  %v7557_v34 = vrot.slane %v7555_v14, 5 }
 0x470   : > { %v5643_v28 = vadd.f32 %v5608_v21, %v17472_v61  ;;  %v7543_v21 = vrot.slane %v7542_v46, 4  ;;  %v14652_v46 = vld [vmem:[%s17828_s8 + $0x6c] sm:$0xff] }
 0x471   : > { %v8144_v35 = vpack.c.b16 %v8122_v10, %v8121_v54  ;;  %v13927_v54 = vrot.slane %v13911_v25, 9 }
 0x472   : > { %v5930_v48 = vadd.f32 %v5895_v19, %v5643_v28  ;;  %14023 = vmatmul.msk.bf16.gmra.mxu2 %vm882_vm5, %v14651_v31  ;;  %v18088_v47 = vpop.f32.mrf.mxu1  ;;  %v7552_v19 = vor.u32 %v7551_v29, %v7547_v63  ;;  %v14635_v31 = vld [vmem:[%s16048_s18 + $0x78] sm:$0xff]  ;;  %v13867_v28 = vld [vmem:[%s16048_s18 + $0x94] sm:$0xf] }
 0x473   : > { %v7569_v18 = vshll.u32 %v13867_v28, 16 }
 0x474   : > { %v6584_v61 = vadd.f32 %v18042_v15, %v5930_v48  ;;  %v7813_v1 = vpop.f32.mrf.mxu0  ;;  %v7553_v50 = vrot.slane %v7552_v19, 4  ;;  %v13866_v15 = vld [vmem:[%s16048_s18 + $0x90] sm:$0xf] }
 0x475   : > { %v8497_v9 = vpop.f32.mrf.mxu2  ;;  %v7560_v57 = vshrl.u32 %v13866_v15, 16  ;;  %v7563_v0 = vshll.u32 %v13866_v15, 16  ;;  %v7571_v15 = vrot.slane %v7569_v18, 5 }
 0x476   : > { %v18095_v20 = vadd.f32 %v6947_v30, %v6584_v61  ;;  %v8061_v30 = vrot.slane %v13867_v28, 5  ;;  %v13868_v61 = vld [vmem:[%s16048_s18 + $0x98] sm:$0x1] }
 0x477   : > { %v5610_v13 = vpop.f32.mrf.mxu3  ;;  %13893 = vmatmul.msk.bf16.gmra.mxu0 %vm882_vm5, %v7745_v11  ;;  %v7573_v11 = vshrl.u32 %v13867_v28, 16  ;;  %v7579_v25 = vshll.u32 %v13868_v61, 16 }
 0x478   : > { %v5644_v37 = vadd.f32 %v5610_v13, %v17497_v42  ;;  %v7548_v42 = vsel %vm15272_vm7, %v7543_v21, %v7547_v63  ;;  %v8063_v10 = vrot.slane %v8061_v30, 4  ;;  %v8064_v13 = vrot.slane %v13868_v61, 5 }
 0x479   : > { %v7723_v63 = vunpack.c.l.b16 %v7548_v42  ;;  %v7565_v21 = vrot.slane %v7563_v0, 5 }
 0x47a   : > { %v5931_v44 = vadd.f32 %v5897_v39, %v5644_v37  ;;  %v18102_v38 = vpop.f32.mrf.mxu1  ;;  %v7558_v39 = vsel %vm15272_vm7, %v7553_v50, %v7557_v34  ;;  %v7575_v50 = vrot.slane %v7573_v11, 4 }
 0x47b   : > { %v7724_v37 = vunpack.c.l.b16 %v7558_v39 }
 0x47c   : > { %13828 = vmatmul.msk.bf16.gmra.mxu3 %vm882_vm5, %v14635_v31  ;;  %v6585_v29 = vadd.f32 %v18058_v59, %v5931_v44  ;;  %v7815_v48 = vpop.f32.mrf.mxu0  ;;  %v7562_v31 = vrot.slane %v7560_v57, 4 }
 0x47d   : > { %v8499_v5 = vpop.f32.mrf.mxu2  ;;  %13943 = vmatmul.msk.bf16.gmra.mxu1 %vm882_vm5, %v8144_v35  ;;  %v8065_v35 = vsel %vm15248_vm3, %v8063_v10, %v8064_v13  ;;  %v7746_v28 = vpack.c.b16 %v7724_v37, %v7723_v63 }
 0x47e   : > { %v18114_v19 = vadd.f32 %v6949_v4, %v6585_v29  ;;  %v8062_v4 = vsel %vm15248_vm3, %v13927_v54, %v8061_v30  ;;  %v7566_v42 = vor.u32 %v7565_v21, %v7562_v31  ;;  %v8124_v39 = vunpack.c.l.b16 %v8065_v35  ;;  %v13912_v21 = vld [vmem:[%s16048_s18 + $0x9c] sm:$0xe] }
 0x47f   : > { %v7159_v14 = vpop.f32.mrf.mxu3  ;;  %v8123_v29 = vunpack.c.l.b16 %v8062_v4  ;;  %v7581_v54 = vrot.slane %v7579_v25, 5 }
 0x480   : > { %v7239_v59 = vadd.f32 %v7159_v14, %v17519_v33  ;;  %v7567_v14 = vrot.slane %v7566_v42, 4  ;;  %v14653_v42 = vld [vmem:[%s17828_s8 + $0x78] sm:$0xff] }
 0x481   : > { %v8145_v13 = vpack.c.b16 %v8124_v39, %v8123_v29  ;;  %v13928_v29 = vrot.slane %v13912_v21, 9 }
 0x482   : > { %v7893_v34 = vadd.f32 %v7813_v1, %v7239_v59  ;;  %14024 = vmatmul.msk.bf16.gmra.mxu2 %vm882_vm5, %v14652_v46  ;;  %v18118_v44 = vpop.f32.mrf.mxu1  ;;  %v7576_v1 = vor.u32 %v7575_v50, %v7571_v15  ;;  %v14636_v46 = vld [vmem:[%s16048_s18 + $0x84] sm:$0xff]  ;;  %v13870_v59 = vld [vmem:[%s16048_s18 + $0xa0] sm:$0xf] }
 0x483   : > { %v7593_v35 = vshll.u32 %v13870_v59, 16 }
 0x484   : > { %v8291_v33 = vadd.f32 %v18072_v62, %v7893_v34  ;;  %v7818_v57 = vpop.f32.mrf.mxu0  ;;  %v7577_v63 = vrot.slane %v7576_v1, 4  ;;  %v13869_v62 = vld [vmem:[%s16048_s18 + $0x9c] sm:$0xf] }
 0x485   : > { %v8502_v0 = vpop.f32.mrf.mxu2  ;;  %v7584_v37 = vshrl.u32 %v13869_v62, 16  ;;  %v7587_v31 = vshll.u32 %v13869_v62, 16  ;;  %v7595_v62 = vrot.slane %v7593_v35, 5 }
 0x486   : > { %v18125_v18 = vadd.f32 %v8497_v9, %v8291_v33  ;;  %v8068_v9 = vrot.slane %v13870_v59, 5  ;;  %v13871_v33 = vld [vmem:[%s16048_s18 + $0xa4] sm:$0x1] }
 0x487   : > { %v7161_v11 = vpop.f32.mrf.mxu3  ;;  %13894 = vmatmul.msk.bf16.gmra.mxu0 %vm882_vm5, %v7746_v28  ;;  %v7597_v28 = vshrl.u32 %v13870_v59, 16  ;;  %v7603_v21 = vshll.u32 %v13871_v33, 16 }
 0x488   : > { %v7240_v30 = vadd.f32 %v7161_v11, %v17544_v3  ;;  %v7572_v3 = vsel %vm15272_vm7, %v7567_v14, %v7571_v15  ;;  %v8070_v39 = vrot.slane %v8068_v9, 4  ;;  %v8071_v11 = vrot.slane %v13871_v33, 5 }
 0x489   : > { %v7725_v15 = vunpack.c.l.b16 %v7572_v3  ;;  %v7589_v14 = vrot.slane %v7587_v31, 5 }
 0x48a   : > { %v7894_v10 = vadd.f32 %v7815_v48, %v7240_v30  ;;  %v18132_v61 = vpop.f32.mrf.mxu1  ;;  %v7582_v48 = vsel %vm15272_vm7, %v7577_v63, %v7581_v54  ;;  %v7599_v63 = vrot.slane %v7597_v28, 4 }
 0x48b   : > { %v7726_v30 = vunpack.c.l.b16 %v7582_v48 }
 0x48c   : > { %13829 = vmatmul.msk.bf16.gmra.mxu3 %vm882_vm5, %v14636_v46  ;;  %v8292_v50 = vadd.f32 %v18088_v47, %v7894_v10  ;;  %v7820_v34 = vpop.f32.mrf.mxu0  ;;  %v7586_v46 = vrot.slane %v7584_v37, 4 }
 0x48d   : > { %v8504_v4 = vpop.f32.mrf.mxu2  ;;  %13944 = vmatmul.msk.bf16.gmra.mxu1 %vm882_vm5, %v8145_v13  ;;  %v8072_v13 = vsel %vm15248_vm3, %v8070_v39, %v8071_v11  ;;  %v7747_v59 = vpack.c.b16 %v7726_v30, %v7725_v15 }
 0x48e   : > { %v18144_v1 = vadd.f32 %v8499_v5, %v8292_v50  ;;  %v8069_v5 = vsel %vm15248_vm3, %v13928_v29, %v8068_v9  ;;  %v7590_v3 = vor.u32 %v7589_v14, %v7586_v46  ;;  %v8126_v48 = vunpack.c.l.b16 %v8072_v13  ;;  %v13913_v14 = vld [vmem:[%s16048_s18 + $0xa8] sm:$0xe] }
 0x48f   : > { %v7164_v25 = vpop.f32.mrf.mxu3  ;;  %v8125_v50 = vunpack.c.l.b16 %v8069_v5  ;;  %v7605_v29 = vrot.slane %v7603_v21, 5 }
 0x490   : > { %v7241_v47 = vadd.f32 %v7164_v25, %v17566_v49  ;;  %v7591_v25 = vrot.slane %v7590_v3, 4  ;;  %v14654_v3 = vld [vmem:[%s17828_s8 + $0x84] sm:$0xff] }
 0x491   : > { %v8146_v11 = vpack.c.b16 %v8126_v48, %v8125_v50  ;;  %v13929_v50 = vrot.slane %v13913_v14, 9 }
 0x492   : > { %v7895_v54 = vadd.f32 %v7818_v57, %v7241_v47  ;;  %14025 = vmatmul.msk.bf16.gmra.mxu2 %vm882_vm5, %v14653_v42  ;;  %v18148_v10 = vpop.f32.mrf.mxu1  ;;  %v7600_v57 = vor.u32 %v7599_v63, %v7595_v62  ;;  %v14637_v42 = vld [vmem:[%s16048_s18 + $0x90] sm:$0xff]  ;;  %v13873_v47 = vld [vmem:[%s16048_s18 + $0xac] sm:$0xf] }
 0x493   : > { %v7617_v13 = vshll.u32 %v13873_v47, 16 }
 0x494   : > { %v8293_v49 = vadd.f32 %v18102_v38, %v7895_v54  ;;  %v7823_v37 = vpop.f32.mrf.mxu0  ;;  %v7601_v15 = vrot.slane %v7600_v57, 4  ;;  %v13872_v38 = vld [vmem:[%s16048_s18 + $0xa8] sm:$0xf] }
 0x495   : > { %v8507_v31 = vpop.f32.mrf.mxu2  ;;  %v7608_v30 = vshrl.u32 %v13872_v38, 16  ;;  %v7611_v46 = vshll.u32 %v13872_v38, 16  ;;  %v7619_v38 = vrot.slane %v7617_v13, 5 }
 0x496   : > { %v18155_v35 = vadd.f32 %v8502_v0, %v8293_v49  ;;  %v8075_v0 = vrot.slane %v13873_v47, 5  ;;  %v13874_v49 = vld [vmem:[%s16048_s18 + $0xb0] sm:$0x1] }
 0x497   : > { %v7166_v28 = vpop.f32.mrf.mxu3  ;;  %13895 = vmatmul.msk.bf16.gmra.mxu0 %vm882_vm5, %v7747_v59  ;;  %v7621_v59 = vshrl.u32 %v13873_v47, 16  ;;  %v7627_v14 = vshll.u32 %v13874_v49, 16 }
 0x498   : > { %20061 = vst [vmem:[#allocation19_spill] sm:$0xff] %v18155_v35  ;;  %v7242_v9 = vadd.f32 %v7166_v28, %v17591_v2  ;;  %v7596_v2 = vsel %vm15272_vm7, %v7591_v25, %v7595_v62  ;;  %v8077_v48 = vrot.slane %v8075_v0, 4  ;;  %v8078_v28 = vrot.slane %v13874_v49, 5 }
 0x499   : > { %v7727_v62 = vunpack.c.l.b16 %v7596_v2  ;;  %v7613_v25 = vrot.slane %v7611_v46, 5 }
 0x49a   : > { %v7896_v39 = vadd.f32 %v7820_v34, %v7242_v9  ;;  %v18162_v33 = vpop.f32.mrf.mxu1  ;;  %v7606_v34 = vsel %vm15272_vm7, %v7601_v15, %v7605_v29  ;;  %v7623_v15 = vrot.slane %v7621_v59, 4 }
 0x49b   : > { %v7728_v9 = vunpack.c.l.b16 %v7606_v34 }
 0x49c   : > { %13830 = vmatmul.msk.bf16.gmra.mxu3 %vm882_vm5, %v14637_v42  ;;  %v8294_v63 = vadd.f32 %v18118_v44, %v7896_v39  ;;  %v7825_v54 = vpop.f32.mrf.mxu0  ;;  %v7610_v42 = vrot.slane %v7608_v30, 4 }
 0x49d   : > { %v8509_v5 = vpop.f32.mrf.mxu2  ;;  %13945 = vmatmul.msk.bf16.gmra.mxu1 %vm882_vm5, %v8146_v11  ;;  %v8079_v11 = vsel %vm15248_vm3, %v8077_v48, %v8078_v28  ;;  %v7748_v47 = vpack.c.b16 %v7728_v9, %v7727_v62  ;;  %v7629_v48 = vrot.slane %v7627_v14, 5  ;;  %v13876_v9 = vld [vmem:[%s16048_s18 + $0xb8] sm:$0xf]  ;;  %v13877_v14 = vld [vmem:[%s16048_s18 + $0xbc] sm:$0x1] }
 0x49e   : > { %v18174_v57 = vadd.f32 %v8504_v4, %v8294_v63  ;;  %v8076_v4 = vsel %vm15248_vm3, %v13929_v50, %v8075_v0  ;;  %v7614_v2 = vor.u32 %v7613_v25, %v7610_v42  ;;  %v8128_v34 = vunpack.c.l.b16 %v8079_v11 }
 0x49f   : > { %v7169_v21 = vpop.f32.mrf.mxu3  ;;  %v8127_v63 = vunpack.c.l.b16 %v8076_v4 }
 0x4a0   : > { %20062 = vst [vmem:[#allocation9_spill] sm:$0xff] %v18174_v57  ;;  %v7243_v44 = vadd.f32 %v7169_v21, %v17613_v23  ;;  %v14638_v21 = vld [vmem:[%s16048_s18 + $0x9c] sm:$0xff]  ;;  %v7615_v62 = vrot.slane %v7614_v2, 4  ;;  %v7641_v2 = vshll.u32 %v13876_v9, 16 }
 0x4a2   : > { %v7897_v29 = vadd.f32 %v7823_v37, %v7243_v44  ;;  %14026 = vmatmul.msk.bf16.gmra.mxu2 %vm882_vm5, %v14654_v3  ;;  %v18178_v39 = vpop.f32.mrf.mxu1  ;;  %v7624_v37 = vor.u32 %v7623_v15, %v7619_v38  ;;  %v20064_v3 = vld [vmem:[#allocation15_spill] sm:$0xff]  ;;  %v8147_v44 = vpack.c.b16 %v8128_v34, %v8127_v63  ;;  %v7620_v42 = vsel %vm15272_vm7, %v7615_v62, %v7619_v38 }
 0x4a3   : > { %v7729_v34 = vunpack.c.l.b16 %v7620_v42 }
 0x4a4   : > { %v8295_v23 = vadd.f32 %v18132_v61, %v7897_v29  ;;  %v7828_v30 = vpop.f32.mrf.mxu0  ;;  %v7625_v50 = vrot.slane %v7624_v37, 4  ;;  %v13875_v61 = vld [vmem:[%s16048_s18 + $0xb4] sm:$0xf] }
 0x4a5   : > { %v8512_v46 = vpop.f32.mrf.mxu2  ;;  %v7632_v25 = vshrl.u32 %v13875_v61, 16  ;;  %v7635_v15 = vshll.u32 %v13875_v61, 16  ;;  %v13914_v29 = vld [vmem:[%s16048_s18 + $0xb4] sm:$0xe] }
 0x4a6   : > { %v18185_v13 = vadd.f32 %v8507_v31, %v8295_v23  ;;  %v8082_v31 = vrot.slane %v13876_v9, 5  ;;  %v7645_v23 = vshrl.u32 %v13876_v9, 16  ;;  %v14655_v37 = vld [vmem:[%s17828_s8 + $0x90] sm:$0xff] }
 0x4a7   : > { %v7171_v59 = vpop.f32.mrf.mxu3  ;;  %13896 = vmatmul.msk.bf16.gmra.mxu0 %vm882_vm5, %v7748_v47  ;;  %v7634_v61 = vrot.slane %v7632_v25, 4 }
 0x4a8   : > { %20063 = vst [vmem:[#allocation10_spill] sm:$0xff] %v18185_v13  ;;  %v7244_v0 = vadd.f32 %v7171_v59, %v20064_v3  ;;  %v13930_v59 = vrot.slane %v13914_v29, 9  ;;  %v8084_v3 = vrot.slane %v8082_v31, 4  ;;  %v9263_v13 = vld [vmem:[%s17828_s8] sm:$0xe] }
 0x4aa   : > { %v7898_v28 = vadd.f32 %v7825_v54, %v7244_v0  ;;  %v18192_v49 = vpop.f32.mrf.mxu1  ;;  %v7630_v54 = vsel %vm15272_vm7, %v7625_v50, %v7629_v48  ;;  %v8085_v0 = vrot.slane %v13877_v14, 5  ;;  %v7643_v50 = vrot.slane %v7641_v2, 5 }
 0x4ab   : > { %v7730_v62 = vunpack.c.l.b16 %v7630_v54  ;;  %v7647_v48 = vrot.slane %v7645_v23, 4  ;;  %v13878_v23 = vld [vmem:[%s16048_s18 + $0xc0] sm:$0xf] }
 0x4ac   : > { %13831 = vmatmul.msk.bf16.gmra.mxu3 %vm882_vm5, %v14638_v21  ;;  %v8296_v4 = vadd.f32 %v18148_v10, %v7898_v28  ;;  %v7830_v11 = vpop.f32.mrf.mxu0  ;;  %v20066_v10 = vld [vmem:[#allocation16_spill] sm:$0xff]  ;;  %v7637_v28 = vrot.slane %v7635_v15, 5  ;;  %v8086_v42 = vsel %vm15248_vm3, %v8084_v3, %v8085_v0  ;;  %v7659_v3 = vshll.u32 %v13878_v23, 16 }
 0x4ad   : > { %v18199_v47 = vpop.f32.mrf.mxu2  ;;  %13946 = vmatmul.msk.bf16.gmra.mxu1 %vm882_vm5, %v8147_v44  ;;  %v7749_v29 = vpack.c.b16 %v7730_v62, %v7729_v34  ;;  %v7648_v2 = vor.u32 %v7647_v48, %v7643_v50 }
 0x4ae   : > { %v18206_v63 = vadd.f32 %v8509_v5, %v8296_v4  ;;  %v8083_v5 = vsel %vm15248_vm3, %v13930_v59, %v8082_v31  ;;  %v7638_v4 = vor.u32 %v7637_v28, %v7634_v61 }
 0x4af   : > { %v7174_v38 = vpop.f32.mrf.mxu3  ;;  %v7649_v0 = vrot.slane %v7648_v2, 4 }
 0x4b0   : > { %20065 = vst [vmem:[#allocation11_spill] sm:$0xff] %v18206_v63  ;;  %v7245_v21 = vadd.f32 %v7174_v38, %v20066_v10  ;;  %v8130_v38 = vunpack.c.l.b16 %v8086_v42  ;;  %v13879_v10 = vld [vmem:[%s16048_s18 + $0xc4] sm:$0xf]  ;;  %v14639_v63 = vld [vmem:[%s16048_s18 + $0xa8] sm:$0xff]  ;;  %v7639_v34 = vrot.slane %v7638_v4, 4 }
 0x4b1   : > { %v7669_v61 = vshrl.u32 %v13879_v10, 16  ;;  %v13915_v42 = vld [vmem:[%s16048_s18 + $0xc0] sm:$0xe] }
 0x4b2   : > { %v7899_v9 = vadd.f32 %v7828_v30, %v7245_v21  ;;  %14027 = vmatmul.msk.bf16.gmra.mxu2 %vm882_vm5, %v14655_v37  ;;  %v18210_v44 = vpop.f32.mrf.mxu1  ;;  %v7651_v30 = vshll.u32 %v13877_v14, 16  ;;  %v8129_v37 = vunpack.c.l.b16 %v8083_v5  ;;  %v7665_v14 = vshll.u32 %v13879_v10, 16 }
 0x4b3   : > { %v7661_v5 = vrot.slane %v7659_v3, 5  ;;  %v7644_v2 = vsel %vm15272_vm7, %v7639_v34, %v7643_v50 }
 0x4b4   : > { %v8297_v25 = vadd.f32 %v18162_v33, %v7899_v9  ;;  %v7833_v15 = vpop.f32.mrf.mxu0  ;;  %v7656_v33 = vshrl.u32 %v13878_v23, 16  ;;  %v7653_v62 = vrot.slane %v7651_v30, 5  ;;  %v8148_v48 = vpack.c.b16 %v8130_v38, %v8129_v37  ;;  %v13880_v30 = vld [vmem:[%s16048_s18 + $0xc8] sm:$0x1]  ;;  %v14656_v38 = vld [vmem:[%s17828_s8 + $0x9c] sm:$0xff] }
 0x4b5   : > { %v18217_v54 = vpop.f32.mrf.mxu2  ;;  %v8089_v9 = vrot.slane %v13879_v10, 5  ;;  %v7667_v23 = vrot.slane %v7665_v14, 5  ;;  %v7671_v37 = vrot.slane %v7669_v61, 4 }
 0x4b6   : > { %v18221_v21 = vadd.f32 %v8512_v46, %v8297_v25 }
 0x4b7   : > { %v7176_v31 = vpop.f32.mrf.mxu3  ;;  %13897 = vmatmul.msk.bf16.gmra.mxu0 %vm882_vm5, %v7749_v29  ;;  %v8091_v10 = vrot.slane %v8089_v9, 4 }
 0x4b8   : > { %20067 = vst [vmem:[#allocation12_spill] sm:$0xff] %v18221_v21  ;;  %v7246_v59 = vadd.f32 %v7176_v31, %v17685_v8  ;;  %v7658_v8 = vrot.slane %v7656_v33, 4  ;;  %v8092_v31 = vrot.slane %v13880_v30, 5  ;;  %v20069_v33 = vld [vmem:[#allocation17_spill] sm:$0xff]  ;;  %v7672_v21 = vor.u32 %v7671_v37, %v7667_v23  ;;  %v13881_v37 = vld [vmem:[%s16048_s18 + $0xcc] sm:$0xf] }
 0x4ba   : > { %v7900_v28 = vadd.f32 %v7830_v11, %v7246_v59  ;;  %v18226_v46 = vpop.f32.mrf.mxu1  ;;  %v7654_v11 = vsel %vm15272_vm7, %v7649_v0, %v7653_v62  ;;  %v7662_v34 = vor.u32 %v7661_v5, %v7658_v8  ;;  %v7675_v0 = vshll.u32 %v13880_v30, 16 }
 0x4bb   : > { %v7732_v50 = vunpack.c.l.b16 %v7654_v11 }
 0x4bc   : > { %13832 = vmatmul.msk.bf16.gmra.mxu3 %vm882_vm5, %v14639_v63  ;;  %v8298_v29 = vadd.f32 %v18178_v39, %v7900_v28  ;;  %v7835_v4 = vpop.f32.mrf.mxu0  ;;  %v13931_v63 = vrot.slane %v13915_v42, 9  ;;  %v7731_v28 = vunpack.c.l.b16 %v7644_v2  ;;  %v7663_v42 = vrot.slane %v7662_v34, 4 }
 0x4bd   : > { %v18231_v25 = vpop.f32.mrf.mxu2  ;;  %13947 = vmatmul.msk.bf16.gmra.mxu1 %vm882_vm5, %v8148_v48  ;;  %v7677_v2 = vrot.slane %v7675_v0, 5  ;;  %v13916_v0 = vld [vmem:[%s16048_s18 + $0xcc] sm:$0xe] }
 0x4be   : > { %v18241_v39 = vadd.f32 %v18199_v47, %v8298_v29  ;;  %v8090_v14 = vsel %vm15248_vm3, %v13931_v63, %v8089_v9  ;;  %v8093_v47 = vsel %vm15248_vm3, %v8091_v10, %v8092_v31  ;;  %v7750_v48 = vpack.c.b16 %v7732_v50, %v7731_v28  ;;  %v13882_v63 = vld [vmem:[%s16048_s18 + $0xd0] sm:$0xf]  ;;  %v14640_v31 = vld [vmem:[%s16048_s18 + $0xb4] sm:$0xff] }
 0x4bf   : > { %v7179_v59 = vpop.f32.mrf.mxu3  ;;  %v8131_v11 = vunpack.c.l.b16 %v8090_v14  ;;  %v8132_v30 = vunpack.c.l.b16 %v8093_v47  ;;  %v7689_v28 = vshll.u32 %v13882_v63, 16  ;;  %v7693_v50 = vshrl.u32 %v13882_v63, 16 }
 0x4c0   : > { %20068 = vst [vmem:[#allocation13_spill] sm:$0xff] %v18241_v39  ;;  %v7247_v3 = vadd.f32 %v7179_v59, %v20069_v33  ;;  %v7680_v33 = vshrl.u32 %v13881_v37, 16 }
 0x4c1   : > { %v8149_v59 = vpack.c.b16 %v8132_v30, %v8131_v11  ;;  %v7695_v11 = vrot.slane %v7693_v50, 4 }
 0x4c2   : > { %v7901_v62 = vadd.f32 %v7833_v15, %v7247_v3  ;;  %14028 = vmatmul.msk.bf16.gmra.mxu2 %vm882_vm5, %v14656_v38  ;;  %v18249_v61 = vpop.f32.mrf.mxu1  ;;  %v7673_v15 = vrot.slane %v7672_v21, 4 }
 0x4c4   : > { %v8299_v8 = vadd.f32 %v18192_v49, %v7901_v62  ;;  %v7838_v5 = vpop.f32.mrf.mxu0  ;;  %v7668_v49 = vsel %vm15272_vm7, %v7663_v42, %v7667_v23  ;;  %v7678_v21 = vsel %vm15272_vm7, %v7673_v15, %v7677_v2  ;;  %v7682_v42 = vrot.slane %v7680_v33, 4 }
 0x4c5   : > { %v18252_v29 = vpop.f32.mrf.mxu2  ;;  %v7733_v47 = vunpack.c.l.b16 %v7668_v49  ;;  %v7691_v2 = vrot.slane %v7689_v28, 5 }
 0x4c6   : > { %v18256_v9 = vadd.f32 %v18217_v54, %v8299_v8  ;;  %v7683_v54 = vshll.u32 %v13881_v37, 16  ;;  %v14657_v8 = vld [vmem:[%s17828_s8 + $0xa8] sm:$0xff] }
 0x4c7   : > { %v7181_v38 = vpop.f32.mrf.mxu3  ;;  %13898 = vmatmul.msk.bf16.gmra.mxu0 %vm882_vm5, %v7750_v48  ;;  %v7734_v48 = vunpack.c.l.b16 %v7678_v21  ;;  %v7696_v33 = vor.u32 %v7695_v11, %v7691_v2 }
 0x4c8   : > { %20070 = vst [vmem:[#allocation14_spill] sm:$0xff] %v18256_v9  ;;  %v7248_v10 = vadd.f32 %v7181_v38, %v17732_v56  ;;  %v8096_v56 = vrot.slane %v13882_v63, 5  ;;  %v7685_v15 = vrot.slane %v7683_v54, 5  ;;  %v14195_v9 = vld [vmem:[%s17828_s8 + $0x10] sm:$0xf] }
 0x4c9   : > { %v7751_v21 = vpack.c.b16 %v7734_v48, %v7733_v47  ;;  %v7697_v11 = vrot.slane %v7696_v33, 4  ;;  %v14196_v33 = vld [vmem:[%s17828_s8 + $0x14] sm:$0x1] }
 0x4ca   : > { %v7902_v3 = vadd.f32 %v7835_v4, %v7248_v10  ;;  %v18266_v34 = vpop.f32.mrf.mxu1  ;;  %v13883_v4 = vld [vmem:[%s16048_s18 + $0xd4] sm:$0x1]  ;;  %v8098_v38 = vrot.slane %v8096_v56, 4  ;;  %v20072_v10 = vld [vmem:[#allocation18_spill] sm:$0xff] }
 0x4cb   : > { %v8099_v63 = vrot.slane %v13883_v4, 5  ;;  %v7699_v28 = vshll.u32 %v13883_v4, 16 }
 0x4cc   : > { %13833 = vmatmul.msk.bf16.gmra.mxu3 %vm882_vm5, %v14640_v31  ;;  %v8300_v62 = vadd.f32 %v18210_v44, %v7902_v3  ;;  %v7840_v23 = vpop.f32.mrf.mxu0  ;;  %v13932_v44 = vrot.slane %v13916_v0, 9  ;;  %v14194_v3 = vld [vmem:[%s17828_s8 + $0xc] sm:$0xf] }
 0x4cd   : > { %v18271_v14 = vpop.f32.mrf.mxu2  ;;  %13948 = vmatmul.msk.bf16.gmra.mxu1 %vm882_vm5, %v8149_v59  ;;  %v7686_v59 = vor.u32 %v7685_v15, %v7682_v42  ;;  %v8100_v50 = vsel %vm15248_vm3, %v8098_v38, %v8099_v63  ;;  %v9997_v0 = vshrl.u32 %v14194_v3, 16 }
 0x4ce   : > { %v18277_v30 = vadd.f32 %v18231_v25, %v8300_v62  ;;  %v8097_v25 = vsel %vm15248_vm3, %v13932_v44, %v8096_v56  ;;  %v10000_v62 = vshll.u32 %v14194_v3, 16  ;;  %v8134_v15 = vunpack.c.l.b16 %v8100_v50  ;;  %v18302_v3 = vld [vmem:[%s17828_s8 + $0x4] sm:$0xf] }
 0x4cf   : > { %v7184_v37 = vpop.f32.mrf.mxu3  ;;  %v8133_v4 = vunpack.c.l.b16 %v8097_v25  ;;  %v7701_v44 = vrot.slane %v7699_v28, 5  ;;  %v9999_v38 = vrot.slane %v9997_v0, 4 }
 0x4d0   : > { %20071 = vst [vmem:[#allocation15_spill] sm:$0xff] %v18277_v30  ;;  %v7249_v31 = vadd.f32 %v7184_v37, %v20072_v10  ;;  %v10010_v37 = vshrl.u32 %v14195_v9, 16  ;;  %v14641_v10 = vld [vmem:[%s16048_s18 + $0xc0] sm:$0xff] }
 0x4d1   : > { %v8150_v50 = vpack.c.b16 %v8134_v15, %v8133_v4  ;;  %v14658_v15 = vld [vmem:[%s17828_s8 + $0xb4] sm:$0xff] }
 0x4d2   : > { %v7903_v49 = vadd.f32 %v7838_v5, %v7249_v31  ;;  %14029 = vmatmul.msk.bf16.gmra.mxu2 %vm882_vm5, %v14657_v8  ;;  %v18283_v54 = vpop.f32.mrf.mxu1  ;;  %v10006_v5 = vshll.u32 %v14195_v9, 16  ;;  %v7687_v8 = vrot.slane %v7686_v59, 4  ;;  %v8609_v59 = vld [vmem:[%s17828_s8] sm:$0xf] }
 0x4d3   : > { %v8661_v0 = vshll.u32 %v8609_v59, 16 }
 0x4d4   : > { %v8301_v47 = vadd.f32 %v18226_v46, %v7903_v49  ;;  %v7843_v48 = vpop.f32.mrf.mxu0  ;;  %v10002_v46 = vrot.slane %v10000_v62, 5  ;;  %v18298_v31 = vrot.slane %v10006_v5, 5  ;;  %v10012_v49 = vrot.slane %v10010_v37, 4  ;;  %v14291_v37 = vld [vmem:[%s20013_s3 + $0x5c] sm:$0xf] }
 0x4d5   : > { %v18290_v42 = vpop.f32.mrf.mxu2 }
 0x4d6   : > { %v18293_v63 = vadd.f32 %v18252_v29, %v8301_v47  ;;  %v7692_v29 = vsel %vm15272_vm7, %v7687_v8, %v7691_v2  ;;  %v10003_v62 = vor.u32 %v10002_v46, %v9999_v38  ;;  %v10013_v5 = vor.u32 %v10012_v49, %v18298_v31 }
 0x4d7   : > { %v7186_v56 = vpop.f32.mrf.mxu3  ;;  %13899 = vmatmul.msk.bf16.gmra.mxu0 %vm882_vm5, %v7751_v21  ;;  %v7702_v21 = vsel %vm15272_vm7, %v7697_v11, %v7701_v44  ;;  %v10016_v2 = vshll.u32 %v14196_v33, 16  ;;  %v8671_v8 = vshrl.u32 %v18302_v3, 16  ;;  %v10877_v11 = vsel %vm931_vm0, %v14291_v37, 0  ;;  %v14197_v37 = vld [vmem:[%s17828_s8 + $0x18] sm:$0xf] }
 0x4d8   : > { %20073 = vst [vmem:[#allocation16_spill] sm:$0xff] %v18293_v63  ;;  %v7250_v9 = vadd.f32 %v7186_v56, %v17786_v60  ;;  %v8658_v60 = vshrl.u32 %v8609_v59, 16  ;;  %v7735_v56 = vunpack.c.l.b16 %v7692_v29  ;;  %v7736_v38 = vunpack.c.l.b16 %v7702_v21  ;;  %10886 = vmatpush.bf16.msra.mxu3 %v10877_v11  ;;  %v8611_v63 = vld [vmem:[%s17828_s8 + $0x8] sm:$0x1] }
 0x4d9   : > { %v10004_v59 = vrot.slane %v10003_v62, 4  ;;  %v10014_v33 = vrot.slane %v10013_v5, 4  ;;  %v10018_v29 = vrot.slane %v10016_v2, 5  ;;  %v8673_v39 = vrot.slane %v8671_v8, 4  ;;  %v14198_v2 = vld [vmem:[%s17828_s8 + $0x1c] sm:$0xf] }
 0x4da   : > { %v7904_v25 = vadd.f32 %v7840_v23, %v7250_v9  ;;  %v18305_v28 = vpop.f32.mrf.mxu1  ;;  %v8667_v23 = vshll.u32 %v18302_v3, 16  ;;  %v8660_v9 = vrot.slane %v8658_v60, 4  ;;  %v7752_v62 = vpack.c.b16 %v7736_v38, %v7735_v56 }
 0x4db   : > { %v10019_v56 = vsel %vm15272_vm7, %v10014_v33, %v10018_v29 }
 0x4dc   : > { %13834 = vmatmul.msk.bf16.gmra.mxu3 %vm882_vm5, %v14641_v10  ;;  %v18317_v47 = vpop.f32.mrf.mxu0  ;;  %v8663_v10 = vrot.slane %v8661_v0, 5  ;;  %v8302_v46 = vadd.f32 %v18249_v61, %v7904_v25  ;;  %v18328_v30 = vrot.slane %v8667_v23, 5  ;;  %v14340_v61 = vld [vmem:[%s20013_s3 + $0x60] sm:$0xf]  ;;  %v8677_v23 = vshll.u32 %v8611_v63, 16 }
 0x4dd   : > { %v18319_v4 = vpop.f32.mrf.mxu2  ;;  %13949 = vmatmul.msk.bf16.gmra.mxu1 %vm882_vm5, %v8150_v50  ;;  %v9329_v50 = vrot.slane %v18302_v3, 5  ;;  %v14469_v3 = vld [vmem:[%s20013_s3 + $0x64] sm:$0xf] }
 0x4de   : > { %v18333_v21 = vadd.f32 %v18271_v14, %v8302_v46  ;;  %v11818_v0 = vsel %vm931_vm0, %v14469_v3, 0  ;;  %v8664_v5 = vor.u32 %v8663_v10, %v8660_v9  ;;  %v8674_v38 = vor.u32 %v8673_v39, %v18328_v30  ;;  %v8612_v3 = vld [vmem:[%s17828_s8 + $0xc] sm:$0xf] }
 0x4df   : > { %v7189_v44 = vpop.f32.mrf.mxu3  ;;  %v14048_v9 = vrot.slane %v9263_v13, 9  ;;  %11827 = vmatpush.bf16.msra.mxu1 %v11818_v0  ;;  %v9331_v10 = vrot.slane %v9329_v50, 4  ;;  %v9332_v46 = vrot.slane %v8611_v63, 5  ;;  %v10383_v39 = vunpack.c.l.b16 %v10019_v56 }
 0x4e0   : > { %v7251_v49 = vadd.f32 %v7189_v44, %v17819_v17  ;;  %20074 = vst [vmem:[#allocation17_spill] sm:$0xff] %v18333_v21  ;;  %v14518_v17 = vld [vmem:[%s20013_s3 + $0x68] sm:$0xf]  ;;  %v10009_v44 = vsel %vm15272_vm7, %v10004_v59, %v18298_v31  ;;  %v14642_v31 = vld [vmem:[%s16048_s18 + $0xcc] sm:$0xff]  ;;  %v8665_v13 = vrot.slane %v8664_v5, 4  ;;  %v8675_v33 = vrot.slane %v8674_v38, 4 }
 0x4e1   : > { %v12216_v14 = vsel %vm931_vm0, %v14518_v17, 0  ;;  %v10030_v17 = vshll.u32 %v14198_v2, 16  ;;  %v10382_v59 = vunpack.c.l.b16 %v10009_v44  ;;  %v8679_v29 = vrot.slane %v8677_v23, 5  ;;  %s19658_s18 = sand.u32 1, %s15071_s22  }
 0x4e2   : > { %v7905_v60 = vadd.f32 %v7843_v48, %v7251_v49  ;;  %14030 = vmatmul.msk.bf16.gmra.mxu2 %vm882_vm5, %v14658_v15  ;;  %v18345_v25 = vpop.f32.mrf.mxu1  ;;  %v11164_v48 = vsel %vm931_vm0, %v14340_v61, 0  ;;  %v10034_v61 = vshrl.u32 %v14198_v2, 16  ;;  %v9330_v63 = vsel %vm15248_vm3, %v14048_v9, %v9329_v50  ;;  %s12775_s15 = sshll.u32 %s19658_s18, 7 }
 0x4e3   : > { %12225 = vmatpush.bf16.msra.mxu2 %v12216_v14  ;;  %11173 = vmatpush.bf16.msra.mxu0 %v11164_v48  ;;  %v18368_v48 = vld [vmem:[%s17828_s8 + $0x10] sm:$0xf]  ;;  %v8682_v2 = vshrl.u32 %v8612_v3, 16  ;;  %v18377_v56 = vrot.slane %v10030_v17, 5  ;;  %s19679_s13 = scalar_lea.vmem [#allocation2], %s12775_s15  ;;  %s12512_s15 = scalar_lea.sflag [#allocation3], %s19658_s18 }
 0x4e4   : > { %v8303_v8 = vadd.f32 %v18266_v34, %v7905_v60  ;;  %v7848_v15 = vpop.f32.mrf.mxu0  ;;  %v10021_v34 = vshrl.u32 %v14197_v37, 16  ;;  %v10024_v60 = vshll.u32 %v14197_v37, 16  ;;  %v9333_v37 = vsel %vm15248_vm3, %v9331_v10, %v9332_v46 }
 0x4e5   : > { %v18353_v11 = vpop.f32.mrf.mxu2  ;;  %v10036_v23 = vrot.slane %v10034_v61, 4  ;;  %v8691_v50 = vshll.u32 %v18368_v48, 16  ;;  %v10414_v10 = vpack.c.b16 %v10383_v39, %v10382_v59  ;;  %v8670_v46 = vsel %vm15272_vm7, %v8665_v13, %v18328_v30  ;;  %v8614_v59 = vld [vmem:[%s17828_s8 + $0x14] sm:$0x1] }
 0x4e6   : > { %v10023_v44 = vrot.slane %v10021_v34, 4  ;;  %v10026_v5 = vrot.slane %v10024_v60, 5  ;;  %v9441_v34 = vunpack.c.l.b16 %v9330_v63  ;;  %v8680_v60 = vsel %vm15272_vm7, %v8675_v33, %v8679_v29 }
 0x4e7   : > { %v7191_v49 = vpop.f32.mrf.mxu3  ;;  %13900 = vmatmul.msk.bf16.gmra.mxu0 %vm882_vm5, %v7752_v62  ;;  %v14199_v62 = vld [vmem:[%s17828_s8 + $0x20] sm:$0x1]  ;;  %v9442_v17 = vunpack.c.l.b16 %v9333_v37  ;;  %v10037_v57 = vor.u32 %v10036_v23, %v18377_v56  ;;  %v18393_v35 = vadd.f32 %v18290_v42, %v8303_v8  ;;  %v18396_v13 = vrot.slane %v8691_v50, 5  ;;  %v9264_v50 = vld [vmem:[%s17828_s8 + $0xc] sm:$0xe] }
 0x4e8   : > { %v7252_v14 = vadd.f32 %v7191_v49, %v17843_v36  ;;  %v14659_v36 = vld [vmem:[%s17828_s8 + $0xc] sm:$0xff]  ;;  %v8685_v49 = vshll.u32 %v8612_v3, 16  ;;  %v10040_v61 = vshll.u32 %v14199_v62, 16  ;;  %v8684_v3 = vrot.slane %v8682_v2, 4  ;;  %v14200_v62 = vld [vmem:[%s17828_s8 + $0x24] sm:$0xf] }
 0x4e9   : > { %v9043_v63 = vunpack.c.l.b16 %v8670_v46  ;;  %v8701_v2 = vshll.u32 %v8614_v59, 16  ;;  %v10038_v8 = vrot.slane %v10037_v57, 4  ;;  %v14049_v57 = vrot.slane %v9264_v50, 9  ;;  %v14202_v50 = vld [vmem:[%s17828_s8 + $0x2c] sm:$0x1] }
 0x4ea   : > { %v7906_v0 = vadd.f32 %v18317_v47, %v7252_v14  ;;  %v18374_v21 = vpop.f32.mrf.mxu1  ;;  %v8695_v47 = vshrl.u32 %v18368_v48, 16  ;;  %v8687_v39 = vrot.slane %v8685_v49, 5 }
 0x4ec   : > { %13835 = vmatmul.msk.bf16.gmra.mxu3 %vm882_vm5, %v14642_v31  ;;  %v7850_v38 = vpop.f32.mrf.mxu0  ;;  %v10027_v31 = vor.u32 %v10026_v5, %v10023_v44  ;;  %v8697_v33 = vrot.slane %v8695_v47, 4  ;;  %v8304_v29 = vadd.f32 %v18283_v54, %v7906_v0  ;;  %v14201_v44 = vld [vmem:[%s17828_s8 + $0x28] sm:$0xf]  ;;  %v10042_v5 = vrot.slane %v10040_v61, 5 }
 0x4ed   : > { %v18382_v9 = vpop.f32.mrf.mxu2  ;;  %14178 = vmatmul.msk.bf16.vlgmr.msrb.gmra.mxu1 %vm882_vm5, %v14659_v36  ;;  %v9044_v36 = vunpack.c.l.b16 %v8680_v60  ;;  %v8688_v23 = vor.u32 %v8687_v39, %v8684_v3  ;;  %v9473_v47 = vpack.c.b16 %v9442_v17, %v9441_v34  ;;  %v10045_v60 = vshrl.u32 %v14200_v62, 16 }
 0x4ee   : > { %v18403_v49 = vadd.f32 %v18319_v4, %v8304_v29  ;;  %v8698_v54 = vor.u32 %v8697_v33, %v18396_v13  ;;  %v10048_v4 = vshll.u32 %v14200_v62, 16  ;;  %v8615_v62 = vld [vmem:[%s17828_s8 + $0x18] sm:$0xf] }
 0x4ef   : > { %v7194_v14 = vpop.f32.mrf.mxu3  ;;  %v9075_v29 = vpack.c.b16 %v9044_v36, %v9043_v63  ;;  %v9339_v63 = vrot.slane %v8614_v59, 5 }
 0x4f0   : > { %v7253_v30 = vadd.f32 %v7194_v14, %v17855_v40  ;;  %v10028_v40 = vrot.slane %v10027_v31, 4  ;;  %v10054_v14 = vshll.u32 %v14201_v44, 16  ;;  %v8703_v31 = vrot.slane %v8701_v2, 5 }
 0x4f1   : > { %v8699_v39 = vrot.slane %v8698_v54, 4  ;;  %v10050_v36 = vrot.slane %v10048_v4, 5  ;;  %v8706_v54 = vshrl.u32 %v8615_v62, 16 }
 0x4f2   : > { %v7907_v37 = vadd.f32 %v7848_v15, %v7253_v30  ;;  %14243 = vmatmul.msk.bf16.vlgmr.msrb.gmra.mxu2 %vm882_vm5, %v10414_v10  ;;  %v18405_v42 = vpop.f32.mrf.mxu1  ;;  %v9336_v15 = vrot.slane %v18368_v48, 5  ;;  %v10058_v30 = vshrl.u32 %v14201_v44, 16  ;;  %v10033_v34 = vsel %vm15272_vm7, %v10028_v40, %v18377_v56 }
 0x4f3   : > { %v10043_v48 = vsel %vm15272_vm7, %v10038_v8, %v10042_v5  ;;  %v18423_v56 = vrot.slane %v10054_v14, 5  ;;  %v10384_v40 = vunpack.c.l.b16 %v10033_v34  ;;  %v14660_v5 = vld [vmem:[%s17828_s8 + $0x18] sm:$0xff]  ;;  %v8709_v14 = vshll.u32 %v8615_v62, 16 }
 0x4f4   : > { %v8305_v0 = vadd.f32 %v18305_v28, %v7907_v37  ;;  %v7853_v10 = vpop.f32.mrf.mxu0  ;;  %v8689_v28 = vrot.slane %v8688_v23, 4  ;;  %v9338_v33 = vrot.slane %v9336_v15, 4  ;;  %v10047_v37 = vrot.slane %v10045_v60, 4 }
 0x4f5   : > { %v18411_v46 = vpop.f32.mrf.mxu2  ;;  %v10060_v2 = vrot.slane %v10058_v30, 4  ;;  %v10385_v8 = vunpack.c.l.b16 %v10043_v48  ;;  %v8711_v62 = vrot.slane %v8709_v14, 5 }
 0x4f6   : > { %v18419_v17 = vadd.f32 %v18353_v11, %v8305_v0  ;;  %v18428_v11 = vld [vmem:[%s17828_s8 + $0x1c] sm:$0xf]  ;;  %v8694_v59 = vsel %vm15272_vm7, %v8689_v28, %v18396_v13  ;;  %v10051_v4 = vor.u32 %v10050_v36, %v10047_v37  ;;  %v10064_v13 = vshll.u32 %v14202_v50, 16  ;;  %v9265_v50 = vld [vmem:[%s17828_s8 + $0x18] sm:$0xe] }
 0x4f7   : > { %v7196_v61 = vpop.f32.mrf.mxu3  ;;  %14065 = vmatmul.msk.bf16.vlgmr.msrb.gmra.mxu0 %vm882_vm5, %v9473_v47  ;;  %v9340_v47 = vsel %vm15248_vm3, %v9338_v33, %v9339_v63  ;;  %v8715_v30 = vshll.u32 %v18428_v11, 16  ;;  %v9045_v34 = vunpack.c.l.b16 %v8694_v59  ;;  %v8708_v33 = vrot.slane %v8706_v54, 4 }
 0x4f8   : > { %v7254_v3 = vadd.f32 %v7196_v61, %v17874_v22  ;;  %v9337_v22 = vsel %vm15248_vm3, %v14049_v57, %v9336_v15  ;;  %v10061_v15 = vor.u32 %v10060_v2, %v18423_v56  ;;  %v9444_v28 = vunpack.c.l.b16 %v9340_v47  ;;  %v8617_v2 = vld [vmem:[%s17828_s8 + $0x20] sm:$0x1] }
 0x4f9   : > { %v9443_v48 = vunpack.c.l.b16 %v9337_v22  ;;  %v10052_v37 = vrot.slane %v10051_v4, 4  ;;  %v14204_v22 = vld [vmem:[%s17828_s8 + $0x34] sm:$0xf]  ;;  %v9343_v59 = vrot.slane %v18428_v11, 5 }
 0x4fa   : > { %v7908_v44 = vadd.f32 %v7850_v38, %v7254_v3  ;;  %v18430_v23 = vpop.f32.mrf.mxu1  ;;  %v8704_v38 = vsel %vm15272_vm7, %v8699_v39, %v8703_v31  ;;  %v8719_v31 = vshrl.u32 %v18428_v11, 16  ;;  %v10062_v36 = vrot.slane %v10061_v15, 4 }
 0x4fb   : > { %v9046_v39 = vunpack.c.l.b16 %v8704_v38  ;;  %v9474_v47 = vpack.c.b16 %v9444_v28, %v9443_v48  ;;  %v10078_v54 = vshll.u32 %v14204_v22, 16  ;;  %v10082_v4 = vshrl.u32 %v14204_v22, 16 }
 0x4fc   : > { %14032 = vmatmul.msk.bf16.vlgmr.msrb.gmra.mxu3 %vm882_vm5, %v9075_v29  ;;  %v18443_v0 = vpop.f32.mrf.mxu0  ;;  %v10415_v29 = vpack.c.b16 %v10385_v8, %v10384_v40  ;;  %v8306_v57 = vadd.f32 %v18345_v25, %v7908_v44  ;;  %v18457_v40 = vrot.slane %v8715_v30, 5  ;;  %v10066_v44 = vrot.slane %v10064_v13, 5 }
 0x4fd   : > { %v18445_v60 = vpop.f32.mrf.mxu2  ;;  %14179 = vmatmul.msk.bf16.gmra.mxu1 %vm882_vm5, %v14660_v5  ;;  %v8721_v8 = vrot.slane %v8719_v31, 4  ;;  %v14203_v5 = vld [vmem:[%s17828_s8 + $0x30] sm:$0xf]  ;;  %v8725_v13 = vshll.u32 %v8617_v2, 16  ;;  %v10057_v31 = vsel %vm15272_vm7, %v10052_v37, %v18423_v56  ;;  %v9346_v56 = vrot.slane %v8617_v2, 5 }
 0x4fe   : > { %v18454_v63 = vadd.f32 %v18382_v9, %v8306_v57  ;;  %v10069_v9 = vshrl.u32 %v14203_v5, 16  ;;  %v10072_v38 = vshll.u32 %v14203_v5, 16  ;;  %v10067_v11 = vsel %vm15272_vm7, %v10062_v36, %v10066_v44  ;;  %v8618_v36 = vld [vmem:[%s17828_s8 + $0x24] sm:$0xf]  ;;  %v18491_v2 = vld [vmem:[%s17828_s8 + $0x28] sm:$0xf] }
 0x4ff   : > { %v7199_v61 = vpop.f32.mrf.mxu3  ;;  %v8722_v57 = vor.u32 %v8721_v8, %v18457_v40  ;;  %v10084_v37 = vrot.slane %v10082_v4, 4  ;;  %v14205_v8 = vld [vmem:[%s17828_s8 + $0x38] sm:$0x1] }
 0x500   : > { %v7255_v3 = vadd.f32 %v7199_v61, %v17885_v58  ;;  %v14050_v61 = vrot.slane %v9265_v50, 9  ;;  %v10071_v28 = vrot.slane %v10069_v9, 4  ;;  %v8727_v50 = vrot.slane %v8725_v13, 5 }
 0x501   : > { %v8723_v22 = vrot.slane %v8722_v57, 4 }
 0x502   : > { %v7909_v25 = vadd.f32 %v7853_v10, %v7255_v3  ;;  %14244 = vmatmul.msk.bf16.gmra.mxu2 %vm882_vm5, %v10415_v29  ;;  %v18462_v58 = vpop.f32.mrf.mxu1  ;;  %v9076_v10 = vpack.c.b16 %v9046_v39, %v9045_v34  ;;  %v8712_v29 = vor.u32 %v8711_v62, %v8708_v33  ;;  %v10074_v34 = vrot.slane %v10072_v38, 5 }
 0x503   : > { %v18480_v33 = vrot.slane %v10078_v54, 5  ;;  %v10386_v62 = vunpack.c.l.b16 %v10057_v31  ;;  %v8733_v54 = vshll.u32 %v8618_v36, 16  ;;  %v8728_v57 = vsel %vm15272_vm7, %v8723_v22, %v8727_v50  ;;  %v14206_v22 = vld [vmem:[%s17828_s8 + $0x3c] sm:$0xf]  ;;  %v14207_v50 = vld [vmem:[%s17828_s8 + $0x40] sm:$0xf] }
 0x504   : > { %v8307_v15 = vadd.f32 %v18374_v21, %v7909_v25  ;;  %v7858_v14 = vpop.f32.mrf.mxu0  ;;  %v9345_v21 = vrot.slane %v9343_v59, 4  ;;  %v10387_v25 = vunpack.c.l.b16 %v10067_v11  ;;  %v8713_v44 = vrot.slane %v8712_v29, 4 }
 0x505   : > { %v18467_v30 = vpop.f32.mrf.mxu2  ;;  %v10075_v38 = vor.u32 %v10074_v34, %v10071_v28 }
 0x506   : > { %v18476_v3 = vadd.f32 %v18411_v46, %v8307_v15  ;;  %v9344_v46 = vsel %vm15248_vm3, %v14050_v61, %v9343_v59  ;;  %v9347_v4 = vsel %vm15248_vm3, %v9345_v21, %v9346_v56  ;;  %v10088_v15 = vshll.u32 %v14205_v8, 16 }
 0x507   : > { %v7201_v48 = vpop.f32.mrf.mxu3  ;;  %14066 = vmatmul.msk.bf16.gmra.mxu0 %vm882_vm5, %v9474_v47  ;;  %v8730_v47 = vshrl.u32 %v8618_v36, 16  ;;  %v10416_v59 = vpack.c.b16 %v10387_v25, %v10386_v62  ;;  %v8718_v31 = vsel %vm15272_vm7, %v8713_v44, %v18457_v40  ;;  %v9445_v11 = vunpack.c.l.b16 %v9344_v46 }
 0x508   : > { %v7256_v39 = vadd.f32 %v7201_v48, %v17904_v41  ;;  %v14661_v41 = vld [vmem:[%s17828_s8 + $0x24] sm:$0xff]  ;;  %v8743_v61 = vshrl.u32 %v18491_v2, 16  ;;  %v9446_v28 = vunpack.c.l.b16 %v9347_v4  ;;  %v10076_v34 = vrot.slane %v10075_v38, 4  ;;  %v8620_v38 = vld [vmem:[%s17828_s8 + $0x2c] sm:$0x1] }
 0x509   : > { %v8735_v56 = vrot.slane %v8733_v54, 5  ;;  %v10090_v36 = vrot.slane %v10088_v15, 5  ;;  %v9047_v25 = vunpack.c.l.b16 %v8718_v31  ;;  %v10093_v54 = vshrl.u32 %v14206_v22, 16 }
 0x50a   : > { %v7910_v5 = vadd.f32 %v18443_v0, %v7256_v39  ;;  %v18488_v9 = vpop.f32.mrf.mxu1  ;;  %v10085_v0 = vor.u32 %v10084_v37, %v18480_v33  ;;  %v8732_v39 = vrot.slane %v8730_v47, 4  ;;  %v9475_v46 = vpack.c.b16 %v9446_v28, %v9445_v11  ;;  %v9266_v47 = vld [vmem:[%s17828_s8 + $0x24] sm:$0xe] }
 0x50b   : > { %v10096_v4 = vshll.u32 %v14206_v22, 16  ;;  %v9350_v31 = vrot.slane %v18491_v2, 5  ;;  %v10102_v11 = vshll.u32 %v14207_v50, 16 }
 0x50c   : > { %14033 = vmatmul.msk.bf16.gmra.mxu3 %vm882_vm5, %v9076_v10  ;;  %v7860_v29 = vpop.f32.mrf.mxu0  ;;  %v8739_v10 = vshll.u32 %v18491_v2, 16  ;;  %v8308_v48 = vadd.f32 %v18405_v42, %v7910_v5  ;;  %v10086_v37 = vrot.slane %v10085_v0, 4  ;;  %v9048_v42 = vunpack.c.l.b16 %v8728_v57 }
 0x50d   : > { %v18497_v13 = vpop.f32.mrf.mxu2  ;;  %14180 = vmatmul.msk.bf16.gmra.mxu1 %vm882_vm5, %v14661_v41  ;;  %v8745_v5 = vrot.slane %v8743_v61, 4  ;;  %v10106_v57 = vshrl.u32 %v14207_v50, 16  ;;  %v8749_v61 = vshll.u32 %v8620_v38, 16  ;;  %v14662_v50 = vld [vmem:[%s17828_s8 + $0x30] sm:$0xff] }
 0x50e   : > { %v18510_v62 = vadd.f32 %v18445_v60, %v8308_v48  ;;  %v18513_v8 = vrot.slane %v8739_v10, 5  ;;  %v8736_v60 = vor.u32 %v8735_v56, %v8732_v39  ;;  %v9077_v10 = vpack.c.b16 %v9048_v42, %v9047_v25 }
 0x50f   : > { %v7204_v21 = vpop.f32.mrf.mxu3  ;;  %v10095_v56 = vrot.slane %v10093_v54, 4  ;;  %v18536_v25 = vrot.slane %v10102_v11, 5  ;;  %v8751_v22 = vrot.slane %v8749_v61, 5 }
 0x510   : > { %v7257_v40 = vadd.f32 %v7204_v21, %v17915_v51  ;;  %v10081_v51 = vsel %vm15272_vm7, %v10076_v34, %v18480_v33  ;;  %v8746_v33 = vor.u32 %v8745_v5, %v18513_v8  ;;  %v14051_v34 = vrot.slane %v9266_v47, 9  ;;  %v18547_v47 = vld [vmem:[%s17828_s8 + $0x34] sm:$0xf] }
 0x511   : > { %v10388_v21 = vunpack.c.l.b16 %v10081_v51  ;;  %v8737_v2 = vrot.slane %v8736_v60, 4 }
 0x512   : > { %v7911_v44 = vadd.f32 %v7858_v14, %v7257_v40  ;;  %14245 = vmatmul.msk.bf16.gmra.mxu2 %vm882_vm5, %v10416_v59  ;;  %v18517_v41 = vpop.f32.mrf.mxu1  ;;  %v10091_v14 = vsel %vm15272_vm7, %v10086_v37, %v10090_v36  ;;  %v10098_v40 = vrot.slane %v10096_v4, 5  ;;  %v9352_v37 = vrot.slane %v9350_v31, 4 }
 0x513   : > { %v10389_v28 = vunpack.c.l.b16 %v10091_v14  ;;  %v9353_v36 = vrot.slane %v8620_v38, 5  ;;  %v8747_v5 = vrot.slane %v8746_v33, 4  ;;  %v8621_v14 = vld [vmem:[%s17828_s8 + $0x30] sm:$0xf] }
 0x514   : > { %v8309_v0 = vadd.f32 %v18430_v23, %v7911_v44  ;;  %v7863_v15 = vpop.f32.mrf.mxu0  ;;  %v10108_v44 = vrot.slane %v10106_v57, 4  ;;  %v10099_v60 = vor.u32 %v10098_v40, %v10095_v56 }
 0x515   : > { %v18527_v59 = vpop.f32.mrf.mxu2  ;;  %v9354_v4 = vsel %vm15248_vm3, %v9352_v37, %v9353_v36  ;;  %v8752_v57 = vsel %vm15272_vm7, %v8747_v5, %v8751_v22  ;;  %v14209_v5 = vld [vmem:[%s17828_s8 + $0x48] sm:$0xf] }
 0x516   : > { %v18532_v39 = vadd.f32 %v18467_v30, %v8309_v0  ;;  %v14208_v30 = vld [vmem:[%s17828_s8 + $0x44] sm:$0x1]  ;;  %v10109_v0 = vor.u32 %v10108_v44, %v18536_v25  ;;  %v9050_v40 = vunpack.c.l.b16 %v8752_v57  ;;  %v10117_v57 = vshrl.u32 %v14209_v5, 16 }
 0x517   : > { %v7206_v48 = vpop.f32.mrf.mxu3  ;;  %14067 = vmatmul.msk.bf16.gmra.mxu0 %vm882_vm5, %v9475_v46  ;;  %v9351_v46 = vsel %vm15248_vm3, %v14051_v34, %v9350_v31  ;;  %v10112_v11 = vshll.u32 %v14208_v30, 16  ;;  %v8754_v31 = vshrl.u32 %v8621_v14, 16  ;;  %v9448_v34 = vunpack.c.l.b16 %v9354_v4 }
 0x518   : > { %v7258_v23 = vadd.f32 %v7206_v48, %v17934_v7  ;;  %v10417_v7 = vpack.c.b16 %v10389_v28, %v10388_v21  ;;  %v9447_v48 = vunpack.c.l.b16 %v9351_v46  ;;  %v8767_v21 = vshrl.u32 %v18547_v47, 16 }
 0x519   : > { %v10114_v37 = vrot.slane %v10112_v11, 5  ;;  %v8756_v44 = vrot.slane %v8754_v31, 4  ;;  %v10120_v31 = vshll.u32 %v14209_v5, 16  ;;  %v8624_v5 = vld [vmem:[%s17828_s8 + $0x3c] sm:$0xf] }
 0x51a   : > { %v7912_v42 = vadd.f32 %v7860_v29, %v7258_v23  ;;  %v18540_v51 = vpop.f32.mrf.mxu1  ;;  %v8742_v29 = vsel %vm15272_vm7, %v8737_v2, %v18513_v8  ;;  %v8763_v8 = vshll.u32 %v18547_v47, 16  ;;  %v10100_v23 = vrot.slane %v10099_v60, 4  ;;  %v9267_v60 = vld [vmem:[%s17828_s8 + $0x30] sm:$0xe] }
 0x51b   : > { %v9049_v56 = vunpack.c.l.b16 %v8742_v29  ;;  %v8769_v30 = vrot.slane %v8767_v21, 4 }
 0x51c   : > { %14034 = vmatmul.msk.bf16.gmra.mxu3 %vm882_vm5, %v9077_v10  ;;  %v7865_v38 = vpop.f32.mrf.mxu0  ;;  %v8757_v10 = vshll.u32 %v8621_v14, 16  ;;  %v8310_v33 = vadd.f32 %v18462_v58, %v7912_v42  ;;  %v10110_v58 = vrot.slane %v10109_v0, 4  ;;  %v14210_v14 = vld [vmem:[%s17828_s8 + $0x4c] sm:$0xf]  ;;  %v10105_v46 = vsel %vm15272_vm7, %v10100_v23, %v18536_v25 }
 0x51d   : > { %v18549_v54 = vpop.f32.mrf.mxu2  ;;  %14181 = vmatmul.msk.bf16.gmra.mxu1 %vm882_vm5, %v14662_v50  ;;  %v18572_v50 = vrot.slane %v8763_v8, 5  ;;  %v9078_v4 = vpack.c.b16 %v9050_v40, %v9049_v56  ;;  %v10390_v8 = vunpack.c.l.b16 %v10105_v46  ;;  %v14663_v40 = vld [vmem:[%s17828_s8 + $0x3c] sm:$0xff]  ;;  %v14211_v46 = vld [vmem:[%s17828_s8 + $0x50] sm:$0x1] }
 0x51e   : > { %v18565_v2 = vadd.f32 %v18497_v13, %v8310_v33  ;;  %v8759_v42 = vrot.slane %v8757_v10, 5  ;;  %v9476_v13 = vpack.c.b16 %v9448_v34, %v9447_v48  ;;  %v10115_v11 = vsel %vm15272_vm7, %v10110_v58, %v10114_v37 }
 0x51f   : > { %v7209_v61 = vpop.f32.mrf.mxu3  ;;  %v10130_v48 = vshrl.u32 %v14210_v14, 16  ;;  %v10391_v34 = vunpack.c.l.b16 %v10115_v11  ;;  %v10119_v58 = vrot.slane %v10117_v57, 4  ;;  %v10122_v37 = vrot.slane %v10120_v31, 5 }
 0x520   : > { %v7259_v28 = vadd.f32 %v7209_v61, %v17945_v53  ;;  %v8623_v53 = vld [vmem:[%s17828_s8 + $0x38] sm:$0x1]  ;;  %v8760_v10 = vor.u32 %v8759_v42, %v8756_v44  ;;  %v10126_v61 = vshll.u32 %v14210_v14, 16  ;;  %v8778_v31 = vshrl.u32 %v8624_v5, 16 }
 0x521   : > { %v8773_v33 = vshll.u32 %v8623_v53, 16  ;;  %v9360_v56 = vrot.slane %v8623_v53, 5  ;;  %v10132_v42 = vrot.slane %v10130_v48, 4  ;;  %v10123_v57 = vor.u32 %v10122_v37, %v10119_v58 }
 0x522   : > { %v7913_v36 = vadd.f32 %v7863_v15, %v7259_v28  ;;  %14246 = vmatmul.msk.bf16.gmra.mxu2 %vm882_vm5, %v10417_v7  ;;  %v18569_v22 = vpop.f32.mrf.mxu1  ;;  %v9357_v15 = vrot.slane %v18547_v47, 5  ;;  %v14052_v47 = vrot.slane %v9267_v60, 9  ;;  %v18592_v44 = vrot.slane %v10126_v61, 5 }
 0x523   : > { %v8761_v14 = vrot.slane %v8760_v10, 4  ;;  %v8781_v61 = vshll.u32 %v8624_v5, 16  ;;  %v8626_v5 = vld [vmem:[%s17828_s8 + $0x44] sm:$0x1] }
 0x524   : > { %v8311_v7 = vadd.f32 %v18488_v9, %v7913_v36  ;;  %v7868_v29 = vpop.f32.mrf.mxu0  ;;  %v8770_v9 = vor.u32 %v8769_v30, %v18572_v50  ;;  %v9359_v23 = vrot.slane %v9357_v15, 4  ;;  %v18596_v30 = vld [vmem:[%s17828_s8 + $0x40] sm:$0xf]  ;;  %v9358_v53 = vsel %vm15248_vm3, %v14052_v47, %v9357_v15 }
 0x525   : > { %v18581_v0 = vpop.f32.mrf.mxu2  ;;  %v8787_v10 = vshll.u32 %v18596_v30, 16  ;;  %v8791_v48 = vshrl.u32 %v18596_v30, 16 }
 0x526   : > { %v18587_v21 = vadd.f32 %v18527_v59, %v8311_v7  ;;  %v8771_v60 = vrot.slane %v8770_v9, 4  ;;  %v9449_v9 = vunpack.c.l.b16 %v9358_v53 }
 0x527   : > { %v7211_v25 = vpop.f32.mrf.mxu3  ;;  %14068 = vmatmul.msk.bf16.gmra.mxu0 %vm882_vm5, %v9476_v13  ;;  %v10418_v13 = vpack.c.b16 %v10391_v34, %v10390_v8  ;;  %v8766_v8 = vsel %vm15272_vm7, %v8761_v14, %v18572_v50  ;;  %v18622_v58 = vrot.slane %v8787_v10, 5  ;;  %v14212_v14 = vld [vmem:[%s17828_s8 + $0x54] sm:$0xf] }
 0x528   : > { %v7260_v28 = vadd.f32 %v7211_v25, %v17964_v55  ;;  %v8775_v55 = vrot.slane %v8773_v33, 5  ;;  %v10136_v33 = vshll.u32 %v14211_v46, 16 }
 0x52a   : > { %v7914_v36 = vadd.f32 %v7865_v38, %v7260_v28  ;;  %v18598_v59 = vpop.f32.mrf.mxu1  ;;  %v9361_v38 = vsel %vm15248_vm3, %v9359_v23, %v9360_v56  ;;  %v8776_v28 = vsel %vm15272_vm7, %v8771_v60, %v8775_v55  ;;  %v10124_v56 = vrot.slane %v10123_v57, 4  ;;  %v14213_v60 = vld [vmem:[%s17828_s8 + $0x58] sm:$0xf] }
 0x52b   : > { %v9450_v34 = vunpack.c.l.b16 %v9361_v38  ;;  %v9051_v55 = vunpack.c.l.b16 %v8766_v8  ;;  %v10154_v8 = vshrl.u32 %v14213_v60, 16 }
 0x52c   : > { %14035 = vmatmul.msk.bf16.gmra.mxu3 %vm882_vm5, %v9078_v4  ;;  %v7870_v7 = vpop.f32.mrf.mxu0  ;;  %v10133_v4 = vor.u32 %v10132_v42, %v18592_v44  ;;  %v8312_v15 = vadd.f32 %v18517_v41, %v7914_v36  ;;  %v8780_v41 = vrot.slane %v8778_v31, 4  ;;  %v10138_v36 = vrot.slane %v10136_v33, 5  ;;  %v9268_v31 = vld [vmem:[%s17828_s8 + $0x3c] sm:$0xe] }
 0x52d   : > { %v18606_v11 = vpop.f32.mrf.mxu2  ;;  %14182 = vmatmul.msk.bf16.gmra.mxu1 %vm882_vm5, %v14663_v40  ;;  %v8783_v40 = vrot.slane %v8781_v61, 5  ;;  %v9477_v46 = vpack.c.b16 %v9450_v34, %v9449_v9  ;;  %v9364_v61 = vrot.slane %v18596_v30, 5  ;;  %v8797_v33 = vshll.u32 %v8626_v5, 16 }
 0x52e   : > { %v18620_v23 = vadd.f32 %v18549_v54, %v8312_v15  ;;  %v10134_v50 = vrot.slane %v10133_v4, 4  ;;  %v9052_v54 = vunpack.c.l.b16 %v8776_v28  ;;  %v14053_v28 = vrot.slane %v9268_v31, 9 }
 0x52f   : > { %v7214_v25 = vpop.f32.mrf.mxu3 }
 0x530   : > { %v7261_v47 = vadd.f32 %v7214_v25, %v17975_v6  ;;  %v8793_v6 = vrot.slane %v8791_v48, 4  ;;  %v10139_v10 = vsel %vm15272_vm7, %v10134_v50, %v10138_v36  ;;  %v10141_v48 = vshrl.u32 %v14212_v14, 16 }
 0x531   : > { %v10150_v25 = vshll.u32 %v14213_v60, 16  ;;  %v10393_v34 = vunpack.c.l.b16 %v10139_v10  ;;  %v8799_v36 = vrot.slane %v8797_v33, 5 }
 0x532   : > { %v7915_v37 = vadd.f32 %v7868_v29, %v7261_v47  ;;  %14247 = vmatmul.msk.bf16.gmra.mxu2 %vm882_vm5, %v10418_v13  ;;  %v18625_v42 = vpop.f32.mrf.mxu1  ;;  %v10129_v29 = vsel %vm15272_vm7, %v10124_v56, %v18592_v44  ;;  %v8784_v13 = vor.u32 %v8783_v40, %v8780_v41  ;;  %v8794_v4 = vor.u32 %v8793_v6, %v18622_v58  ;;  %v14664_v6 = vld [vmem:[%s17828_s8 + $0x48] sm:$0xff] }
 0x533   : > { %v9079_v47 = vpack.c.b16 %v9052_v54, %v9051_v55  ;;  %v10392_v30 = vunpack.c.l.b16 %v10129_v29  ;;  %v9366_v41 = vrot.slane %v9364_v61, 4  ;;  %v9367_v40 = vrot.slane %v8626_v5, 5  ;;  %v14214_v5 = vld [vmem:[%s17828_s8 + $0x5c] sm:$0x1] }
 0x534   : > { %v8313_v53 = vadd.f32 %v18540_v51, %v7915_v37  ;;  %v7873_v38 = vpop.f32.mrf.mxu0  ;;  %v10144_v51 = vshll.u32 %v14212_v14, 16  ;;  %v8785_v56 = vrot.slane %v8784_v13, 4  ;;  %v8795_v50 = vrot.slane %v8794_v4, 4  ;;  %v8627_v14 = vld [vmem:[%s17828_s8 + $0x48] sm:$0xf] }
 0x535   : > { %v18631_v57 = vpop.f32.mrf.mxu2  ;;  %v10143_v60 = vrot.slane %v10141_v48, 4  ;;  %v18650_v55 = vrot.slane %v10150_v25, 5  ;;  %v10156_v54 = vrot.slane %v10154_v8, 4  ;;  %v10419_v13 = vpack.c.b16 %v10393_v34, %v10392_v30 }
 0x536   : > { %v18642_v9 = vadd.f32 %v18581_v0, %v8313_v53  ;;  %v9365_v53 = vsel %vm15248_vm3, %v14053_v28, %v9364_v61  ;;  %v8790_v31 = vsel %vm15272_vm7, %v8785_v56, %v18622_v58  ;;  %v9368_v10 = vsel %vm15248_vm3, %v9366_v41, %v9367_v40 }
 0x537   : > { %v7216_v15 = vpop.f32.mrf.mxu3  ;;  %14069 = vmatmul.msk.bf16.gmra.mxu0 %vm882_vm5, %v9477_v46  ;;  %v18653_v46 = vld [vmem:[%s17828_s8 + $0x4c] sm:$0xf]  ;;  %v8802_v4 = vshrl.u32 %v8627_v14, 16  ;;  %v8800_v33 = vsel %vm15272_vm7, %v8795_v50, %v8799_v36  ;;  %v8805_v61 = vshll.u32 %v8627_v14, 16  ;;  %v10157_v58 = vor.u32 %v10156_v54, %v18650_v55  ;;  %v14215_v36 = vld [vmem:[%s17828_s8 + $0x60] sm:$0xf] }
 0x538   : > { %v7262_v44 = vadd.f32 %v7216_v15, %v17994_v26  ;;  %v10146_v26 = vrot.slane %v10144_v51, 5  ;;  %v8811_v48 = vshll.u32 %v18653_v46, 16  ;;  %v10160_v8 = vshll.u32 %v14214_v5, 16  ;;  %v8629_v54 = vld [vmem:[%s17828_s8 + $0x50] sm:$0x1] }
 0x539   : > { %v9451_v30 = vunpack.c.l.b16 %v9365_v53  ;;  %v9452_v28 = vunpack.c.l.b16 %v9368_v10  ;;  %v9053_v56 = vunpack.c.l.b16 %v8790_v31  ;;  %v8804_v41 = vrot.slane %v8802_v4, 4  ;;  %v9269_v10 = vld [vmem:[%s17828_s8 + $0x48] sm:$0xe] }
 0x53a   : > { %v7916_v37 = vadd.f32 %v7870_v7, %v7262_v44  ;;  %v18648_v0 = vpop.f32.mrf.mxu1  ;;  %v10147_v25 = vor.u32 %v10146_v26, %v10143_v60  ;;  %v8815_v44 = vshrl.u32 %v18653_v46, 16  ;;  %v9054_v40 = vunpack.c.l.b16 %v8800_v33 }
 0x53b   : > { %v18680_v50 = vrot.slane %v8811_v48, 5  ;;  %v10158_v60 = vrot.slane %v10157_v58, 4  ;;  %v10162_v26 = vrot.slane %v10160_v8, 5  ;;  %v9478_v53 = vpack.c.b16 %v9452_v28, %v9451_v30 }
 0x53c   : > { %14036 = vmatmul.msk.bf16.gmra.mxu3 %vm882_vm5, %v9079_v47  ;;  %v18659_v7 = vpop.f32.mrf.mxu0  ;;  %v8314_v15 = vadd.f32 %v18569_v22, %v7916_v37  ;;  %v8807_v37 = vrot.slane %v8805_v61, 5  ;;  %v9371_v5 = vrot.slane %v18653_v46, 5  ;;  %v10165_v4 = vshrl.u32 %v14215_v36, 16 }
 0x53d   : > { %v18661_v29 = vpop.f32.mrf.mxu2  ;;  %14183 = vmatmul.msk.bf16.gmra.mxu1 %vm882_vm5, %v14664_v6  ;;  %v14216_v6 = vld [vmem:[%s17828_s8 + $0x64] sm:$0xf]  ;;  %v10168_v33 = vshll.u32 %v14215_v36, 16  ;;  %v14054_v30 = vrot.slane %v9269_v10, 9 }
 0x53e   : > { %v18677_v34 = vadd.f32 %v18606_v11, %v8314_v15  ;;  %v8817_v11 = vrot.slane %v8815_v44, 4  ;;  %v10174_v61 = vshll.u32 %v14216_v6, 16  ;;  %v10178_v48 = vshrl.u32 %v14216_v6, 16 }
 0x53f   : > { %v7219_v51 = vpop.f32.mrf.mxu3  ;;  %v9080_v15 = vpack.c.b16 %v9054_v40, %v9053_v56  ;;  %v9373_v28 = vrot.slane %v9371_v5, 4  ;;  %v9374_v56 = vrot.slane %v8629_v54, 5 }
 0x540   : > { %v7263_v47 = vadd.f32 %v7219_v51, %v18005_v32  ;;  %v10148_v32 = vrot.slane %v10147_v25, 4  ;;  %v8808_v51 = vor.u32 %v8807_v37, %v8804_v41  ;;  %v8821_v25 = vshll.u32 %v8629_v54, 16  ;;  %v8630_v37 = vld [vmem:[%s17828_s8 + $0x54] sm:$0xf] }
 0x541   : > { %v8818_v8 = vor.u32 %v8817_v11, %v18680_v50  ;;  %v10167_v41 = vrot.slane %v10165_v4, 4  ;;  %v10180_v40 = vrot.slane %v10178_v48, 4  ;;  %v9372_v54 = vsel %vm15248_vm3, %v14054_v30, %v9371_v5 }
 0x542   : > { %v7917_v22 = vadd.f32 %v7873_v38, %v7263_v47  ;;  %14248 = vmatmul.msk.bf16.gmra.mxu2 %vm882_vm5, %v10419_v13  ;;  %v18684_v14 = vpop.f32.mrf.mxu1  ;;  %v10153_v46 = vsel %vm15272_vm7, %v10148_v32, %v18650_v55  ;;  %v10170_v55 = vrot.slane %v10168_v33, 5  ;;  %v8823_v11 = vrot.slane %v8821_v25, 5 }
 0x543   : > { %v10394_v6 = vunpack.c.l.b16 %v10153_v46  ;;  %v8826_v10 = vshrl.u32 %v8630_v37, 16 }
 0x544   : > { %v8315_v38 = vadd.f32 %v18598_v59, %v7917_v22  ;;  %v18689_v13 = vpop.f32.mrf.mxu0  ;;  %v10163_v59 = vsel %vm15272_vm7, %v10158_v60, %v10162_v26  ;;  %v18705_v22 = vrot.slane %v10174_v61, 5  ;;  %v18711_v60 = vld [vmem:[%s17828_s8 + $0x58] sm:$0xf]  ;;  %v8809_v26 = vrot.slane %v8808_v51, 4 }
 0x545   : > { %v18691_v31 = vpop.f32.mrf.mxu2  ;;  %v10395_v32 = vunpack.c.l.b16 %v10163_v59  ;;  %v8819_v61 = vrot.slane %v8818_v8, 4  ;;  %v10171_v48 = vor.u32 %v10170_v55, %v10167_v41  ;;  %v8835_v51 = vshll.u32 %v18711_v60, 16 }
 0x546   : > { %v18701_v44 = vadd.f32 %v18631_v57, %v8315_v38  ;;  %v14665_v57 = vld [vmem:[%s17828_s8 + $0x54] sm:$0xff]  ;;  %v9375_v38 = vsel %vm15248_vm3, %v9373_v28, %v9374_v56  ;;  %v8839_v5 = vshrl.u32 %v18711_v60, 16  ;;  %v9453_v8 = vunpack.c.l.b16 %v9372_v54 }
 0x547   : > { %v7221_v58 = vpop.f32.mrf.mxu3  ;;  %14070 = vmatmul.msk.bf16.gmra.mxu0 %vm882_vm5, %v9478_v53  ;;  %v14217_v53 = vld [vmem:[%s17828_s8 + $0x68] sm:$0x1]  ;;  %v10420_v25 = vpack.c.b16 %v10395_v32, %v10394_v6  ;;  %v9454_v30 = vunpack.c.l.b16 %v9375_v38  ;;  %v8828_v56 = vrot.slane %v8826_v10, 4  ;;  %v18738_v6 = vrot.slane %v8835_v51, 5  ;;  %v9270_v54 = vld [vmem:[%s17828_s8 + $0x54] sm:$0xe] }
 0x548   : > { %v7264_v47 = vadd.f32 %v7221_v58, %v18024_v45  ;;  %v10181_v58 = vor.u32 %v10180_v40, %v18705_v22  ;;  %v8824_v40 = vsel %vm15272_vm7, %v8819_v61, %v8823_v11  ;;  %v8841_v32 = vrot.slane %v8839_v5, 4 }
 0x549   : > { %v9056_v11 = vunpack.c.l.b16 %v8824_v40  ;;  %v9479_v38 = vpack.c.b16 %v9454_v30, %v9453_v8 }
 0x54a   : > { %v7918_v36 = vadd.f32 %v18659_v7, %v7264_v47  ;;  %v18713_v45 = vpop.f32.mrf.mxu1  ;;  %v8829_v7 = vshll.u32 %v8630_v37, 16  ;;  %v8814_v47 = vsel %vm15272_vm7, %v8809_v26, %v18680_v50  ;;  %v10182_v37 = vrot.slane %v10181_v58, 4  ;;  %v14218_v26 = vld [vmem:[%s17828_s8 + $0x6c] sm:$0xf] }
 0x54b   : > { %v8842_v5 = vor.u32 %v8841_v32, %v18738_v6 }
 0x54c   : > { %14037 = vmatmul.msk.bf16.gmra.mxu3 %vm882_vm5, %v9080_v15  ;;  %v7880_v4 = vpop.f32.mrf.mxu0  ;;  %v10184_v15 = vshll.u32 %v14217_v53, 16  ;;  %v8316_v46 = vadd.f32 %v18625_v42, %v7918_v36  ;;  %v8831_v41 = vrot.slane %v8829_v7, 5  ;;  %v10172_v42 = vrot.slane %v10171_v48, 4  ;;  %v8632_v36 = vld [vmem:[%s17828_s8 + $0x5c] sm:$0x1] }
 0x54d   : > { %v18721_v33 = vpop.f32.mrf.mxu2  ;;  %14184 = vmatmul.msk.bf16.gmra.mxu1 %vm882_vm5, %v14665_v57  ;;  %v9378_v57 = vrot.slane %v18711_v60, 5  ;;  %v14219_v7 = vld [vmem:[%s17828_s8 + $0x70] sm:$0xf]  ;;  %v8845_v51 = vshll.u32 %v8632_v36, 16  ;;  %v10189_v60 = vshrl.u32 %v14218_v26, 16  ;;  %v8843_v32 = vrot.slane %v8842_v5, 4 }
 0x54e   : > { %v18733_v55 = vadd.f32 %v18661_v29, %v8316_v46  ;;  %v9055_v29 = vunpack.c.l.b16 %v8814_v47  ;;  %v8832_v10 = vor.u32 %v8831_v41, %v8828_v56  ;;  %v14055_v46 = vrot.slane %v9270_v54, 9 }
 0x54f   : > { %v7224_v59 = vpop.f32.mrf.mxu3  ;;  %v10198_v8 = vshll.u32 %v14219_v7, 16  ;;  %v10202_v30 = vshrl.u32 %v14219_v7, 16 }
 0x550   : > { %v7265_v28 = vadd.f32 %v7224_v59, %v18035_v52  ;;  %v10186_v52 = vrot.slane %v10184_v15, 5  ;;  %v9380_v59 = vrot.slane %v9378_v57, 4  ;;  %v9081_v56 = vpack.c.b16 %v9056_v11, %v9055_v29 }
 0x551   : > { %v10200_v29 = vrot.slane %v10198_v8, 5  ;;  %v10204_v11 = vrot.slane %v10202_v30, 4 }
 0x552   : > { %v7919_v50 = vadd.f32 %v18689_v13, %v7265_v28  ;;  %14249 = vmatmul.msk.bf16.gmra.mxu2 %vm882_vm5, %v10420_v25  ;;  %v18744_v53 = vpop.f32.mrf.mxu1  ;;  %v10177_v13 = vsel %vm15272_vm7, %v10172_v42, %v18705_v22  ;;  %v10192_v25 = vshll.u32 %v14218_v26, 16  ;;  %v10187_v15 = vsel %vm15272_vm7, %v10182_v37, %v10186_v52  ;;  %v14666_v26 = vld [vmem:[%s17828_s8 + $0x60] sm:$0xff] }
 0x553   : > { %v10396_v41 = vunpack.c.l.b16 %v10177_v13  ;;  %v10397_v40 = vunpack.c.l.b16 %v10187_v15  ;;  %v8833_v42 = vrot.slane %v8832_v10, 4  ;;  %v10191_v37 = vrot.slane %v10189_v60, 4  ;;  %v8633_v10 = vld [vmem:[%s17828_s8 + $0x60] sm:$0xf]  ;;  %v18778_v60 = vld [vmem:[%s17828_s8 + $0x64] sm:$0xf] }
 0x554   : > { %v8317_v61 = vadd.f32 %v18648_v0, %v7919_v50  ;;  %v7883_v48 = vpop.f32.mrf.mxu0  ;;  %v9381_v0 = vrot.slane %v8632_v36, 5  ;;  %v10194_v50 = vrot.slane %v10192_v25, 5  ;;  %v8847_v36 = vrot.slane %v8845_v51, 5 }
 0x555   : > { %v18749_v58 = vpop.f32.mrf.mxu2  ;;  %v8838_v13 = vsel %vm15272_vm7, %v8833_v42, %v18738_v6  ;;  %v8853_v8 = vshll.u32 %v8633_v10, 16  ;;  %v8859_v30 = vshll.u32 %v18778_v60, 16 }
 0x556   : > { %v18758_v28 = vadd.f32 %v18691_v31, %v8317_v61  ;;  %v9382_v31 = vsel %vm15248_vm3, %v9380_v59, %v9381_v0  ;;  %v10421_v61 = vpack.c.b16 %v10397_v40, %v10396_v41  ;;  %v10195_v51 = vor.u32 %v10194_v50, %v10191_v37  ;;  %v14221_v37 = vld [vmem:[%s17828_s8 + $0x78] sm:$0xf] }
 0x557   : > { %v7226_v47 = vpop.f32.mrf.mxu3  ;;  %14071 = vmatmul.msk.bf16.gmra.mxu0 %vm882_vm5, %v9479_v38  ;;  %v14220_v38 = vld [vmem:[%s17828_s8 + $0x74] sm:$0x1]  ;;  %v9456_v15 = vunpack.c.l.b16 %v9382_v31  ;;  %v10205_v59 = vor.u32 %v10204_v11, %v10200_v29  ;;  %v8850_v0 = vshrl.u32 %v8633_v10, 16  ;;  %v8635_v31 = vld [vmem:[%s17828_s8 + $0x68] sm:$0x1]  ;;  %v18796_v11 = vrot.slane %v8859_v30, 5 }
 0x558   : > { %v7266_v22 = vadd.f32 %v7226_v47, %v18054_v16  ;;  %v9379_v16 = vsel %vm15248_vm3, %v14055_v46, %v9378_v57  ;;  %v8848_v57 = vsel %vm15272_vm7, %v8843_v32, %v8847_v36  ;;  %v10208_v47 = vshll.u32 %v14220_v38, 16 }
 0x559   : > { %v9455_v25 = vunpack.c.l.b16 %v9379_v16  ;;  %v10196_v41 = vrot.slane %v10195_v51, 4  ;;  %v9058_v42 = vunpack.c.l.b16 %v8848_v57  ;;  %v8852_v32 = vrot.slane %v8850_v0, 4 }
 0x55a   : > { %v7920_v52 = vadd.f32 %v7880_v4, %v7266_v22  ;;  %v18763_v54 = vpop.f32.mrf.mxu1  ;;  %v8863_v22 = vshrl.u32 %v18778_v60, 16  ;;  %v8855_v36 = vrot.slane %v8853_v8, 5  ;;  %v9385_v51 = vrot.slane %v18778_v60, 5 }
 0x55b   : > { %v9480_v16 = vpack.c.b16 %v9456_v15, %v9455_v25  ;;  %v10213_v57 = vshrl.u32 %v14221_v37, 16  ;;  %v8869_v0 = vshll.u32 %v8635_v31, 16 }
 0x55c   : > { %14038 = vmatmul.msk.bf16.gmra.mxu3 %vm882_vm5, %v9081_v56  ;;  %v7885_v7 = vpop.f32.mrf.mxu0  ;;  %v8318_v5 = vadd.f32 %v18684_v14, %v7920_v52  ;;  %v9057_v14 = vunpack.c.l.b16 %v8838_v13  ;;  %v10206_v52 = vrot.slane %v10205_v59, 4  ;;  %v9271_v13 = vld [vmem:[%s17828_s8 + $0x60] sm:$0xe] }
 0x55d   : > { %v18772_v4 = vpop.f32.mrf.mxu2  ;;  %14185 = vmatmul.msk.bf16.gmra.mxu1 %vm882_vm5, %v14666_v26  ;;  %v14222_v26 = vld [vmem:[%s17828_s8 + $0x7c] sm:$0xf]  ;;  %v14056_v30 = vrot.slane %v9271_v13, 9 }
 0x55e   : > { %v18788_v56 = vadd.f32 %v18721_v33, %v8318_v5  ;;  %v8865_v33 = vrot.slane %v8863_v22, 4  ;;  %v10216_v5 = vshll.u32 %v14221_v37, 16  ;;  %v10222_v59 = vshll.u32 %v14222_v26, 16 }
 0x55f   : > { %v7229_v46 = vpop.f32.mrf.mxu3  ;;  %v10226_v25 = vshrl.u32 %v14222_v26, 16  ;;  %v9387_v22 = vrot.slane %v9385_v51, 4  ;;  %v14223_v26 = vld [vmem:[%s17828_s8 + $0x80] sm:$0x1] }
 0x560   : > { %v7267_v6 = vadd.f32 %v7229_v46, %v18065_v27  ;;  %v10210_v27 = vrot.slane %v10208_v47, 5  ;;  %v9082_v46 = vpack.c.b16 %v9058_v42, %v9057_v14  ;;  %v10218_v14 = vrot.slane %v10216_v5, 5 }
 0x562   : > { %v7921_v40 = vadd.f32 %v7883_v48, %v7267_v6  ;;  %14250 = vmatmul.msk.bf16.gmra.mxu2 %vm882_vm5, %v10421_v61  ;;  %v18792_v50 = vpop.f32.mrf.mxu1  ;;  %v10201_v61 = vsel %vm15272_vm7, %v10196_v41, %v10200_v29  ;;  %v10211_v47 = vsel %vm15272_vm7, %v10206_v52, %v10210_v27  ;;  %v8866_v6 = vor.u32 %v8865_v33, %v18796_v11  ;;  %v14667_v52 = vld [vmem:[%s17828_s8 + $0x6c] sm:$0xff] }
 0x563   : > { %v10398_v60 = vunpack.c.l.b16 %v10201_v61  ;;  %v9388_v41 = vrot.slane %v8635_v31, 5  ;;  %v10399_v37 = vunpack.c.l.b16 %v10211_v47  ;;  %v18814_v27 = vrot.slane %v10222_v59, 5 }
 0x564   : > { %v8319_v48 = vadd.f32 %v18713_v45, %v7921_v40  ;;  %v7888_v38 = vpop.f32.mrf.mxu0  ;;  %v8856_v45 = vor.u32 %v8855_v36, %v8852_v32  ;;  %v10215_v40 = vrot.slane %v10213_v57, 4  ;;  %v8636_v32 = vld [vmem:[%s17828_s8 + $0x6c] sm:$0xf]  ;;  %v8871_v33 = vrot.slane %v8869_v0, 5 }
 0x565   : > { %v18799_v10 = vpop.f32.mrf.mxu2  ;;  %v9386_v31 = vsel %vm15248_vm3, %v14056_v30, %v9385_v51  ;;  %v9389_v13 = vsel %vm15248_vm3, %v9387_v22, %v9388_v41  ;;  %v8874_v5 = vshrl.u32 %v8636_v32, 16  ;;  %v8877_v59 = vshll.u32 %v8636_v32, 16 }
 0x566   : > { %v18808_v8 = vadd.f32 %v18749_v58, %v8319_v48  ;;  %v10228_v58 = vrot.slane %v10226_v25, 4  ;;  %v8857_v36 = vrot.slane %v8856_v45, 4  ;;  %v18824_v48 = vld [vmem:[%s17828_s8 + $0x70] sm:$0xf]  ;;  %v10219_v57 = vor.u32 %v10218_v14, %v10215_v40 }
 0x567   : > { %v7231_v15 = vpop.f32.mrf.mxu3  ;;  %14072 = vmatmul.msk.bf16.gmra.mxu0 %vm882_vm5, %v9480_v16  ;;  %v8867_v16 = vrot.slane %v8866_v6, 4  ;;  %v10422_v25 = vpack.c.b16 %v10399_v37, %v10398_v60  ;;  %v9457_v0 = vunpack.c.l.b16 %v9386_v31  ;;  %v8887_v6 = vshrl.u32 %v18824_v48, 16  ;;  %v9272_v31 = vld [vmem:[%s17828_s8 + $0x6c] sm:$0xe] }
 0x568   : > { %v7268_v29 = vadd.f32 %v7231_v15, %v18084_v24  ;;  %v10232_v15 = vshll.u32 %v14223_v26, 16  ;;  %v8862_v45 = vsel %vm15272_vm7, %v8857_v36, %v18796_v11  ;;  %v9458_v22 = vunpack.c.l.b16 %v9389_v13  ;;  %v8638_v36 = vld [vmem:[%s17828_s8 + $0x74] sm:$0x1] }
 0x569   : > { %v8872_v30 = vsel %vm15272_vm7, %v8867_v16, %v8871_v33  ;;  %v10220_v41 = vrot.slane %v10219_v57, 4  ;;  %v8876_v40 = vrot.slane %v8874_v5, 4  ;;  %v8879_v11 = vrot.slane %v8877_v59, 5 }
 0x56a   : > { %v7922_v42 = vadd.f32 %v7885_v7, %v7268_v29  ;;  %v18817_v24 = vpop.f32.mrf.mxu1  ;;  %v8883_v29 = vshll.u32 %v18824_v48, 16  ;;  %v10234_v37 = vrot.slane %v10232_v15, 5  ;;  %v8889_v16 = vrot.slane %v8887_v6, 4 }
 0x56b   : > { %v9481_v33 = vpack.c.b16 %v9458_v22, %v9457_v0  ;;  %v9392_v13 = vrot.slane %v18824_v48, 5  ;;  %v10225_v59 = vsel %vm15272_vm7, %v10220_v41, %v18814_v27  ;;  %v14057_v6 = vrot.slane %v9272_v31, 9  ;;  %v14226_v31 = vld [vmem:[%s17828_s8 + $0x8c] sm:$0x1] }
 0x56c   : > { %14039 = vmatmul.msk.bf16.gmra.mxu3 %vm882_vm5, %v9082_v46  ;;  %v18826_v7 = vpop.f32.mrf.mxu0  ;;  %v10229_v46 = vor.u32 %v10228_v58, %v18814_v27  ;;  %v8320_v51 = vadd.f32 %v18744_v53, %v7922_v42  ;;  %v9059_v58 = vunpack.c.l.b16 %v8862_v45  ;;  %v18851_v26 = vrot.slane %v8883_v29, 5 }
 0x56d   : > { %v18828_v61 = vpop.f32.mrf.mxu2  ;;  %14186 = vmatmul.msk.bf16.gmra.mxu1 %vm882_vm5, %v14667_v52  ;;  %v14224_v52 = vld [vmem:[%s17828_s8 + $0x84] sm:$0xf]  ;;  %v9394_v22 = vrot.slane %v9392_v13, 4  ;;  %v9395_v41 = vrot.slane %v8638_v36, 5 }
 0x56e   : > { %v18844_v53 = vadd.f32 %v18772_v4, %v8320_v51  ;;  %v10230_v42 = vrot.slane %v10229_v46, 4  ;;  %v14225_v4 = vld [vmem:[%s17828_s8 + $0x88] sm:$0xf]  ;;  %v10237_v46 = vshrl.u32 %v14224_v52, 16  ;;  %v10240_v15 = vshll.u32 %v14224_v52, 16 }
 0x56f   : > { %v7234_v47 = vpop.f32.mrf.mxu3  ;;  %v10246_v45 = vshll.u32 %v14225_v4, 16  ;;  %v10250_v48 = vshrl.u32 %v14225_v4, 16  ;;  %v8890_v29 = vor.u32 %v8889_v16, %v18851_v26  ;;  %v18874_v52 = vld [vmem:[%s17828_s8 + $0x7c] sm:$0xf] }
 0x570   : > { %v7269_v60 = vadd.f32 %v7234_v47, %v18095_v20  ;;  %v9060_v20 = vunpack.c.l.b16 %v8872_v30  ;;  %v10235_v51 = vsel %vm15272_vm7, %v10230_v42, %v10234_v37  ;;  %v8893_v47 = vshll.u32 %v8638_v36, 16 }
 0x571   : > { %v10400_v30 = vunpack.c.l.b16 %v10225_v59  ;;  %v10239_v42 = vrot.slane %v10237_v46, 4  ;;  %v10242_v37 = vrot.slane %v10240_v15, 5  ;;  %v18878_v16 = vrot.slane %v10246_v45, 5 }
 0x572   : > { %v7923_v14 = vadd.f32 %v7888_v38, %v7269_v60  ;;  %14251 = vmatmul.msk.bf16.gmra.mxu2 %vm882_vm5, %v10422_v25  ;;  %v18848_v32 = vpop.f32.mrf.mxu1  ;;  %v8880_v25 = vor.u32 %v8879_v11, %v8876_v40  ;;  %v9083_v0 = vpack.c.b16 %v9060_v20, %v9059_v58  ;;  %v8639_v40 = vld [vmem:[%s17828_s8 + $0x78] sm:$0xf]  ;;  %v10401_v11 = vunpack.c.l.b16 %v10235_v51 }
 0x573   : > { %v8895_v20 = vrot.slane %v8893_v47, 5  ;;  %v9393_v36 = vsel %vm15248_vm3, %v14057_v6, %v9392_v13  ;;  %v8901_v59 = vshll.u32 %v8639_v40, 16  ;;  %v8911_v46 = vshrl.u32 %v18874_v52, 16 }
 0x574   : > { %v8321_v38 = vadd.f32 %v18763_v54, %v7923_v14  ;;  %v18857_v57 = vpop.f32.mrf.mxu0  ;;  %v8881_v14 = vrot.slane %v8880_v25, 4  ;;  %v9396_v25 = vsel %vm15248_vm3, %v9394_v22, %v9395_v41  ;;  %v10423_v47 = vpack.c.b16 %v10401_v11, %v10400_v30 }
 0x575   : > { %v18859_v5 = vpop.f32.mrf.mxu2  ;;  %v10243_v45 = vor.u32 %v10242_v37, %v10239_v42  ;;  %v9460_v22 = vunpack.c.l.b16 %v9396_v25  ;;  %v8903_v41 = vrot.slane %v8901_v59, 5 }
 0x576   : > { %v18868_v60 = vadd.f32 %v18799_v10, %v8321_v38  ;;  %v14668_v10 = vld [vmem:[%s17828_s8 + $0x78] sm:$0xff]  ;;  %v8898_v38 = vshrl.u32 %v8639_v40, 16  ;;  %v8886_v13 = vsel %vm15272_vm7, %v8881_v14, %v18851_v26  ;;  %v8641_v40 = vld [vmem:[%s17828_s8 + $0x80] sm:$0x1]  ;;  %v8913_v14 = vrot.slane %v8911_v46, 4 }
 0x577   : > { %v7236_v54 = vpop.f32.mrf.mxu3  ;;  %14073 = vmatmul.msk.bf16.gmra.mxu0 %vm882_vm5, %v9481_v33  ;;  %v8891_v33 = vrot.slane %v8890_v29, 4  ;;  %v10244_v37 = vrot.slane %v10243_v45, 4 }
 0x578   : > { %v7270_v27 = vadd.f32 %v7236_v54, %v18114_v19  ;;  %v10252_v19 = vrot.slane %v10250_v48, 4  ;;  %v9459_v48 = vunpack.c.l.b16 %v9393_v36  ;;  %v8900_v30 = vrot.slane %v8898_v38, 4  ;;  %v14228_v36 = vld [vmem:[%s17828_s8 + $0x94] sm:$0xf] }
 0x579   : > { %v8917_v38 = vshll.u32 %v8641_v40, 16 }
 0x57a   : > { %v7924_v58 = vadd.f32 %v18826_v7, %v7270_v27  ;;  %v18880_v4 = vpop.f32.mrf.mxu1  ;;  %v8907_v7 = vshll.u32 %v18874_v52, 16  ;;  %v10253_v54 = vor.u32 %v10252_v19, %v18878_v16  ;;  %v8896_v27 = vsel %vm15272_vm7, %v8891_v33, %v8895_v20  ;;  %v14227_v33 = vld [vmem:[%s17828_s8 + $0x90] sm:$0xf] }
 0x57b   : > { %v9062_v20 = vunpack.c.l.b16 %v8896_v27  ;;  %v9482_v59 = vpack.c.b16 %v9460_v22, %v9459_v48  ;;  %v10264_v45 = vshll.u32 %v14227_v33, 16  ;;  %v8919_v22 = vrot.slane %v8917_v38, 5 }
 0x57c   : > { %14040 = vmatmul.msk.bf16.gmra.mxu3 %vm882_vm5, %v9083_v0  ;;  %v9551_v15 = vpop.f32.mrf.mxu0  ;;  %v10256_v0 = vshll.u32 %v14226_v31, 16  ;;  %v8322_v29 = vadd.f32 %v18792_v50, %v7924_v58  ;;  %v18902_v11 = vrot.slane %v8907_v7, 5  ;;  %v9061_v50 = vunpack.c.l.b16 %v8886_v13 }
 0x57d   : > { %v18890_v51 = vpop.f32.mrf.mxu2  ;;  %14187 = vmatmul.msk.bf16.gmra.mxu1 %vm882_vm5, %v14668_v10  ;;  %v10254_v10 = vrot.slane %v10253_v54, 4  ;;  %v8904_v31 = vor.u32 %v8903_v41, %v8900_v30  ;;  %v9399_v7 = vrot.slane %v18874_v52, 5  ;;  %v10270_v54 = vshll.u32 %v14228_v36, 16 }
 0x57e   : > { %v18905_v42 = vadd.f32 %v18828_v61, %v8322_v29  ;;  %v10258_v19 = vrot.slane %v10256_v0, 5  ;;  %v8914_v25 = vor.u32 %v8913_v14, %v18902_v11  ;;  %v9273_v61 = vld [vmem:[%s17828_s8 + $0x78] sm:$0xe]  ;;  %v10274_v0 = vshrl.u32 %v14228_v36, 16 }
 0x57f   : > { %v9151_v6 = vpop.f32.mrf.mxu3  ;;  %v9084_v29 = vpack.c.b16 %v9062_v20, %v9061_v50  ;;  %v8905_v52 = vrot.slane %v8904_v31, 4  ;;  %v9402_v14 = vrot.slane %v8641_v40, 5  ;;  %v14669_v31 = vld [vmem:[%s17828_s8 + $0x84] sm:$0xff] }
 0x580   : > { %v9231_v26 = vadd.f32 %v9151_v6, %v18125_v18  ;;  %v10249_v6 = vsel %vm15272_vm7, %v10244_v37, %v18878_v16  ;;  %v10259_v48 = vsel %vm15272_vm7, %v10254_v10, %v10258_v19  ;;  %v9401_v16 = vrot.slane %v9399_v7, 4  ;;  %v8642_v10 = vld [vmem:[%s17828_s8 + $0x84] sm:$0xf] }
 0x581   : > { %v10266_v37 = vrot.slane %v10264_v45, 5  ;;  %v10276_v20 = vrot.slane %v10274_v0, 4  ;;  %v10403_v36 = vunpack.c.l.b16 %v10259_v48  ;;  %v8910_v40 = vsel %vm15272_vm7, %v8905_v52, %v18902_v11 }
 0x582   : > { %v9629_v58 = vadd.f32 %v18857_v57, %v9231_v26  ;;  %14252 = vmatmul.msk.bf16.gmra.mxu2 %vm882_vm5, %v10423_v47  ;;  %v18911_v18 = vpop.f32.mrf.mxu1  ;;  %v10261_v47 = vshrl.u32 %v14227_v33, 16  ;;  %v8915_v26 = vrot.slane %v8914_v25, 4  ;;  %v10402_v33 = vunpack.c.l.b16 %v10249_v6 }
 0x583   : > { %v9403_v25 = vsel %vm15248_vm3, %v9401_v16, %v9402_v14  ;;  %v9063_v52 = vunpack.c.l.b16 %v8910_v40 }
 0x584   : > { %v9916_v46 = vadd.f32 %v18817_v24, %v9629_v58  ;;  %v9554_v57 = vpop.f32.mrf.mxu0  ;;  %v14058_v24 = vrot.slane %v9273_v61, 9  ;;  %v10263_v50 = vrot.slane %v10261_v47, 4  ;;  %v18929_v58 = vrot.slane %v10270_v54, 5 }
 0x585   : > { %v18917_v13 = vpop.f32.mrf.mxu2  ;;  %v8922_v61 = vshrl.u32 %v8642_v10, 16  ;;  %v8925_v54 = vshll.u32 %v8642_v10, 16  ;;  %v9462_v16 = vunpack.c.l.b16 %v9403_v25  ;;  %v8644_v10 = vld [vmem:[%s17828_s8 + $0x8c] sm:$0x1] }
 0x586   : > { %v18925_v30 = vadd.f32 %v18859_v5, %v9916_v46  ;;  %v18934_v5 = vld [vmem:[%s17828_s8 + $0x88] sm:$0xf]  ;;  %v10267_v45 = vor.u32 %v10266_v37, %v10263_v50 }
 0x587   : > { %v9153_v27 = vpop.f32.mrf.mxu3  ;;  %14074 = vmatmul.msk.bf16.gmra.mxu0 %vm882_vm5, %v9482_v59  ;;  %v14229_v59 = vld [vmem:[%s17828_s8 + $0x98] sm:$0x1]  ;;  %v8931_v0 = vshll.u32 %v18934_v5, 16  ;;  %v8935_v6 = vshrl.u32 %v18934_v5, 16  ;;  %v8924_v14 = vrot.slane %v8922_v61, 4  ;;  %v9406_v25 = vrot.slane %v18934_v5, 5 }
 0x588   : > { %v9232_v41 = vadd.f32 %v9153_v27, %v18144_v1  ;;  %v9400_v1 = vsel %vm15248_vm3, %v14058_v24, %v9399_v7  ;;  %v10277_v7 = vor.u32 %v10276_v20, %v18929_v58  ;;  %v10280_v11 = vshll.u32 %v14229_v59, 16  ;;  %v14231_v59 = vld [vmem:[%s17828_s8 + $0xa0] sm:$0xf] }
 0x589   : > { %v9461_v24 = vunpack.c.l.b16 %v9400_v1  ;;  %v10268_v37 = vrot.slane %v10267_v45, 4  ;;  %v14230_v1 = vld [vmem:[%s17828_s8 + $0x9c] sm:$0xf] }
 0x58a   : > { %v9630_v19 = vadd.f32 %v9551_v15, %v9232_v41  ;;  %v18936_v38 = vpop.f32.mrf.mxu1  ;;  %v8920_v15 = vsel %vm15272_vm7, %v8915_v26, %v8919_v22  ;;  %v20075_v41 = vld [vmem:[#allocation19_spill] sm:$0xff]  ;;  %v10278_v20 = vrot.slane %v10277_v7, 4  ;;  %v10288_v61 = vshll.u32 %v14230_v1, 16 }
 0x58b   : > { %v9064_v22 = vunpack.c.l.b16 %v8920_v15  ;;  %v9274_v15 = vld [vmem:[%s17828_s8 + $0x84] sm:$0xe]  ;;  %v9483_v45 = vpack.c.b16 %v9462_v16, %v9461_v24  ;;  %v10294_v7 = vshll.u32 %v14231_v59, 16 }
 0x58c   : > { %14041 = vmatmul.msk.bf16.gmra.mxu3 %vm882_vm5, %v9084_v29  ;;  %v18949_v46 = vpop.f32.mrf.mxu0  ;;  %v10424_v29 = vpack.c.b16 %v10403_v36, %v10402_v33  ;;  %v9917_v48 = vadd.f32 %v18848_v32, %v9630_v19  ;;  %v8927_v33 = vrot.slane %v8925_v54, 5  ;;  %v18963_v36 = vrot.slane %v8931_v0, 5 }
 0x58d   : > { %v18951_v47 = vpop.f32.mrf.mxu2  ;;  %14188 = vmatmul.msk.bf16.gmra.mxu1 %vm882_vm5, %v14669_v31  ;;  %v10282_v19 = vrot.slane %v10280_v11, 5  ;;  %v8937_v31 = vrot.slane %v8935_v6, 4  ;;  %v8941_v11 = vshll.u32 %v8644_v10, 16  ;;  %v10273_v6 = vsel %vm15272_vm7, %v10268_v37, %v18929_v58 }
 0x58e   : > { %v18960_v50 = vadd.f32 %v18890_v51, %v9917_v48  ;;  %v10285_v51 = vshrl.u32 %v14230_v1, 16  ;;  %v10298_v48 = vshrl.u32 %v14231_v59, 16  ;;  %v9409_v58 = vrot.slane %v8644_v10, 5  ;;  %v14232_v59 = vld [vmem:[%s17828_s8 + $0xa4] sm:$0x1] }
 0x58f   : > { %v9156_v27 = vpop.f32.mrf.mxu3  ;;  %v10283_v5 = vsel %vm15272_vm7, %v10278_v20, %v10282_v19  ;;  %v8938_v24 = vor.u32 %v8937_v31, %v18963_v36  ;;  %v18986_v37 = vrot.slane %v10294_v7, 5  ;;  %v10404_v19 = vunpack.c.l.b16 %v10273_v6  ;;  %v18997_v10 = vld [vmem:[%s17828_s8 + $0x94] sm:$0xf] }
 0x590   : > { %v9233_v26 = vadd.f32 %v9156_v27, %v20075_v41  ;;  %v14059_v41 = vrot.slane %v9274_v15, 9  ;;  %v10287_v16 = vrot.slane %v10285_v51, 4  ;;  %v10300_v20 = vrot.slane %v10298_v48, 4 }
 0x591   : > { %v10405_v31 = vunpack.c.l.b16 %v10283_v5  ;;  %v8939_v51 = vrot.slane %v8938_v24, 4  ;;  %v10304_v6 = vshll.u32 %v14232_v59, 16 }
 0x592   : > { %v9631_v32 = vadd.f32 %v9554_v57, %v9233_v26  ;;  %14253 = vmatmul.msk.bf16.gmra.mxu2 %vm882_vm5, %v10424_v29  ;;  %v18968_v40 = vpop.f32.mrf.mxu1  ;;  %v9085_v57 = vpack.c.b16 %v9064_v22, %v9063_v52  ;;  %v8928_v29 = vor.u32 %v8927_v33, %v8924_v14  ;;  %v10290_v52 = vrot.slane %v10288_v61, 5  ;;  %v20077_v14 = vld [vmem:[#allocation9_spill] sm:$0xff] }
 0x593   : > { %v8943_v61 = vrot.slane %v8941_v11, 5 }
 0x594   : > { %v9918_v54 = vadd.f32 %v18880_v4, %v9631_v32  ;;  %v9559_v0 = vpop.f32.mrf.mxu0  ;;  %v9408_v4 = vrot.slane %v9406_v25, 4  ;;  %v8645_v32 = vld [vmem:[%s17828_s8 + $0x90] sm:$0xf]  ;;  %v8929_v1 = vrot.slane %v8928_v29, 4 }
 0x595   : > { %v18973_v27 = vpop.f32.mrf.mxu2  ;;  %v8946_v7 = vshrl.u32 %v8645_v32, 16  ;;  %v8949_v48 = vshll.u32 %v8645_v32, 16 }
 0x596   : > { %v18982_v22 = vadd.f32 %v18917_v13, %v9918_v54  ;;  %v9407_v13 = vsel %vm15248_vm3, %v14059_v41, %v9406_v25  ;;  %v14670_v54 = vld [vmem:[%s17828_s8 + $0x90] sm:$0xff]  ;;  %v9410_v29 = vsel %vm15248_vm3, %v9408_v4, %v9409_v58  ;;  %v10425_v25 = vpack.c.b16 %v10405_v31, %v10404_v19 }
 0x597   : > { %v9158_v26 = vpop.f32.mrf.mxu3  ;;  %14075 = vmatmul.msk.bf16.gmra.mxu0 %vm882_vm5, %v9483_v45  ;;  %v10291_v45 = vor.u32 %v10290_v52, %v10287_v16  ;;  %v8934_v24 = vsel %vm15272_vm7, %v8929_v1, %v18963_v36  ;;  %v9463_v41 = vunpack.c.l.b16 %v9407_v13  ;;  %v8944_v16 = vsel %vm15272_vm7, %v8939_v51, %v8943_v61  ;;  %v20078_v36 = vld [vmem:[#allocation10_spill] sm:$0xff] }
 0x598   : > { %20076 = vst [vmem:[#allocation18_spill] sm:$0xff] %v18982_v22  ;;  %v9234_v33 = vadd.f32 %v9158_v26, %v20077_v14  ;;  %v8959_v4 = vshrl.u32 %v18997_v10, 16  ;;  %v8951_v32 = vrot.slane %v8949_v48, 5  ;;  %v10306_v1 = vrot.slane %v10304_v6, 5  ;;  %v9275_v6 = vld [vmem:[%s17828_s8 + $0x90] sm:$0xe] }
 0x599   : > { %v10292_v58 = vrot.slane %v10291_v45, 4  ;;  %v9065_v51 = vunpack.c.l.b16 %v8934_v24  ;;  %v14234_v45 = vld [vmem:[%s17828_s8 + $0xac] sm:$0xf] }
 0x59a   : > { %v9632_v15 = vadd.f32 %v18949_v46, %v9234_v33  ;;  %v18994_v26 = vpop.f32.mrf.mxu1  ;;  %v10301_v46 = vor.u32 %v10300_v20, %v18986_v37  ;;  %v9464_v33 = vunpack.c.l.b16 %v9410_v29  ;;  %v8948_v20 = vrot.slane %v8946_v7, 4 }
 0x59b   : > { %v8961_v13 = vrot.slane %v8959_v4, 4  ;;  %v10297_v29 = vsel %vm15272_vm7, %v10292_v58, %v18986_v37 }
 0x59c   : > { %14042 = vmatmul.msk.bf16.gmra.mxu3 %vm882_vm5, %v9085_v57  ;;  %v9561_v11 = vpop.f32.mrf.mxu0  ;;  %v8955_v57 = vshll.u32 %v18997_v10, 16  ;;  %v9919_v52 = vadd.f32 %v18911_v18, %v9632_v15  ;;  %v10302_v31 = vrot.slane %v10301_v46, 4  ;;  %v9066_v18 = vunpack.c.l.b16 %v8944_v16  ;;  %v8647_v46 = vld [vmem:[%s17828_s8 + $0x98] sm:$0x1] }
 0x59d   : > { %v19003_v5 = vpop.f32.mrf.mxu2  ;;  %14189 = vmatmul.msk.bf16.gmra.mxu1 %vm882_vm5, %v14670_v54  ;;  %v14233_v54 = vld [vmem:[%s17828_s8 + $0xa8] sm:$0xf]  ;;  %v9484_v7 = vpack.c.b16 %v9464_v33, %v9463_v41  ;;  %v9413_v41 = vrot.slane %v18997_v10, 5  ;;  %v8965_v58 = vshll.u32 %v8647_v46, 16 }
 0x59e   : > { %v19016_v59 = vadd.f32 %v18951_v47, %v9919_v52  ;;  %v19019_v15 = vrot.slane %v8955_v57, 5  ;;  %v8952_v47 = vor.u32 %v8951_v32, %v8948_v20  ;;  %v10312_v24 = vshll.u32 %v14233_v54, 16 }
 0x59f   : > { %v9161_v14 = vpop.f32.mrf.mxu3  ;;  %v10318_v52 = vshll.u32 %v14234_v45, 16  ;;  %v9086_v33 = vpack.c.b16 %v9066_v18, %v9065_v51  ;;  %v10406_v32 = vunpack.c.l.b16 %v10297_v29  ;;  %v9415_v18 = vrot.slane %v9413_v41, 4 }
 0x5a0   : > { %v9235_v19 = vadd.f32 %v9161_v14, %v20078_v36  ;;  %20079 = vst [vmem:[#allocation19_spill] sm:$0xff] %v19016_v59  ;;  %v10322_v14 = vshrl.u32 %v14234_v45, 16  ;;  %v8962_v37 = vor.u32 %v8961_v13, %v19019_v15  ;;  %v8953_v10 = vrot.slane %v8952_v47, 4  ;;  %v14671_v59 = vld [vmem:[%s17828_s8 + $0x9c] sm:$0xff] }
 0x5a1   : > { %v10314_v51 = vrot.slane %v10312_v24, 5  ;;  %v9416_v13 = vrot.slane %v8647_v46, 5  ;;  %v19053_v24 = vld [vmem:[%s17828_s8 + $0xa0] sm:$0xf] }
 0x5a2   : > { %v9633_v61 = vadd.f32 %v9559_v0, %v9235_v19  ;;  %14254 = vmatmul.msk.bf16.gmra.mxu2 %vm882_vm5, %v10425_v25  ;;  %v19023_v48 = vpop.f32.mrf.mxu1  ;;  %v10307_v0 = vsel %vm15272_vm7, %v10302_v31, %v10306_v1  ;;  %v10309_v25 = vshrl.u32 %v14233_v54, 16  ;;  %v14060_v19 = vrot.slane %v9275_v6, 9 }
 0x5a3   : > { %v10407_v36 = vunpack.c.l.b16 %v10307_v0  ;;  %v19042_v54 = vrot.slane %v10318_v52, 5  ;;  %v10324_v45 = vrot.slane %v10322_v14, 4  ;;  %v8963_v0 = vrot.slane %v8962_v37, 4 }
 0x5a4   : > { %v9920_v16 = vadd.f32 %v18936_v38, %v9633_v61  ;;  %v9564_v57 = vpop.f32.mrf.mxu0  ;;  %v20081_v38 = vld [vmem:[#allocation11_spill] sm:$0xff]  ;;  %v10311_v61 = vrot.slane %v10309_v25, 4  ;;  %v8967_v6 = vrot.slane %v8965_v58, 5  ;;  %v9414_v47 = vsel %vm15248_vm3, %v14060_v19, %v9413_v41 }
 0x5a5   : > { %v19033_v4 = vpop.f32.mrf.mxu2  ;;  %v9417_v14 = vsel %vm15248_vm3, %v9415_v18, %v9416_v13  ;;  %v10325_v37 = vor.u32 %v10324_v45, %v19042_v54  ;;  %v9465_v19 = vunpack.c.l.b16 %v9414_v47  ;;  %v8650_v47 = vld [vmem:[%s17828_s8 + $0xa4] sm:$0x1] }
 0x5a6   : > { %v19038_v31 = vadd.f32 %v18973_v27, %v9920_v16  ;;  %v14235_v27 = vld [vmem:[%s17828_s8 + $0xb0] sm:$0x1]  ;;  %v10315_v25 = vor.u32 %v10314_v51, %v10311_v61  ;;  %v8968_v58 = vsel %vm15272_vm7, %v8963_v0, %v8967_v6  ;;  %v9466_v61 = vunpack.c.l.b16 %v9417_v14  ;;  %v14236_v6 = vld [vmem:[%s17828_s8 + $0xb4] sm:$0xf] }
 0x5a7   : > { %v9163_v20 = vpop.f32.mrf.mxu3  ;;  %14076 = vmatmul.msk.bf16.gmra.mxu0 %vm882_vm5, %v9484_v7  ;;  %v10426_v7 = vpack.c.b16 %v10407_v36, %v10406_v32 }
 0x5a8   : > { %20080 = vst [vmem:[#allocation9_spill] sm:$0xff] %v19038_v31  ;;  %v9236_v1 = vadd.f32 %v9163_v20, %v20081_v38  ;;  %v8648_v31 = vld [vmem:[%s17828_s8 + $0x9c] sm:$0xf]  ;;  %v8983_v38 = vshrl.u32 %v19053_v24, 16  ;;  %v10316_v51 = vrot.slane %v10315_v25, 4 }
 0x5a9   : > { %v8970_v41 = vshrl.u32 %v8648_v31, 16  ;;  %v8973_v20 = vshll.u32 %v8648_v31, 16  ;;  %v9068_v31 = vunpack.c.l.b16 %v8968_v58 }
 0x5aa   : > { %v9634_v29 = vadd.f32 %v9561_v11, %v9236_v1  ;;  %v19046_v16 = vpop.f32.mrf.mxu1  ;;  %v8958_v11 = vsel %vm15272_vm7, %v8953_v10, %v19019_v15  ;;  %v8979_v15 = vshll.u32 %v19053_v24, 16  ;;  %v20082_v1 = vld [vmem:[#allocation12_spill] sm:$0xff]  ;;  %v8985_v25 = vrot.slane %v8983_v38, 4 }
 0x5ab   : > { %v8975_v0 = vrot.slane %v8973_v20, 5  ;;  %v8989_v38 = vshll.u32 %v8650_v47, 16 }
 0x5ac   : > { %14043 = vmatmul.msk.bf16.gmra.mxu3 %vm882_vm5, %v9086_v33  ;;  %v9566_v46 = vpop.f32.mrf.mxu0  ;;  %v10328_v33 = vshll.u32 %v14235_v27, 16  ;;  %v9921_v32 = vadd.f32 %v18968_v40, %v9634_v29  ;;  %v10326_v40 = vrot.slane %v10325_v37, 4  ;;  %v8972_v29 = vrot.slane %v8970_v41, 4  ;;  %v9276_v37 = vld [vmem:[%s17828_s8 + $0x9c] sm:$0xe] }
 0x5ad   : > { %v19055_v52 = vpop.f32.mrf.mxu2  ;;  %14190 = vmatmul.msk.bf16.gmra.mxu1 %vm882_vm5, %v14671_v59  ;;  %v9067_v59 = vunpack.c.l.b16 %v8958_v11  ;;  %v19078_v14 = vrot.slane %v8979_v15, 5  ;;  %v10321_v11 = vsel %vm15272_vm7, %v10316_v51, %v19042_v54  ;;  %v10336_v15 = vshll.u32 %v14236_v6, 16 }
 0x5ae   : > { %v19071_v18 = vadd.f32 %v19003_v5, %v9921_v32  ;;  %v10330_v13 = vrot.slane %v10328_v33, 5  ;;  %v9485_v5 = vpack.c.b16 %v9466_v61, %v9465_v19  ;;  %v10333_v32 = vshrl.u32 %v14236_v6, 16 }
 0x5af   : > { %v9166_v36 = vpop.f32.mrf.mxu3  ;;  %v9087_v58 = vpack.c.b16 %v9068_v31, %v9067_v59  ;;  %v8976_v19 = vor.u32 %v8975_v0, %v8972_v29  ;;  %v10408_v61 = vunpack.c.l.b16 %v10321_v11  ;;  %v20085_v59 = vld [vmem:[#allocation13_spill] sm:$0xff]  ;;  %v14672_v29 = vld [vmem:[%s17828_s8 + $0xa8] sm:$0xff]  ;;  %v10338_v6 = vrot.slane %v10336_v15, 5 }
 0x5b0   : > { %v9237_v10 = vadd.f32 %v9166_v36, %v20082_v1  ;;  %20083 = vst [vmem:[#allocation10_spill] sm:$0xff] %v19071_v18  ;;  %v14237_v36 = vld [vmem:[%s17828_s8 + $0xb8] sm:$0xf]  ;;  %v10331_v20 = vsel %vm15272_vm7, %v10326_v40, %v10330_v13  ;;  %v10335_v0 = vrot.slane %v10333_v32, 4 }
 0x5b1   : > { %v10342_v1 = vshll.u32 %v14237_v36, 16  ;;  %v10409_v40 = vunpack.c.l.b16 %v10331_v20 }
 0x5b2   : > { %v9635_v45 = vadd.f32 %v9564_v57, %v9237_v10  ;;  %14255 = vmatmul.msk.bf16.gmra.mxu2 %vm882_vm5, %v10426_v7  ;;  %v19075_v27 = vpop.f32.mrf.mxu1  ;;  %v9420_v57 = vrot.slane %v19053_v24, 5  ;;  %v10346_v10 = vshrl.u32 %v14237_v36, 16  ;;  %v14061_v24 = vrot.slane %v9276_v37, 9  ;;  %v19102_v37 = vld [vmem:[%s17828_s8 + $0xac] sm:$0xf] }
 0x5b3   : > { %v19098_v11 = vrot.slane %v10342_v1, 5  ;;  %v10339_v1 = vor.u32 %v10338_v6, %v10335_v0 }
 0x5b4   : > { %v9922_v7 = vadd.f32 %v18994_v26, %v9635_v45  ;;  %v9569_v33 = vpop.f32.mrf.mxu0  ;;  %v8986_v26 = vor.u32 %v8985_v25, %v19078_v14  ;;  %v9422_v13 = vrot.slane %v9420_v57, 4  ;;  %v9423_v45 = vrot.slane %v8650_v47, 5  ;;  %v8651_v25 = vld [vmem:[%s17828_s8 + $0xa8] sm:$0xf] }
 0x5b5   : > { %v19087_v41 = vpop.f32.mrf.mxu2  ;;  %v10348_v18 = vrot.slane %v10346_v10, 4  ;;  %v9421_v47 = vsel %vm15248_vm3, %v14061_v24, %v9420_v57  ;;  %v8994_v10 = vshrl.u32 %v8651_v25, 16  ;;  %v10340_v6 = vrot.slane %v10339_v1, 4 }
 0x5b6   : > { %v19093_v51 = vadd.f32 %v19033_v4, %v9922_v7  ;;  %v8977_v7 = vrot.slane %v8976_v19, 4  ;;  %v8987_v20 = vrot.slane %v8986_v26, 4  ;;  %v9003_v19 = vshll.u32 %v19102_v37, 16 }
 0x5b7   : > { %v9168_v54 = vpop.f32.mrf.mxu3  ;;  %14077 = vmatmul.msk.bf16.gmra.mxu0 %vm882_vm5, %v9485_v5  ;;  %v10427_v5 = vpack.c.b16 %v10409_v40, %v10408_v61  ;;  %v9007_v61 = vshrl.u32 %v19102_v37, 16  ;;  %v9467_v40 = vunpack.c.l.b16 %v9421_v47  ;;  %v8653_v47 = vld [vmem:[%s17828_s8 + $0xb0] sm:$0x1] }
 0x5b8   : > { %20084 = vst [vmem:[#allocation11_spill] sm:$0xff] %v19093_v51  ;;  %v9238_v31 = vadd.f32 %v9168_v54, %v20085_v59  ;;  %v8991_v54 = vrot.slane %v8989_v38, 5  ;;  %v14238_v59 = vld [vmem:[%s17828_s8 + $0xbc] sm:$0x1]  ;;  %v8982_v24 = vsel %vm15272_vm7, %v8977_v7, %v19078_v14 }
 0x5b9   : > { %v10352_v38 = vshll.u32 %v14238_v59, 16 }
 0x5ba   : > { %v9636_v36 = vadd.f32 %v9566_v46, %v9238_v31  ;;  %v19104_v4 = vpop.f32.mrf.mxu1  ;;  %v9424_v46 = vsel %vm15248_vm3, %v9422_v13, %v9423_v45  ;;  %v8997_v31 = vshll.u32 %v8651_v25, 16  ;;  %v20086_v13 = vld [vmem:[#allocation14_spill] sm:$0xff]  ;;  %v8992_v0 = vsel %vm15272_vm7, %v8987_v20, %v8991_v54 }
 0x5bb   : > { %v8996_v25 = vrot.slane %v8994_v10, 4  ;;  %v10354_v7 = vrot.slane %v10352_v38, 5  ;;  %v9069_v20 = vunpack.c.l.b16 %v8982_v24  ;;  %v10345_v38 = vsel %vm15272_vm7, %v10340_v6, %v19098_v11 }
 0x5bc   : > { %14044 = vmatmul.msk.bf16.gmra.mxu3 %vm882_vm5, %v9087_v58  ;;  %v9571_v32 = vpop.f32.mrf.mxu0  ;;  %v10349_v58 = vor.u32 %v10348_v18, %v19098_v11  ;;  %v9923_v57 = vadd.f32 %v19023_v48, %v9636_v36  ;;  %v8999_v48 = vrot.slane %v8997_v31, 5  ;;  %v19128_v36 = vrot.slane %v9003_v19, 5 }
 0x5bd   : > { %v19112_v15 = vpop.f32.mrf.mxu2  ;;  %14191 = vmatmul.msk.bf16.gmra.mxu1 %vm882_vm5, %v14672_v29  ;;  %v9468_v29 = vunpack.c.l.b16 %v9424_v46  ;;  %v9070_v46 = vunpack.c.l.b16 %v8992_v0  ;;  %v9013_v19 = vshll.u32 %v8653_v47, 16  ;;  %v10410_v6 = vunpack.c.l.b16 %v10345_v38 }
 0x5be   : > { %v19126_v18 = vadd.f32 %v19055_v52, %v9923_v57  ;;  %v10350_v14 = vrot.slane %v10349_v58, 4  ;;  %v9277_v57 = vld [vmem:[%s17828_s8 + $0xa8] sm:$0xe]  ;;  %v14239_v58 = vld [vmem:[%s17828_s8 + $0xc0] sm:$0xf] }
 0x5bf   : > { %v9171_v26 = vpop.f32.mrf.mxu3  ;;  %v9486_v52 = vpack.c.b16 %v9468_v29, %v9467_v40  ;;  %v10357_v40 = vshrl.u32 %v14239_v58, 16  ;;  %v14062_v11 = vrot.slane %v9277_v57, 9  ;;  %v9015_v22 = vrot.slane %v9013_v19, 5  ;;  %v14241_v57 = vld [vmem:[%s17828_s8 + $0xc8] sm:$0x1] }
 0x5c0   : > { %v9239_v45 = vadd.f32 %v9171_v26, %v20086_v13  ;;  %20087 = vst [vmem:[#allocation12_spill] sm:$0xff] %v19126_v18  ;;  %v9009_v26 = vrot.slane %v9007_v61, 4  ;;  %v14240_v13 = vld [vmem:[%s17828_s8 + $0xc4] sm:$0xf]  ;;  %v10355_v61 = vsel %vm15272_vm7, %v10350_v14, %v10354_v7 }
 0x5c1   : > { %v10366_v0 = vshll.u32 %v14240_v13, 16  ;;  %v10370_v29 = vshrl.u32 %v14240_v13, 16  ;;  %v10411_v14 = vunpack.c.l.b16 %v10355_v61  ;;  %v14673_v13 = vld [vmem:[%s17828_s8 + $0xb4] sm:$0xff] }
 0x5c2   : > { %v9637_v59 = vadd.f32 %v9569_v33, %v9239_v45  ;;  %14256 = vmatmul.msk.bf16.gmra.mxu2 %vm882_vm5, %v10427_v5  ;;  %v19132_v54 = vpop.f32.mrf.mxu1  ;;  %v9000_v33 = vor.u32 %v8999_v48, %v8996_v25  ;;  %v9427_v5 = vrot.slane %v19102_v37, 5  ;;  %v9010_v24 = vor.u32 %v9009_v26, %v19128_v36  ;;  %v20089_v37 = vld [vmem:[#allocation15_spill] sm:$0xff] }
 0x5c3   : > { %v10360_v45 = vshll.u32 %v14239_v58, 16  ;;  %v9430_v26 = vrot.slane %v8653_v47, 5 }
 0x5c4   : > { %v9924_v1 = vadd.f32 %v19046_v16, %v9637_v59  ;;  %v9574_v10 = vpop.f32.mrf.mxu0  ;;  %v9088_v59 = vpack.c.b16 %v9070_v46, %v9069_v20  ;;  %v9429_v7 = vrot.slane %v9427_v5, 4  ;;  %v9001_v58 = vrot.slane %v9000_v33, 4 }
 0x5c5   : > { %v19136_v31 = vpop.f32.mrf.mxu2  ;;  %v9011_v51 = vrot.slane %v9010_v24, 4  ;;  %v10368_v20 = vrot.slane %v10366_v0, 5  ;;  %v10372_v46 = vrot.slane %v10370_v29, 4  ;;  %v10428_v33 = vpack.c.b16 %v10411_v14, %v10410_v6  ;;  %v8655_v24 = vld [vmem:[%s17828_s8 + $0xb8] sm:$0xf] }
 0x5c6   : > { %v19148_v25 = vadd.f32 %v19087_v41, %v9924_v1  ;;  %v10359_v1 = vrot.slane %v10357_v40, 4  ;;  %v9431_v47 = vsel %vm15248_vm3, %v9429_v7, %v9430_v26  ;;  %v9006_v19 = vsel %vm15272_vm7, %v9001_v58, %v19128_v36 }
 0x5c7   : > { %v9173_v16 = vpop.f32.mrf.mxu3  ;;  %14078 = vmatmul.msk.bf16.gmra.mxu0 %vm882_vm5, %v9486_v52  ;;  %v8654_v52 = vld [vmem:[%s17828_s8 + $0xb4] sm:$0xf]  ;;  %v9016_v29 = vsel %vm15272_vm7, %v9011_v51, %v9015_v22  ;;  %v9470_v6 = vunpack.c.l.b16 %v9431_v47  ;;  %v9071_v14 = vunpack.c.l.b16 %v9006_v19  ;;  %v9027_v26 = vshll.u32 %v8655_v24, 16  ;;  %v8656_v47 = vld [vmem:[%s17828_s8 + $0xbc] sm:$0x1] }
 0x5c8   : > { %20088 = vst [vmem:[#allocation13_spill] sm:$0xff] %v19148_v25  ;;  %v9240_v48 = vadd.f32 %v9173_v16, %v20089_v37  ;;  %v10362_v16 = vrot.slane %v10360_v45, 5  ;;  %v9018_v40 = vshrl.u32 %v8654_v52, 16  ;;  %v9021_v45 = vshll.u32 %v8654_v52, 16 }
 0x5c9   : > { %v9031_v36 = vshrl.u32 %v8655_v24, 16  ;;  %v9072_v52 = vunpack.c.l.b16 %v9016_v29  ;;  %v9434_v19 = vrot.slane %v8655_v24, 5 }
 0x5ca   : > { %v9638_v18 = vadd.f32 %v9571_v32, %v9240_v48  ;;  %v19153_v41 = vpop.f32.mrf.mxu1  ;;  %v9428_v32 = vsel %vm15248_vm3, %v14062_v11, %v9427_v5  ;;  %v10363_v37 = vor.u32 %v10362_v16, %v10359_v1  ;;  %v10373_v48 = vor.u32 %v10372_v46, %v10368_v20 }
 0x5cb   : > { %v10376_v5 = vshll.u32 %v14241_v57, 16  ;;  %v9469_v7 = vunpack.c.l.b16 %v9428_v32  ;;  %v9020_v25 = vrot.slane %v9018_v40, 4  ;;  %v9023_v22 = vrot.slane %v9021_v45, 5  ;;  %v9278_v45 = vld [vmem:[%s17828_s8 + $0xb4] sm:$0xe] }
 0x5cc   : > { %14045 = vmatmul.msk.bf16.gmra.mxu3 %vm882_vm5, %v9088_v59  ;;  %v9576_v38 = vpop.f32.mrf.mxu0  ;;  %v20090_v59 = vld [vmem:[#allocation16_spill] sm:$0xff]  ;;  %v9925_v58 = vadd.f32 %v19075_v27, %v9638_v18  ;;  %v10364_v1 = vrot.slane %v10363_v37, 4  ;;  %v10374_v16 = vrot.slane %v10373_v48, 4  ;;  %v9033_v40 = vrot.slane %v9031_v36, 4 }
 0x5cd   : > { %v19158_v61 = vpop.f32.mrf.mxu2  ;;  %14192 = vmatmul.msk.bf16.gmra.mxu1 %vm882_vm5, %v14673_v13  ;;  %v10378_v46 = vrot.slane %v10376_v5, 5  ;;  %v9487_v32 = vpack.c.b16 %v9470_v6, %v9469_v7  ;;  %v9037_v48 = vshll.u32 %v8656_v47, 16  ;;  %v20091_v5 = vld [vmem:[#allocation17_spill] sm:$0xff]  ;;  %v9437_v7 = vrot.slane %v8656_v47, 5  ;;  %v14421_v6 = vld [vmem:[%s17828_s8 + $0x18] sm:$0xf] }
 0x5ce   : > { %v19177_v57 = vadd.f32 %v19112_v15, %v9925_v58  ;;  %v9089_v15 = vpack.c.b16 %v9072_v52, %v9071_v14  ;;  %v10369_v24 = vsel %vm15272_vm7, %v10364_v1, %v10368_v20  ;;  %v14422_v52 = vld [vmem:[%s17828_s8 + $0x1c] sm:$0xf] }
 0x5cf   : > { %v9176_v0 = vpop.f32.mrf.mxu3  ;;  %v10412_v36 = vunpack.c.l.b16 %v10369_v24  ;;  %v9039_v1 = vrot.slane %v9037_v48, 5  ;;  %v14423_v48 = vld [vmem:[%s17828_s8 + $0x20] sm:$0x1] }
 0x5d0   : > { %v9241_v11 = vadd.f32 %v9176_v0, %v20090_v59  ;;  %v9024_v0 = vor.u32 %v9023_v22, %v9020_v25  ;;  %v9436_v25 = vrot.slane %v9434_v19, 4  ;;  %v11336_v22 = vshrl.u32 %v14421_v6, 16 }
 0x5d2   : > { %v9639_v13 = vadd.f32 %v9574_v10, %v9241_v11  ;;  %14257 = vmatmul.msk.bf16.gmra.mxu2 %vm882_vm5, %v10428_v33  ;;  %v19174_v51 = vpop.f32.mrf.mxu1  ;;  %v9029_v33 = vrot.slane %v9027_v26, 5  ;;  %v14063_v11 = vrot.slane %v9278_v45, 9  ;;  %v9025_v58 = vrot.slane %v9024_v0, 4 }
 0x5d3   : > { %v11345_v45 = vshll.u32 %v14422_v52, 16  ;;  %v11349_v0 = vshrl.u32 %v14422_v52, 16 }
 0x5d4   : > { %v9926_v27 = vadd.f32 %v19104_v4, %v9639_v13  ;;  %v9579_v18 = vpop.f32.mrf.mxu0  ;;  %v10379_v4 = vsel %vm15272_vm7, %v10374_v16, %v10378_v46  ;;  %v14674_v13 = vld [vmem:[%s17828_s8 + $0xc0] sm:$0xff]  ;;  %v9435_v16 = vsel %vm15248_vm3, %v14063_v11, %v9434_v19  ;;  %v9438_v46 = vsel %vm15248_vm3, %v9436_v25, %v9437_v7 }
 0x5d5   : > { %v19181_v10 = vpop.f32.mrf.mxu2  ;;  %v10413_v14 = vunpack.c.l.b16 %v10379_v4  ;;  %v9471_v19 = vunpack.c.l.b16 %v9435_v16  ;;  %v9472_v4 = vunpack.c.l.b16 %v9438_v46  ;;  %v11347_v7 = vrot.slane %v11345_v45, 5 }
 0x5d6   : > { %v19185_v29 = vadd.f32 %v19136_v31, %v9926_v27  ;;  %v9034_v31 = vor.u32 %v9033_v40, %v9029_v33  ;;  %v11338_v40 = vrot.slane %v11336_v22, 4 }
 0x5d7   : > { %v9178_v37 = vpop.f32.mrf.mxu3  ;;  %14079 = vmatmul.msk.bf16.gmra.mxu0 %vm882_vm5, %v9487_v32 }
 0x5d8   : > { %v9242_v59 = vadd.f32 %v9178_v37, %v20091_v5  ;;  %v9035_v27 = vrot.slane %v9034_v31, 4  ;;  %v10429_v37 = vpack.c.b16 %v10413_v14, %v10412_v36  ;;  %v14486_v5 = vld [vmem:[%s17828_s8 + $0x18] sm:$0xe]  ;;  %v11351_v31 = vrot.slane %v11349_v0, 4 }
 0x5da   : > { %v9640_v26 = vadd.f32 %v9576_v38, %v9242_v59  ;;  %v19196_v20 = vpop.f32.mrf.mxu1  ;;  %v11339_v38 = vshll.u32 %v14421_v6, 16  ;;  %v12007_v59 = vrot.slane %v14422_v52, 5  ;;  %v11355_v6 = vshll.u32 %v14423_v48, 16 }
 0x5db   : > { %v9040_v36 = vsel %vm15272_vm7, %v9035_v27, %v9039_v1  ;;  %v11352_v16 = vor.u32 %v11351_v31, %v11347_v7  ;;  %v9488_v1 = vpack.c.b16 %v9472_v4, %v9471_v19 }
 0x5dc   : > { %14046 = vmatmul.msk.bf16.gmra.mxu3 %vm882_vm5, %v9089_v15  ;;  %v9581_v32 = vpop.f32.mrf.mxu0  ;;  %v9030_v15 = vsel %vm15272_vm7, %v9025_v58, %v9029_v33  ;;  %v11341_v11 = vrot.slane %v11339_v38, 5  ;;  %v9927_v33 = vadd.f32 %v19132_v54, %v9640_v26  ;;  %v11357_v46 = vrot.slane %v11355_v6, 5 }
 0x5dd   : > { %v19203_v47 = vpop.f32.mrf.mxu2  ;;  %14193 = vmatmul.msk.bf16.gmra.mxu1 %vm882_vm5, %v14674_v13  ;;  %v9073_v14 = vunpack.c.l.b16 %v9030_v15  ;;  %v14502_v13 = vrot.slane %v14486_v5, 9  ;;  %v12009_v38 = vrot.slane %v12007_v59, 4  ;;  %v11353_v27 = vrot.slane %v11352_v16, 4 }
 0x5de   : > { %v11342_v22 = vor.u32 %v11341_v11, %v11338_v40  ;;  %v19218_v0 = vadd.f32 %v19158_v61, %v9927_v33 }
 0x5df   : > { %v9181_v24 = vpop.f32.mrf.mxu3  ;;  %v12008_v4 = vsel %vm15248_vm3, %v14502_v13, %v12007_v59 }
 0x5e0   : > { %v9243_v25 = vadd.f32 %v9181_v24, %v18393_v35  ;;  %v12010_v35 = vrot.slane %v14423_v48, 5  ;;  %v11343_v45 = vrot.slane %v11342_v22, 4  ;;  %v9074_v24 = vunpack.c.l.b16 %v9040_v36 }
 0x5e1   : > { %v12119_v36 = vunpack.c.l.b16 %v12008_v4 }
 0x5e2   : > { %v9641_v58 = vadd.f32 %v9579_v18, %v9243_v25  ;;  %14258 = vmatmul.msk.bf16.gmra.mxu2 %vm882_vm5, %v10429_v37  ;;  %v19215_v52 = vpop.f32.mrf.mxu1  ;;  %v11348_v40 = vsel %vm15272_vm7, %v11343_v45, %v11347_v7  ;;  %v11358_v37 = vsel %vm15272_vm7, %v11353_v27, %v11357_v46  ;;  %v9090_v11 = vpack.c.b16 %v9074_v24, %v9073_v14  ;;  %v14259_v25 = vld [vmem:[%s17828_s8 + $0xc] sm:$0xe]  ;;  %v14909_v7 = vld [vmem:[%s17828_s8 + $0x10] sm:$0xf]  ;;  %v14910_v14 = vld [vmem:[%s17828_s8 + $0x14] sm:$0x1] }
 0x5e3   : > { %v11721_v15 = vunpack.c.l.b16 %v11348_v40  ;;  %v11722_v48 = vunpack.c.l.b16 %v11358_v37  ;;  %v10668_v31 = vrot.slane %v14909_v7, 5  ;;  %v10671_v16 = vrot.slane %v14910_v14, 5  ;;  %v14426_v40 = vld [vmem:[%s17828_s8 + $0x2c] sm:$0x1]  ;;  %v14487_v37 = vld [vmem:[%s17828_s8 + $0x24] sm:$0xe] }
 0x5e4   : > { %v9928_v54 = vadd.f32 %v19153_v41, %v9641_v58  ;;  %v9584_v18 = vpop.f32.mrf.mxu0  ;;  %v12011_v41 = vsel %vm15248_vm3, %v12009_v38, %v12010_v35  ;;  %v14425_v58 = vld [vmem:[%s17828_s8 + $0x28] sm:$0xf]  ;;  %v12017_v14 = vrot.slane %v14426_v40, 5 }
 0x5e5   : > { %v19221_v26 = vpop.f32.mrf.mxu2  ;;  %v12120_v22 = vunpack.c.l.b16 %v12011_v41  ;;  %v11753_v33 = vpack.c.b16 %v11722_v48, %v11721_v15  ;;  %v10670_v45 = vrot.slane %v10668_v31, 4  ;;  %v11369_v24 = vshll.u32 %v14425_v58, 16 }
 0x5e6   : > { %v19228_v61 = vadd.f32 %v19181_v10, %v9928_v54  ;;  %v14424_v10 = vld [vmem:[%s17828_s8 + $0x24] sm:$0xf]  ;;  %v12014_v15 = vrot.slane %v14425_v58, 5 }
 0x5e7   : > { %v9183_v19 = vpop.f32.mrf.mxu3  ;;  %14080 = vmatmul.msk.bf16.gmra.mxu0 %vm882_vm5, %v9488_v1  ;;  %v11360_v13 = vshrl.u32 %v14424_v10, 16  ;;  %v11363_v46 = vshll.u32 %v14424_v10, 16  ;;  %v11373_v1 = vshrl.u32 %v14425_v58, 16  ;;  %v12151_v27 = vpack.c.b16 %v12120_v22, %v12119_v36 }
 0x5e8   : > { %v9244_v5 = vadd.f32 %v9183_v19, %v18403_v49  ;;  %v14275_v49 = vrot.slane %v14259_v25, 9  ;;  %v11371_v41 = vrot.slane %v11369_v24, 5  ;;  %v10672_v25 = vsel %vm15248_vm3, %v10670_v45, %v10671_v16  ;;  %v14675_v16 = vld [vmem:[%s17828_s8 + $0x18] sm:$0xff] }
 0x5e9   : > { %v11365_v19 = vrot.slane %v11363_v46, 5  ;;  %v11375_v48 = vrot.slane %v11373_v1, 4  ;;  %v14503_v22 = vrot.slane %v14487_v37, 9  ;;  %v10781_v24 = vunpack.c.l.b16 %v10672_v25 }
 0x5ea   : > { %v9642_v6 = vadd.f32 %v9581_v32, %v9244_v5  ;;  %v19240_v59 = vpop.f32.mrf.mxu1  ;;  %v11362_v32 = vrot.slane %v11360_v13, 4  ;;  %v11379_v5 = vshll.u32 %v14426_v40, 16  ;;  %v12016_v13 = vrot.slane %v12014_v15, 4 }
 0x5eb   : > { %v12015_v40 = vsel %vm15248_vm3, %v14503_v22, %v12014_v15 }
 0x5ec   : > { %14047 = vmatmul.msk.bf16.gmra.mxu3 %vm882_vm5, %v9090_v11  ;;  %v9586_v38 = vpop.f32.mrf.mxu0  ;;  %v10669_v11 = vsel %vm15248_vm3, %v14275_v49, %v10668_v31  ;;  %v11366_v7 = vor.u32 %v11365_v19, %v11362_v32  ;;  %v9929_v10 = vadd.f32 %v19174_v51, %v9642_v6  ;;  %v11381_v58 = vrot.slane %v11379_v5, 5 }
 0x5ed   : > { %v19244_v35 = vpop.f32.mrf.mxu2  ;;  %14470 = vmatmul.msk.bf16.vlgmr.msra.gmra.mxu1 %vm882_vm5, %v11753_v33  ;;  %v11376_v33 = vor.u32 %v11375_v48, %v11371_v41  ;;  %v10780_v49 = vunpack.c.l.b16 %v10669_v11  ;;  %v14911_v48 = vld [vmem:[%s17828_s8 + $0x1c] sm:$0xf]  ;;  %v12121_v25 = vunpack.c.l.b16 %v12015_v40 }
 0x5ee   : > { %v11367_v46 = vrot.slane %v11366_v7, 4  ;;  %v19259_v31 = vadd.f32 %v19203_v47, %v9929_v10  ;;  %v10675_v5 = vrot.slane %v14911_v48, 5 }
 0x5ef   : > { %v9186_v54 = vpop.f32.mrf.mxu3  ;;  %v11377_v45 = vrot.slane %v11376_v33, 4  ;;  %v14912_v33 = vld [vmem:[%s17828_s8 + $0x20] sm:$0x1] }
 0x5f0   : > { %v9245_v4 = vadd.f32 %v9186_v54, %v18419_v17  ;;  %v11372_v32 = vsel %vm15272_vm7, %v11367_v46, %v11371_v41  ;;  %v14260_v41 = vld [vmem:[%s17828_s8 + $0x18] sm:$0xe] }
 0x5f1   : > { %v11382_v1 = vsel %vm15272_vm7, %v11377_v45, %v11381_v58  ;;  %v11723_v47 = vunpack.c.l.b16 %v11372_v32  ;;  %v10678_v58 = vrot.slane %v14912_v33, 5  ;;  %v14429_v32 = vld [vmem:[%s17828_s8 + $0x38] sm:$0x1] }
 0x5f2   : > { %v9643_v36 = vadd.f32 %v9584_v18, %v9245_v4  ;;  %14519 = vmatmul.msk.bf16.vlgmr.msra.gmra.mxu2 %vm882_vm5, %v12151_v27  ;;  %v19256_v17 = vpop.f32.mrf.mxu1  ;;  %v11724_v37 = vunpack.c.l.b16 %v11382_v1  ;;  %v10812_v4 = vpack.c.b16 %v10781_v24, %v10780_v49  ;;  %v10677_v49 = vrot.slane %v10675_v5, 4  ;;  %v14488_v1 = vld [vmem:[%s17828_s8 + $0x30] sm:$0xe] }
 0x5f3   : > { %v12024_v33 = vrot.slane %v14429_v32, 5 }
 0x5f4   : > { %v9930_v51 = vadd.f32 %v19196_v20, %v9643_v36  ;;  %v9589_v18 = vpop.f32.mrf.mxu0  ;;  %v12018_v20 = vsel %vm15248_vm3, %v12016_v13, %v12017_v14  ;;  %v11754_v10 = vpack.c.b16 %v11724_v37, %v11723_v47  ;;  %v14428_v36 = vld [vmem:[%s17828_s8 + $0x34] sm:$0xf] }
 0x5f5   : > { %v19263_v6 = vpop.f32.mrf.mxu2  ;;  %v12122_v7 = vunpack.c.l.b16 %v12018_v20  ;;  %v11393_v24 = vshll.u32 %v14428_v36, 16  ;;  %v12021_v47 = vrot.slane %v14428_v36, 5 }
 0x5f6   : > { %v19270_v27 = vadd.f32 %v19221_v26, %v9930_v51  ;;  %v14427_v26 = vld [vmem:[%s17828_s8 + $0x30] sm:$0xf] }
 0x5f7   : > { %v9188_v54 = vpop.f32.mrf.mxu3  ;;  %14405 = vmatmul.msk.bf16.vlgmr.msra.gmra.mxu0 %vm882_vm5, %v14675_v16  ;;  %v11384_v22 = vshrl.u32 %v14427_v26, 16  ;;  %v11387_v13 = vshll.u32 %v14427_v26, 16  ;;  %v11397_v16 = vshrl.u32 %v14428_v36, 16  ;;  %v12152_v45 = vpack.c.b16 %v12122_v7, %v12121_v25 }
 0x5f8   : > { %v9246_v19 = vadd.f32 %v9188_v54, %v18454_v63  ;;  %v14276_v63 = vrot.slane %v14260_v41, 9  ;;  %v11395_v20 = vrot.slane %v11393_v24, 5  ;;  %v10679_v41 = vsel %vm15248_vm3, %v10677_v49, %v10678_v58  ;;  %v14676_v58 = vld [vmem:[%s17828_s8 + $0x24] sm:$0xff] }
 0x5f9   : > { %v11389_v54 = vrot.slane %v11387_v13, 5  ;;  %v11399_v37 = vrot.slane %v11397_v16, 4  ;;  %v14504_v7 = vrot.slane %v14488_v1, 9  ;;  %v10783_v24 = vunpack.c.l.b16 %v10679_v41 }
 0x5fa   : > { %v9644_v11 = vadd.f32 %v9586_v38, %v9246_v19  ;;  %v19282_v15 = vpop.f32.mrf.mxu1  ;;  %v11386_v38 = vrot.slane %v11384_v22, 4  ;;  %v11403_v19 = vshll.u32 %v14429_v32, 16  ;;  %v12023_v22 = vrot.slane %v12021_v47, 4 }
 0x5fb   : > { %v12022_v32 = vsel %vm15248_vm3, %v14504_v7, %v12021_v47 }
 0x5fc   : > { %14292 = vmatmul.msk.bf16.vlgmr.msra.gmra.mxu3 %vm882_vm5, %v10812_v4  ;;  %v9591_v14 = vpop.f32.mrf.mxu0  ;;  %v10676_v4 = vsel %vm15248_vm3, %v14276_v63, %v10675_v5  ;;  %v11390_v48 = vor.u32 %v11389_v54, %v11386_v38  ;;  %v9931_v26 = vadd.f32 %v19215_v52, %v9644_v11  ;;  %v11405_v36 = vrot.slane %v11403_v19, 5 }
 0x5fd   : > { %v19286_v46 = vpop.f32.mrf.mxu2  ;;  %14471 = vmatmul.msk.bf16.gmra.mxu1 %vm882_vm5, %v11754_v10  ;;  %v11400_v10 = vor.u32 %v11399_v37, %v11395_v20  ;;  %v10782_v63 = vunpack.c.l.b16 %v10676_v4  ;;  %v14913_v37 = vld [vmem:[%s17828_s8 + $0x28] sm:$0xf]  ;;  %v12123_v41 = vunpack.c.l.b16 %v12022_v32 }
 0x5fe   : > { %v11391_v13 = vrot.slane %v11390_v48, 4  ;;  %v19301_v5 = vadd.f32 %v19244_v35, %v9931_v26  ;;  %v10682_v19 = vrot.slane %v14913_v37, 5 }
 0x5ff   : > { %v9191_v51 = vpop.f32.mrf.mxu3  ;;  %v11401_v49 = vrot.slane %v11400_v10, 4  ;;  %v14914_v10 = vld [vmem:[%s17828_s8 + $0x2c] sm:$0x1] }
 0x600   : > { %v9247_v40 = vadd.f32 %v9191_v51, %v18476_v3  ;;  %v11396_v38 = vsel %vm15272_vm7, %v11391_v13, %v11395_v20  ;;  %v14261_v20 = vld [vmem:[%s17828_s8 + $0x24] sm:$0xe] }
 0x601   : > { %v11406_v16 = vsel %vm15272_vm7, %v11401_v49, %v11405_v36  ;;  %v11725_v35 = vunpack.c.l.b16 %v11396_v38  ;;  %v10685_v36 = vrot.slane %v14914_v10, 5  ;;  %v14432_v38 = vld [vmem:[%s17828_s8 + $0x44] sm:$0x1] }
 0x602   : > { %v9645_v25 = vadd.f32 %v9589_v18, %v9247_v40  ;;  %14520 = vmatmul.msk.bf16.gmra.mxu2 %vm882_vm5, %v12152_v45  ;;  %v19298_v3 = vpop.f32.mrf.mxu1  ;;  %v11726_v1 = vunpack.c.l.b16 %v11406_v16  ;;  %v10813_v40 = vpack.c.b16 %v10783_v24, %v10782_v63  ;;  %v10684_v63 = vrot.slane %v10682_v19, 4  ;;  %v14489_v16 = vld [vmem:[%s17828_s8 + $0x3c] sm:$0xe] }
 0x603   : > { %v12031_v10 = vrot.slane %v14432_v38, 5 }
 0x604   : > { %v9932_v52 = vadd.f32 %v19240_v59, %v9645_v25  ;;  %v9594_v18 = vpop.f32.mrf.mxu0  ;;  %v12025_v59 = vsel %vm15248_vm3, %v12023_v22, %v12024_v33  ;;  %v11755_v26 = vpack.c.b16 %v11726_v1, %v11725_v35  ;;  %v14431_v25 = vld [vmem:[%s17828_s8 + $0x40] sm:$0xf] }
 0x605   : > { %v19305_v11 = vpop.f32.mrf.mxu2  ;;  %v12124_v48 = vunpack.c.l.b16 %v12025_v59  ;;  %v11417_v24 = vshll.u32 %v14431_v25, 16  ;;  %v12028_v35 = vrot.slane %v14431_v25, 5 }
 0x606   : > { %v19312_v45 = vadd.f32 %v19263_v6, %v9932_v52  ;;  %v14430_v6 = vld [vmem:[%s17828_s8 + $0x3c] sm:$0xf] }
 0x607   : > { %v9193_v51 = vpop.f32.mrf.mxu3  ;;  %14406 = vmatmul.msk.bf16.gmra.mxu0 %vm882_vm5, %v14676_v58  ;;  %v11408_v7 = vshrl.u32 %v14430_v6, 16  ;;  %v11411_v22 = vshll.u32 %v14430_v6, 16  ;;  %v11421_v58 = vshrl.u32 %v14431_v25, 16  ;;  %v12153_v49 = vpack.c.b16 %v12124_v48, %v12123_v41 }
 0x608   : > { %v9248_v54 = vadd.f32 %v9193_v51, %v18510_v62  ;;  %v14277_v62 = vrot.slane %v14261_v20, 9  ;;  %v11419_v59 = vrot.slane %v11417_v24, 5  ;;  %v10686_v20 = vsel %vm15248_vm3, %v10684_v63, %v10685_v36  ;;  %v14677_v36 = vld [vmem:[%s17828_s8 + $0x30] sm:$0xff] }
 0x609   : > { %v11413_v51 = vrot.slane %v11411_v22, 5  ;;  %v11423_v1 = vrot.slane %v11421_v58, 4  ;;  %v14505_v48 = vrot.slane %v14489_v16, 9  ;;  %v10785_v24 = vunpack.c.l.b16 %v10686_v20 }
 0x60a   : > { %v9646_v4 = vadd.f32 %v9591_v14, %v9248_v54  ;;  %v19324_v47 = vpop.f32.mrf.mxu1  ;;  %v11410_v14 = vrot.slane %v11408_v7, 4  ;;  %v11427_v54 = vshll.u32 %v14432_v38, 16  ;;  %v12030_v7 = vrot.slane %v12028_v35, 4 }
 0x60b   : > { %v12029_v38 = vsel %vm15248_vm3, %v14505_v48, %v12028_v35 }
 0x60c   : > { %14293 = vmatmul.msk.bf16.gmra.mxu3 %vm882_vm5, %v10813_v40  ;;  %v9596_v33 = vpop.f32.mrf.mxu0  ;;  %v10683_v40 = vsel %vm15248_vm3, %v14277_v62, %v10682_v19  ;;  %v11414_v37 = vor.u32 %v11413_v51, %v11410_v14  ;;  %v9933_v6 = vadd.f32 %v19256_v17, %v9646_v4  ;;  %v11429_v25 = vrot.slane %v11427_v54, 5 }
 0x60d   : > { %v19328_v13 = vpop.f32.mrf.mxu2  ;;  %14472 = vmatmul.msk.bf16.gmra.mxu1 %vm882_vm5, %v11755_v26  ;;  %v11424_v26 = vor.u32 %v11423_v1, %v11419_v59  ;;  %v10784_v62 = vunpack.c.l.b16 %v10683_v40  ;;  %v14915_v1 = vld [vmem:[%s17828_s8 + $0x34] sm:$0xf]  ;;  %v12125_v20 = vunpack.c.l.b16 %v12029_v38 }
 0x60e   : > { %v11415_v22 = vrot.slane %v11414_v37, 4  ;;  %v19343_v19 = vadd.f32 %v19286_v46, %v9933_v6  ;;  %v10689_v54 = vrot.slane %v14915_v1, 5 }
 0x60f   : > { %v9196_v52 = vpop.f32.mrf.mxu3  ;;  %v11425_v63 = vrot.slane %v11424_v26, 4  ;;  %v14916_v26 = vld [vmem:[%s17828_s8 + $0x38] sm:$0x1] }
 0x610   : > { %v9249_v32 = vadd.f32 %v9196_v52, %v18532_v39  ;;  %v11420_v14 = vsel %vm15272_vm7, %v11415_v22, %v11419_v59  ;;  %v14262_v59 = vld [vmem:[%s17828_s8 + $0x30] sm:$0xe] }
 0x611   : > { %v11430_v58 = vsel %vm15272_vm7, %v11425_v63, %v11429_v25  ;;  %v11727_v46 = vunpack.c.l.b16 %v11420_v14  ;;  %v10692_v25 = vrot.slane %v14916_v26, 5  ;;  %v14435_v14 = vld [vmem:[%s17828_s8 + $0x50] sm:$0x1] }
 0x612   : > { %v9647_v41 = vadd.f32 %v9594_v18, %v9249_v32  ;;  %14521 = vmatmul.msk.bf16.gmra.mxu2 %vm882_vm5, %v12153_v49  ;;  %v19340_v39 = vpop.f32.mrf.mxu1  ;;  %v11728_v16 = vunpack.c.l.b16 %v11430_v58  ;;  %v10814_v32 = vpack.c.b16 %v10785_v24, %v10784_v62  ;;  %v10691_v62 = vrot.slane %v10689_v54, 4  ;;  %v14490_v58 = vld [vmem:[%s17828_s8 + $0x48] sm:$0xe] }
 0x613   : > { %v12038_v26 = vrot.slane %v14435_v14, 5 }
 0x614   : > { %v9934_v17 = vadd.f32 %v19282_v15, %v9647_v41  ;;  %v9599_v18 = vpop.f32.mrf.mxu0  ;;  %v12032_v15 = vsel %vm15248_vm3, %v12030_v7, %v12031_v10  ;;  %v11756_v6 = vpack.c.b16 %v11728_v16, %v11727_v46  ;;  %v14434_v41 = vld [vmem:[%s17828_s8 + $0x4c] sm:$0xf] }
 0x615   : > { %v19347_v4 = vpop.f32.mrf.mxu2  ;;  %v12126_v37 = vunpack.c.l.b16 %v12032_v15  ;;  %v11441_v24 = vshll.u32 %v14434_v41, 16  ;;  %v12035_v46 = vrot.slane %v14434_v41, 5 }
 0x616   : > { %v19354_v49 = vadd.f32 %v19305_v11, %v9934_v17  ;;  %v14433_v11 = vld [vmem:[%s17828_s8 + $0x48] sm:$0xf] }
 0x617   : > { %v9198_v52 = vpop.f32.mrf.mxu3  ;;  %14407 = vmatmul.msk.bf16.gmra.mxu0 %vm882_vm5, %v14677_v36  ;;  %v11432_v48 = vshrl.u32 %v14433_v11, 16  ;;  %v11435_v7 = vshll.u32 %v14433_v11, 16  ;;  %v11445_v36 = vshrl.u32 %v14434_v41, 16  ;;  %v12154_v63 = vpack.c.b16 %v12126_v37, %v12125_v20 }
 0x618   : > { %v9250_v51 = vadd.f32 %v9198_v52, %v18565_v2  ;;  %v14278_v2 = vrot.slane %v14262_v59, 9  ;;  %v11443_v15 = vrot.slane %v11441_v24, 5  ;;  %v10693_v59 = vsel %vm15248_vm3, %v10691_v62, %v10692_v25  ;;  %v14678_v25 = vld [vmem:[%s17828_s8 + $0x3c] sm:$0xff] }
 0x619   : > { %v11437_v52 = vrot.slane %v11435_v7, 5  ;;  %v11447_v16 = vrot.slane %v11445_v36, 4  ;;  %v14506_v37 = vrot.slane %v14490_v58, 9  ;;  %v10787_v24 = vunpack.c.l.b16 %v10693_v59 }
 0x61a   : > { %v9648_v40 = vadd.f32 %v9596_v33, %v9250_v51  ;;  %v19366_v35 = vpop.f32.mrf.mxu1  ;;  %v11434_v33 = vrot.slane %v11432_v48, 4  ;;  %v11451_v51 = vshll.u32 %v14435_v14, 16  ;;  %v12037_v48 = vrot.slane %v12035_v46, 4 }
 0x61b   : > { %v12036_v14 = vsel %vm15248_vm3, %v14506_v37, %v12035_v46 }
 0x61c   : > { %14294 = vmatmul.msk.bf16.gmra.mxu3 %vm882_vm5, %v10814_v32  ;;  %v9601_v10 = vpop.f32.mrf.mxu0  ;;  %v10690_v32 = vsel %vm15248_vm3, %v14278_v2, %v10689_v54  ;;  %v11438_v1 = vor.u32 %v11437_v52, %v11434_v33  ;;  %v9935_v11 = vadd.f32 %v19298_v3, %v9648_v40  ;;  %v11453_v41 = vrot.slane %v11451_v51, 5 }
 0x61d   : > { %v19370_v22 = vpop.f32.mrf.mxu2  ;;  %14473 = vmatmul.msk.bf16.gmra.mxu1 %vm882_vm5, %v11756_v6  ;;  %v11448_v6 = vor.u32 %v11447_v16, %v11443_v15  ;;  %v10786_v2 = vunpack.c.l.b16 %v10690_v32  ;;  %v14917_v16 = vld [vmem:[%s17828_s8 + $0x40] sm:$0xf]  ;;  %v12127_v59 = vunpack.c.l.b16 %v12036_v14 }
 0x61e   : > { %v11439_v7 = vrot.slane %v11438_v1, 4  ;;  %v19385_v54 = vadd.f32 %v19328_v13, %v9935_v11  ;;  %v10696_v51 = vrot.slane %v14917_v16, 5 }
 0x61f   : > { %v9201_v17 = vpop.f32.mrf.mxu3  ;;  %v11449_v62 = vrot.slane %v11448_v6, 4  ;;  %v14918_v6 = vld [vmem:[%s17828_s8 + $0x44] sm:$0x1] }
 0x620   : > { %v9251_v38 = vadd.f32 %v9201_v17, %v18587_v21  ;;  %v11444_v33 = vsel %vm15272_vm7, %v11439_v7, %v11443_v15  ;;  %v14263_v15 = vld [vmem:[%s17828_s8 + $0x3c] sm:$0xe] }
 0x621   : > { %v11454_v36 = vsel %vm15272_vm7, %v11449_v62, %v11453_v41  ;;  %v11729_v13 = vunpack.c.l.b16 %v11444_v33  ;;  %v10699_v41 = vrot.slane %v14918_v6, 5  ;;  %v14438_v33 = vld [vmem:[%s17828_s8 + $0x5c] sm:$0x1] }
 0x622   : > { %v9649_v20 = vadd.f32 %v9599_v18, %v9251_v38  ;;  %14522 = vmatmul.msk.bf16.gmra.mxu2 %vm882_vm5, %v12154_v63  ;;  %v19382_v21 = vpop.f32.mrf.mxu1  ;;  %v11730_v58 = vunpack.c.l.b16 %v11454_v36  ;;  %v10815_v38 = vpack.c.b16 %v10787_v24, %v10786_v2  ;;  %v10698_v2 = vrot.slane %v10696_v51, 4  ;;  %v14491_v36 = vld [vmem:[%s17828_s8 + $0x54] sm:$0xe] }
 0x623   : > { %v12045_v6 = vrot.slane %v14438_v33, 5 }
 0x624   : > { %v9936_v3 = vadd.f32 %v19324_v47, %v9649_v20  ;;  %v9604_v18 = vpop.f32.mrf.mxu0  ;;  %v12039_v47 = vsel %vm15248_vm3, %v12037_v48, %v12038_v26  ;;  %v11757_v11 = vpack.c.b16 %v11730_v58, %v11729_v13  ;;  %v14437_v20 = vld [vmem:[%s17828_s8 + $0x58] sm:$0xf] }
 0x625   : > { %v19389_v40 = vpop.f32.mrf.mxu2  ;;  %v12128_v1 = vunpack.c.l.b16 %v12039_v47  ;;  %v11465_v24 = vshll.u32 %v14437_v20, 16  ;;  %v12042_v13 = vrot.slane %v14437_v20, 5 }
 0x626   : > { %v19396_v63 = vadd.f32 %v19347_v4, %v9936_v3  ;;  %v14436_v4 = vld [vmem:[%s17828_s8 + $0x54] sm:$0xf] }
 0x627   : > { %v9203_v17 = vpop.f32.mrf.mxu3  ;;  %14408 = vmatmul.msk.bf16.gmra.mxu0 %vm882_vm5, %v14678_v25  ;;  %v11456_v37 = vshrl.u32 %v14436_v4, 16  ;;  %v11459_v48 = vshll.u32 %v14436_v4, 16  ;;  %v11469_v25 = vshrl.u32 %v14437_v20, 16  ;;  %v12155_v62 = vpack.c.b16 %v12128_v1, %v12127_v59 }
 0x628   : > { %v9252_v52 = vadd.f32 %v9203_v17, %v18620_v23  ;;  %v14279_v23 = vrot.slane %v14263_v15, 9  ;;  %v11467_v47 = vrot.slane %v11465_v24, 5  ;;  %v10700_v15 = vsel %vm15248_vm3, %v10698_v2, %v10699_v41  ;;  %v14679_v41 = vld [vmem:[%s17828_s8 + $0x48] sm:$0xff] }
 0x629   : > { %v11461_v17 = vrot.slane %v11459_v48, 5  ;;  %v11471_v58 = vrot.slane %v11469_v25, 4  ;;  %v14507_v1 = vrot.slane %v14491_v36, 9  ;;  %v10789_v24 = vunpack.c.l.b16 %v10700_v15 }
 0x62a   : > { %v9650_v32 = vadd.f32 %v9601_v10, %v9252_v52  ;;  %v19408_v46 = vpop.f32.mrf.mxu1  ;;  %v11458_v10 = vrot.slane %v11456_v37, 4  ;;  %v11475_v52 = vshll.u32 %v14438_v33, 16  ;;  %v12044_v37 = vrot.slane %v12042_v13, 4 }
 0x62b   : > { %v12043_v33 = vsel %vm15248_vm3, %v14507_v1, %v12042_v13 }
 0x62c   : > { %14295 = vmatmul.msk.bf16.gmra.mxu3 %vm882_vm5, %v10815_v38  ;;  %v9606_v26 = vpop.f32.mrf.mxu0  ;;  %v10697_v38 = vsel %vm15248_vm3, %v14279_v23, %v10696_v51  ;;  %v11462_v16 = vor.u32 %v11461_v17, %v11458_v10  ;;  %v9937_v4 = vadd.f32 %v19340_v39, %v9650_v32  ;;  %v11477_v20 = vrot.slane %v11475_v52, 5 }
 0x62d   : > { %v19412_v7 = vpop.f32.mrf.mxu2  ;;  %14474 = vmatmul.msk.bf16.gmra.mxu1 %vm882_vm5, %v11757_v11  ;;  %v11472_v11 = vor.u32 %v11471_v58, %v11467_v47  ;;  %v10788_v23 = vunpack.c.l.b16 %v10697_v38  ;;  %v14919_v58 = vld [vmem:[%s17828_s8 + $0x4c] sm:$0xf]  ;;  %v12129_v15 = vunpack.c.l.b16 %v12043_v33 }
 0x62e   : > { %v11463_v48 = vrot.slane %v11462_v16, 4  ;;  %v19427_v51 = vadd.f32 %v19370_v22, %v9937_v4  ;;  %v10703_v52 = vrot.slane %v14919_v58, 5 }
 0x62f   : > { %v9206_v3 = vpop.f32.mrf.mxu3  ;;  %v11473_v2 = vrot.slane %v11472_v11, 4  ;;  %v14920_v11 = vld [vmem:[%s17828_s8 + $0x50] sm:$0x1] }
 0x630   : > { %v9253_v14 = vadd.f32 %v9206_v3, %v18642_v9  ;;  %v11468_v10 = vsel %vm15272_vm7, %v11463_v48, %v11467_v47  ;;  %v14264_v47 = vld [vmem:[%s17828_s8 + $0x48] sm:$0xe] }
 0x631   : > { %v11478_v25 = vsel %vm15272_vm7, %v11473_v2, %v11477_v20  ;;  %v11731_v22 = vunpack.c.l.b16 %v11468_v10  ;;  %v10706_v20 = vrot.slane %v14920_v11, 5  ;;  %v14441_v10 = vld [vmem:[%s17828_s8 + $0x68] sm:$0x1] }
 0x632   : > { %v9651_v59 = vadd.f32 %v9604_v18, %v9253_v14  ;;  %14523 = vmatmul.msk.bf16.gmra.mxu2 %vm882_vm5, %v12155_v62  ;;  %v19424_v9 = vpop.f32.mrf.mxu1  ;;  %v11732_v36 = vunpack.c.l.b16 %v11478_v25  ;;  %v10816_v14 = vpack.c.b16 %v10789_v24, %v10788_v23  ;;  %v10705_v23 = vrot.slane %v10703_v52, 4  ;;  %v14492_v25 = vld [vmem:[%s17828_s8 + $0x60] sm:$0xe] }
 0x633   : > { %v12052_v11 = vrot.slane %v14441_v10, 5 }
 0x634   : > { %v9938_v39 = vadd.f32 %v19366_v35, %v9651_v59  ;;  %v9609_v18 = vpop.f32.mrf.mxu0  ;;  %v12046_v35 = vsel %vm15248_vm3, %v12044_v37, %v12045_v6  ;;  %v11758_v4 = vpack.c.b16 %v11732_v36, %v11731_v22  ;;  %v14440_v59 = vld [vmem:[%s17828_s8 + $0x64] sm:$0xf] }
 0x635   : > { %v19431_v32 = vpop.f32.mrf.mxu2  ;;  %v12130_v16 = vunpack.c.l.b16 %v12046_v35  ;;  %v11489_v24 = vshll.u32 %v14440_v59, 16  ;;  %v12049_v22 = vrot.slane %v14440_v59, 5 }
 0x636   : > { %v19438_v62 = vadd.f32 %v19389_v40, %v9938_v39  ;;  %v14439_v40 = vld [vmem:[%s17828_s8 + $0x60] sm:$0xf] }
 0x637   : > { %v9208_v3 = vpop.f32.mrf.mxu3  ;;  %14409 = vmatmul.msk.bf16.gmra.mxu0 %vm882_vm5, %v14679_v41  ;;  %v11480_v1 = vshrl.u32 %v14439_v40, 16  ;;  %v11483_v37 = vshll.u32 %v14439_v40, 16  ;;  %v11493_v41 = vshrl.u32 %v14440_v59, 16  ;;  %v12156_v2 = vpack.c.b16 %v12130_v16, %v12129_v15 }
 0x638   : > { %v9254_v17 = vadd.f32 %v9208_v3, %v18677_v34  ;;  %v14280_v34 = vrot.slane %v14264_v47, 9  ;;  %v11491_v35 = vrot.slane %v11489_v24, 5  ;;  %v10707_v47 = vsel %vm15248_vm3, %v10705_v23, %v10706_v20  ;;  %v14680_v20 = vld [vmem:[%s17828_s8 + $0x54] sm:$0xff] }
 0x639   : > { %v11485_v3 = vrot.slane %v11483_v37, 5  ;;  %v11495_v36 = vrot.slane %v11493_v41, 4  ;;  %v14508_v16 = vrot.slane %v14492_v25, 9  ;;  %v10791_v24 = vunpack.c.l.b16 %v10707_v47 }
 0x63a   : > { %v9652_v38 = vadd.f32 %v9606_v26, %v9254_v17  ;;  %v19450_v13 = vpop.f32.mrf.mxu1  ;;  %v11482_v26 = vrot.slane %v11480_v1, 4  ;;  %v11499_v17 = vshll.u32 %v14441_v10, 16  ;;  %v12051_v1 = vrot.slane %v12049_v22, 4 }
 0x63b   : > { %v12050_v10 = vsel %vm15248_vm3, %v14508_v16, %v12049_v22 }
 0x63c   : > { %14296 = vmatmul.msk.bf16.gmra.mxu3 %vm882_vm5, %v10816_v14  ;;  %v9611_v6 = vpop.f32.mrf.mxu0  ;;  %v10704_v14 = vsel %vm15248_vm3, %v14280_v34, %v10703_v52  ;;  %v11486_v58 = vor.u32 %v11485_v3, %v11482_v26  ;;  %v9939_v40 = vadd.f32 %v19382_v21, %v9652_v38  ;;  %v11501_v59 = vrot.slane %v11499_v17, 5 }
 0x63d   : > { %v19454_v48 = vpop.f32.mrf.mxu2  ;;  %14475 = vmatmul.msk.bf16.gmra.mxu1 %vm882_vm5, %v11758_v4  ;;  %v11496_v4 = vor.u32 %v11495_v36, %v11491_v35  ;;  %v10790_v34 = vunpack.c.l.b16 %v10704_v14  ;;  %v14921_v36 = vld [vmem:[%s17828_s8 + $0x58] sm:$0xf]  ;;  %v12131_v47 = vunpack.c.l.b16 %v12050_v10 }
 0x63e   : > { %v11487_v37 = vrot.slane %v11486_v58, 4  ;;  %v19469_v52 = vadd.f32 %v19412_v7, %v9939_v40  ;;  %v10710_v17 = vrot.slane %v14921_v36, 5 }
 0x63f   : > { %v9211_v39 = vpop.f32.mrf.mxu3  ;;  %v11497_v23 = vrot.slane %v11496_v4, 4  ;;  %v14922_v4 = vld [vmem:[%s17828_s8 + $0x5c] sm:$0x1] }
 0x640   : > { %v9255_v33 = vadd.f32 %v9211_v39, %v18701_v44  ;;  %v11492_v26 = vsel %vm15272_vm7, %v11487_v37, %v11491_v35  ;;  %v14265_v35 = vld [vmem:[%s17828_s8 + $0x54] sm:$0xe] }
 0x641   : > { %v11502_v41 = vsel %vm15272_vm7, %v11497_v23, %v11501_v59  ;;  %v11733_v7 = vunpack.c.l.b16 %v11492_v26  ;;  %v10713_v59 = vrot.slane %v14922_v4, 5  ;;  %v14444_v26 = vld [vmem:[%s17828_s8 + $0x74] sm:$0x1] }
 0x642   : > { %v9653_v15 = vadd.f32 %v9609_v18, %v9255_v33  ;;  %14524 = vmatmul.msk.bf16.gmra.mxu2 %vm882_vm5, %v12156_v2  ;;  %v19466_v44 = vpop.f32.mrf.mxu1  ;;  %v11734_v25 = vunpack.c.l.b16 %v11502_v41  ;;  %v10817_v33 = vpack.c.b16 %v10791_v24, %v10790_v34  ;;  %v10712_v34 = vrot.slane %v10710_v17, 4  ;;  %v14493_v41 = vld [vmem:[%s17828_s8 + $0x6c] sm:$0xe] }
 0x643   : > { %v12059_v4 = vrot.slane %v14444_v26, 5 }
 0x644   : > { %v9940_v21 = vadd.f32 %v19408_v46, %v9653_v15  ;;  %v9614_v18 = vpop.f32.mrf.mxu0  ;;  %v12053_v46 = vsel %vm15248_vm3, %v12051_v1, %v12052_v11  ;;  %v11759_v40 = vpack.c.b16 %v11734_v25, %v11733_v7  ;;  %v14443_v15 = vld [vmem:[%s17828_s8 + $0x70] sm:$0xf] }
 0x645   : > { %v19473_v38 = vpop.f32.mrf.mxu2  ;;  %v12132_v58 = vunpack.c.l.b16 %v12053_v46  ;;  %v11513_v24 = vshll.u32 %v14443_v15, 16  ;;  %v12056_v7 = vrot.slane %v14443_v15, 5 }
 0x646   : > { %v19480_v2 = vadd.f32 %v19431_v32, %v9940_v21  ;;  %v14442_v32 = vld [vmem:[%s17828_s8 + $0x6c] sm:$0xf] }
 0x647   : > { %v9213_v39 = vpop.f32.mrf.mxu3  ;;  %14410 = vmatmul.msk.bf16.gmra.mxu0 %vm882_vm5, %v14680_v20  ;;  %v11504_v16 = vshrl.u32 %v14442_v32, 16  ;;  %v11507_v1 = vshll.u32 %v14442_v32, 16  ;;  %v11517_v20 = vshrl.u32 %v14443_v15, 16  ;;  %v12157_v23 = vpack.c.b16 %v12132_v58, %v12131_v47 }
 0x648   : > { %v9256_v3 = vadd.f32 %v9213_v39, %v18733_v55  ;;  %v14281_v55 = vrot.slane %v14265_v35, 9  ;;  %v11515_v46 = vrot.slane %v11513_v24, 5  ;;  %v10714_v35 = vsel %vm15248_vm3, %v10712_v34, %v10713_v59  ;;  %v14681_v34 = vld [vmem:[%s17828_s8 + $0x60] sm:$0xff] }
 0x649   : > { %v11509_v39 = vrot.slane %v11507_v1, 5  ;;  %v11519_v25 = vrot.slane %v11517_v20, 4  ;;  %v14509_v58 = vrot.slane %v14493_v41, 9  ;;  %v10793_v59 = vunpack.c.l.b16 %v10714_v35  ;;  %v14923_v41 = vld [vmem:[%s17828_s8 + $0x64] sm:$0xf] }
 0x64a   : > { %v9654_v14 = vadd.f32 %v9611_v6, %v9256_v3  ;;  %v19492_v22 = vpop.f32.mrf.mxu1  ;;  %v11506_v6 = vrot.slane %v11504_v16, 4  ;;  %v11523_v3 = vshll.u32 %v14444_v26, 16  ;;  %v12058_v16 = vrot.slane %v12056_v7, 4 }
 0x64c   : > { %14297 = vmatmul.msk.bf16.gmra.mxu3 %vm882_vm5, %v10817_v33  ;;  %v9616_v11 = vpop.f32.mrf.mxu0  ;;  %v10711_v33 = vsel %vm15248_vm3, %v14281_v55, %v10710_v17  ;;  %v11510_v36 = vor.u32 %v11509_v39, %v11506_v6  ;;  %v9941_v32 = vadd.f32 %v19424_v9, %v9654_v14  ;;  %v11525_v15 = vrot.slane %v11523_v3, 5  ;;  %v14266_v3 = vld [vmem:[%s17828_s8 + $0x60] sm:$0xe] }
 0x64d   : > { %v19496_v37 = vpop.f32.mrf.mxu2  ;;  %14476 = vmatmul.msk.bf16.gmra.mxu1 %vm882_vm5, %v11759_v40  ;;  %v11520_v40 = vor.u32 %v11519_v25, %v11515_v46  ;;  %v10792_v55 = vunpack.c.l.b16 %v10711_v33  ;;  %v12060_v26 = vsel %vm15248_vm3, %v12058_v16, %v12059_v4  ;;  %v10717_v39 = vrot.slane %v14923_v41, 5 }
 0x64e   : > { %v11511_v1 = vrot.slane %v11510_v36, 4  ;;  %v19511_v17 = vadd.f32 %v19454_v48, %v9941_v32  ;;  %v12134_v36 = vunpack.c.l.b16 %v12060_v26 }
 0x64f   : > { %v9216_v21 = vpop.f32.mrf.mxu3  ;;  %v11521_v6 = vrot.slane %v11520_v40, 4  ;;  %v10818_v25 = vpack.c.b16 %v10793_v59, %v10792_v55  ;;  %v10719_v40 = vrot.slane %v10717_v39, 4 }
 0x650   : > { %v9257_v10 = vadd.f32 %v9216_v21, %v18758_v28  ;;  %v11516_v24 = vsel %vm15272_vm7, %v11511_v1, %v11515_v46 }
 0x651   : > { %v11526_v20 = vsel %vm15272_vm7, %v11521_v6, %v11525_v15  ;;  %v14924_v15 = vld [vmem:[%s17828_s8 + $0x68] sm:$0x1] }
 0x652   : > { %v9655_v47 = vadd.f32 %v9614_v18, %v9257_v10  ;;  %14525 = vmatmul.msk.bf16.gmra.mxu2 %vm882_vm5, %v12157_v23  ;;  %v19508_v28 = vpop.f32.mrf.mxu1  ;;  %v11735_v23 = vunpack.c.l.b16 %v11516_v24  ;;  %v11736_v10 = vunpack.c.l.b16 %v11526_v20  ;;  %v10720_v16 = vrot.slane %v14924_v15, 5  ;;  %v14494_v24 = vld [vmem:[%s17828_s8 + $0x78] sm:$0xe] }
 0x654   : > { %v9942_v9 = vadd.f32 %v19450_v13, %v9655_v47  ;;  %v9619_v18 = vpop.f32.mrf.mxu0  ;;  %v12057_v13 = vsel %vm15248_vm3, %v14509_v58, %v12056_v7  ;;  %v11760_v32 = vpack.c.b16 %v11736_v10, %v11735_v23  ;;  %v14446_v47 = vld [vmem:[%s17828_s8 + $0x7c] sm:$0xf]  ;;  %v14282_v58 = vrot.slane %v14266_v3, 9 }
 0x655   : > { %v19515_v14 = vpop.f32.mrf.mxu2  ;;  %v12133_v35 = vunpack.c.l.b16 %v12057_v13  ;;  %v11537_v59 = vshll.u32 %v14446_v47, 16  ;;  %v12063_v20 = vrot.slane %v14446_v47, 5  ;;  %v10721_v13 = vsel %vm15248_vm3, %v10719_v40, %v10720_v16 }
 0x656   : > { %v19522_v48 = vadd.f32 %v19473_v38, %v9942_v9  ;;  %v14445_v38 = vld [vmem:[%s17828_s8 + $0x78] sm:$0xf]  ;;  %v14447_v9 = vld [vmem:[%s17828_s8 + $0x80] sm:$0x1]  ;;  %v14510_v3 = vrot.slane %v14494_v24, 9 }
 0x657   : > { %v9218_v21 = vpop.f32.mrf.mxu3  ;;  %14411 = vmatmul.msk.bf16.gmra.mxu0 %vm882_vm5, %v14681_v34  ;;  %v11528_v4 = vshrl.u32 %v14445_v38, 16  ;;  %v11541_v34 = vshrl.u32 %v14446_v47, 16  ;;  %v12158_v6 = vpack.c.b16 %v12134_v36, %v12133_v35  ;;  %v11539_v10 = vrot.slane %v11537_v59, 5 }
 0x658   : > { %v9258_v46 = vadd.f32 %v9218_v21, %v18788_v56  ;;  %v11531_v56 = vshll.u32 %v14445_v38, 16  ;;  %v10718_v21 = vsel %vm15248_vm3, %v14282_v58, %v10717_v39  ;;  %v12066_v38 = vrot.slane %v14447_v9, 5 }
 0x659   : > { %v12065_v47 = vrot.slane %v12063_v20, 4  ;;  %v10794_v16 = vunpack.c.l.b16 %v10718_v21 }
 0x65a   : > { %v9656_v33 = vadd.f32 %v9616_v11, %v9258_v46  ;;  %v19534_v7 = vpop.f32.mrf.mxu1  ;;  %v11530_v11 = vrot.slane %v11528_v4, 4  ;;  %v11533_v26 = vrot.slane %v11531_v56, 5  ;;  %v11543_v46 = vrot.slane %v11541_v34, 4  ;;  %v14682_v56 = vld [vmem:[%s17828_s8 + $0x6c] sm:$0xff] }
 0x65b   : > { %v10795_v4 = vunpack.c.l.b16 %v10721_v13  ;;  %v14925_v13 = vld [vmem:[%s17828_s8 + $0x70] sm:$0xf] }
 0x65c   : > { %14298 = vmatmul.msk.bf16.gmra.mxu3 %vm882_vm5, %v10818_v25  ;;  %v9621_v1 = vpop.f32.mrf.mxu0  ;;  %v11547_v25 = vshll.u32 %v14447_v9, 16  ;;  %v11534_v35 = vor.u32 %v11533_v26, %v11530_v11  ;;  %v9943_v36 = vadd.f32 %v19466_v44, %v9656_v33  ;;  %v11544_v39 = vor.u32 %v11543_v46, %v11539_v10  ;;  %v14267_v46 = vld [vmem:[%s17828_s8 + $0x6c] sm:$0xe] }
 0x65d   : > { %v19538_v55 = vpop.f32.mrf.mxu2  ;;  %14477 = vmatmul.msk.bf16.gmra.mxu1 %vm882_vm5, %v11760_v32  ;;  %v12064_v33 = vsel %vm15248_vm3, %v14510_v3, %v12063_v20  ;;  %v10819_v20 = vpack.c.b16 %v10795_v4, %v10794_v16  ;;  %v10724_v26 = vrot.slane %v14925_v13, 5  ;;  %v14448_v3 = vld [vmem:[%s17828_s8 + $0x84] sm:$0xf] }
 0x65e   : > { %v11549_v58 = vrot.slane %v11547_v25, 5  ;;  %v11535_v40 = vrot.slane %v11534_v35, 4  ;;  %v11545_v59 = vrot.slane %v11544_v39, 4  ;;  %v14449_v25 = vld [vmem:[%s17828_s8 + $0x88] sm:$0xf]  ;;  %v14283_v39 = vrot.slane %v14267_v46, 9 }
 0x65f   : > { %v9221_v23 = vpop.f32.mrf.mxu3  ;;  %v12070_v4 = vrot.slane %v14449_v25, 5 }
 0x660   : > { %v9259_v41 = vadd.f32 %v9221_v23, %v18808_v8  ;;  %v19553_v8 = vadd.f32 %v19496_v37, %v9943_v36  ;;  %v11540_v34 = vsel %vm15272_vm7, %v11535_v40, %v11539_v10  ;;  %v12067_v37 = vsel %vm15248_vm3, %v12065_v47, %v12066_v38  ;;  %v14926_v40 = vld [vmem:[%s17828_s8 + $0x74] sm:$0x1] }
 0x661   : > { %v11737_v9 = vunpack.c.l.b16 %v11540_v34  ;;  %v12136_v10 = vunpack.c.l.b16 %v12067_v37  ;;  %v11552_v36 = vshrl.u32 %v14448_v3, 16  ;;  %v11561_v47 = vshll.u32 %v14449_v25, 16 }
 0x662   : > { %v9657_v32 = vadd.f32 %v9619_v18, %v9259_v41  ;;  %14526 = vmatmul.msk.bf16.gmra.mxu2 %vm882_vm5, %v12158_v6  ;;  %v19550_v15 = vpop.f32.mrf.mxu1  ;;  %v11550_v6 = vsel %vm15272_vm7, %v11545_v59, %v11549_v58  ;;  %v12135_v41 = vunpack.c.l.b16 %v12064_v33  ;;  %v10726_v58 = vrot.slane %v10724_v26, 4 }
 0x663   : > { %v11738_v23 = vunpack.c.l.b16 %v11550_v6  ;;  %v10727_v16 = vrot.slane %v14926_v40, 5  ;;  %v11563_v33 = vrot.slane %v11561_v47, 5  ;;  %v14495_v6 = vld [vmem:[%s17828_s8 + $0x84] sm:$0xe] }
 0x664   : > { %v9944_v11 = vadd.f32 %v19492_v22, %v9657_v32  ;;  %v9624_v44 = vpop.f32.mrf.mxu0  ;;  %v12159_v37 = vpack.c.b16 %v12136_v10, %v12135_v41 }
 0x665   : > { %v19557_v18 = vpop.f32.mrf.mxu2  ;;  %v11761_v35 = vpack.c.b16 %v11738_v23, %v11737_v9 }
 0x666   : > { %v19568_v22 = vadd.f32 %v19515_v14, %v9944_v11  ;;  %v11555_v14 = vshll.u32 %v14448_v3, 16  ;;  %v14511_v3 = vrot.slane %v14495_v6, 9 }
 0x667   : > { %v9223_v24 = vpop.f32.mrf.mxu3  ;;  %14412 = vmatmul.msk.bf16.gmra.mxu0 %vm882_vm5, %v14682_v56 }
 0x668   : > { %v9260_v21 = vadd.f32 %v9223_v24, %v18844_v53  ;;  %v11565_v53 = vshrl.u32 %v14449_v25, 16  ;;  %v11557_v11 = vrot.slane %v11555_v14, 5  ;;  %v14450_v24 = vld [vmem:[%s17828_s8 + $0x8c] sm:$0x1]  ;;  %v10728_v25 = vsel %vm15248_vm3, %v10726_v58, %v10727_v16  ;;  %v14683_v58 = vld [vmem:[%s17828_s8 + $0x78] sm:$0xff] }
 0x669   : > { %v11571_v46 = vshll.u32 %v14450_v24, 16  ;;  %v10797_v40 = vunpack.c.l.b16 %v10728_v25 }
 0x66a   : > { %v9658_v38 = vadd.f32 %v9621_v1, %v9260_v21  ;;  %v19576_v32 = vpop.f32.mrf.mxu1  ;;  %v11554_v1 = vrot.slane %v11552_v36, 4  ;;  %v11567_v34 = vrot.slane %v11565_v53, 4  ;;  %v12072_v36 = vrot.slane %v12070_v4, 4 }
 0x66b   : > { %v11573_v47 = vrot.slane %v11571_v46, 5  ;;  %v14451_v46 = vld [vmem:[%s17828_s8 + $0x90] sm:$0xf] }
 0x66c   : > { %14299 = vmatmul.msk.bf16.gmra.mxu3 %vm882_vm5, %v10819_v20  ;;  %v9626_v56 = vpop.f32.mrf.mxu0  ;;  %v11558_v23 = vor.u32 %v11557_v11, %v11554_v1  ;;  %v10725_v20 = vsel %vm15248_vm3, %v14283_v39, %v10724_v26  ;;  %v11568_v13 = vor.u32 %v11567_v34, %v11563_v33  ;;  %v9945_v26 = vadd.f32 %v19508_v28, %v9658_v38 }
 0x66d   : > { %v19580_v59 = vpop.f32.mrf.mxu2  ;;  %14478 = vmatmul.msk.bf16.gmra.mxu1 %vm882_vm5, %v11761_v35  ;;  %v12073_v35 = vrot.slane %v14450_v24, 5  ;;  %v10796_v39 = vunpack.c.l.b16 %v10725_v20  ;;  %v12071_v34 = vsel %vm15248_vm3, %v14511_v3, %v12070_v4  ;;  %v14268_v20 = vld [vmem:[%s17828_s8 + $0x78] sm:$0xe] }
 0x66e   : > { %v11559_v41 = vrot.slane %v11558_v23, 4  ;;  %v11569_v14 = vrot.slane %v11568_v13, 4  ;;  %v19605_v28 = vadd.f32 %v19538_v55, %v9945_v26  ;;  %v14927_v23 = vld [vmem:[%s17828_s8 + $0x7c] sm:$0xf]  ;;  %v14452_v13 = vld [vmem:[%s17828_s8 + $0x94] sm:$0xf] }
 0x66f   : > { %v9226_v9 = vpop.f32.mrf.mxu3  ;;  %v12074_v38 = vsel %vm15248_vm3, %v12072_v36, %v12073_v35  ;;  %v10820_v24 = vpack.c.b16 %v10797_v40, %v10796_v39  ;;  %v10731_v4 = vrot.slane %v14927_v23, 5  ;;  %v11576_v36 = vshrl.u32 %v14451_v46, 16 }
 0x670   : > { %v9261_v21 = vadd.f32 %v9226_v9, %v18868_v60  ;;  %v11564_v60 = vsel %vm15272_vm7, %v11559_v41, %v11563_v33  ;;  %v11574_v16 = vsel %vm15272_vm7, %v11569_v14, %v11573_v47  ;;  %v12138_v55 = vunpack.c.l.b16 %v12074_v38  ;;  %v14928_v47 = vld [vmem:[%s17828_s8 + $0x80] sm:$0x1] }
 0x671   : > { %v11739_v33 = vunpack.c.l.b16 %v11564_v60  ;;  %v11579_v41 = vshll.u32 %v14451_v46, 16  ;;  %v14284_v35 = vrot.slane %v14268_v20, 9  ;;  %v10733_v14 = vrot.slane %v10731_v4, 4 }
 0x672   : > { %v9659_v10 = vadd.f32 %v9624_v44, %v9261_v21  ;;  %14527 = vmatmul.msk.bf16.gmra.mxu2 %vm882_vm5, %v12159_v37  ;;  %v19591_v53 = vpop.f32.mrf.mxu1  ;;  %v11740_v37 = vunpack.c.l.b16 %v11574_v16  ;;  %v12137_v21 = vunpack.c.l.b16 %v12071_v34  ;;  %v10734_v60 = vrot.slane %v14928_v47, 5  ;;  %v14496_v34 = vld [vmem:[%s17828_s8 + $0x90] sm:$0xe]  ;;  %v14684_v47 = vld [vmem:[%s17828_s8 + $0x84] sm:$0xff] }
 0x673   : > { %v11578_v40 = vrot.slane %v11576_v36, 4  ;;  %v12077_v38 = vrot.slane %v14452_v13, 5  ;;  %v10732_v20 = vsel %vm15248_vm3, %v14284_v35, %v10731_v4  ;;  %v14512_v36 = vrot.slane %v14496_v34, 9 }
 0x674   : > { %v9946_v44 = vadd.f32 %v19534_v7, %v9659_v10  ;;  %v11175_v1 = vpop.f32.mrf.mxu0  ;;  %v11762_v3 = vpack.c.b16 %v11740_v37, %v11739_v33  ;;  %v11585_v10 = vshll.u32 %v14452_v13, 16  ;;  %v14453_v37 = vld [vmem:[%s17828_s8 + $0x98] sm:$0x1]  ;;  %v10735_v46 = vsel %vm15248_vm3, %v10733_v14, %v10734_v60 }
 0x675   : > { %v19600_v11 = vpop.f32.mrf.mxu2  ;;  %v11595_v23 = vshll.u32 %v14453_v37, 16  ;;  %v10798_v35 = vunpack.c.l.b16 %v10732_v20  ;;  %v10799_v14 = vunpack.c.l.b16 %v10735_v46 }
 0x676   : > { %v19610_v6 = vadd.f32 %v19557_v18, %v9946_v44  ;;  %v12160_v44 = vpack.c.b16 %v12138_v55, %v12137_v21  ;;  %v12079_v55 = vrot.slane %v12077_v38, 4 }
 0x677   : > { %v9228_v7 = vpop.f32.mrf.mxu3  ;;  %14413 = vmatmul.msk.bf16.gmra.mxu0 %vm882_vm5, %v14683_v58  ;;  %v11587_v58 = vrot.slane %v11585_v10, 5 }
 0x678   : > { %v9262_v9 = vadd.f32 %v9228_v7, %v18905_v42  ;;  %v11589_v42 = vshrl.u32 %v14452_v13, 16  ;;  %v12080_v13 = vrot.slane %v14453_v37, 5 }
 0x67a   : > { %v9660_v25 = vadd.f32 %v9626_v56, %v9262_v9  ;;  %v19618_v18 = vpop.f32.mrf.mxu1  ;;  %v11581_v56 = vrot.slane %v11579_v41, 5  ;;  %v11591_v16 = vrot.slane %v11589_v42, 4  ;;  %v11597_v41 = vrot.slane %v11595_v23, 5 }
 0x67c   : > { %14300 = vmatmul.msk.bf16.gmra.mxu3 %vm882_vm5, %v10820_v24  ;;  %v11177_v26 = vpop.f32.mrf.mxu0  ;;  %v11582_v7 = vor.u32 %v11581_v56, %v11578_v40  ;;  %v11592_v24 = vor.u32 %v11591_v16, %v11587_v58  ;;  %v9947_v4 = vadd.f32 %v19550_v15, %v9660_v25  ;;  %v14269_v16 = vld [vmem:[%s17828_s8 + $0x84] sm:$0xe]  ;;  %v12078_v15 = vsel %vm15248_vm3, %v14512_v36, %v12077_v38  ;;  %v14930_v38 = vld [vmem:[%s17828_s8 + $0x8c] sm:$0x1] }
 0x67d   : > { %v19622_v39 = vpop.f32.mrf.mxu2  ;;  %14479 = vmatmul.msk.bf16.gmra.mxu1 %vm882_vm5, %v11762_v3  ;;  %v12081_v25 = vsel %vm15248_vm3, %v12079_v55, %v12080_v13  ;;  %v12139_v23 = vunpack.c.l.b16 %v12078_v15  ;;  %v10741_v36 = vrot.slane %v14930_v38, 5 }
 0x67e   : > { %v11583_v21 = vrot.slane %v11582_v7, 4  ;;  %v11593_v3 = vrot.slane %v11592_v24, 4  ;;  %v19646_v34 = vadd.f32 %v19580_v59, %v9947_v4  ;;  %v10821_v24 = vpack.c.b16 %v10799_v14, %v10798_v35 }
 0x67f   : > { %v10888_v33 = vpop.f32.mrf.mxu3  ;;  %v14285_v59 = vrot.slane %v14269_v16, 9  ;;  %v12140_v20 = vunpack.c.l.b16 %v12081_v25 }
 0x680   : > { %v10968_v9 = vadd.f32 %v10888_v33, %v18925_v30  ;;  %v11588_v42 = vsel %vm15272_vm7, %v11583_v21, %v11587_v58  ;;  %v11598_v60 = vsel %vm15272_vm7, %v11593_v3, %v11597_v41  ;;  %v14454_v21 = vld [vmem:[%s17828_s8 + $0x9c] sm:$0xf]  ;;  %v14455_v3 = vld [vmem:[%s17828_s8 + $0xa0] sm:$0xf] }
 0x681   : > { %v11741_v58 = vunpack.c.l.b16 %v11588_v42  ;;  %v11742_v33 = vunpack.c.l.b16 %v11598_v60  ;;  %v11603_v41 = vshll.u32 %v14454_v21, 16  ;;  %v11609_v60 = vshll.u32 %v14455_v3, 16 }
 0x682   : > { %14528 = vmatmul.msk.bf16.gmra.mxu2 %vm882_vm5, %v12160_v44  ;;  %v11255_v30 = vadd.f32 %v11175_v1, %v10968_v9  ;;  %v19633_v10 = vpop.f32.mrf.mxu1  ;;  %v14929_v44 = vld [vmem:[%s17828_s8 + $0x88] sm:$0xf]  ;;  %v12161_v16 = vpack.c.b16 %v12140_v20, %v12139_v23 }
 0x683   : > { %v10738_v1 = vrot.slane %v14929_v44, 5  ;;  %v11763_v13 = vpack.c.b16 %v11742_v33, %v11741_v58  ;;  %v12084_v44 = vrot.slane %v14455_v3, 5  ;;  %v14497_v58 = vld [vmem:[%s17828_s8 + $0x9c] sm:$0xe]  ;;  %v11613_v33 = vshrl.u32 %v14455_v3, 16 }
 0x684   : > { %v11180_v40 = vpop.f32.mrf.mxu0  ;;  %v11909_v37 = vadd.f32 %v19576_v32, %v11255_v30  ;;  %v11600_v32 = vshrl.u32 %v14454_v21, 16  ;;  %v11611_v23 = vrot.slane %v11609_v60, 5 }
 0x685   : > { %v19641_v56 = vpop.f32.mrf.mxu2  ;;  %v10740_v46 = vrot.slane %v10738_v1, 4 }
 0x686   : > { %v11602_v14 = vrot.slane %v11600_v32, 4 }
 0x687   : > { %v10890_v7 = vpop.f32.mrf.mxu3  ;;  %14414 = vmatmul.msk.bf16.gmra.mxu0 %vm882_vm5, %v14684_v47  ;;  %v11605_v47 = vrot.slane %v11603_v41, 5  ;;  %v11615_v41 = vrot.slane %v11613_v33, 4 }
 0x688   : > { %v10969_v9 = vadd.f32 %v10890_v7, %v18960_v50  ;;  %v12307_v50 = vadd.f32 %v19600_v11, %v11909_v37 }
 0x689   : > { %v11616_v60 = vor.u32 %v11615_v41, %v11611_v23 }
 0x68a   : > { %v11256_v55 = vadd.f32 %v11177_v26, %v10969_v9  ;;  %v19662_v30 = vpop.f32.mrf.mxu1  ;;  %v10739_v26 = vsel %vm15248_vm3, %v14285_v59, %v10738_v1  ;;  %v12440_v15 = vmul.f32 %v12307_v50, %v12307_v50  ;;  %v20092_v9 = vld [vmem:[#allocation18_spill] sm:$0xff]  ;;  %v14456_v59 = vld [vmem:[%s17828_s8 + $0xa4] sm:$0x1] }
 0x68b   : > { %v10800_v38 = vunpack.c.l.b16 %v10739_v26  ;;  %v12087_v3 = vrot.slane %v14456_v59, 5  ;;  %v14685_v26 = vld [vmem:[%s17828_s8 + $0x90] sm:$0xff] }
 0x68c   : > { %v11910_v42 = vadd.f32 %v19591_v53, %v11256_v55  ;;  %14301 = vmatmul.msk.bf16.gmra.mxu3 %vm882_vm5, %v10821_v24  ;;  %v11182_v4 = vpop.f32.mrf.mxu0  ;;  %v10742_v53 = vsel %vm15248_vm3, %v10740_v46, %v10741_v36  ;;  %v14513_v36 = vrot.slane %v14497_v58, 9  ;;  %v12086_v55 = vrot.slane %v12084_v44, 4 }
 0x68d   : > { %v19667_v35 = vpop.f32.mrf.mxu2  ;;  %14480 = vmatmul.msk.bf16.gmra.mxu1 %vm882_vm5, %v11763_v13  ;;  %v10801_v21 = vunpack.c.l.b16 %v10742_v53  ;;  %v11617_v58 = vrot.slane %v11616_v60, 4 }
 0x68e   : > { %v12308_v11 = vadd.f32 %v19622_v39, %v11910_v42  ;;  %v11606_v39 = vor.u32 %v11605_v47, %v11602_v14  ;;  %v12085_v53 = vsel %vm15248_vm3, %v14513_v36, %v12084_v44 }
 0x68f   : > { %v10893_v25 = vpop.f32.mrf.mxu3 }
 0x690   : > { %v14695_v37 = vpack.c.bf16 %v12308_v11, %v12307_v50  ;;  %v12403_v7 = vadd.f32 %v12308_v11, %v12307_v50  ;;  %v12441_v1 = vmul.f32 %v12308_v11, %v12308_v11  ;;  %v10970_v24 = vadd.f32 %v10893_v25, %v20092_v9 }
 0x691   : > { %v11607_v32 = vrot.slane %v11606_v39, 4  ;;  %v11619_v50 = vshll.u32 %v14456_v59, 16  ;;  %v10822_v25 = vpack.c.b16 %v10801_v21, %v10800_v38  ;;  %v12141_v59 = vunpack.c.l.b16 %v12085_v53  ;;  %v14931_v39 = vld [vmem:[%s17828_s8 + $0x94] sm:$0xf]  ;;  %v14457_v38 = vld [vmem:[%s17828_s8 + $0xa8] sm:$0xf] }
 0x692   : > { %v12472_v20 = vadd.f32 %v12441_v1, %v12440_v15  ;;  %v11257_v46 = vadd.f32 %v11180_v40, %v10970_v24  ;;  %14529 = vmatmul.msk.bf16.gmra.mxu2 %vm882_vm5, %v12161_v16  ;;  %14696 = vst [vmem:[%s19679_s13] sm:$0xff] %v14695_v37   ;;  %v19682_v13 = vpop.f32.mrf.mxu1  ;;  %v20093_v1 = vld [vmem:[#allocation19_spill] sm:$0xff]  ;;  %v11627_v41 = vshll.u32 %v14457_v38, 16 }
 0x693   : > { %v11612_v40 = vsel %vm15272_vm7, %v11607_v32, %v11611_v23  ;;  %v11621_v11 = vrot.slane %v11619_v50, 5  ;;  %v10745_v23 = vrot.slane %v14931_v39, 5  ;;  %v11624_v32 = vshrl.u32 %v14457_v38, 16 }
 0x694   : > { %v11911_v42 = vadd.f32 %v19618_v18, %v11257_v46  ;;  %v11185_v14 = vpop.f32.mrf.mxu0  ;;  %v12088_v18 = vsel %vm15248_vm3, %v12086_v55, %v12087_v3  ;;  %v11743_v24 = vunpack.c.l.b16 %v11612_v40  ;;  %v14458_v3 = vld [vmem:[%s17828_s8 + $0xac] sm:$0xf] }
 0x695   : > { %v19686_v47 = vpop.f32.mrf.mxu2  ;;  %v11622_v44 = vsel %vm15272_vm7, %v11617_v58, %v11621_v11  ;;  %v12142_v36 = vunpack.c.l.b16 %v12088_v18  ;;  %v11626_v53 = vrot.slane %v11624_v32, 4 }
 0x696   : > { %v12309_v16 = vadd.f32 %v19641_v56, %v11911_v42  ;;  %v14270_v56 = vld [vmem:[%s17828_s8 + $0x90] sm:$0xe] }
 0x697   : > { %v10895_v15 = vpop.f32.mrf.mxu3  ;;  %14415 = vmatmul.msk.bf16.gmra.mxu0 %vm882_vm5, %v14685_v26  ;;  %v14286_v42 = vrot.slane %v14270_v56, 9  ;;  %v12162_v58 = vpack.c.b16 %v12142_v36, %v12141_v59 }
 0x698   : > { %v12404_v33 = vadd.f32 %v12403_v7, %v12309_v16  ;;  %v12442_v37 = vmul.f32 %v12309_v16, %v12309_v16  ;;  %v10971_v9 = vadd.f32 %v10895_v15, %v20093_v1  ;;  %v11744_v7 = vunpack.c.l.b16 %v11622_v44  ;;  %v14459_v1 = vld [vmem:[%s17828_s8 + $0xb0] sm:$0x1]  ;;  %v20094_v44 = vld [vmem:[#allocation9_spill] sm:$0xff] }
 0x699   : > { %v11629_v15 = vrot.slane %v11627_v41, 5  ;;  %v12094_v41 = vrot.slane %v14459_v1, 5 }
 0x69a   : > { %v12473_v21 = vadd.f32 %v12472_v20, %v12442_v37  ;;  %v11258_v46 = vadd.f32 %v11182_v4, %v10971_v9  ;;  %v19702_v55 = vpop.f32.mrf.mxu1  ;;  %v11764_v26 = vpack.c.b16 %v11744_v7, %v11743_v24  ;;  %v10747_v20 = vrot.slane %v10745_v23, 4  ;;  %v14932_v4 = vld [vmem:[%s17828_s8 + $0x98] sm:$0x1]  ;;  %v14498_v37 = vld [vmem:[%s17828_s8 + $0xa8] sm:$0xe] }
 0x69b   : > { %v10748_v11 = vrot.slane %v14932_v4, 5  ;;  %v11630_v9 = vor.u32 %v11629_v15, %v11626_v53  ;;  %v14514_v59 = vrot.slane %v14498_v37, 9  ;;  %v11643_v4 = vshll.u32 %v14459_v1, 16 }
 0x69c   : > { %v11912_v50 = vadd.f32 %v19633_v10, %v11258_v46  ;;  %14302 = vmatmul.msk.bf16.gmra.mxu3 %vm882_vm5, %v10822_v25  ;;  %v11187_v40 = vpop.f32.mrf.mxu0  ;;  %v12091_v10 = vrot.slane %v14458_v3, 5  ;;  %v10746_v46 = vsel %vm15248_vm3, %v14286_v42, %v10745_v23 }
 0x69d   : > { %v19707_v60 = vpop.f32.mrf.mxu2  ;;  %14481 = vmatmul.msk.bf16.gmra.mxu1 %vm882_vm5, %v11764_v26  ;;  %v11637_v26 = vshrl.u32 %v14458_v3, 16  ;;  %v10802_v42 = vunpack.c.l.b16 %v10746_v46  ;;  %v11645_v1 = vrot.slane %v11643_v4, 5  ;;  %v14271_v46 = vld [vmem:[%s17828_s8 + $0x9c] sm:$0xe] }
 0x69e   : > { %v12310_v18 = vadd.f32 %v19667_v35, %v11912_v50  ;;  %v10749_v35 = vsel %vm15248_vm3, %v10747_v20, %v10748_v11  ;;  %v12093_v32 = vrot.slane %v12091_v10, 4  ;;  %v11633_v50 = vshll.u32 %v14458_v3, 16  ;;  %v14686_v20 = vld [vmem:[%s17828_s8 + $0x9c] sm:$0xff] }
 0x69f   : > { %v10898_v25 = vpop.f32.mrf.mxu3  ;;  %v10803_v53 = vunpack.c.l.b16 %v10749_v35  ;;  %v14933_v35 = vld [vmem:[%s17828_s8 + $0xa0] sm:$0xf] }
 0x6a0   : > { %v14700_v24 = vpack.c.bf16 %v12310_v18, %v12309_v16  ;;  %v12405_v56 = vadd.f32 %v12404_v33, %v12310_v18  ;;  %v12443_v39 = vmul.f32 %v12310_v18, %v12310_v18  ;;  %v10972_v38 = vadd.f32 %v10898_v25, %v20094_v44 }
 0x6a1   : > { %v11631_v33 = vrot.slane %v11630_v9, 4  ;;  %v12095_v3 = vsel %vm15248_vm3, %v12093_v32, %v12094_v41  ;;  %v14460_v32 = vld [vmem:[%s17828_s8 + $0xb4] sm:$0xf] }
 0x6a2   : > { %v12474_v36 = vadd.f32 %v12473_v21, %v12443_v39  ;;  %v11259_v7 = vadd.f32 %v11185_v14, %v10972_v38  ;;  %14530 = vmatmul.msk.bf16.gmra.mxu2 %vm882_vm5, %v12162_v58  ;;  %14772 = vst [vmem:[%s19679_s13 + $0x8] sm:$0xff] %v14700_v24   ;;  %v19721_v16 = vpop.f32.mrf.mxu1  ;;  %v11635_v14 = vrot.slane %v11633_v50, 5  ;;  %v11639_v21 = vrot.slane %v11637_v26, 4  ;;  %v20095_v39 = vld [vmem:[#allocation10_spill] sm:$0xff] }
 0x6a3   : > { %v12092_v58 = vsel %vm15248_vm3, %v14514_v59, %v12091_v10  ;;  %v10823_v38 = vpack.c.b16 %v10803_v53, %v10802_v42  ;;  %v12144_v10 = vunpack.c.l.b16 %v12095_v3  ;;  %v10752_v59 = vrot.slane %v14933_v35, 5  ;;  %v14462_v35 = vld [vmem:[%s17828_s8 + $0xbc] sm:$0x1] }
 0x6a4   : > { %v11913_v23 = vadd.f32 %v19662_v30, %v11259_v7  ;;  %v11190_v11 = vpop.f32.mrf.mxu0  ;;  %v11636_v37 = vsel %vm15272_vm7, %v11631_v33, %v11635_v14  ;;  %v11640_v25 = vor.u32 %v11639_v21, %v11635_v14  ;;  %v11648_v26 = vshrl.u32 %v14460_v32, 16 }
 0x6a5   : > { %v19725_v15 = vpop.f32.mrf.mxu2  ;;  %v11745_v50 = vunpack.c.l.b16 %v11636_v37  ;;  %v11651_v42 = vshll.u32 %v14460_v32, 16 }
 0x6a6   : > { %v12311_v18 = vadd.f32 %v19686_v47, %v11913_v23  ;;  %v12143_v47 = vunpack.c.l.b16 %v12092_v58  ;;  %v11641_v7 = vrot.slane %v11640_v25, 4  ;;  %v14461_v23 = vld [vmem:[%s17828_s8 + $0xb8] sm:$0xf]  ;;  %v14934_v58 = vld [vmem:[%s17828_s8 + $0xa4] sm:$0x1] }
 0x6a7   : > { %v10900_v30 = vpop.f32.mrf.mxu3  ;;  %14416 = vmatmul.msk.bf16.gmra.mxu0 %vm882_vm5, %v14686_v20  ;;  %v14287_v20 = vrot.slane %v14271_v46, 9  ;;  %v10755_v3 = vrot.slane %v14934_v58, 5  ;;  %v11653_v37 = vrot.slane %v11651_v42, 5 }
 0x6a8   : > { %v12406_v9 = vadd.f32 %v12405_v56, %v12311_v18  ;;  %v12444_v24 = vmul.f32 %v12311_v18, %v12311_v18  ;;  %v10973_v44 = vadd.f32 %v10900_v30, %v20095_v39  ;;  %v11646_v4 = vsel %vm15272_vm7, %v11641_v7, %v11645_v1  ;;  %v14499_v39 = vld [vmem:[%s17828_s8 + $0xb4] sm:$0xe] }
 0x6a9   : > { %v11746_v14 = vunpack.c.l.b16 %v11646_v4  ;;  %v11650_v30 = vrot.slane %v11648_v26, 4  ;;  %v12163_v1 = vpack.c.b16 %v12144_v10, %v12143_v47  ;;  %v10753_v26 = vsel %vm15248_vm3, %v14287_v20, %v10752_v59 }
 0x6aa   : > { %v12475_v41 = vadd.f32 %v12474_v36, %v12444_v24  ;;  %v11260_v33 = vadd.f32 %v11187_v40, %v10973_v44  ;;  %v19739_v56 = vpop.f32.mrf.mxu1  ;;  %v10754_v40 = vrot.slane %v10752_v59, 4  ;;  %v12098_v44 = vrot.slane %v14461_v23, 5 }
 0x6ab   : > { %v11765_v24 = vpack.c.b16 %v11746_v14, %v11745_v50  ;;  %v14515_v47 = vrot.slane %v14499_v39, 9  ;;  %v11654_v10 = vor.u32 %v11653_v37, %v11650_v30  ;;  %v10804_v20 = vunpack.c.l.b16 %v10753_v26  ;;  %v14272_v26 = vld [vmem:[%s17828_s8 + $0xa8] sm:$0xe] }
 0x6ac   : > { %v11914_v53 = vadd.f32 %v19682_v13, %v11260_v33  ;;  %14303 = vmatmul.msk.bf16.gmra.mxu3 %vm882_vm5, %v10823_v38  ;;  %v11192_v21 = vpop.f32.mrf.mxu0  ;;  %v11657_v38 = vshll.u32 %v14461_v23, 16  ;;  %v20096_v33 = vld [vmem:[#allocation11_spill] sm:$0xff] }
 0x6ad   : > { %v19746_v36 = vpop.f32.mrf.mxu2  ;;  %14482 = vmatmul.msk.bf16.gmra.mxu1 %vm882_vm5, %v11765_v24  ;;  %v11655_v14 = vrot.slane %v11654_v10, 4  ;;  %v12099_v37 = vsel %vm15248_vm3, %v14515_v47, %v12098_v44 }
 0x6ae   : > { %v12312_v25 = vadd.f32 %v19707_v60, %v11914_v53  ;;  %v10756_v60 = vsel %vm15248_vm3, %v10754_v40, %v10755_v3  ;;  %v11659_v58 = vrot.slane %v11657_v38, 5  ;;  %v14687_v40 = vld [vmem:[%s17828_s8 + $0xa8] sm:$0xff]  ;;  %v11667_v3 = vshll.u32 %v14462_v35, 16 }
 0x6af   : > { %v10903_v13 = vpop.f32.mrf.mxu3  ;;  %v10805_v24 = vunpack.c.l.b16 %v10756_v60  ;;  %v14935_v60 = vld [vmem:[%s17828_s8 + $0xac] sm:$0xf] }
 0x6b0   : > { %v14705_v46 = vpack.c.bf16 %v12312_v25, %v12311_v18  ;;  %v12407_v7 = vadd.f32 %v12406_v9, %v12312_v25  ;;  %v12445_v32 = vmul.f32 %v12312_v25, %v12312_v25  ;;  %v10974_v4 = vadd.f32 %v10903_v13, %v20096_v33 }
 0x6b1   : > { %v12100_v18 = vrot.slane %v12098_v44, 4  ;;  %v12101_v9 = vrot.slane %v14462_v35, 5  ;;  %v11661_v25 = vshrl.u32 %v14461_v23, 16  ;;  %v11669_v35 = vrot.slane %v11667_v3, 5 }
 0x6b2   : > { %v12476_v50 = vadd.f32 %v12475_v41, %v12445_v32  ;;  %v11261_v42 = vadd.f32 %v11190_v11, %v10974_v4  ;;  %14531 = vmatmul.msk.bf16.gmra.mxu2 %vm882_vm5, %v12163_v1  ;;  %14773 = vst [vmem:[%s19679_s13 + $0x10] sm:$0xff] %v14705_v46   ;;  %v19760_v53 = vpop.f32.mrf.mxu1  ;;  %v11660_v1 = vsel %vm15272_vm7, %v11655_v14, %v11659_v58  ;;  %v20097_v32 = vld [vmem:[#allocation12_spill] sm:$0xff]  ;;  %v10759_v47 = vrot.slane %v14935_v60, 5  ;;  %v14465_v60 = vld [vmem:[%s17828_s8 + $0xc8] sm:$0x1] }
 0x6b3   : > { %v11663_v11 = vrot.slane %v11661_v25, 4  ;;  %v12102_v23 = vsel %vm15248_vm3, %v12100_v18, %v12101_v9  ;;  %v10824_v4 = vpack.c.b16 %v10805_v24, %v10804_v20  ;;  %v11747_v14 = vunpack.c.l.b16 %v11660_v1 }
 0x6b4   : > { %v11915_v59 = vadd.f32 %v19702_v55, %v11261_v42  ;;  %v11195_v39 = vpop.f32.mrf.mxu0  ;;  %v12146_v44 = vunpack.c.l.b16 %v12102_v23  ;;  %v14463_v42 = vld [vmem:[%s17828_s8 + $0xc0] sm:$0xf] }
 0x6b5   : > { %v19764_v30 = vpop.f32.mrf.mxu2  ;;  %v11664_v13 = vor.u32 %v11663_v11, %v11659_v58  ;;  %v11672_v58 = vshrl.u32 %v14463_v42, 16  ;;  %v11675_v20 = vshll.u32 %v14463_v42, 16 }
 0x6b6   : > { %v12313_v41 = vadd.f32 %v19725_v15, %v11915_v59  ;;  %v12145_v15 = vunpack.c.l.b16 %v12099_v37  ;;  %v14464_v59 = vld [vmem:[%s17828_s8 + $0xc4] sm:$0xf]  ;;  %v14936_v37 = vld [vmem:[%s17828_s8 + $0xb0] sm:$0x1] }
 0x6b7   : > { %v10905_v55 = vpop.f32.mrf.mxu3  ;;  %14417 = vmatmul.msk.bf16.gmra.mxu0 %vm882_vm5, %v14687_v40  ;;  %v11665_v10 = vrot.slane %v11664_v13, 4  ;;  %v14288_v40 = vrot.slane %v14272_v26, 9  ;;  %v10762_v23 = vrot.slane %v14936_v37, 5  ;;  %v11677_v1 = vrot.slane %v11675_v20, 5 }
 0x6b8   : > { %v12408_v38 = vadd.f32 %v12407_v7, %v12313_v41  ;;  %v12446_v46 = vmul.f32 %v12313_v41, %v12313_v41  ;;  %v10975_v33 = vadd.f32 %v10905_v55, %v20097_v32  ;;  %v11674_v55 = vrot.slane %v11672_v58, 4  ;;  %v14500_v32 = vld [vmem:[%s17828_s8 + $0xc0] sm:$0xe] }
 0x6b9   : > { %v11670_v25 = vsel %vm15272_vm7, %v11665_v10, %v11669_v35  ;;  %v12164_v35 = vpack.c.b16 %v12146_v44, %v12145_v15  ;;  %v10760_v58 = vsel %vm15248_vm3, %v14288_v40, %v10759_v47  ;;  %v14516_v15 = vrot.slane %v14500_v32, 9 }
 0x6ba   : > { %v12477_v18 = vadd.f32 %v12476_v50, %v12446_v46  ;;  %v11262_v9 = vadd.f32 %v11192_v21, %v10975_v33  ;;  %v19778_v7 = vpop.f32.mrf.mxu1  ;;  %v11748_v3 = vunpack.c.l.b16 %v11670_v25  ;;  %v10761_v21 = vrot.slane %v10759_v47, 4 }
 0x6bb   : > { %v12105_v33 = vrot.slane %v14464_v59, 5  ;;  %v11678_v44 = vor.u32 %v11677_v1, %v11674_v55  ;;  %v10806_v40 = vunpack.c.l.b16 %v10760_v58  ;;  %v14937_v58 = vld [vmem:[%s17828_s8 + $0xb8] sm:$0xf] }
 0x6bc   : > { %v11916_v24 = vadd.f32 %v19721_v16, %v11262_v9  ;;  %14304 = vmatmul.msk.bf16.gmra.mxu3 %vm882_vm5, %v10824_v4  ;;  %v11197_v11 = vpop.f32.mrf.mxu0  ;;  %v11766_v46 = vpack.c.b16 %v11748_v3, %v11747_v14  ;;  %v11681_v4 = vshll.u32 %v14464_v59, 16  ;;  %v20098_v9 = vld [vmem:[#allocation13_spill] sm:$0xff] }
 0x6bd   : > { %v19785_v50 = vpop.f32.mrf.mxu2  ;;  %v11679_v3 = vrot.slane %v11678_v44, 4  ;;  %v12106_v1 = vsel %vm15248_vm3, %v14516_v15, %v12105_v33  ;;  %v14466_v44 = vld [vmem:[%s17828_s8 + $0xcc] sm:$0xf] }
 0x6be   : > { %v12314_v13 = vadd.f32 %v19746_v36, %v11916_v24  ;;  %14483 = vmatmul.msk.bf16.gmra.mxu1 %vm882_vm5, %v11766_v46  ;;  %v10763_v36 = vsel %vm15248_vm3, %v10761_v21, %v10762_v23  ;;  %v11683_v37 = vrot.slane %v11681_v4, 5  ;;  %v14688_v21 = vld [vmem:[%s17828_s8 + $0xb4] sm:$0xff]  ;;  %v11691_v23 = vshll.u32 %v14465_v60, 16 }
 0x6bf   : > { %v10908_v16 = vpop.f32.mrf.mxu3  ;;  %v10807_v46 = vunpack.c.l.b16 %v10763_v36  ;;  %v10766_v36 = vrot.slane %v14937_v58, 5 }
 0x6c0   : > { %v14710_v26 = vpack.c.bf16 %v12314_v13, %v12313_v41  ;;  %v12409_v10 = vadd.f32 %v12408_v38, %v12314_v13  ;;  %v12447_v42 = vmul.f32 %v12314_v13, %v12314_v13  ;;  %v10976_v25 = vadd.f32 %v10908_v16, %v20098_v9 }
 0x6c1   : > { %v12107_v41 = vrot.slane %v12105_v33, 4  ;;  %v12108_v38 = vrot.slane %v14465_v60, 5  ;;  %v11685_v13 = vshrl.u32 %v14464_v59, 16  ;;  %v11693_v60 = vrot.slane %v11691_v23, 5 }
 0x6c2   : > { %v12478_v14 = vadd.f32 %v12477_v18, %v12447_v42  ;;  %v11263_v20 = vadd.f32 %v11195_v39, %v10976_v25  ;;  %14532 = vmatmul.msk.bf16.gmra.mxu2 %vm882_vm5, %v12164_v35  ;;  %14774 = vst [vmem:[%s19679_s13 + $0x18] sm:$0xff] %v14710_v26   ;;  %v19799_v24 = vpop.f32.mrf.mxu1  ;;  %v11684_v35 = vsel %vm15272_vm7, %v11679_v3, %v11683_v37  ;;  %v14273_v25 = vld [vmem:[%s17828_s8 + $0xb4] sm:$0xe]  ;;  %v11696_v3 = vshrl.u32 %v14466_v44, 16 }
 0x6c3   : > { %v11687_v39 = vrot.slane %v11685_v13, 4  ;;  %v12109_v59 = vsel %vm15248_vm3, %v12107_v41, %v12108_v38  ;;  %v10825_v9 = vpack.c.b16 %v10807_v46, %v10806_v40  ;;  %v11749_v38 = vunpack.c.l.b16 %v11684_v35 }
 0x6c4   : > { %v11917_v47 = vadd.f32 %v19739_v56, %v11263_v20  ;;  %v11200_v32 = vpop.f32.mrf.mxu0  ;;  %v12148_v33 = vunpack.c.l.b16 %v12109_v59  ;;  %v11699_v13 = vshll.u32 %v14466_v44, 16  ;;  %v14289_v40 = vrot.slane %v14273_v25, 9  ;;  %v14468_v44 = vld [vmem:[%s17828_s8 + $0xd4] sm:$0x1] }
 0x6c5   : > { %v19803_v55 = vpop.f32.mrf.mxu2  ;;  %v11688_v16 = vor.u32 %v11687_v39, %v11683_v37  ;;  %v14467_v37 = vld [vmem:[%s17828_s8 + $0xd0] sm:$0xf] }
 0x6c6   : > { %v12315_v18 = vadd.f32 %v19764_v30, %v11917_v47  ;;  %v12147_v30 = vunpack.c.l.b16 %v12106_v1  ;;  %v11698_v1 = vrot.slane %v11696_v3, 4  ;;  %v11701_v59 = vrot.slane %v11699_v13, 5 }
 0x6c7   : > { %v10910_v56 = vpop.f32.mrf.mxu3  ;;  %14418 = vmatmul.msk.bf16.gmra.mxu0 %vm882_vm5, %v14688_v21  ;;  %v11689_v15 = vrot.slane %v11688_v16, 4 }
 0x6c8   : > { %v12410_v4 = vadd.f32 %v12409_v10, %v12315_v18  ;;  %v12448_v26 = vmul.f32 %v12315_v18, %v12315_v18  ;;  %v10977_v42 = vadd.f32 %v10910_v56, %v19177_v57  ;;  %v12165_v35 = vpack.c.b16 %v12148_v33, %v12147_v30 }
 0x6c9   : > { %v11694_v57 = vsel %vm15272_vm7, %v11689_v15, %v11693_v60  ;;  %v12112_v60 = vrot.slane %v14467_v37, 5  ;;  %v11702_v30 = vor.u32 %v11701_v59, %v11698_v1 }
 0x6ca   : > { %v12479_v20 = vadd.f32 %v12478_v14, %v12448_v26  ;;  %v11264_v41 = vadd.f32 %v11197_v11, %v10977_v42  ;;  %v19817_v10 = vpop.f32.mrf.mxu1  ;;  %v11750_v46 = vunpack.c.l.b16 %v11694_v57  ;;  %v10768_v11 = vrot.slane %v10766_v36, 4  ;;  %v14938_v14 = vld [vmem:[%s17828_s8 + $0xbc] sm:$0x1]  ;;  %v14501_v26 = vld [vmem:[%s17828_s8 + $0xcc] sm:$0xe] }
 0x6cb   : > { %v10769_v39 = vrot.slane %v14938_v14, 5  ;;  %v11705_v42 = vshll.u32 %v14467_v37, 16  ;;  %v11703_v57 = vrot.slane %v11702_v30, 4  ;;  %v11715_v14 = vshll.u32 %v14468_v44, 16  ;;  %v14274_v30 = vld [vmem:[%s17828_s8 + $0xc0] sm:$0xe] }
 0x6cc   : > { %v11918_v47 = vadd.f32 %v19760_v53, %v11264_v41  ;;  %14305 = vmatmul.msk.bf16.gmra.mxu3 %vm882_vm5, %v10825_v9  ;;  %v11202_v21 = vpop.f32.mrf.mxu0  ;;  %v11767_v16 = vpack.c.b16 %v11750_v46, %v11749_v38  ;;  %v10767_v41 = vsel %vm15248_vm3, %v14289_v40, %v10766_v36 }
 0x6cd   : > { %v19824_v23 = vpop.f32.mrf.mxu2  ;;  %v11707_v13 = vrot.slane %v11705_v42, 5  ;;  %v10808_v40 = vunpack.c.l.b16 %v10767_v41 }
 0x6ce   : > { %v12316_v56 = vadd.f32 %v19785_v50, %v11918_v47  ;;  %14484 = vmatmul.msk.bf16.gmra.mxu1 %vm882_vm5, %v11767_v16  ;;  %v10770_v50 = vsel %vm15248_vm3, %v10768_v11, %v10769_v39  ;;  %v11709_v47 = vshrl.u32 %v14467_v37, 16  ;;  %v14689_v11 = vld [vmem:[%s17828_s8 + $0xc0] sm:$0xff]  ;;  %v11717_v16 = vrot.slane %v11715_v14, 5 }
 0x6cf   : > { %v10913_v53 = vpop.f32.mrf.mxu3  ;;  %v10809_v46 = vunpack.c.l.b16 %v10770_v50 }
 0x6d0   : > { %v14715_v9 = vpack.c.bf16 %v12316_v56, %v12315_v18  ;;  %v12411_v25 = vadd.f32 %v12410_v4, %v12316_v56  ;;  %v12449_v58 = vmul.f32 %v12316_v56, %v12316_v56  ;;  %v10978_v15 = vadd.f32 %v10913_v53, %v19185_v29 }
 0x6d1   : > { %v14517_v18 = vrot.slane %v14501_v26, 9  ;;  %v12114_v4 = vrot.slane %v12112_v60, 4  ;;  %v12115_v29 = vrot.slane %v14468_v44, 5 }
 0x6d2   : > { %v12480_v33 = vadd.f32 %v12479_v20, %v12449_v58  ;;  %v11265_v38 = vadd.f32 %v11200_v32, %v10978_v15  ;;  %14533 = vmatmul.msk.bf16.gmra.mxu2 %vm882_vm5, %v12165_v35  ;;  %14775 = vst [vmem:[%s19679_s13 + $0x20] sm:$0xff] %v14715_v9   ;;  %v19838_v3 = vpop.f32.mrf.mxu1  ;;  %v11711_v20 = vrot.slane %v11709_v47, 4  ;;  %v10826_v9 = vpack.c.b16 %v10809_v46, %v10808_v40  ;;  %v14939_v58 = vld [vmem:[%s17828_s8 + $0xc4] sm:$0xf] }
 0x6d3   : > { %v12113_v59 = vsel %vm15248_vm3, %v14517_v18, %v12112_v60  ;;  %v12116_v35 = vsel %vm15248_vm3, %v12114_v4, %v12115_v29  ;;  %v10773_v60 = vrot.slane %v14939_v58, 5 }
 0x6d4   : > { %v11919_v36 = vadd.f32 %v19778_v7, %v11265_v38  ;;  %v11205_v39 = vpop.f32.mrf.mxu0  ;;  %v11708_v7 = vsel %vm15272_vm7, %v11703_v57, %v11707_v13  ;;  %v11712_v37 = vor.u32 %v11711_v20, %v11707_v13  ;;  %v12150_v50 = vunpack.c.l.b16 %v12116_v35 }
 0x6d5   : > { %v12257_v32 = vpop.f32.mrf.mxu2  ;;  %v11751_v38 = vunpack.c.l.b16 %v11708_v7  ;;  %v14290_v13 = vrot.slane %v14274_v30, 9  ;;  %v10775_v47 = vrot.slane %v10773_v60, 4 }
 0x6d6   : > { %v12317_v1 = vadd.f32 %v19803_v55, %v11919_v36  ;;  %v12149_v55 = vunpack.c.l.b16 %v12113_v59  ;;  %v11713_v15 = vrot.slane %v11712_v37, 4  ;;  %v14940_v36 = vld [vmem:[%s17828_s8 + $0xc8] sm:$0x1] }
 0x6d7   : > { %v10915_v56 = vpop.f32.mrf.mxu3  ;;  %14419 = vmatmul.msk.bf16.gmra.mxu0 %vm882_vm5, %v14689_v11  ;;  %v10774_v59 = vsel %vm15248_vm3, %v14290_v13, %v10773_v60 }
 0x6d8   : > { %v12412_v53 = vadd.f32 %v12411_v25, %v12317_v1  ;;  %v12450_v26 = vmul.f32 %v12317_v1, %v12317_v1  ;;  %v10979_v42 = vadd.f32 %v10915_v56, %v19218_v0  ;;  %v11718_v25 = vsel %vm15272_vm7, %v11713_v15, %v11717_v16 }
 0x6d9   : > { %v11752_v0 = vunpack.c.l.b16 %v11718_v25  ;;  %v12166_v40 = vpack.c.b16 %v12150_v50, %v12149_v55  ;;  %v10810_v37 = vunpack.c.l.b16 %v10774_v59 }
 0x6da   : > { %v12481_v44 = vadd.f32 %v12480_v33, %v12450_v26  ;;  %v11266_v41 = vadd.f32 %v11202_v21, %v10979_v42  ;;  %v11864_v18 = vpop.f32.mrf.mxu1  ;;  %v10776_v33 = vrot.slane %v14940_v36, 5 }
 0x6db   : > { %v11768_v46 = vpack.c.b16 %v11752_v0, %v11751_v38 }
 0x6dc   : > { %v11920_v4 = vadd.f32 %v19799_v24, %v11266_v41  ;;  %14306 = vmatmul.msk.bf16.gmra.mxu3 %vm882_vm5, %v10826_v9  ;;  %v11207_v29 = vpop.f32.mrf.mxu0  ;;  %v10777_v56 = vsel %vm15248_vm3, %v10775_v47, %v10776_v33 }
 0x6dd   : > { %v12259_v57 = vpop.f32.mrf.mxu2  ;;  %v10811_v16 = vunpack.c.l.b16 %v10777_v56 }
 0x6de   : > { %v12318_v21 = vadd.f32 %v19824_v23, %v11920_v4  ;;  %14485 = vmatmul.msk.bf16.gmra.mxu1 %vm882_vm5, %v11768_v46 }
 0x6df   : > { %v10918_v11 = vpop.f32.mrf.mxu3  ;;  %v10827_v60 = vpack.c.b16 %v10811_v16, %v10810_v37 }
 0x6e0   : > { %v14720_v43 = vpack.c.bf16 %v12318_v21, %v12317_v1  ;;  %v12413_v14 = vadd.f32 %v12412_v53, %v12318_v21  ;;  %v12451_v20 = vmul.f32 %v12318_v21, %v12318_v21  ;;  %v10980_v24 = vadd.f32 %v10918_v11, %v19228_v61  ;;  %v14690_v53 = vld [vmem:[%s17828_s8 + $0xcc] sm:$0xff]  ;;  %s14538_s8 = sshll.u32 %s15083_s25, 3 }
 0x6e1   : > { %s19901_s14 = sadd.s32 %s15079_s24, %s14538_s8  ;;  %s12536_s24 = sshll.u32 %s19679_s13, 4  ;;  %s19909_s24 = int_to_ptr.vmem [resolvable:$true] %s12536_s24 }
 0x6e2   : > { %v12482_v35 = vadd.f32 %v12481_v44, %v12451_v20  ;;  %v11267_v7 = vadd.f32 %v11205_v39, %v10980_v24  ;;  %14534 = vmatmul.msk.bf16.gmra.mxu2 %vm882_vm5, %v12166_v40  ;;  %14776 = vst [vmem:[%s19679_s13 + $0x28] sm:$0xff] %v14720_v43   ;;  %v11866_v23 = vpop.f32.mrf.mxu1  ;;  %s14691_s10 = sshll.u32 %s19901_s14, 7  ;;  %s14542_s19 = sshll.u32 %s19901_s14, 3 }
 0x6e3   : > { %s12535_s29 = scalar_lea.hbm %s20002_s4, %s14691_s10 }
 0x6e4   : > { %v11921_v1 = vadd.f32 %v19817_v10, %v11267_v7  ;;  %v11210_v61 = vpop.f32.mrf.mxu0  ;;  %s12538_s16 = sshll.u32 %s12535_s29, 4  ;;  %s14961_s29 = scalar_lea.hbm %s20002_s4, 2048  ;;  %s12539_s16 = int_to_ptr.hbm [resolvable:$true] %s12538_s16 }
 0x6e5   : > { %v12262_v26 = vpop.f32.mrf.mxu2  ;;  %s14955_s8 = sshra.s32 %s12539_s16, 4  ;;  %s14956_s8 = int_to_ptr.hbm [resolvable:$true] %s14955_s8 }
 0x6e6   : > { %v12319_v42 = vadd.f32 %v12257_v32, %v11921_v1  ;;  %s14957_s10 = scalar_lea.hbm %s14956_s8, 128  ;;  %p14962_p6 = scmp.lt.s32.totalorder %s14956_s8, %s20002_s4 }
 0x6e7   : > { %v10920_v9 = vpop.f32.mrf.mxu3  ;;  %14420 = vmatmul.msk.bf16.gmra.mxu0 %vm882_vm5, %v14690_v53  ;;  %p14958_p2 = scmp.ne.s32.totalorder %s14956_s8, %s14957_s10  ;;  %p14963_p8 = scmp.lt.s32.totalorder %s14961_s29, %s14957_s10 }
 0x6e8   : > { %v12414_v55 = vadd.f32 %v12413_v14, %v12319_v42  ;;  %v12452_v58 = vmul.f32 %v12319_v42, %v12319_v42  ;;  %v10981_v12 = vadd.f32 %v10920_v9, %v19259_v31 }
 0x6e9   : > { %p14959_p3 = pnand %p14958_p2, %p15189_p5  ;;  %p14964_p9 = por %p14963_p8, %p14962_p6 }
 0x6ea   : > { %v12483_v39 = vadd.f32 %v12482_v35, %v12452_v58  ;;  %v11268_v15 = vadd.f32 %v11207_v29, %v10981_v12  ;;  %v11869_v44 = vpop.f32.mrf.mxu1 }
 0x6eb   : > { %p14960_p4 = pneg %p14959_p3 }
 0x6ec   : > { %v11922_v10 = vadd.f32 %v19838_v3, %v11268_v15  ;;  %14307 = vmatmul.msk.bf16.gmra.mxu3 %vm882_vm5, %v10827_v60  ;;  %v11212_v41 = vpop.f32.mrf.mxu0 }
 0x6ed   : > { %v12264_v50 = vpop.f32.mrf.mxu2  ;;  %p14965_p10 = pnand %p14964_p9, %p14960_p4 }
 0x6ee   : > { %v12320_v30 = vadd.f32 %v12259_v57, %v11922_v10 }
 0x6ef   : > { %v10923_v32 = vpop.f32.mrf.mxu3 }
 0x6f0   : > { %v14725_v38 = vpack.c.bf16 %v12320_v30, %v12319_v42  ;;  %v12415_v25 = vadd.f32 %v12414_v55, %v12320_v30  ;;  %v12453_v4 = vmul.f32 %v12320_v30, %v12320_v30  ;;  %v10982_v31 = vadd.f32 %v10923_v32, %v19270_v27 }
 0x6f2   : > { %v12484_v0 = vadd.f32 %v12483_v39, %v12453_v4  ;;  %v11269_v13 = vadd.f32 %v11210_v61, %v10982_v31  ;;  %14777 = vst [vmem:[%s19679_s13 + $0x30] sm:$0xff] %v14725_v38   ;;  %v11871_v47 = vpop.f32.mrf.mxu1 }
 0x6f4   : > { %v11923_v36 = vadd.f32 %v11864_v18, %v11269_v13  ;;  %v11215_v29 = vpop.f32.mrf.mxu0 }
 0x6f5   : > { %v12267_v33 = vpop.f32.mrf.mxu2 }
 0x6f6   : > { %v12321_v21 = vadd.f32 %v12262_v26, %v11923_v36 }
 0x6f7   : > { %v10925_v3 = vpop.f32.mrf.mxu3 }
 0x6f8   : > { %v12416_v40 = vadd.f32 %v12415_v25, %v12321_v21  ;;  %v12454_v46 = vmul.f32 %v12321_v21, %v12321_v21  ;;  %v10983_v57 = vadd.f32 %v10925_v3, %v19301_v5 }
 0x6fa   : > { %v12485_v11 = vadd.f32 %v12484_v0, %v12454_v46  ;;  %v11270_v43 = vadd.f32 %v11212_v41, %v10983_v57  ;;  %v11874_v14 = vpop.f32.mrf.mxu1 }
 0x6fc   : > { %v11924_v20 = vadd.f32 %v11866_v23, %v11270_v43  ;;  %v11217_v24 = vpop.f32.mrf.mxu0 }
 0x6fd   : > { %v12269_v27 = vpop.f32.mrf.mxu2 }
 0x6fe   : > { %v12322_v59 = vadd.f32 %v12264_v50, %v11924_v20 }
 0x6ff   : > { %v10928_v56 = vpop.f32.mrf.mxu3 }
 0x700   : > { %v14730_v35 = vpack.c.bf16 %v12322_v59, %v12321_v21  ;;  %v12417_v7 = vadd.f32 %v12416_v40, %v12322_v59  ;;  %v12455_v18 = vmul.f32 %v12322_v59, %v12322_v59  ;;  %v10984_v1 = vadd.f32 %v10928_v56, %v19312_v45 }
 0x702   : > { %v12486_v37 = vadd.f32 %v12485_v11, %v12455_v18  ;;  %v11271_v16 = vadd.f32 %v11215_v29, %v10984_v1  ;;  %14778 = vst [vmem:[%s19679_s13 + $0x38] sm:$0xff] %v14730_v35   ;;  %v11876_v53 = vpop.f32.mrf.mxu1 }
 0x704   : > { %v11925_v61 = vadd.f32 %v11869_v44, %v11271_v16  ;;  %v11220_v26 = vpop.f32.mrf.mxu0 }
 0x705   : > { %v12272_v5 = vpop.f32.mrf.mxu2 }
 0x706   : > { %v12323_v42 = vadd.f32 %v12267_v33, %v11925_v61 }
 0x707   : > { %v10930_v9 = vpop.f32.mrf.mxu3 }
 0x708   : > { %v12418_v55 = vadd.f32 %v12417_v7, %v12323_v42  ;;  %v12456_v23 = vmul.f32 %v12323_v42, %v12323_v42  ;;  %v10985_v58 = vadd.f32 %v10930_v9, %v19343_v19 }
 0x70a   : > { %v12487_v12 = vadd.f32 %v12486_v37, %v12456_v23  ;;  %v11272_v60 = vadd.f32 %v11217_v24, %v10985_v58  ;;  %v11879_v15 = vpop.f32.mrf.mxu1 }
 0x70c   : > { %v11926_v39 = vadd.f32 %v11871_v47, %v11272_v60  ;;  %v11222_v10 = vpop.f32.mrf.mxu0 }
 0x70d   : > { %v12274_v45 = vpop.f32.mrf.mxu2 }
 0x70e   : > { %v12324_v41 = vadd.f32 %v12269_v27, %v11926_v39 }
 0x70f   : > { %v10933_v50 = vpop.f32.mrf.mxu3 }
 0x710   : > { %v14735_v30 = vpack.c.bf16 %v12324_v41, %v12323_v42  ;;  %v12419_v32 = vadd.f32 %v12418_v55, %v12324_v41  ;;  %v12457_v44 = vmul.f32 %v12324_v41, %v12324_v41  ;;  %v10986_v38 = vadd.f32 %v10933_v50, %v19354_v49 }
 0x712   : > { %v12488_v25 = vadd.f32 %v12487_v12, %v12457_v44  ;;  %v11273_v4 = vadd.f32 %v11220_v26, %v10986_v38  ;;  %14779 = vst [vmem:[%s19679_s13 + $0x40] sm:$0xff] %v14735_v30   ;;  %v11881_v29 = vpop.f32.mrf.mxu1 }
 0x714   : > { %v11927_v31 = vadd.f32 %v11874_v14, %v11273_v4  ;;  %v11225_v0 = vpop.f32.mrf.mxu0 }
 0x715   : > { %v12277_v13 = vpop.f32.mrf.mxu2 }
 0x716   : > { %v12325_v19 = vadd.f32 %v12272_v5, %v11927_v31 }
 0x717   : > { %v10935_v36 = vpop.f32.mrf.mxu3 }
 0x718   : > { %v12420_v47 = vadd.f32 %v12419_v32, %v12325_v19  ;;  %v12458_v33 = vmul.f32 %v12325_v19, %v12325_v19  ;;  %v10987_v21 = vadd.f32 %v10935_v36, %v19385_v54 }
 0x71a   : > { %v12489_v3 = vadd.f32 %v12488_v25, %v12458_v33  ;;  %v11274_v40 = vadd.f32 %v11222_v10, %v10987_v21  ;;  %v11884_v59 = vpop.f32.mrf.mxu1 }
 0x71c   : > { %v11928_v46 = vadd.f32 %v11876_v53, %v11274_v40  ;;  %v11227_v57 = vpop.f32.mrf.mxu0 }
 0x71d   : > { %v12279_v11 = vpop.f32.mrf.mxu2 }
 0x71e   : > { %v12326_v49 = vadd.f32 %v12274_v45, %v11928_v46 }
 0x71f   : > { %v10938_v43 = vpop.f32.mrf.mxu3 }
 0x720   : > { %v14740_v20 = vpack.c.bf16 %v12326_v49, %v12325_v19  ;;  %v12421_v24 = vadd.f32 %v12420_v47, %v12326_v49  ;;  %v12459_v14 = vmul.f32 %v12326_v49, %v12326_v49  ;;  %v10988_v27 = vadd.f32 %v10938_v43, %v19396_v63 }
 0x722   : > { %v12490_v56 = vadd.f32 %v12489_v3, %v12459_v14  ;;  %v11275_v35 = vadd.f32 %v11225_v0, %v10988_v27  ;;  %14780 = vst [vmem:[%s19679_s13 + $0x48] sm:$0xff] %v14740_v20   ;;  %v11886_v42 = vpop.f32.mrf.mxu1 }
 0x724   : > { %v11929_v7 = vadd.f32 %v11879_v15, %v11275_v35  ;;  %v11230_v18 = vpop.f32.mrf.mxu0 }
 0x725   : > { %v12282_v1 = vpop.f32.mrf.mxu2 }
 0x726   : > { %v12327_v54 = vadd.f32 %v12277_v13, %v11929_v7 }
 0x727   : > { %v10940_v37 = vpop.f32.mrf.mxu3 }
 0x728   : > { %v12422_v16 = vadd.f32 %v12421_v24, %v12327_v54  ;;  %v12460_v53 = vmul.f32 %v12327_v54, %v12327_v54  ;;  %v10989_v61 = vadd.f32 %v10940_v37, %v19427_v51 }
 0x72a   : > { %v12491_v26 = vadd.f32 %v12490_v56, %v12460_v53  ;;  %v11276_v5 = vadd.f32 %v11227_v57, %v10989_v61  ;;  %v11889_v30 = vpop.f32.mrf.mxu1 }
 0x72c   : > { %v11930_v9 = vadd.f32 %v11881_v29, %v11276_v5  ;;  %v11232_v55 = vpop.f32.mrf.mxu0 }
 0x72d   : > { %v12284_v63 = vpop.f32.mrf.mxu2 }
 0x72e   : > { %v12328_v23 = vadd.f32 %v12279_v11, %v11930_v9 }
 0x72f   : > { %v10943_v58 = vpop.f32.mrf.mxu3 }
 0x730   : > { %v14745_v12 = vpack.c.bf16 %v12328_v23, %v12327_v54  ;;  %v12423_v60 = vadd.f32 %v12422_v16, %v12328_v23  ;;  %v12461_v39 = vmul.f32 %v12328_v23, %v12328_v23  ;;  %v10990_v15 = vadd.f32 %v10943_v58, %v19438_v62 }
 0x732   : > { %v12492_v10 = vadd.f32 %v12491_v26, %v12461_v39  ;;  %v11277_v45 = vadd.f32 %v11230_v18, %v10990_v15  ;;  %14781 = vst [vmem:[%s19679_s13 + $0x50] sm:$0xff] %v14745_v12   ;;  %v11891_v29 = vpop.f32.mrf.mxu1 }
 0x734   : > { %v11931_v41 = vadd.f32 %v11884_v59, %v11277_v45  ;;  %v11235_v50 = vpop.f32.mrf.mxu0 }
 0x735   : > { %v12287_v44 = vpop.f32.mrf.mxu2 }
 0x736   : > { %v12329_v51 = vadd.f32 %v12282_v1, %v11931_v41 }
 0x737   : > { %v10945_v32 = vpop.f32.mrf.mxu3 }
 0x738   : > { %v12424_v38 = vadd.f32 %v12423_v60, %v12329_v51  ;;  %v12462_v25 = vmul.f32 %v12329_v51, %v12329_v51  ;;  %v10991_v4 = vadd.f32 %v10945_v32, %v19469_v52 }
 0x73a   : > { %v12493_v31 = vadd.f32 %v12492_v10, %v12462_v25  ;;  %v11278_v0 = vadd.f32 %v11232_v55, %v10991_v4 }
 0x73b   : > { %v11894_v27 = vpop.f32.mrf.mxu1 }
 0x73c   : > { %v11932_v13 = vadd.f32 %v11886_v42, %v11278_v0  ;;  %v11237_v19 = vpop.f32.mrf.mxu0 }
 0x73d   : > { %v12289_v40 = vpop.f32.mrf.mxu2 }
 0x73e   : > { %v12330_v36 = vadd.f32 %v12284_v63, %v11932_v13 }
 0x73f   : > { %v10948_v62 = vpop.f32.mrf.mxu3 }
 0x740   : > { %v14750_v47 = vpack.c.bf16 %v12330_v36, %v12329_v51  ;;  %v12425_v33 = vadd.f32 %v12424_v38, %v12330_v36  ;;  %v12463_v21 = vmul.f32 %v12330_v36, %v12330_v36  ;;  %v10992_v3 = vadd.f32 %v10948_v62, %v19480_v2 }
 0x742   : > { %v12494_v46 = vadd.f32 %v12493_v31, %v12463_v21  ;;  %v11279_v57 = vadd.f32 %v11235_v50, %v10992_v3  ;;  %14782 = vst [vmem:[%s19679_s13 + $0x58] sm:$0xff] %v14750_v47  }
 0x743   : > { %v11896_v5 = vpop.f32.mrf.mxu1 }
 0x744   : > { %v11933_v11 = vadd.f32 %v11889_v30, %v11279_v57  ;;  %v11240_v52 = vpop.f32.mrf.mxu0 }
 0x745   : > { %v12292_v35 = vpop.f32.mrf.mxu2 }
 0x746   : > { %v12331_v49 = vadd.f32 %v12287_v44, %v11933_v11 }
 0x747   : > { %v10950_v43 = vpop.f32.mrf.mxu3 }
 0x748   : > { %v12426_v20 = vadd.f32 %v12425_v33, %v12331_v49  ;;  %v12464_v24 = vmul.f32 %v12331_v49, %v12331_v49  ;;  %v10993_v14 = vadd.f32 %v10950_v43, %v19511_v17 }
 0x74a   : > { %v12495_v59 = vadd.f32 %v12494_v46, %v12464_v24  ;;  %v11280_v56 = vadd.f32 %v11237_v19, %v10993_v14 }
 0x74b   : > { %v11899_v10 = vpop.f32.mrf.mxu1 }
 0x74c   : > { %v11934_v7 = vadd.f32 %v11891_v29, %v11280_v56  ;;  %v11242_v53 = vpop.f32.mrf.mxu0 }
 0x74d   : > { %v12294_v9 = vpop.f32.mrf.mxu2 }
 0x74e   : > { %v12332_v18 = vadd.f32 %v12289_v40, %v11934_v7 }
 0x74f   : > { %v10953_v2 = vpop.f32.mrf.mxu3 }
 0x750   : > { %v14755_v1 = vpack.c.bf16 %v12332_v18, %v12331_v49  ;;  %v12427_v54 = vadd.f32 %v12426_v20, %v12332_v18  ;;  %v12465_v37 = vmul.f32 %v12332_v18, %v12332_v18  ;;  %v10994_v16 = vadd.f32 %v10953_v2, %v19522_v48 }
 0x752   : > { %v12496_v61 = vadd.f32 %v12495_v59, %v12465_v37  ;;  %v11281_v26 = vadd.f32 %v11240_v52, %v10994_v16  ;;  %14783 = vst [vmem:[%s19679_s13 + $0x60] sm:$0xff] %v14755_v1  }
 0x754   : > { %v11935_v42 = vadd.f32 %v11894_v27, %v11281_v26  ;;  %v11245_v39 = vpop.f32.mrf.mxu0 }
 0x755   : > { %v12297_v45 = vpop.f32.mrf.mxu2 }
 0x756   : > { %v12333_v17 = vadd.f32 %v12292_v35, %v11935_v42 }
 0x757   : > { %v10955_v55 = vpop.f32.mrf.mxu3 }
 0x758   : > { %v12428_v63 = vadd.f32 %v12427_v54, %v12333_v17  ;;  %v12466_v23 = vmul.f32 %v12333_v17, %v12333_v17  ;;  %v10995_v58 = vadd.f32 %v10955_v55, %v19553_v8  ;;  %v11901_v8 = vpop.f32.mrf.mxu1 }
 0x75a   : > { %v12497_v12 = vadd.f32 %v12496_v61, %v12466_v23  ;;  %v11282_v60 = vadd.f32 %v11242_v53, %v10995_v58 }
 0x75c   : > { %v11936_v15 = vadd.f32 %v11896_v5, %v11282_v60  ;;  %v11247_v4 = vpop.f32.mrf.mxu0 }
 0x75d   : > { %v12299_v62 = vpop.f32.mrf.mxu2 }
 0x75e   : > { %v12334_v48 = vadd.f32 %v12294_v9, %v11936_v15 }
 0x75f   : > { %v10958_v41 = vpop.f32.mrf.mxu3 }
 0x760   : > { %v14760_v50 = vpack.c.bf16 %v12334_v48, %v12333_v17  ;;  %v12429_v30 = vadd.f32 %v12428_v63, %v12334_v48  ;;  %v12467_v51 = vmul.f32 %v12334_v48, %v12334_v48  ;;  %v10996_v32 = vadd.f32 %v10958_v41, %v19568_v22  ;;  %v11904_v49 = vpop.f32.mrf.mxu1 }
 0x762   : > { %v12498_v44 = vadd.f32 %v12497_v12, %v12467_v51  ;;  %v11283_v38 = vadd.f32 %v11245_v39, %v10996_v32  ;;  %14784 = vst [vmem:[%s19679_s13 + $0x68] sm:$0xff] %v14760_v50  }
 0x764   : > { %v11937_v25 = vadd.f32 %v11899_v10, %v11283_v38  ;;  %v11250_v21 = vpop.f32.mrf.mxu0 }
 0x766   : > { %v12335_v31 = vadd.f32 %v12297_v45, %v11937_v25 }
 0x767   : > { %v10960_v0 = vpop.f32.mrf.mxu3 }
 0x768   : > { %v12430_v13 = vadd.f32 %v12429_v30, %v12335_v31  ;;  %v12468_v19 = vmul.f32 %v12335_v31, %v12335_v31  ;;  %v10997_v36 = vadd.f32 %v10960_v0, %v19605_v28  ;;  %v12302_v28 = vpop.f32.mrf.mxu2  ;;  %v11906_v18 = vpop.f32.mrf.mxu1 }
 0x76a   : > { %v12499_v29 = vadd.f32 %v12498_v44, %v12468_v19  ;;  %v11284_v47 = vadd.f32 %v11247_v4, %v10997_v36 }
 0x76c   : > { %v11938_v33 = vadd.f32 %v11901_v8, %v11284_v47  ;;  %v11252_v35 = vpop.f32.mrf.mxu0 }
 0x76e   : > { %v12336_v22 = vadd.f32 %v12299_v62, %v11938_v33 }
 0x76f   : > { %v10963_v3 = vpop.f32.mrf.mxu3 }
 0x770   : > { %v14765_v40 = vpack.c.bf16 %v12336_v22, %v12335_v31  ;;  %v12431_v46 = vadd.f32 %v12430_v13, %v12336_v22  ;;  %v12469_v57 = vmul.f32 %v12336_v22, %v12336_v22  ;;  %v10998_v11 = vadd.f32 %v10963_v3, %v19610_v6  ;;  %v12304_v1 = vpop.f32.mrf.mxu2 }
 0x772   : > { %v12500_v43 = vadd.f32 %v12499_v29, %v12469_v57  ;;  %v11285_v52 = vadd.f32 %v11250_v21, %v10998_v11  ;;  %14785 = vst [vmem:[%s19679_s13 + $0x70] sm:$0xff] %v14765_v40  }
 0x774   : > { %v11939_v20 = vadd.f32 %v11904_v49, %v11285_v52 }
 0x776   : > { %v12337_v24 = vadd.f32 %v12302_v28, %v11939_v20 }
 0x777   : > { %v10965_v14 = vpop.f32.mrf.mxu3 }
 0x778   : > { %v12432_v27 = vadd.f32 %v12431_v46, %v12337_v24  ;;  %v12470_v59 = vmul.f32 %v12337_v24, %v12337_v24  ;;  %v10999_v56 = vadd.f32 %v10965_v14, %v19646_v34 }
 0x77a   : > { %v12501_v6 = vadd.f32 %v12500_v43, %v12470_v59  ;;  %v11286_v7 = vadd.f32 %v11252_v35, %v10999_v56 }
 0x77c   : > { %v11940_v2 = vadd.f32 %v11906_v18, %v11286_v7 }
 0x77e   : > { %v12338_v54 = vadd.f32 %v12304_v1, %v11940_v2 }
 0x780   : > { %v14770_v34 = vpack.c.bf16 %v12338_v54, %v12337_v24  ;;  %v12433_v37 = vadd.f32 %v12432_v27, %v12338_v54  ;;  %v12471_v16 = vmul.f32 %v12338_v54, %v12338_v54 }
 0x782   : > { %v12502_v53 = vadd.f32 %v12501_v6, %v12471_v16  ;;  %14786 = vst [vmem:[%s19679_s13 + $0x78] sm:$0xff] %v14770_v34   ;;  %v12434_v61 = vrot.slane %v12433_v37, 4 }
 0x783   : > { %14968 = shalt.err (!%p14965_p10)
}
 0x784   : > { %s15097_s13 = smov 64   ;;  %s15098_s14 = smov 4   ;;  %v12435_v26 = vadd.f32 %v12434_v61, %v12433_v37  ;;  %v12503_v5 = vrot.slane %v12502_v53, 4 }
 0x785   : > { %14794 = dma.vmem_to_hbm [thread:$0]  (%p15189_p5), %s19909_s24, 2048, %s12539_s16, %s12512_s15, %s15097_s13, %s15097_s13, %s15098_s14  }
 0x786   : > { %v12436_v42 = vrot.slane %v12435_v26, 2  ;;  %s12553_s0 = scalar_lea.hbm %s20003_s5, %s14542_s19  ;;  %v12504_v9 = vadd.f32 %v12503_v5, %v12502_v53  ;;  %s20099_s1 = sadd.s32 4294967295, %s15095_s28  }
 0x787   : > { %s19931_s8 = sand.u32 1, %s20099_s1   ;;  %s12569_s9 = scalar_lea.hbm %s20004_s6, %s14542_s19 }
 0x788   : > { %v12437_v17 = vadd.f32 %v12436_v42, %v12435_v26  ;;  %v12505_v55 = vrot.slane %v12504_v9, 2  ;;  %s20100_s2 = sshll.u32 %s19658_s18, 3  ;;  %s12557_s16 = sshll.u32 %s12553_s0, 4  ;;  %s12558_s16 = int_to_ptr.hbm [resolvable:$true] %s12557_s16 }
 0x789   : > { %s349_s3 = scalar_lea.vmem [#allocation4], %s20100_s2  ;;  %s20101_s15 = smov %s20100_s2 }
 0x78a   : > { %s12555_s24 = sshll.u32 %s349_s3, 4  ;;  %v12438_v63 = vrot.slane %v12437_v17, 1  ;;  %v12506_v23 = vadd.f32 %v12505_v55, %v12504_v9  ;;  %s356_s13 = scalar_lea.vmem [#allocation6], %s20101_s15  ;;  %s12556_s24 = int_to_ptr.vmem [resolvable:$true] %s12555_s24 }
 0x78b   : > { %s12571_s14 = sshll.u32 %s356_s13, 4  ;;  %s12573_s20 = sshll.u32 %s12569_s9, 4  ;;  %s19940_s14 = int_to_ptr.vmem [resolvable:$true] %s12571_s14  ;;  %s19942_s20 = int_to_ptr.hbm [resolvable:$true] %s12573_s20 }
 0x78c   : > { %v12439_v58 = vadd.f32 %v12438_v63, %v12437_v17  ;;  %v12507_v12 = vrot.slane %v12506_v23, 1  ;;  %s12517_s2 = scalar_lea.sflag [#allocation5], %s19931_s8  ;;  %s14983_s19 = sshra.s32 %s12558_s16, 4  ;;  %s14984_s19 = int_to_ptr.hbm [resolvable:$true] %s14983_s19 }
 0x78d   : > { %s14985_s25 = scalar_lea.hbm %s14984_s19, 8  ;;  %s14989_s0 = scalar_lea.hbm %s20003_s5, 128 }
 0x78e   : > { %12509 = vst [vmem:[%s349_s3] sm:$0xff] %v12439_v58  ;;  %v12508_v60 = vadd.f32 %v12507_v12, %v12506_v23  ;;  %p14986_p11 = scmp.ne.s32.totalorder %s14984_s19, %s14985_s25  ;;  %p14990_p0 = scmp.lt.s32.totalorder %s14984_s19, %s20003_s5 }
 0x78f   : > { %p14991_p1 = scmp.lt.s32.totalorder %s14989_s0, %s14985_s25 }
 0x790   : > { %p14987_p12 = pnand %p14986_p11, %p15189_p5 }
 0x791   : > { %p14992_p2 = por %p14991_p1, %p14990_p0 }
 0x792   : > { %p14988_p13 = pneg %p14987_p12 }
 0x794   : > { %p14993_p3 = pnand %p14992_p2, %p14988_p13 }
 0x796   : > { %14996 = shalt.err (!%p14993_p3)
}
 0x797   : > { %14795 = dma.vmem_to_hbm [thread:$0]  (%p15189_p5), %s12556_s24, 128, %s12558_s16, %s12517_s2   ;;  %12510 = vst [vmem:[%s356_s13] sm:$0xff] %v12508_v60 }
 0x798   : > { %s15011_s3 = sshra.s32 %s19942_s20, 4  ;;  %s15017_s19 = scalar_lea.hbm %s20004_s6, 128  ;;  %s15012_s3 = int_to_ptr.hbm [resolvable:$true] %s15011_s3 }
 0x799   : > { %s15013_s8 = scalar_lea.hbm %s15012_s3, 8  ;;  %p15018_p9 = scmp.lt.s32.totalorder %s15012_s3, %s20004_s6 }
 0x79a   : > { %p15014_p4 = scmp.ne.s32.totalorder %s15012_s3, %s15013_s8  ;;  %p15019_p10 = scmp.lt.s32.totalorder %s15017_s19, %s15013_s8 }
 0x79c   : > { %p15015_p6 = pnand %p15014_p4, %p15189_p5  ;;  %p15020_p11 = por %p15019_p10, %p15018_p9 }
 0x79e   : > { %p15016_p8 = pneg %p15015_p6 }
 0x7a0   : > { %p15021_p12 = pnand %p15020_p11, %p15016_p8 }
 0x7a2   : > { %15024 = shalt.err (!%p15021_p12)
}
 0x7a3   : > { %14796 = dma.vmem_to_hbm [thread:$0]  (%p15189_p5), %s19940_s14, 128, %s19942_s20, %s12517_s2  }
 0x7a4 PF: > { %p14810_p13 = scmp.ge.s32.totalorder %s15095_s28, 2  ;;  %s12585_s24 = sand.u32 1, %s15067_s21  }
 0x7a5   : > { %s12586_s16 = scalar_lea.sflag [#allocation3], %s12585_s24 }
 0x7a6   : > { %p14801_p0 = pnand %p14810_p13, %p15197_p7 }
 0x7a8   : > { %p14802_p1 = pneg %p14801_p0 }
 0x7aa   : > { %15058 = dma.done.wait (%p14802_p1), %s12586_s16, 2048  }
 0x7ab   : > { %15060 = vsyncadd (%p14802_p1), %s12586_s16, 4294965248  ;;  %s20102_s13 = sadd.s32 4294967294, %s15095_s28  }
 0x7ac   : > { %s12595_s9 = sand.u32 1, %s20102_s13  }
 0x7ad   : > { %s12596_s0 = scalar_lea.sflag [#allocation5], %s12595_s9 }
 0x7ae   : > { %15062 = dma.done.wait (%p14802_p1), %s12596_s0, 256  }
 0x7af   : > { %15064 = vsyncadd (%p14802_p1), %s12596_s0, 4294967040  ;;  %s23_s28 = sadd.s32 1, %s15095_s28   ;;  %s20103_s21 = smov %s15071_s22 }
 0x7b0   : > { %p20_p5 = scmp.ge.s32.totalorder %s23_s28, 18   ;;  %s20104_s22 = smov %s15075_s23 }
 0x7b1   : > { %s20105_s23 = smov %s15207_s17  ;;  %s20106_s24 = smov %s15087_s26 }
 0x7b2   : > { %s20107_s25 = smov %s15091_s27  ;;  %s20108_s26 = smov %s20111_s30 }
 0x7b3   : > { %s20109_s27 = smov %s20115_s7  ;;  %22 = sbr.rel (!%p20_p5) target bundleno = 12 (0xc), region = 141 }
 0x7b8   :  { %12612 = vsyncpa [#allocation3], 1 }
 0x7b9   :  { %12614 = vsyncpa [#allocation3 + $0x1], 1 }
 0x7ba   :  { %12615 = vsyncpa [#allocation5], 1 }
 0x7bb   :  { %12617 = vsyncpa [#allocation5 + $0x1], 1 }

</bundles_post_ra>
